<compile_context>
chip_gen: v5e
topology: v5e:2x2
jax: 0.10.0
libtpu: 0.0.40
codegen_flags: <defaults>
</compile_context>

<pallas_src>
import jax
import jax.numpy as jnp
from jax import lax
from jax.experimental import pallas as pl
from jax.experimental.pallas import tpu as pltpu

BN_EPS = 1e-5     # nn.BatchNorm2d default eps
COS_EPS = 1e-12   # F.normalize default eps


# ---------------------------------------------------------------------------
# small helpers
# ---------------------------------------------------------------------------
def _round_up(n, m):
    return ((n + m - 1) // m) * m


def _pick_imgs_per_tile(n_imgs, rows_per_img, bytes_per_row,
                        max_rows=1024, max_bytes=6 * 1024 * 1024):
    """Largest divisor of n_imgs whose tile (d * rows_per_img rows) stays within
    the row budget and a per-buffer VMEM budget (the Pallas pipeline double
    buffers each operand, so ~6 MiB/buffer keeps us far below the 16/32 MiB
    scoped defaults on v5e/v6e/v7x)."""
    best = 1
    for d in range(1, n_imgs + 1):
        if n_imgs % d:
            continue
        rows = d * rows_per_img
        if rows <= max_rows and rows * bytes_per_row <= max_bytes:
            best = d
    return best   # falls back to one image per tile for very large spatial maps


# ---------------------------------------------------------------------------
# Pass 1: tiled conv-as-matmul (bf16 -> f32 acc) + bias + per-tile BN stats.
#   p_ref:  (TM, 9C) bf16 patches tile
#   w_ref:  (9C, C)  bf16 reshaped conv weight
#   b_ref:  (1, C)   f32 conv bias
#   y_ref:  (TM, C)  f32 raw conv output (pre-BN)
#   sum_ref/sq_ref: (8, C) per-tile sufficient statistics.  Each tile owns an
#   8-sublane slab; the sums are spread over the 8 rows (exact /8 scaling) so
#   the apply pass can reduce the whole stats array with one jnp.sum.
# ---------------------------------------------------------------------------
def _conv_matmul_stats_kernel(p_ref, w_ref, b_ref, y_ref, sum_ref, sq_ref):
    y = jnp.dot(p_ref[...], w_ref[...], preferred_element_type=jnp.float32)
    y = y + b_ref[...]
    y_ref[...] = y
    s = jnp.sum(y, axis=0, keepdims=True) * 0.125        # (1, C)
    q = jnp.sum(y * y, axis=0, keepdims=True) * 0.125    # (1, C)  (single-pass stats)
    sum_ref[...] = jnp.broadcast_to(s, sum_ref.shape)
    sq_ref[...] = jnp.broadcast_to(q, sq_ref.shape)


# ---------------------------------------------------------------------------
# Pass 2: global batch-stat BN + ReLU; optionally fused per-image average pool.
#   Statistics are reduced from the tiny per-tile stats array, so normalization
#   is identical to a single-block computation (correct under M tiling).
# ---------------------------------------------------------------------------
def _make_bn_apply_kernel(inv_count, pool):
    def kernel(y_ref, sums_ref, sqs_ref, g_ref, beta_ref, o_ref):
        mean = jnp.sum(sums_ref[...], axis=0, keepdims=True) * inv_count   # (1, C)
        ex2 = jnp.sum(sqs_ref[...], axis=0, keepdims=True) * inv_count     # (1, C)
        var = jnp.maximum(ex2 - mean * mean, 0.0)                          # biased var
        scale = lax.rsqrt(var + BN_EPS) * g_ref[...]
        shift = beta_ref[...] - mean * scale
        a = jnp.maximum(y_ref[...] * scale + shift, 0.0)
        if pool:
            # y_ref is (imgs_per_tile, Ho*Wo, C); average the spatial rows.
            o_ref[...] = jnp.mean(a, axis=1).astype(o_ref.dtype)
        else:
            o_ref[...] = a.astype(o_ref.dtype)
    return kernel


# ---------------------------------------------------------------------------
# Kernel: cosine fully-connected layer (x row-normalized in kernel; weight is
# column-normalized + lane-padded + bf16-cast outside, since it is constant).
# ---------------------------------------------------------------------------
def _cosine_fc_kernel(x_ref, wn_ref, s_ref, o_ref):
    x = x_ref[...]                                                     # (TN, C) f32
    sq = jnp.sum(x * x, axis=1, keepdims=True)
    xn = x * lax.rsqrt(jnp.maximum(sq, COS_EPS * COS_EPS))             # == x / max(||x||, eps)
    out = jnp.dot(xn.astype(jnp.bfloat16), wn_ref[...],
                  preferred_element_type=jnp.float32)
    o_ref[...] = out * s_ref[0]


# ---------------------------------------------------------------------------
# Kernel: mean over axis 1 of a tiny [G, L, C] tensor (few-shot prototype mean).
# ---------------------------------------------------------------------------
def _mean_axis1_kernel(x_ref, o_ref):
    o_ref[...] = jnp.mean(x_ref[...], axis=1)


def mean_axis1(x):
    G, L, C = x.shape
    return pl.pallas_call(
        _mean_axis1_kernel,
        out_shape=jax.ShapeDtypeStruct((G, C), jnp.float32),
        grid=(1,),
        in_specs=[pl.BlockSpec((G, L, C), lambda i: (0, 0, 0))],
        out_specs=pl.BlockSpec((G, C), lambda i: (0, 0)),
    )(x)


# ---------------------------------------------------------------------------
# Glue: im2col for a 3x3 conv with stride 2, padding 1 (pure data movement,
# done in bf16 so the materialized patch tensor is half-size).
# ---------------------------------------------------------------------------
def _im2col_3x3_s2_p1(x_nhwc):
    N, H, W, C = x_nhwc.shape
    Ho = (H + 2 - 3) // 2 + 1
    Wo = (W + 2 - 3) // 2 + 1
    xp = jnp.pad(x_nhwc, ((0, 0), (1, 1), (1, 1), (0, 0)))
    pieces = []
    for kh in range(3):
        for kw in range(3):
            pieces.append(
                lax.slice(
                    xp,
                    (0, kh, kw, 0),
                    (N, kh + 2 * (Ho - 1) + 1, kw + 2 * (Wo - 1) + 1, C),
                    (1, 2, 2, 1),
                )
            )
    patches = jnp.concatenate(pieces, axis=-1)            # [N, Ho, Wo, 9C] (kh, kw, cin)
    return patches.reshape(N * Ho * Wo, 9 * C), Ho, Wo


# ---------------------------------------------------------------------------
# Conv2d(3,2,1) + BatchNorm2d(training stats) + ReLU, optionally fused avg-pool.
# ---------------------------------------------------------------------------
def conv_block(x_nhwc, w_hwio, bias, gamma, beta, *, fuse_pool,
               max_rows_per_tile=1024):
    N, H, W, C = x_nhwc.shape
    patches, Ho, Wo = _im2col_3x3_s2_p1(x_nhwc.astype(jnp.bfloat16))
    K9 = patches.shape[1]
    R = Ho * Wo
    M = N * R

    bytes_per_row = K9 * 2 + C * 4                        # bf16 patches + f32 conv out
    ipt = _pick_imgs_per_tile(N, R, bytes_per_row, max_rows=max_rows_per_tile)
    TM = ipt * R
    num_tiles = N // ipt

    w2 = w_hwio.reshape(K9, C).astype(jnp.bfloat16)
    b = bias.reshape(1, C).astype(jnp.float32)
    g = gamma.reshape(1, C).astype(jnp.float32)
    bt = beta.reshape(1, C).astype(jnp.float32)

    # ---- pass 1: tiled MXU matmul + bias + per-tile BN sufficient statistics ----
    cost = pl.CostEstimate(
        flops=2 * M * K9 * C,
        transcendentals=0,
        bytes_accessed=M * K9 * 2 + K9 * C * 2 + M * C * 4 + 2 * num_tiles * 8 * C * 4)
    y, sums, sqs = pl.pallas_call(
        _conv_matmul_stats_kernel,
        out_shape=(jax.ShapeDtypeStruct((M, C), jnp.float32),
                   jax.ShapeDtypeStruct((num_tiles * 8, C), jnp.float32),
                   jax.ShapeDtypeStruct((num_tiles * 8, C), jnp.float32)),
        grid=(num_tiles,),
        in_specs=[pl.BlockSpec((TM, K9), lambda i: (i, 0)),
                  pl.BlockSpec((K9, C), lambda i: (0, 0)),
                  pl.BlockSpec((1, C), lambda i: (0, 0))],
        out_specs=[pl.BlockSpec((TM, C), lambda i: (i, 0)),
                   pl.BlockSpec((8, C), lambda i: (i, 0)),
                   pl.BlockSpec((8, C), lambda i: (i, 0))],
        compiler_params=pltpu.CompilerParams(dimension_semantics=("parallel",)),
        cost_estimate=cost,
    )(patches, w2, b)

    inv_m = 1.0 / float(M)
    stats_spec = pl.BlockSpec((num_tiles * 8, C), lambda i: (0, 0))
    par = pltpu.CompilerParams(dimension_semantics=("parallel",))

    if not fuse_pool:
        # ---- pass 2: global BN + ReLU, bf16 activations out (feeds conv block 2) ----
        act = pl.pallas_call(
            _make_bn_apply_kernel(inv_m, pool=False),
            out_shape=jax.ShapeDtypeStruct((M, C), jnp.bfloat16),
            grid=(num_tiles,),
            in_specs=[pl.BlockSpec((TM, C), lambda i: (i, 0)),
                      stats_spec, stats_spec,
                      pl.BlockSpec((1, C), lambda i: (0, 0)),
                      pl.BlockSpec((1, C), lambda i: (0, 0))],
            out_specs=pl.BlockSpec((TM, C), lambda i: (i, 0)),
            compiler_params=par,
        )(y, sums, sqs, g, bt)
        return act.reshape(N, Ho, Wo, C)

    # ---- pass 2 (fused): global BN + ReLU + per-image adaptive average pool ----
    pooled = pl.pallas_call(
        _make_bn_apply_kernel(inv_m, pool=True),
        out_shape=jax.ShapeDtypeStruct((N, C), jnp.float32),
        grid=(num_tiles,),
        in_specs=[pl.BlockSpec((ipt, R, C), lambda i: (i, 0, 0)),
                  stats_spec, stats_spec,
                  pl.BlockSpec((1, C), lambda i: (0, 0)),
                  pl.BlockSpec((1, C), lambda i: (0, 0))],
        out_specs=pl.BlockSpec((ipt, C), lambda i: (i, 0)),
        compiler_params=par,
    )(y.reshape(N, R, C), sums, sqs, g, bt)
    return pooled


# ---------------------------------------------------------------------------
# Cosine FC wrapper: hoisted weight column-normalization, lane-dense (128x)
# padding of the class dim, bf16 operands, row-tiled over the batch.
# ---------------------------------------------------------------------------
def cosine_fc(x, w, scale, row_tile=256):
    N, C = x.shape
    K = w.shape[1]
    wn = w * lax.rsqrt(jnp.maximum(jnp.sum(w * w, axis=0, keepdims=True),
                                   COS_EPS * COS_EPS))
    Kp = _round_up(K, 128)
    wn = jnp.pad(wn, ((0, 0), (0, Kp - K))).astype(jnp.bfloat16)

    TN = min(row_tile, _round_up(N, 8))
    Np = _round_up(N, TN)
    xp = jnp.pad(x, ((0, Np - N), (0, 0))) if Np != N else x

    out = pl.pallas_call(
        _cosine_fc_kernel,
        out_shape=jax.ShapeDtypeStruct((Np, Kp), jnp.float32),
        grid=(Np // TN,),
        in_specs=[pl.BlockSpec((TN, C), lambda i: (i, 0)),
                  pl.BlockSpec((C, Kp), lambda i: (0, 0)),
                  pl.BlockSpec(memory_space=pltpu.MemorySpace.SMEM)],
        out_specs=pl.BlockSpec((TN, Kp), lambda i: (i, 0)),
        compiler_params=pltpu.CompilerParams(dimension_semantics=("parallel",)),
    )(xp, wn, jnp.reshape(jnp.asarray(scale, jnp.float32), (1,)))
    return out[:N, :K]


# ---------------------------------------------------------------------------
# Parameter init (shapes follow FxCosineClassifier.__init__; conv weights are
# stored [kh, kw, cin, cout] so .reshape(9C, C) matches the im2col order; this
# re-init intentionally differs from PyTorch's default Kaiming-uniform).
# ---------------------------------------------------------------------------
def init_params(key, dim, cls_num):
    k = jax.random.split(key, 8)
    he = (2.0 / (9 * dim)) ** 0.5
    return {
        "conv1_w": jax.random.normal(k[0], (3, 3, dim, dim), jnp.float32) * he,
        "conv1_b": 0.1 * jax.random.normal(k[1], (dim,), jnp.float32),
        "bn1_g": 1.0 + 0.2 * jax.random.normal(k[2], (dim,), jnp.float32),
        "bn1_b": 0.1 * jax.random.normal(k[3], (dim,), jnp.float32),
        "conv2_w": jax.random.normal(k[4], (3, 3, dim, dim), jnp.float32) * he,
        "conv2_b": jnp.zeros((dim,), jnp.float32),
        "bn2_g": 1.0 + 0.2 * jax.random.normal(k[5], (dim,), jnp.float32),
        "bn2_b": 0.1 * jax.random.normal(k[6], (dim,), jnp.float32),
        "fc_w": jax.random.normal(k[7], (cls_num, dim), jnp.float32) * (2.0 / dim) ** 0.5,
        "fc_scale": jnp.float32(10.0),   # learnable scale_cls
        "scale": jnp.float32(10.0),      # fixed self.scale
    }


# ---------------------------------------------------------------------------
# Forward pass of FxCosineClassifier.
#   x_nchw: [N, dim, H, W] (PyTorch NCHW convention), N = bs*nw*(ns+nq)
# ---------------------------------------------------------------------------
def fx_cosine_classifier_forward(params, x_nchw, elabel, glabel,
                                 bs, nw, ns, nq, training=True):
    x = jnp.transpose(x_nchw, (0, 2, 3, 1)).astype(jnp.float32)   # NCHW -> NHWC

    a1 = conv_block(x, params["conv1_w"], params["conv1_b"],
                    params["bn1_g"], params["bn1_b"], fuse_pool=False)
    feat = conv_block(a1, params["conv2_w"], params["conv2_b"],
                      params["bn2_g"], params["bn2_b"], fuse_pool=True)   # [N, C]

    if training:
        pred = cosine_fc(feat, params["fc_w"].T, params["fc_scale"])
        return pred, glabel

    # eval: few-shot prototype classifier
    assert bs == 1, "prototype path assumes bs == 1 (as in the PyTorch reference)"
    fd = feat.shape[-1]
    xr = feat.reshape(bs, nw, ns + nq, fd)
    support = xr[:, :, :ns].reshape(bs * nw, ns, fd)
    proto = mean_axis1(support)                           # [nw, fd]
    pred = cosine_fc(xr.reshape(nw * (ns + nq), fd), proto.T, params["scale"])
    return pred, elabel


# ---------------------------------------------------------------------------
# Plain-JAX/XLA reference with matching bf16 matmul numerics (f32 accumulation)
# for a numerical sanity check of the Pallas path.
# ---------------------------------------------------------------------------
def _reference_forward(params, x_nchw, elabel, glabel, bs, nw, ns, nq, training):
    x = jnp.transpose(x_nchw, (0, 2, 3, 1)).astype(jnp.float32)

    def conv_bn_relu_ref(inp, w, b, g, bt):
        y = lax.conv_general_dilated(
            inp.astype(jnp.bfloat16), w.astype(jnp.bfloat16),
            window_strides=(2, 2), padding=((1, 1), (1, 1)),
            dimension_numbers=("NHWC", "HWIO", "NHWC"),
            preferred_element_type=jnp.float32)
        y = y + b.reshape(1, 1, 1, -1)
        mean = jnp.mean(y, axis=(0, 1, 2), keepdims=True)
        var = jnp.mean(jnp.square(y - mean), axis=(0, 1, 2), keepdims=True)
        yn = (y - mean) * lax.rsqrt(var + BN_EPS) * g.reshape(1, 1, 1, -1) \
            + bt.reshape(1, 1, 1, -1)
        return jnp.maximum(yn, 0.0)

    a1 = conv_bn_relu_ref(x, params["conv1_w"], params["conv1_b"],
                          params["bn1_g"], params["bn1_b"])
    a1 = a1.astype(jnp.bfloat16).astype(jnp.float32)   # kernel stores conv1 act as bf16
    a2 = conv_bn_relu_ref(a1, params["conv2_w"], params["conv2_b"],
                          params["bn2_g"], params["bn2_b"])
    feat = jnp.mean(a2, axis=(1, 2))

    def cos_fc_ref(xf, w, scale):
        xn = xf * lax.rsqrt(jnp.maximum(jnp.sum(xf * xf, axis=1, keepdims=True),
                                        COS_EPS * COS_EPS))
        wn = w * lax.rsqrt(jnp.maximum(jnp.sum(w * w, axis=0, keepdims=True),
                                       COS_EPS * COS_EPS))
        return jnp.dot(xn.astype(jnp.bfloat16), wn.astype(jnp.bfloat16),
                       preferred_element_type=jnp.float32) * scale

    if training:
        return cos_fc_ref(feat, params["fc_w"].T, params["fc_scale"])
    fd = feat.shape[-1]
    xr = feat.reshape(bs, nw, ns + nq, fd)
    weight = jnp.mean(xr[:, :, :ns], axis=2).reshape(nw, fd).T
    return cos_fc_ref(xr.reshape(nw * (ns + nq), fd), weight, params["scale"])


if __name__ == "__main__":
    key = jax.random.PRNGKey(0)
    dim, cls_num = 32, 16
    bs, nw, ns, nq = 1, 4, 2, 2
    N = bs * nw * (ns + nq)            # 16
    H = W = 32                         # conv1 runs with 4 M-tiles (multi-tile BN path)

    kx, kp, kl = jax.random.split(key, 3)
    x = jax.random.normal(kx, (N, dim, H, W), jnp.float32)
    elabel = jnp.tile(jnp.arange(nw, dtype=jnp.int32), ns + nq)
    glabel = jax.random.randint(kl, (N,), 0, cls_num, dtype=jnp.int32)
    params = init_params(kp, dim, cls_num)

    fwd = jax.jit(fx_cosine_classifier_forward,
                  static_argnames=("bs", "nw", "ns", "nq", "training"))

    pred_train, g = fwd(params, x, elabel, glabel,
                        bs=bs, nw=nw, ns=ns, nq=nq, training=True)
    pred_eval, e = fwd(params, x, elabel, glabel,
                       bs=bs, nw=nw, ns=ns, nq=nq, training=False)
    jax.block_until_ready((pred_train, g, pred_eval, e))

    assert pred_train.shape == (N, cls_num)
    assert pred_eval.shape == (nw * (ns + nq), nw)

    # numerical sanity check against an XLA reference with matching bf16 numerics
    ref_train = _reference_forward(params, x, elabel, glabel, bs, nw, ns, nq, True)
    ref_eval = _reference_forward(params, x, elabel, glabel, bs, nw, ns, nq, False)
    err_t = float(jnp.max(jnp.abs(pred_train - ref_train)))
    err_e = float(jnp.max(jnp.abs(pred_eval - ref_eval)))
    assert err_t < 5e-2 and err_e < 5e-2, (err_t, err_e)

    print("KERNEL_OK")
</pallas_src>

<mosaic_0001>
module attributes {stable_mosaic.version = 11 : i64} {
  func.func @_conv_matmul_stats_kernel(%arg0: i32, %arg1: memref<1024x288xbf16, #tpu.memory_space<vmem>>, %arg2: memref<288x32xbf16, #tpu.memory_space<vmem>>, %arg3: memref<1x32xf32, #tpu.memory_space<vmem>>, %arg4: memref<1024x32xf32, #tpu.memory_space<vmem>>, %arg5: memref<8x32xf32, #tpu.memory_space<vmem>>, %arg6: memref<8x32xf32, #tpu.memory_space<vmem>>) attributes {dimension_semantics = [#tpu.dimension_semantics<parallel>], iteration_bounds = array<i64: 4>, scalar_prefetch = 0 : i64, scratch_operands = 0 : i64, tpu.core_type = #tpu.core_type<tc>, window_params = [{transform_indices = @transform_0, window_bounds = array<i64: 1024, 288>}, {pipeline_mode = #tpu.pipeline_mode<synchronous>, transform_indices = @transform_1, window_bounds = array<i64: 288, 32>}, {pipeline_mode = #tpu.pipeline_mode<synchronous>, transform_indices = @transform_2, window_bounds = array<i64: 1, 32>}, {transform_indices = @transform_3, window_bounds = array<i64: 1024, 32>}, {transform_indices = @transform_4, window_bounds = array<i64: 8, 32>}, {transform_indices = @transform_5, window_bounds = array<i64: 8, 32>}]} {
    %c0 = arith.constant 0 : index
    %c0_0 = arith.constant 0 : index
    %0 = vector.load %arg1[%c0, %c0_0] : memref<1024x288xbf16, #tpu.memory_space<vmem>>, vector<1024x288xbf16>
    %c0_1 = arith.constant 0 : index
    %c0_2 = arith.constant 0 : index
    %1 = vector.load %arg2[%c0_1, %c0_2] : memref<288x32xbf16, #tpu.memory_space<vmem>>, vector<288x32xbf16>
    %cst = arith.constant dense<0.000000e+00> : vector<1024x32xf32>
    %2 = tpu.matmul %0, %1, %cst {dimension_numbers = #tpu.dot_dimension_numbers<[1], [0], [0], [1], [0, 0, 1, 1], [], []>} : vector<1024x288xbf16>, vector<288x32xbf16>, vector<1024x32xf32> -> vector<1024x32xf32>
    %c0_3 = arith.constant 0 : index
    %c0_4 = arith.constant 0 : index
    %3 = vector.load %arg3[%c0_3, %c0_4] : memref<1x32xf32, #tpu.memory_space<vmem>>, vector<1x32xf32>
    %4 = vector.broadcast %3 : vector<1x32xf32> to vector<1024x32xf32>
    %5 = arith.addf %2, %4 : vector<1024x32xf32>
    %c0_5 = arith.constant 0 : index
    %c0_6 = arith.constant 0 : index
    %6 = vector.load %arg4[%c0_5, %c0_6] : memref<1024x32xf32, #tpu.memory_space<vmem>>, vector<1024x32xf32>
    tpu.vector_store %arg4[%c0_5, %c0_6], %5 {strides = array<i32>} : memref<1024x32xf32, #tpu.memory_space<vmem>>, vector<1024x32xf32>,
    %cst_7 = arith.constant dense<0.000000e+00> : vector<32xf32>
    %7 = vector.multi_reduction <add>, %5, %cst_7 [0] : vector<1024x32xf32> to vector<32xf32>
    %8 = vector.shape_cast %7 : vector<32xf32> to vector<1x32xf32>
    %cst_8 = arith.constant 1.250000e-01 : f32
    %9 = vector.broadcast %cst_8 : f32 to vector<1x32xf32>
    %10 = arith.mulf %8, %9 : vector<1x32xf32>
    %11 = arith.mulf %5, %5 : vector<1024x32xf32>
    %cst_9 = arith.constant dense<0.000000e+00> : vector<32xf32>
    %12 = vector.multi_reduction <add>, %11, %cst_9 [0] : vector<1024x32xf32> to vector<32xf32>
    %13 = vector.shape_cast %12 : vector<32xf32> to vector<1x32xf32>
    %cst_10 = arith.constant 1.250000e-01 : f32
    %14 = vector.broadcast %cst_10 : f32 to vector<1x32xf32>
    %15 = arith.mulf %13, %14 : vector<1x32xf32>
    %16 = vector.shape_cast %10 : vector<1x32xf32> to vector<1x32xf32>
    %17 = vector.broadcast %16 : vector<1x32xf32> to vector<8x32xf32>
    %c0_11 = arith.constant 0 : index
    %c0_12 = arith.constant 0 : index
    %18 = vector.load %arg5[%c0_11, %c0_12] : memref<8x32xf32, #tpu.memory_space<vmem>>, vector<8x32xf32>
    tpu.vector_store %arg5[%c0_11, %c0_12], %17 {strides = array<i32>} : memref<8x32xf32, #tpu.memory_space<vmem>>, vector<8x32xf32>,
    %19 = vector.shape_cast %15 : vector<1x32xf32> to vector<1x32xf32>
    %20 = vector.broadcast %19 : vector<1x32xf32> to vector<8x32xf32>
    %c0_13 = arith.constant 0 : index
    %c0_14 = arith.constant 0 : index
    %21 = vector.load %arg6[%c0_13, %c0_14] : memref<8x32xf32, #tpu.memory_space<vmem>>, vector<8x32xf32>
    tpu.vector_store %arg6[%c0_13, %c0_14], %20 {strides = array<i32>} : memref<8x32xf32, #tpu.memory_space<vmem>>, vector<8x32xf32>,
    return
  }
  func.func @transform_0(%arg0: i32) -> (i32, i32) {
    %c0_i32 = arith.constant 0 : i32
    %c0_i32_0 = arith.constant 0 : i32
    return %arg0, %c0_i32 : i32, i32
  }
  func.func @transform_1(%arg0: i32) -> (i32, i32) {
    %c0_i32 = arith.constant 0 : i32
    %c0_i32_0 = arith.constant 0 : i32
    %c0_i32_1 = arith.constant 0 : i32
    return %c0_i32, %c0_i32_0 : i32, i32
  }
  func.func @transform_2(%arg0: i32) -> (i32, i32) {
    %c0_i32 = arith.constant 0 : i32
    %c0_i32_0 = arith.constant 0 : i32
    %c0_i32_1 = arith.constant 0 : i32
    return %c0_i32, %c0_i32_0 : i32, i32
  }
  func.func @transform_3(%arg0: i32) -> (i32, i32) {
    %c0_i32 = arith.constant 0 : i32
    %c0_i32_0 = arith.constant 0 : i32
    return %arg0, %c0_i32 : i32, i32
  }
  func.func @transform_4(%arg0: i32) -> (i32, i32) {
    %c0_i32 = arith.constant 0 : i32
    %c0_i32_0 = arith.constant 0 : i32
    return %arg0, %c0_i32 : i32, i32
  }
  func.func @transform_5(%arg0: i32) -> (i32, i32) {
    %c0_i32 = arith.constant 0 : i32
    %c0_i32_0 = arith.constant 0 : i32
    return %arg0, %c0_i32 : i32, i32
  }
}

module attributes {stable_mosaic.version = 11 : i64} {
  func.func @kernel(%arg0: i32, %arg1: memref<1024x32xf32, #tpu.memory_space<vmem>>, %arg2: memref<32x32xf32, #tpu.memory_space<vmem>>, %arg3: memref<32x32xf32, #tpu.memory_space<vmem>>, %arg4: memref<1x32xf32, #tpu.memory_space<vmem>>, %arg5: memref<1x32xf32, #tpu.memory_space<vmem>>, %arg6: memref<1024x32xbf16, #tpu.memory_space<vmem>>) attributes {dimension_semantics = [#tpu.dimension_semantics<parallel>], iteration_bounds = array<i64: 4>, scalar_prefetch = 0 : i64, scratch_operands = 0 : i64, tpu.core_type = #tpu.core_type<tc>, window_params = [{transform_indices = @transform_0, window_bounds = array<i64: 1024, 32>}, {pipeline_mode = #tpu.pipeline_mode<synchronous>, transform_indices = @transform_1, window_bounds = array<i64: 32, 32>}, {pipeline_mode = #tpu.pipeline_mode<synchronous>, transform_indices = @transform_2, window_bounds = array<i64: 32, 32>}, {pipeline_mode = #tpu.pipeline_mode<synchronous>, transform_indices = @transform_3, window_bounds = array<i64: 1, 32>}, {pipeline_mode = #tpu.pipeline_mode<synchronous>, transform_indices = @transform_4, window_bounds = array<i64: 1, 32>}, {transform_indices = @transform_5, window_bounds = array<i64: 1024, 32>}]} {
    %c0 = arith.constant 0 : index
    %c0_0 = arith.constant 0 : index
    %0 = vector.load %arg2[%c0, %c0_0] : memref<32x32xf32, #tpu.memory_space<vmem>>, vector<32x32xf32>
    %cst = arith.constant dense<0.000000e+00> : vector<32xf32>
    %1 = vector.multi_reduction <add>, %0, %cst [0] : vector<32x32xf32> to vector<32xf32>
    %2 = vector.shape_cast %1 : vector<32xf32> to vector<1x32xf32>
    %cst_1 = arith.constant 2.44140625E-4 : f32
    %3 = vector.broadcast %cst_1 : f32 to vector<1x32xf32>
    %4 = arith.mulf %2, %3 : vector<1x32xf32>
    %c0_2 = arith.constant 0 : index
    %c0_3 = arith.constant 0 : index
    %5 = vector.load %arg3[%c0_2, %c0_3] : memref<32x32xf32, #tpu.memory_space<vmem>>, vector<32x32xf32>
    %cst_4 = arith.constant dense<0.000000e+00> : vector<32xf32>
    %6 = vector.multi_reduction <add>, %5, %cst_4 [0] : vector<32x32xf32> to vector<32xf32>
    %7 = vector.shape_cast %6 : vector<32xf32> to vector<1x32xf32>
    %cst_5 = arith.constant 2.44140625E-4 : f32
    %8 = vector.broadcast %cst_5 : f32 to vector<1x32xf32>
    %9 = arith.mulf %7, %8 : vector<1x32xf32>
    %10 = arith.mulf %4, %4 : vector<1x32xf32>
    %11 = arith.subf %9, %10 : vector<1x32xf32>
    %cst_6 = arith.constant 0.000000e+00 : f32
    %12 = vector.broadcast %cst_6 : f32 to vector<1x32xf32>
    %13 = arith.maximumf %11, %12 : vector<1x32xf32>
    %cst_7 = arith.constant 9.99999974E-6 : f32
    %14 = vector.broadcast %cst_7 : f32 to vector<1x32xf32>
    %15 = arith.addf %13, %14 : vector<1x32xf32>
    %16 = math.rsqrt %15 : vector<1x32xf32>
    %c0_8 = arith.constant 0 : index
    %c0_9 = arith.constant 0 : index
    %17 = vector.load %arg4[%c0_8, %c0_9] : memref<1x32xf32, #tpu.memory_space<vmem>>, vector<1x32xf32>
    %18 = arith.mulf %16, %17 : vector<1x32xf32>
    %c0_10 = arith.constant 0 : index
    %c0_11 = arith.constant 0 : index
    %19 = vector.load %arg5[%c0_10, %c0_11] : memref<1x32xf32, #tpu.memory_space<vmem>>, vector<1x32xf32>
    %20 = arith.mulf %4, %18 : vector<1x32xf32>
    %21 = arith.subf %19, %20 : vector<1x32xf32>
    %c0_12 = arith.constant 0 : index
    %c0_13 = arith.constant 0 : index
    %22 = vector.load %arg1[%c0_12, %c0_13] : memref<1024x32xf32, #tpu.memory_space<vmem>>, vector<1024x32xf32>
    %23 = vector.broadcast %18 : vector<1x32xf32> to vector<1024x32xf32>
    %24 = arith.mulf %22, %23 : vector<1024x32xf32>
    %25 = vector.broadcast %21 : vector<1x32xf32> to vector<1024x32xf32>
    %26 = arith.addf %24, %25 : vector<1024x32xf32>
    %cst_14 = arith.constant 0.000000e+00 : f32
    %27 = vector.broadcast %cst_14 : f32 to vector<1024x32xf32>
    %28 = arith.maximumf %26, %27 : vector<1024x32xf32>
    %29 = arith.truncf %28 : vector<1024x32xf32> to vector<1024x32xbf16>
    %c0_15 = arith.constant 0 : index
    %c0_16 = arith.constant 0 : index
    %30 = vector.load %arg6[%c0_15, %c0_16] : memref<1024x32xbf16, #tpu.memory_space<vmem>>, vector<1024x32xbf16>
    tpu.vector_store %arg6[%c0_15, %c0_16], %29 {strides = array<i32>} : memref<1024x32xbf16, #tpu.memory_space<vmem>>, vector<1024x32xbf16>,
    return
  }
  func.func @transform_0(%arg0: i32) -> (i32, i32) {
    %c0_i32 = arith.constant 0 : i32
    %c0_i32_0 = arith.constant 0 : i32
    return %arg0, %c0_i32 : i32, i32
  }
  func.func @transform_1(%arg0: i32) -> (i32, i32) {
    %c0_i32 = arith.constant 0 : i32
    %c0_i32_0 = arith.constant 0 : i32
    %c0_i32_1 = arith.constant 0 : i32
    return %c0_i32, %c0_i32_0 : i32, i32
  }
  func.func @transform_2(%arg0: i32) -> (i32, i32) {
    %c0_i32 = arith.constant 0 : i32
    %c0_i32_0 = arith.constant 0 : i32
    %c0_i32_1 = arith.constant 0 : i32
    return %c0_i32, %c0_i32_0 : i32, i32
  }
  func.func @transform_3(%arg0: i32) -> (i32, i32) {
    %c0_i32 = arith.constant 0 : i32
    %c0_i32_0 = arith.constant 0 : i32
    %c0_i32_1 = arith.constant 0 : i32
    return %c0_i32, %c0_i32_0 : i32, i32
  }
  func.func @transform_4(%arg0: i32) -> (i32, i32) {
    %c0_i32 = arith.constant 0 : i32
    %c0_i32_0 = arith.constant 0 : i32
    %c0_i32_1 = arith.constant 0 : i32
    return %c0_i32, %c0_i32_0 : i32, i32
  }
  func.func @transform_5(%arg0: i32) -> (i32, i32) {
    %c0_i32 = arith.constant 0 : i32
    %c0_i32_0 = arith.constant 0 : i32
    return %arg0, %c0_i32 : i32, i32
  }
}

module attributes {stable_mosaic.version = 11 : i64} {
  func.func @_conv_matmul_stats_kernel(%arg0: i32, %arg1: memref<1024x288xbf16, #tpu.memory_space<vmem>>, %arg2: memref<288x32xbf16, #tpu.memory_space<vmem>>, %arg3: memref<1x32xf32, #tpu.memory_space<vmem>>, %arg4: memref<1024x32xf32, #tpu.memory_space<vmem>>, %arg5: memref<8x32xf32, #tpu.memory_space<vmem>>, %arg6: memref<8x32xf32, #tpu.memory_space<vmem>>) attributes {dimension_semantics = [#tpu.dimension_semantics<parallel>], iteration_bounds = array<i64: 1>, scalar_prefetch = 0 : i64, scratch_operands = 0 : i64, tpu.core_type = #tpu.core_type<tc>, window_params = [{transform_indices = @transform_0, window_bounds = array<i64: 1024, 288>}, {pipeline_mode = #tpu.pipeline_mode<synchronous>, transform_indices = @transform_1, window_bounds = array<i64: 288, 32>}, {pipeline_mode = #tpu.pipeline_mode<synchronous>, transform_indices = @transform_2, window_bounds = array<i64: 1, 32>}, {transform_indices = @transform_3, window_bounds = array<i64: 1024, 32>}, {transform_indices = @transform_4, window_bounds = array<i64: 8, 32>}, {transform_indices = @transform_5, window_bounds = array<i64: 8, 32>}]} {
    %c0 = arith.constant 0 : index
    %c0_0 = arith.constant 0 : index
    %0 = vector.load %arg1[%c0, %c0_0] : memref<1024x288xbf16, #tpu.memory_space<vmem>>, vector<1024x288xbf16>
    %c0_1 = arith.constant 0 : index
    %c0_2 = arith.constant 0 : index
    %1 = vector.load %arg2[%c0_1, %c0_2] : memref<288x32xbf16, #tpu.memory_space<vmem>>, vector<288x32xbf16>
    %cst = arith.constant dense<0.000000e+00> : vector<1024x32xf32>
    %2 = tpu.matmul %0, %1, %cst {dimension_numbers = #tpu.dot_dimension_numbers<[1], [0], [0], [1], [0, 0, 1, 1], [], []>} : vector<1024x288xbf16>, vector<288x32xbf16>, vector<1024x32xf32> -> vector<1024x32xf32>
    %c0_3 = arith.constant 0 : index
    %c0_4 = arith.constant 0 : index
    %3 = vector.load %arg3[%c0_3, %c0_4] : memref<1x32xf32, #tpu.memory_space<vmem>>, vector<1x32xf32>
    %4 = vector.broadcast %3 : vector<1x32xf32> to vector<1024x32xf32>
    %5 = arith.addf %2, %4 : vector<1024x32xf32>
    %c0_5 = arith.constant 0 : index
    %c0_6 = arith.constant 0 : index
    %6 = vector.load %arg4[%c0_5, %c0_6] : memref<1024x32xf32, #tpu.memory_space<vmem>>, vector<1024x32xf32>
    tpu.vector_store %arg4[%c0_5, %c0_6], %5 {strides = array<i32>} : memref<1024x32xf32, #tpu.memory_space<vmem>>, vector<1024x32xf32>,
    %cst_7 = arith.constant dense<0.000000e+00> : vector<32xf32>
    %7 = vector.multi_reduction <add>, %5, %cst_7 [0] : vector<1024x32xf32> to vector<32xf32>
    %8 = vector.shape_cast %7 : vector<32xf32> to vector<1x32xf32>
    %cst_8 = arith.constant 1.250000e-01 : f32
    %9 = vector.broadcast %cst_8 : f32 to vector<1x32xf32>
    %10 = arith.mulf %8, %9 : vector<1x32xf32>
    %11 = arith.mulf %5, %5 : vector<1024x32xf32>
    %cst_9 = arith.constant dense<0.000000e+00> : vector<32xf32>
    %12 = vector.multi_reduction <add>, %11, %cst_9 [0] : vector<1024x32xf32> to vector<32xf32>
    %13 = vector.shape_cast %12 : vector<32xf32> to vector<1x32xf32>
    %cst_10 = arith.constant 1.250000e-01 : f32
    %14 = vector.broadcast %cst_10 : f32 to vector<1x32xf32>
    %15 = arith.mulf %13, %14 : vector<1x32xf32>
    %16 = vector.shape_cast %10 : vector<1x32xf32> to vector<1x32xf32>
    %17 = vector.broadcast %16 : vector<1x32xf32> to vector<8x32xf32>
    %c0_11 = arith.constant 0 : index
    %c0_12 = arith.constant 0 : index
    %18 = vector.load %arg5[%c0_11, %c0_12] : memref<8x32xf32, #tpu.memory_space<vmem>>, vector<8x32xf32>
    tpu.vector_store %arg5[%c0_11, %c0_12], %17 {strides = array<i32>} : memref<8x32xf32, #tpu.memory_space<vmem>>, vector<8x32xf32>,
    %19 = vector.shape_cast %15 : vector<1x32xf32> to vector<1x32xf32>
    %20 = vector.broadcast %19 : vector<1x32xf32> to vector<8x32xf32>
    %c0_13 = arith.constant 0 : index
    %c0_14 = arith.constant 0 : index
    %21 = vector.load %arg6[%c0_13, %c0_14] : memref<8x32xf32, #tpu.memory_space<vmem>>, vector<8x32xf32>
    tpu.vector_store %arg6[%c0_13, %c0_14], %20 {strides = array<i32>} : memref<8x32xf32, #tpu.memory_space<vmem>>, vector<8x32xf32>,
    return
  }
  func.func @transform_0(%arg0: i32) -> (i32, i32) {
    %c0_i32 = arith.constant 0 : i32
    %c0_i32_0 = arith.constant 0 : i32
    return %arg0, %c0_i32 : i32, i32
  }
  func.func @transform_1(%arg0: i32) -> (i32, i32) {
    %c0_i32 = arith.constant 0 : i32
    %c0_i32_0 = arith.constant 0 : i32
    %c0_i32_1 = arith.constant 0 : i32
    return %c0_i32, %c0_i32_0 : i32, i32
  }
  func.func @transform_2(%arg0: i32) -> (i32, i32) {
    %c0_i32 = arith.constant 0 : i32
    %c0_i32_0 = arith.constant 0 : i32
    %c0_i32_1 = arith.constant 0 : i32
    return %c0_i32, %c0_i32_0 : i32, i32
  }
  func.func @transform_3(%arg0: i32) -> (i32, i32) {
    %c0_i32 = arith.constant 0 : i32
    %c0_i32_0 = arith.constant 0 : i32
    return %arg0, %c0_i32 : i32, i32
  }
  func.func @transform_4(%arg0: i32) -> (i32, i32) {
    %c0_i32 = arith.constant 0 : i32
    %c0_i32_0 = arith.constant 0 : i32
    return %arg0, %c0_i32 : i32, i32
  }
  func.func @transform_5(%arg0: i32) -> (i32, i32) {
    %c0_i32 = arith.constant 0 : i32
    %c0_i32_0 = arith.constant 0 : i32
    return %arg0, %c0_i32 : i32, i32
  }
}

module attributes {stable_mosaic.version = 11 : i64} {
  func.func @kernel(%arg0: i32, %arg1: memref<16x64x32xf32, #tpu.memory_space<vmem>>, %arg2: memref<8x32xf32, #tpu.memory_space<vmem>>, %arg3: memref<8x32xf32, #tpu.memory_space<vmem>>, %arg4: memref<1x32xf32, #tpu.memory_space<vmem>>, %arg5: memref<1x32xf32, #tpu.memory_space<vmem>>, %arg6: memref<16x32xf32, #tpu.memory_space<vmem>>) attributes {dimension_semantics = [#tpu.dimension_semantics<parallel>], iteration_bounds = array<i64: 1>, scalar_prefetch = 0 : i64, scratch_operands = 0 : i64, tpu.core_type = #tpu.core_type<tc>, window_params = [{transform_indices = @transform_0, window_bounds = array<i64: 16, 64, 32>}, {pipeline_mode = #tpu.pipeline_mode<synchronous>, transform_indices = @transform_1, window_bounds = array<i64: 8, 32>}, {pipeline_mode = #tpu.pipeline_mode<synchronous>, transform_indices = @transform_2, window_bounds = array<i64: 8, 32>}, {pipeline_mode = #tpu.pipeline_mode<synchronous>, transform_indices = @transform_3, window_bounds = array<i64: 1, 32>}, {pipeline_mode = #tpu.pipeline_mode<synchronous>, transform_indices = @transform_4, window_bounds = array<i64: 1, 32>}, {transform_indices = @transform_5, window_bounds = array<i64: 16, 32>}]} {
    %c0 = arith.constant 0 : index
    %c0_0 = arith.constant 0 : index
    %0 = vector.load %arg2[%c0, %c0_0] : memref<8x32xf32, #tpu.memory_space<vmem>>, vector<8x32xf32>
    %cst = arith.constant dense<0.000000e+00> : vector<32xf32>
    %1 = vector.multi_reduction <add>, %0, %cst [0] : vector<8x32xf32> to vector<32xf32>
    %2 = vector.shape_cast %1 : vector<32xf32> to vector<1x32xf32>
    %cst_1 = arith.constant 9.765625E-4 : f32
    %3 = vector.broadcast %cst_1 : f32 to vector<1x32xf32>
    %4 = arith.mulf %2, %3 : vector<1x32xf32>
    %c0_2 = arith.constant 0 : index
    %c0_3 = arith.constant 0 : index
    %5 = vector.load %arg3[%c0_2, %c0_3] : memref<8x32xf32, #tpu.memory_space<vmem>>, vector<8x32xf32>
    %cst_4 = arith.constant dense<0.000000e+00> : vector<32xf32>
    %6 = vector.multi_reduction <add>, %5, %cst_4 [0] : vector<8x32xf32> to vector<32xf32>
    %7 = vector.shape_cast %6 : vector<32xf32> to vector<1x32xf32>
    %cst_5 = arith.constant 9.765625E-4 : f32
    %8 = vector.broadcast %cst_5 : f32 to vector<1x32xf32>
    %9 = arith.mulf %7, %8 : vector<1x32xf32>
    %10 = arith.mulf %4, %4 : vector<1x32xf32>
    %11 = arith.subf %9, %10 : vector<1x32xf32>
    %cst_6 = arith.constant 0.000000e+00 : f32
    %12 = vector.broadcast %cst_6 : f32 to vector<1x32xf32>
    %13 = arith.maximumf %11, %12 : vector<1x32xf32>
    %cst_7 = arith.constant 9.99999974E-6 : f32
    %14 = vector.broadcast %cst_7 : f32 to vector<1x32xf32>
    %15 = arith.addf %13, %14 : vector<1x32xf32>
    %16 = math.rsqrt %15 : vector<1x32xf32>
    %c0_8 = arith.constant 0 : index
    %c0_9 = arith.constant 0 : index
    %17 = vector.load %arg4[%c0_8, %c0_9] : memref<1x32xf32, #tpu.memory_space<vmem>>, vector<1x32xf32>
    %18 = arith.mulf %16, %17 : vector<1x32xf32>
    %c0_10 = arith.constant 0 : index
    %c0_11 = arith.constant 0 : index
    %19 = vector.load %arg5[%c0_10, %c0_11] : memref<1x32xf32, #tpu.memory_space<vmem>>, vector<1x32xf32>
    %20 = arith.mulf %4, %18 : vector<1x32xf32>
    %21 = arith.subf %19, %20 : vector<1x32xf32>
    %c0_12 = arith.constant 0 : index
    %c0_13 = arith.constant 0 : index
    %c0_14 = arith.constant 0 : index
    %22 = vector.load %arg1[%c0_12, %c0_13, %c0_14] : memref<16x64x32xf32, #tpu.memory_space<vmem>>, vector<16x64x32xf32>
    %23 = vector.shape_cast %18 : vector<1x32xf32> to vector<1x1x32xf32>
    %24 = vector.broadcast %23 : vector<1x1x32xf32> to vector<16x64x32xf32>
    %25 = arith.mulf %22, %24 : vector<16x64x32xf32>
    %26 = vector.shape_cast %21 : vector<1x32xf32> to vector<1x1x32xf32>
    %27 = vector.broadcast %26 : vector<1x1x32xf32> to vector<16x64x32xf32>
    %28 = arith.addf %25, %27 : vector<16x64x32xf32>
    %cst_15 = arith.constant 0.000000e+00 : f32
    %29 = vector.broadcast %cst_15 : f32 to vector<16x64x32xf32>
    %30 = arith.maximumf %28, %29 : vector<16x64x32xf32>
    %cst_16 = arith.constant dense<0.000000e+00> : vector<16x32xf32>
    %31 = vector.multi_reduction <add>, %30, %cst_16 [1] : vector<16x64x32xf32> to vector<16x32xf32>
    %cst_17 = arith.constant 6.400000e+01 : f32
    %32 = vector.broadcast %cst_17 : f32 to vector<16x32xf32>
    %33 = arith.divf %31, %32 : vector<16x32xf32>
    %c0_18 = arith.constant 0 : index
    %c0_19 = arith.constant 0 : index
    %34 = vector.load %arg6[%c0_18, %c0_19] : memref<16x32xf32, #tpu.memory_space<vmem>>, vector<16x32xf32>
    tpu.vector_store %arg6[%c0_18, %c0_19], %33 {strides = array<i32>} : memref<16x32xf32, #tpu.memory_space<vmem>>, vector<16x32xf32>,
    return
  }
  func.func @transform_0(%arg0: i32) -> (i32, i32, i32) {
    %c0_i32 = arith.constant 0 : i32
    %c0_i32_0 = arith.constant 0 : i32
    %c0_i32_1 = arith.constant 0 : i32
    return %arg0, %c0_i32, %c0_i32_0 : i32, i32, i32
  }
  func.func @transform_1(%arg0: i32) -> (i32, i32) {
    %c0_i32 = arith.constant 0 : i32
    %c0_i32_0 = arith.constant 0 : i32
    %c0_i32_1 = arith.constant 0 : i32
    return %c0_i32, %c0_i32_0 : i32, i32
  }
  func.func @transform_2(%arg0: i32) -> (i32, i32) {
    %c0_i32 = arith.constant 0 : i32
    %c0_i32_0 = arith.constant 0 : i32
    %c0_i32_1 = arith.constant 0 : i32
    return %c0_i32, %c0_i32_0 : i32, i32
  }
  func.func @transform_3(%arg0: i32) -> (i32, i32) {
    %c0_i32 = arith.constant 0 : i32
    %c0_i32_0 = arith.constant 0 : i32
    %c0_i32_1 = arith.constant 0 : i32
    return %c0_i32, %c0_i32_0 : i32, i32
  }
  func.func @transform_4(%arg0: i32) -> (i32, i32) {
    %c0_i32 = arith.constant 0 : i32
    %c0_i32_0 = arith.constant 0 : i32
    %c0_i32_1 = arith.constant 0 : i32
    return %c0_i32, %c0_i32_0 : i32, i32
  }
  func.func @transform_5(%arg0: i32) -> (i32, i32) {
    %c0_i32 = arith.constant 0 : i32
    %c0_i32_0 = arith.constant 0 : i32
    return %arg0, %c0_i32 : i32, i32
  }
}

module attributes {stable_mosaic.version = 11 : i64} {
  func.func @_cosine_fc_kernel(%arg0: i32, %arg1: memref<16x32xf32, #tpu.memory_space<vmem>>, %arg2: memref<32x128xbf16, #tpu.memory_space<vmem>>, %arg3: memref<1xf32, #tpu.memory_space<smem>>, %arg4: memref<16x128xf32, #tpu.memory_space<vmem>>) attributes {dimension_semantics = [#tpu.dimension_semantics<parallel>], iteration_bounds = array<i64: 1>, scalar_prefetch = 0 : i64, scratch_operands = 0 : i64, tpu.core_type = #tpu.core_type<tc>, window_params = [{transform_indices = @transform_0, window_bounds = array<i64: 16, 32>}, {pipeline_mode = #tpu.pipeline_mode<synchronous>, transform_indices = @transform_1, window_bounds = array<i64: 32, 128>}, {transform_indices = @transform_2, window_bounds = array<i64: 1>}, {transform_indices = @transform_3, window_bounds = array<i64: 16, 128>}]} {
    %c0 = arith.constant 0 : index
    %c0_0 = arith.constant 0 : index
    %0 = vector.load %arg1[%c0, %c0_0] : memref<16x32xf32, #tpu.memory_space<vmem>>, vector<16x32xf32>
    %1 = arith.mulf %0, %0 : vector<16x32xf32>
    %cst = arith.constant dense<0.000000e+00> : vector<16xf32>
    %2 = vector.multi_reduction <add>, %1, %cst [1] : vector<16x32xf32> to vector<16xf32>
    %3 = vector.shape_cast %2 : vector<16xf32> to vector<16x1xf32>
    %cst_1 = arith.constant 1.000000e-24 : f32
    %4 = vector.broadcast %cst_1 : f32 to vector<16x1xf32>
    %5 = arith.maximumf %3, %4 : vector<16x1xf32>
    %6 = math.rsqrt %5 : vector<16x1xf32>
    %7 = vector.broadcast %6 : vector<16x1xf32> to vector<16x32xf32>
    %8 = arith.mulf %0, %7 : vector<16x32xf32>
    %9 = arith.truncf %8 : vector<16x32xf32> to vector<16x32xbf16>
    %c0_2 = arith.constant 0 : index
    %c0_3 = arith.constant 0 : index
    %10 = vector.load %arg2[%c0_2, %c0_3] : memref<32x128xbf16, #tpu.memory_space<vmem>>, vector<32x128xbf16>
    %cst_4 = arith.constant dense<0.000000e+00> : vector<16x128xf32>
    %11 = tpu.matmul %9, %10, %cst_4 {dimension_numbers = #tpu.dot_dimension_numbers<[1], [0], [0], [1], [0, 0, 1, 1], [], []>} : vector<16x32xbf16>, vector<32x128xbf16>, vector<16x128xf32> -> vector<16x128xf32>
    %c0_5 = arith.constant 0 : index
    %12 = memref.load %arg3[%c0_5] : memref<1xf32, #tpu.memory_space<smem>>
    %13 = vector.broadcast %12 : f32 to vector<16x128xf32>
    %14 = arith.mulf %11, %13 : vector<16x128xf32>
    %c0_6 = arith.constant 0 : index
    %c0_7 = arith.constant 0 : index
    %15 = vector.load %arg4[%c0_6, %c0_7] : memref<16x128xf32, #tpu.memory_space<vmem>>, vector<16x128xf32>
    tpu.vector_store %arg4[%c0_6, %c0_7], %14 {strides = array<i32>} : memref<16x128xf32, #tpu.memory_space<vmem>>, vector<16x128xf32>,
    return
  }
  func.func @transform_0(%arg0: i32) -> (i32, i32) {
    %c0_i32 = arith.constant 0 : i32
    %c0_i32_0 = arith.constant 0 : i32
    return %arg0, %c0_i32 : i32, i32
  }
  func.func @transform_1(%arg0: i32) -> (i32, i32) {
    %c0_i32 = arith.constant 0 : i32
    %c0_i32_0 = arith.constant 0 : i32
    %c0_i32_1 = arith.constant 0 : i32
    return %c0_i32, %c0_i32_0 : i32, i32
  }
  func.func @transform_2(%arg0: i32) -> i32 {
    %c0_i32 = arith.constant 0 : i32
    %c0_i32_0 = arith.constant 0 : i32
    return %c0_i32 : i32
  }
  func.func @transform_3(%arg0: i32) -> (i32, i32) {
    %c0_i32 = arith.constant 0 : i32
    %c0_i32_0 = arith.constant 0 : i32
    return %arg0, %c0_i32 : i32, i32
  }
}

</mosaic_0001>

<bundles_post_ra>
// kernel: fx_cosine_classifier_forward.6
= control target key start
LH: loop header
LB: loop body
LE: loop exit
PB: predicated region body
PF: predicated region fallthrough
CT: control target
= control target key end

     0   :  { %s1172_s18 = smov 0   ;;  %s1881_s0 = inlined_call_operand.vmem [shape: f32[4096,32], index: 0, kind: input, shape index: {}]   ;;  %s1882_s1 = inlined_call_operand.vmem [shape: f32[32,32], index: 1, kind: input, shape index: {}]   ;;  %s1883_s2 = inlined_call_operand.vmem [shape: f32[32,32], index: 2, kind: input, shape index: {}]   ;;  %s1884_s3 = inlined_call_operand.vmem [shape: f32[1,32], index: 3, kind: input, shape index: {}]   ;;  %s1885_s4 = inlined_call_operand.vmem [shape: f32[1,32], index: 4, kind: input, shape index: {}]   ;;  %s1886_s5 = inlined_call_operand.vmem [shape: bf16[4096,32], index: 5, kind: output, shape index: {}]  }
   0x1 LB: > { %s1113_s19 = sadd.s32 4294967295, %s1140_s18   ;;  %p1117_p0 = scmp.ge.s32.totalorder %s1140_s18, 1  ;;  %s1140_s18 = sphi %s1172_s18, %s15_s18  }
   0x2   : > { %p188_p1 = scmp.lt.s32.totalorder %s1140_s18, 5 }
   0x4   : > { %p189_p2 = pnand %p1117_p0, %p188_p1 }
   0x5   : > { %s1118_s11 = sshll.u32 (!%p189_p2), %s1113_s19, 7 }
   0x6   : > { %192 = sbr.rel (%p189_p2) target bundleno = 201 (0xc9), region = 40  ;;  %p217_p3 = scmp.lt.s32.totalorder (!%p189_p2), %s1118_s11, 511 }
   0xb   : > { %v228_v0 = vld [vmem:[%s1882_s1] sm:$0xff]  ;;  %v229_v1 = vld [vmem:[%s1882_s1 + $0x8] sm:$0xff]  ;;  %v230_v2 = vld [vmem:[%s1882_s1 + $0x10] sm:$0xff]  ;;  %vm232_vm0 = vcmask 261120   ;;  %s1888_s11 = smov (!%p217_p3, %s1118_s11), 511  ;;  %vm928_vm4 = vcmask 257024  }
   0xc   : > { %v231_v3 = vld [vmem:[%s1882_s1 + $0x18] sm:$0xff]  ;;  %v233_v4 = vsel %vm232_vm0, %v228_v0, 0.0  ;;  %v234_v5 = vsel %vm232_vm0, %v229_v1, 0.0  ;;  %v236_v6 = vsel %vm232_vm0, %v230_v2, 0.0  ;;  %v247_v7 = vld [vmem:[%s1883_s2] sm:$0xff]  ;;  %v248_v9 = vld [vmem:[%s1883_s2 + $0x8] sm:$0xff] }
   0xd   : > { %v235_v8 = vadd.f32 %v234_v5, %v233_v4  ;;  %v249_v10 = vld [vmem:[%s1883_s2 + $0x10] sm:$0xff]  ;;  %v250_v11 = vld [vmem:[%s1883_s2 + $0x18] sm:$0xff]  ;;  %v251_v12 = vsel %vm232_vm0, %v247_v7, 0.0  ;;  %v238_v13 = vsel %vm232_vm0, %v231_v3, 0.0  ;;  %v252_v14 = vsel %vm232_vm0, %v248_v9, 0.0  ;;  %s1119_s12 = sshll.u32 %s1888_s11, 3 }
   0xe   : > { %v254_v15 = vsel %vm232_vm0, %v249_v10, 0.0  ;;  %v253_v17 = vadd.f32 %v252_v14, %v251_v12  ;;  %v256_v18 = vsel %vm232_vm0, %v250_v11, 0.0  ;;  %s1220_s15 = scalar_lea.vmem %s1881_s0, %s1119_s12  ;;  %v279_v46 = vld [vmem:[%s1884_s3] sm:$0x1]  ;;  %s1121_s21 = sshll.u32 %s1888_s11, 2 }
   0xf   : > { %v237_v16 = vadd.f32 %v236_v6, %v235_v8  ;;  %v281_v49 = vld [vmem:[%s1885_s4] sm:$0x1]  ;;  %v285_v51 = vld [vmem:[%s1220_s15 + $0x8] sm:$0xff]  ;;  %v286_v52 = vld [vmem:[%s1220_s15 + $0x10] sm:$0xff]  ;;  %s1272_s24 = scalar_lea.vmem %s1886_s5, %s1121_s21 }
  0x10   : > { %v255_v20 = vadd.f32 %v254_v15, %v253_v17  ;;  %v284_v50 = vld [vmem:[%s1220_s15] sm:$0xff]  ;;  %v287_v53 = vld [vmem:[%s1220_s15 + $0x18] sm:$0xff]  ;;  %v289_v57 = vld [vmem:[%s1220_s15 + $0x28] sm:$0xff] }
  0x11   : > { %v239_v19 = vadd.f32 %v238_v13, %v237_v16  ;;  %v288_v54 = vld [vmem:[%s1220_s15 + $0x20] sm:$0xff]  ;;  %v290_v58 = vld [vmem:[%s1220_s15 + $0x30] sm:$0xff]  ;;  %v291_v59 = vld [vmem:[%s1220_s15 + $0x38] sm:$0xff] }
  0x12   : > { %v257_v22 = vadd.f32 %v256_v18, %v255_v20  ;;  %v292_v60 = vld [vmem:[%s1220_s15 + $0x40] sm:$0xff]  ;;  %v293_v61 = vld [vmem:[%s1220_s15 + $0x48] sm:$0xff]  ;;  %v294_v62 = vld [vmem:[%s1220_s15 + $0x50] sm:$0xff] }
  0x13   : > { %v240_v21 = vrot.slane %v239_v19, 4  ;;  %v295_v3 = vld [vmem:[%s1220_s15 + $0x58] sm:$0xff]  ;;  %v296_v4 = vld [vmem:[%s1220_s15 + $0x60] sm:$0xff]  ;;  %v297_v5 = vld [vmem:[%s1220_s15 + $0x68] sm:$0xff] }
  0x14   : > { %v258_v24 = vrot.slane %v257_v22, 4 }
  0x15   : > { %v241_v23 = vadd.f32 %v240_v21, %v239_v19 }
  0x16   : > { %v259_v26 = vadd.f32 %v258_v24, %v257_v22 }
  0x17   : > { %v242_v25 = vrot.slane %v241_v23, 2 }
  0x18   : > { %v260_v28 = vrot.slane %v259_v26, 2 }
  0x19   : > { %v243_v27 = vadd.f32 %v242_v25, %v241_v23 }
  0x1a   : > { %v261_v30 = vadd.f32 %v260_v28, %v259_v26 }
  0x1b   : > { %v244_v29 = vrot.slane %v243_v27, 1 }
  0x1c   : > { %v262_v32 = vrot.slane %v261_v30, 1 }
  0x1d   : > { %v245_v31 = vadd.f32 %v244_v29, %v243_v27 }
  0x1e   : > { %v263_v34 = vadd.f32 %v262_v32, %v261_v30 }
  0x1f   : > { %v246_v33 = vmul.f32 0.00024414063, %v245_v31 }
  0x20   : > { %v264_v35 = vmul.f32 0.00024414063, %v263_v34 }
  0x21   : > { %v265_v36 = vmul.f32 %v246_v33, %v246_v33 }
  0x23   : > { %v266_v37 = vsub.f32 %v264_v35, %v265_v36 }
  0x25   : > { %v267_v38 = vmax.f32 %v266_v37, 0.0 }
  0x27   : > { %v268_v39 = vadd.f32 1e-05, %v267_v38  ;;  %v298_v38 = vld [vmem:[%s1220_s15 + $0x70] sm:$0xff] }
  0x29   : > { %1132 = vrsqrt.f32 %v268_v39  ;;  %vm275_vm1 = vweird.f32 %v268_v39 }
  0x2f   : > { %v1133_v40 = vpop.eup %1132 }
  0x30   : > { %v270_v41 = vmul.f32 %v1133_v40, %v268_v39  ;;  %vm276_vm2 = vweird.f32 %v1133_v40  ;;  %v299_v39 = vld [vmem:[%s1220_s15 + $0x78] sm:$0xff] }
  0x31   : > { %vm277_vm3 = vmor %vm275_vm1, %vm276_vm2 }
  0x32   : > { %v271_v42 = vmul.f32 %v1133_v40, %v270_v41 }
  0x34   : > { %v272_v43 = vmul.f32 0.5, %v271_v42 }
  0x36   : > { %v273_v44 = vsub.f32 1.5, %v272_v43 }
  0x38   : > { %v274_v45 = vmul.f32 %v1133_v40, %v273_v44 }
  0x3a   : > { %v278_v47 = vsel %vm277_vm3, %v1133_v40, %v274_v45 }
  0x3b   : > { %v280_v48 = vmul.f32 %v279_v46, %v278_v47 }
  0x3d   : > { %v282_v55 = vmul.f32 %v280_v48, %v246_v33  ;;  %v1233_v56 = vperm.slane %v280_v48, 0 }
  0x3f   : > { %v283_v63 = vsub.f32 %v281_v49, %v282_v55  ;;  %v413_v0 = vmul.f32 %v1233_v56, %v284_v50  ;;  %v414_v1 = vmul.f32 %v1233_v56, %v285_v51  ;;  %v415_v2 = vmul.f32 %v1233_v56, %v286_v52  ;;  %v300_v52 = vld [vmem:[%s1220_s15 + $0x80] sm:$0xff] }
  0x40   : > { %v416_v6 = vmul.f32 %v1233_v56, %v287_v53  ;;  %v417_v7 = vmul.f32 %v1233_v56, %v288_v54  ;;  %v418_v8 = vmul.f32 %v1233_v56, %v289_v57  ;;  %v419_v9 = vmul.f32 %v1233_v56, %v290_v58  ;;  %v301_v53 = vld [vmem:[%s1220_s15 + $0x88] sm:$0xff] }
  0x41   : > { %v1251_v10 = vperm.slane %v283_v63, 0  ;;  %v420_v11 = vmul.f32 %v1233_v56, %v291_v59  ;;  %v421_v12 = vmul.f32 %v1233_v56, %v292_v60  ;;  %v422_v13 = vmul.f32 %v1233_v56, %v293_v61  ;;  %v302_v63 = vld [vmem:[%s1220_s15 + $0x90] sm:$0xff] }
  0x42   : > { %v423_v14 = vmul.f32 %v1233_v56, %v294_v62  ;;  %v424_v15 = vmul.f32 %v1233_v56, %v295_v3  ;;  %v425_v16 = vmul.f32 %v1233_v56, %v296_v4  ;;  %v426_v17 = vmul.f32 %v1233_v56, %v297_v5  ;;  %v304_v5 = vld [vmem:[%s1220_s15 + $0xa0] sm:$0xff] }
  0x43   : > { %v544_v18 = vadd.f32 %v1251_v10, %v413_v0  ;;  %v545_v19 = vadd.f32 %v1251_v10, %v414_v1  ;;  %v546_v20 = vadd.f32 %v1251_v10, %v415_v2  ;;  %v547_v21 = vadd.f32 %v1251_v10, %v416_v6  ;;  %v303_v0 = vld [vmem:[%s1220_s15 + $0x98] sm:$0xff]  ;;  %v305_v6 = vld [vmem:[%s1220_s15 + $0xa8] sm:$0xff] }
  0x44   : > { %v548_v22 = vadd.f32 %v1251_v10, %v417_v7  ;;  %v549_v23 = vadd.f32 %v1251_v10, %v418_v8  ;;  %v550_v24 = vadd.f32 %v1251_v10, %v419_v9  ;;  %v551_v25 = vadd.f32 %v1251_v10, %v420_v11 }
  0x45   : > { %v672_v26 = vmax.f32 %v544_v18, 0.0  ;;  %v673_v27 = vmax.f32 %v545_v19, 0.0  ;;  %v674_v28 = vmax.f32 %v546_v20, 0.0  ;;  %v675_v29 = vmax.f32 %v547_v21, 0.0 }
  0x46   : > { %v676_v30 = vmax.f32 %v548_v22, 0.0  ;;  %v677_v31 = vmax.f32 %v549_v23, 0.0  ;;  %v678_v32 = vmax.f32 %v550_v24, 0.0  ;;  %v679_v33 = vmax.f32 %v551_v25, 0.0 }
  0x47   : > { %v800_v34 = vpack.c.bf16 %v672_v26, %v672_v26  ;;  %v801_v35 = vpack.c.bf16 %v673_v27, %v673_v27  ;;  %v802_v36 = vpack.c.bf16 %v674_v28, %v674_v28  ;;  %v803_v37 = vpack.c.bf16 %v675_v29, %v675_v29 }
  0x48   : > { %v804_v40 = vpack.c.bf16 %v676_v30, %v676_v30  ;;  %v805_v41 = vpack.c.bf16 %v677_v31, %v677_v31  ;;  %v806_v42 = vpack.c.bf16 %v678_v32, %v678_v32  ;;  %v807_v43 = vpack.c.bf16 %v679_v33, %v679_v33  ;;  %v308_v30 = vld [vmem:[%s1220_s15 + $0xc0] sm:$0xff]  ;;  %v309_v31 = vld [vmem:[%s1220_s15 + $0xc8] sm:$0xff] }
  0x49   : > { %929 = vst.msk [vmem:[%s1272_s24] sm:$0xf] %vm928_vm4, %v800_v34  ;;  %v552_v44 = vadd.f32 %v1251_v10, %v421_v12  ;;  %v553_v45 = vadd.f32 %v1251_v10, %v422_v13  ;;  %v554_v46 = vadd.f32 %v1251_v10, %v423_v14  ;;  %v555_v47 = vadd.f32 %v1251_v10, %v424_v15 }
  0x4a   : > { %930 = vst.msk [vmem:[%s1272_s24 + $0x4] sm:$0xf] %vm928_vm4, %v801_v35  ;;  %v556_v48 = vadd.f32 %v1251_v10, %v425_v16  ;;  %v557_v49 = vadd.f32 %v1251_v10, %v426_v17  ;;  %v427_v50 = vmul.f32 %v1233_v56, %v298_v38  ;;  %v428_v51 = vmul.f32 %v1233_v56, %v299_v39  ;;  %v306_v16 = vld [vmem:[%s1220_s15 + $0xb0] sm:$0xff]  ;;  %v307_v17 = vld [vmem:[%s1220_s15 + $0xb8] sm:$0xff] }
  0x4b   : > { %931 = vst.msk [vmem:[%s1272_s24 + $0x8] sm:$0xf] %vm928_vm4, %v802_v36  ;;  %v680_v54 = vmax.f32 %v552_v44, 0.0  ;;  %v681_v55 = vmax.f32 %v553_v45, 0.0  ;;  %v682_v57 = vmax.f32 %v554_v46, 0.0  ;;  %v683_v58 = vmax.f32 %v555_v47, 0.0 }
  0x4c   : > { %932 = vst.msk [vmem:[%s1272_s24 + $0xc] sm:$0xf] %vm928_vm4, %v803_v37  ;;  %v684_v59 = vmax.f32 %v556_v48, 0.0  ;;  %v685_v60 = vmax.f32 %v557_v49, 0.0  ;;  %v558_v61 = vadd.f32 %v1251_v10, %v427_v50  ;;  %v559_v62 = vadd.f32 %v1251_v10, %v428_v51  ;;  %v312_v46 = vld [vmem:[%s1220_s15 + $0xe0] sm:$0xff]  ;;  %v313_v47 = vld [vmem:[%s1220_s15 + $0xe8] sm:$0xff] }
  0x4d   : > { %933 = vst.msk [vmem:[%s1272_s24 + $0x10] sm:$0xf] %vm928_vm4, %v804_v40  ;;  %v808_v1 = vpack.c.bf16 %v680_v54, %v680_v54  ;;  %v809_v2 = vpack.c.bf16 %v681_v55, %v681_v55  ;;  %v810_v3 = vpack.c.bf16 %v682_v57, %v682_v57  ;;  %v811_v4 = vpack.c.bf16 %v683_v58, %v683_v58  ;;  %v310_v40 = vld [vmem:[%s1220_s15 + $0xd0] sm:$0xff]  ;;  %v315_v58 = vld [vmem:[%s1220_s15 + $0xf8] sm:$0xff] }
  0x4e   : > { %934 = vst.msk [vmem:[%s1272_s24 + $0x14] sm:$0xf] %vm928_vm4, %v805_v41  ;;  %v812_v7 = vpack.c.bf16 %v684_v59, %v684_v59  ;;  %v813_v8 = vpack.c.bf16 %v685_v60, %v685_v60  ;;  %v686_v9 = vmax.f32 %v558_v61, 0.0  ;;  %v687_v11 = vmax.f32 %v559_v62, 0.0  ;;  %v311_v41 = vld [vmem:[%s1220_s15 + $0xd8] sm:$0xff]  ;;  %v314_v57 = vld [vmem:[%s1220_s15 + $0xf0] sm:$0xff] }
  0x4f   : > { %935 = vst.msk [vmem:[%s1272_s24 + $0x18] sm:$0xf] %vm928_vm4, %v806_v42  ;;  %v429_v12 = vmul.f32 %v1233_v56, %v300_v52  ;;  %v430_v13 = vmul.f32 %v1233_v56, %v301_v53  ;;  %v431_v14 = vmul.f32 %v1233_v56, %v302_v63  ;;  %v432_v15 = vmul.f32 %v1233_v56, %v303_v0 }
  0x50   : > { %936 = vst.msk [vmem:[%s1272_s24 + $0x1c] sm:$0xf] %vm928_vm4, %v807_v43  ;;  %v814_v18 = vpack.c.bf16 %v686_v9, %v686_v9  ;;  %v815_v19 = vpack.c.bf16 %v687_v11, %v687_v11  ;;  %v433_v20 = vmul.f32 %v1233_v56, %v304_v5  ;;  %v434_v21 = vmul.f32 %v1233_v56, %v305_v6 }
  0x51   : > { %937 = vst.msk [vmem:[%s1272_s24 + $0x20] sm:$0xf] %vm928_vm4, %v808_v1  ;;  %v560_v22 = vadd.f32 %v1251_v10, %v429_v12  ;;  %v561_v23 = vadd.f32 %v1251_v10, %v430_v13  ;;  %v562_v24 = vadd.f32 %v1251_v10, %v431_v14  ;;  %v563_v25 = vadd.f32 %v1251_v10, %v432_v15 }
  0x52   : > { %938 = vst.msk [vmem:[%s1272_s24 + $0x24] sm:$0xf] %vm928_vm4, %v809_v2  ;;  %v564_v26 = vadd.f32 %v1251_v10, %v433_v20  ;;  %v565_v27 = vadd.f32 %v1251_v10, %v434_v21  ;;  %v435_v28 = vmul.f32 %v1233_v56, %v306_v16  ;;  %v436_v29 = vmul.f32 %v1233_v56, %v307_v17 }
  0x53   : > { %939 = vst.msk [vmem:[%s1272_s24 + $0x28] sm:$0xf] %vm928_vm4, %v810_v3  ;;  %v688_v32 = vmax.f32 %v560_v22, 0.0  ;;  %v689_v33 = vmax.f32 %v561_v23, 0.0  ;;  %v690_v34 = vmax.f32 %v562_v24, 0.0  ;;  %v691_v35 = vmax.f32 %v563_v25, 0.0 }
  0x54   : > { %940 = vst.msk [vmem:[%s1272_s24 + $0x2c] sm:$0xf] %vm928_vm4, %v811_v4  ;;  %v692_v36 = vmax.f32 %v564_v26, 0.0  ;;  %v693_v37 = vmax.f32 %v565_v27, 0.0  ;;  %v566_v38 = vadd.f32 %v1251_v10, %v435_v28  ;;  %v567_v39 = vadd.f32 %v1251_v10, %v436_v29  ;;  %v320_v24 = vld [vmem:[%s1220_s15 + $0x120] sm:$0xff]  ;;  %v321_v25 = vld [vmem:[%s1220_s15 + $0x128] sm:$0xff] }
  0x55   : > { %941 = vst.msk [vmem:[%s1272_s24 + $0x30] sm:$0xf] %vm928_vm4, %v812_v7  ;;  %v816_v42 = vpack.c.bf16 %v688_v32, %v688_v32  ;;  %v817_v43 = vpack.c.bf16 %v689_v33, %v689_v33  ;;  %v818_v44 = vpack.c.bf16 %v690_v34, %v690_v34  ;;  %v819_v45 = vpack.c.bf16 %v691_v35, %v691_v35  ;;  %v316_v7 = vld [vmem:[%s1220_s15 + $0x100] sm:$0xff]  ;;  %v322_v34 = vld [vmem:[%s1220_s15 + $0x130] sm:$0xff]  ;;  %v323_v35 = vld [vmem:[%s1220_s15 + $0x138] sm:$0xff] }
  0x56   : > { %942 = vst.msk [vmem:[%s1272_s24 + $0x34] sm:$0xf] %vm928_vm4, %v813_v8  ;;  %v820_v48 = vpack.c.bf16 %v692_v36, %v692_v36  ;;  %v821_v49 = vpack.c.bf16 %v693_v37, %v693_v37  ;;  %v694_v50 = vmax.f32 %v566_v38, 0.0  ;;  %v695_v51 = vmax.f32 %v567_v39, 0.0  ;;  %v317_v8 = vld [vmem:[%s1220_s15 + $0x108] sm:$0xff] }
  0x57   : > { %943 = vst.msk [vmem:[%s1272_s24 + $0x38] sm:$0xf] %vm928_vm4, %v814_v18  ;;  %v437_v52 = vmul.f32 %v1233_v56, %v308_v30  ;;  %v438_v53 = vmul.f32 %v1233_v56, %v309_v31  ;;  %v439_v54 = vmul.f32 %v1233_v56, %v310_v40  ;;  %v440_v55 = vmul.f32 %v1233_v56, %v311_v41  ;;  %v318_v18 = vld [vmem:[%s1220_s15 + $0x110] sm:$0xff] }
  0x58   : > { %944 = vst.msk [vmem:[%s1272_s24 + $0x3c] sm:$0xf] %vm928_vm4, %v815_v19  ;;  %v822_v59 = vpack.c.bf16 %v694_v50, %v694_v50  ;;  %v823_v60 = vpack.c.bf16 %v695_v51, %v695_v51  ;;  %v441_v61 = vmul.f32 %v1233_v56, %v312_v46  ;;  %v442_v62 = vmul.f32 %v1233_v56, %v313_v47  ;;  %v319_v19 = vld [vmem:[%s1220_s15 + $0x118] sm:$0xff] }
  0x59   : > { %945 = vst.msk [vmem:[%s1272_s24 + $0x40] sm:$0xf] %vm928_vm4, %v816_v42  ;;  %v568_v63 = vadd.f32 %v1251_v10, %v437_v52  ;;  %v569_v0 = vadd.f32 %v1251_v10, %v438_v53  ;;  %v570_v1 = vadd.f32 %v1251_v10, %v439_v54  ;;  %v571_v2 = vadd.f32 %v1251_v10, %v440_v55 }
  0x5a   : > { %946 = vst.msk [vmem:[%s1272_s24 + $0x44] sm:$0xf] %vm928_vm4, %v817_v43  ;;  %v572_v3 = vadd.f32 %v1251_v10, %v441_v61  ;;  %v573_v4 = vadd.f32 %v1251_v10, %v442_v62  ;;  %v443_v5 = vmul.f32 %v1233_v56, %v314_v57  ;;  %v444_v6 = vmul.f32 %v1233_v56, %v315_v58 }
  0x5b   : > { %947 = vst.msk [vmem:[%s1272_s24 + $0x48] sm:$0xf] %vm928_vm4, %v818_v44  ;;  %v696_v9 = vmax.f32 %v568_v63, 0.0  ;;  %v697_v11 = vmax.f32 %v569_v0, 0.0  ;;  %v698_v12 = vmax.f32 %v570_v1, 0.0  ;;  %v699_v13 = vmax.f32 %v571_v2, 0.0 }
  0x5c   : > { %948 = vst.msk [vmem:[%s1272_s24 + $0x4c] sm:$0xf] %vm928_vm4, %v819_v45  ;;  %v700_v14 = vmax.f32 %v572_v3, 0.0  ;;  %v701_v15 = vmax.f32 %v573_v4, 0.0  ;;  %v574_v16 = vadd.f32 %v1251_v10, %v443_v5  ;;  %v575_v17 = vadd.f32 %v1251_v10, %v444_v6  ;;  %v328_v1 = vld [vmem:[%s1220_s15 + $0x160] sm:$0xff]  ;;  %v329_v2 = vld [vmem:[%s1220_s15 + $0x168] sm:$0xff] }
  0x5d   : > { %949 = vst.msk [vmem:[%s1272_s24 + $0x50] sm:$0xf] %vm928_vm4, %v820_v48  ;;  %v824_v20 = vpack.c.bf16 %v696_v9, %v696_v9  ;;  %v825_v21 = vpack.c.bf16 %v697_v11, %v697_v11  ;;  %v826_v22 = vpack.c.bf16 %v698_v12, %v698_v12  ;;  %v827_v23 = vpack.c.bf16 %v699_v13, %v699_v13  ;;  %v324_v48 = vld [vmem:[%s1220_s15 + $0x140] sm:$0xff]  ;;  %v330_v12 = vld [vmem:[%s1220_s15 + $0x170] sm:$0xff]  ;;  %v331_v13 = vld [vmem:[%s1220_s15 + $0x178] sm:$0xff] }
  0x5e   : > { %950 = vst.msk [vmem:[%s1272_s24 + $0x54] sm:$0xf] %vm928_vm4, %v821_v49  ;;  %v828_v26 = vpack.c.bf16 %v700_v14, %v700_v14  ;;  %v829_v27 = vpack.c.bf16 %v701_v15, %v701_v15  ;;  %v702_v28 = vmax.f32 %v574_v16, 0.0  ;;  %v703_v29 = vmax.f32 %v575_v17, 0.0  ;;  %v325_v49 = vld [vmem:[%s1220_s15 + $0x148] sm:$0xff] }
  0x5f   : > { %951 = vst.msk [vmem:[%s1272_s24 + $0x58] sm:$0xf] %vm928_vm4, %v822_v59  ;;  %v445_v30 = vmul.f32 %v1233_v56, %v316_v7  ;;  %v446_v31 = vmul.f32 %v1233_v56, %v317_v8  ;;  %v447_v32 = vmul.f32 %v1233_v56, %v318_v18  ;;  %v448_v33 = vmul.f32 %v1233_v56, %v319_v19  ;;  %v326_v59 = vld [vmem:[%s1220_s15 + $0x150] sm:$0xff] }
  0x60   : > { %952 = vst.msk [vmem:[%s1272_s24 + $0x5c] sm:$0xf] %vm928_vm4, %v823_v60  ;;  %v830_v36 = vpack.c.bf16 %v702_v28, %v702_v28  ;;  %v831_v37 = vpack.c.bf16 %v703_v29, %v703_v29  ;;  %v449_v38 = vmul.f32 %v1233_v56, %v320_v24  ;;  %v450_v39 = vmul.f32 %v1233_v56, %v321_v25  ;;  %v327_v60 = vld [vmem:[%s1220_s15 + $0x158] sm:$0xff] }
  0x61   : > { %953 = vst.msk [vmem:[%s1272_s24 + $0x60] sm:$0xf] %vm928_vm4, %v824_v20  ;;  %v576_v40 = vadd.f32 %v1251_v10, %v445_v30  ;;  %v577_v41 = vadd.f32 %v1251_v10, %v446_v31  ;;  %v578_v42 = vadd.f32 %v1251_v10, %v447_v32  ;;  %v579_v43 = vadd.f32 %v1251_v10, %v448_v33 }
  0x62   : > { %954 = vst.msk [vmem:[%s1272_s24 + $0x64] sm:$0xf] %vm928_vm4, %v825_v21  ;;  %v580_v44 = vadd.f32 %v1251_v10, %v449_v38  ;;  %v581_v45 = vadd.f32 %v1251_v10, %v450_v39  ;;  %v451_v46 = vmul.f32 %v1233_v56, %v322_v34  ;;  %v452_v47 = vmul.f32 %v1233_v56, %v323_v35 }
  0x63   : > { %955 = vst.msk [vmem:[%s1272_s24 + $0x68] sm:$0xf] %vm928_vm4, %v826_v22  ;;  %v704_v50 = vmax.f32 %v576_v40, 0.0  ;;  %v705_v51 = vmax.f32 %v577_v41, 0.0  ;;  %v706_v52 = vmax.f32 %v578_v42, 0.0  ;;  %v707_v53 = vmax.f32 %v579_v43, 0.0 }
  0x64   : > { %956 = vst.msk [vmem:[%s1272_s24 + $0x6c] sm:$0xf] %vm928_vm4, %v827_v23  ;;  %v708_v54 = vmax.f32 %v580_v44, 0.0  ;;  %v709_v55 = vmax.f32 %v581_v45, 0.0  ;;  %v582_v57 = vadd.f32 %v1251_v10, %v451_v46  ;;  %v583_v58 = vadd.f32 %v1251_v10, %v452_v47  ;;  %v336_v42 = vld [vmem:[%s1220_s15 + $0x1a0] sm:$0xff]  ;;  %v337_v43 = vld [vmem:[%s1220_s15 + $0x1a8] sm:$0xff] }
  0x65   : > { %957 = vst.msk [vmem:[%s1272_s24 + $0x70] sm:$0xf] %vm928_vm4, %v828_v26  ;;  %v832_v61 = vpack.c.bf16 %v704_v50, %v704_v50  ;;  %v833_v62 = vpack.c.bf16 %v705_v51, %v705_v51  ;;  %v834_v63 = vpack.c.bf16 %v706_v52, %v706_v52  ;;  %v835_v0 = vpack.c.bf16 %v707_v53, %v707_v53  ;;  %v332_v26 = vld [vmem:[%s1220_s15 + $0x180] sm:$0xff]  ;;  %v338_v52 = vld [vmem:[%s1220_s15 + $0x1b0] sm:$0xff]  ;;  %v339_v53 = vld [vmem:[%s1220_s15 + $0x1b8] sm:$0xff] }
  0x66   : > { %958 = vst.msk [vmem:[%s1272_s24 + $0x74] sm:$0xf] %vm928_vm4, %v829_v27  ;;  %v836_v3 = vpack.c.bf16 %v708_v54, %v708_v54  ;;  %v837_v4 = vpack.c.bf16 %v709_v55, %v709_v55  ;;  %v710_v5 = vmax.f32 %v582_v57, 0.0  ;;  %v711_v6 = vmax.f32 %v583_v58, 0.0  ;;  %v333_v27 = vld [vmem:[%s1220_s15 + $0x188] sm:$0xff] }
  0x67   : > { %959 = vst.msk [vmem:[%s1272_s24 + $0x78] sm:$0xf] %vm928_vm4, %v830_v36  ;;  %v453_v7 = vmul.f32 %v1233_v56, %v324_v48  ;;  %v454_v8 = vmul.f32 %v1233_v56, %v325_v49  ;;  %v455_v9 = vmul.f32 %v1233_v56, %v326_v59  ;;  %v456_v11 = vmul.f32 %v1233_v56, %v327_v60  ;;  %v334_v36 = vld [vmem:[%s1220_s15 + $0x190] sm:$0xff] }
  0x68   : > { %960 = vst.msk [vmem:[%s1272_s24 + $0x7c] sm:$0xf] %vm928_vm4, %v831_v37  ;;  %v838_v14 = vpack.c.bf16 %v710_v5, %v710_v5  ;;  %v839_v15 = vpack.c.bf16 %v711_v6, %v711_v6  ;;  %v457_v16 = vmul.f32 %v1233_v56, %v328_v1  ;;  %v458_v17 = vmul.f32 %v1233_v56, %v329_v2  ;;  %v335_v37 = vld [vmem:[%s1220_s15 + $0x198] sm:$0xff] }
  0x69   : > { %961 = vst.msk [vmem:[%s1272_s24 + $0x80] sm:$0xf] %vm928_vm4, %v832_v61  ;;  %v584_v18 = vadd.f32 %v1251_v10, %v453_v7  ;;  %v585_v19 = vadd.f32 %v1251_v10, %v454_v8  ;;  %v586_v20 = vadd.f32 %v1251_v10, %v455_v9  ;;  %v587_v21 = vadd.f32 %v1251_v10, %v456_v11 }
  0x6a   : > { %962 = vst.msk [vmem:[%s1272_s24 + $0x84] sm:$0xf] %vm928_vm4, %v833_v62  ;;  %v588_v22 = vadd.f32 %v1251_v10, %v457_v16  ;;  %v589_v23 = vadd.f32 %v1251_v10, %v458_v17  ;;  %v459_v24 = vmul.f32 %v1233_v56, %v330_v12  ;;  %v460_v25 = vmul.f32 %v1233_v56, %v331_v13 }
  0x6b   : > { %963 = vst.msk [vmem:[%s1272_s24 + $0x88] sm:$0xf] %vm928_vm4, %v834_v63  ;;  %v712_v28 = vmax.f32 %v584_v18, 0.0  ;;  %v713_v29 = vmax.f32 %v585_v19, 0.0  ;;  %v714_v30 = vmax.f32 %v586_v20, 0.0  ;;  %v715_v31 = vmax.f32 %v587_v21, 0.0 }
  0x6c   : > { %964 = vst.msk [vmem:[%s1272_s24 + $0x8c] sm:$0xf] %vm928_vm4, %v835_v0  ;;  %v716_v32 = vmax.f32 %v588_v22, 0.0  ;;  %v717_v33 = vmax.f32 %v589_v23, 0.0  ;;  %v590_v34 = vadd.f32 %v1251_v10, %v459_v24  ;;  %v591_v35 = vadd.f32 %v1251_v10, %v460_v25  ;;  %v344_v20 = vld [vmem:[%s1220_s15 + $0x1e0] sm:$0xff]  ;;  %v345_v21 = vld [vmem:[%s1220_s15 + $0x1e8] sm:$0xff] }
  0x6d   : > { %965 = vst.msk [vmem:[%s1272_s24 + $0x90] sm:$0xf] %vm928_vm4, %v836_v3  ;;  %v840_v38 = vpack.c.bf16 %v712_v28, %v712_v28  ;;  %v841_v39 = vpack.c.bf16 %v713_v29, %v713_v29  ;;  %v842_v40 = vpack.c.bf16 %v714_v30, %v714_v30  ;;  %v843_v41 = vpack.c.bf16 %v715_v31, %v715_v31  ;;  %v340_v3 = vld [vmem:[%s1220_s15 + $0x1c0] sm:$0xff]  ;;  %v346_v30 = vld [vmem:[%s1220_s15 + $0x1f0] sm:$0xff]  ;;  %v347_v31 = vld [vmem:[%s1220_s15 + $0x1f8] sm:$0xff] }
  0x6e   : > { %966 = vst.msk [vmem:[%s1272_s24 + $0x94] sm:$0xf] %vm928_vm4, %v837_v4  ;;  %v844_v44 = vpack.c.bf16 %v716_v32, %v716_v32  ;;  %v845_v45 = vpack.c.bf16 %v717_v33, %v717_v33  ;;  %v718_v46 = vmax.f32 %v590_v34, 0.0  ;;  %v719_v47 = vmax.f32 %v591_v35, 0.0  ;;  %v341_v4 = vld [vmem:[%s1220_s15 + $0x1c8] sm:$0xff] }
  0x6f   : > { %967 = vst.msk [vmem:[%s1272_s24 + $0x98] sm:$0xf] %vm928_vm4, %v838_v14  ;;  %v461_v48 = vmul.f32 %v1233_v56, %v332_v26  ;;  %v462_v49 = vmul.f32 %v1233_v56, %v333_v27  ;;  %v463_v50 = vmul.f32 %v1233_v56, %v334_v36  ;;  %v464_v51 = vmul.f32 %v1233_v56, %v335_v37  ;;  %v342_v14 = vld [vmem:[%s1220_s15 + $0x1d0] sm:$0xff] }
  0x70   : > { %968 = vst.msk [vmem:[%s1272_s24 + $0x9c] sm:$0xf] %vm928_vm4, %v839_v15  ;;  %v846_v54 = vpack.c.bf16 %v718_v46, %v718_v46  ;;  %v847_v55 = vpack.c.bf16 %v719_v47, %v719_v47  ;;  %v465_v57 = vmul.f32 %v1233_v56, %v336_v42  ;;  %v466_v58 = vmul.f32 %v1233_v56, %v337_v43  ;;  %v343_v15 = vld [vmem:[%s1220_s15 + $0x1d8] sm:$0xff] }
  0x71   : > { %969 = vst.msk [vmem:[%s1272_s24 + $0xa0] sm:$0xf] %vm928_vm4, %v840_v38  ;;  %v592_v59 = vadd.f32 %v1251_v10, %v461_v48  ;;  %v593_v60 = vadd.f32 %v1251_v10, %v462_v49  ;;  %v594_v61 = vadd.f32 %v1251_v10, %v463_v50  ;;  %v595_v62 = vadd.f32 %v1251_v10, %v464_v51 }
  0x72   : > { %970 = vst.msk [vmem:[%s1272_s24 + $0xa4] sm:$0xf] %vm928_vm4, %v841_v39  ;;  %v596_v63 = vadd.f32 %v1251_v10, %v465_v57  ;;  %v597_v0 = vadd.f32 %v1251_v10, %v466_v58  ;;  %v467_v1 = vmul.f32 %v1233_v56, %v338_v52  ;;  %v468_v2 = vmul.f32 %v1233_v56, %v339_v53 }
  0x73   : > { %971 = vst.msk [vmem:[%s1272_s24 + $0xa8] sm:$0xf] %vm928_vm4, %v842_v40  ;;  %v720_v5 = vmax.f32 %v592_v59, 0.0  ;;  %v721_v6 = vmax.f32 %v593_v60, 0.0  ;;  %v722_v7 = vmax.f32 %v594_v61, 0.0  ;;  %v723_v8 = vmax.f32 %v595_v62, 0.0 }
  0x74   : > { %972 = vst.msk [vmem:[%s1272_s24 + $0xac] sm:$0xf] %vm928_vm4, %v843_v41  ;;  %v724_v9 = vmax.f32 %v596_v63, 0.0  ;;  %v725_v11 = vmax.f32 %v597_v0, 0.0  ;;  %v598_v12 = vadd.f32 %v1251_v10, %v467_v1  ;;  %v599_v13 = vadd.f32 %v1251_v10, %v468_v2  ;;  %v352_v61 = vld [vmem:[%s1220_s15 + $0x220] sm:$0xff]  ;;  %v353_v62 = vld [vmem:[%s1220_s15 + $0x228] sm:$0xff] }
  0x75   : > { %973 = vst.msk [vmem:[%s1272_s24 + $0xb0] sm:$0xf] %vm928_vm4, %v844_v44  ;;  %v848_v16 = vpack.c.bf16 %v720_v5, %v720_v5  ;;  %v849_v17 = vpack.c.bf16 %v721_v6, %v721_v6  ;;  %v850_v18 = vpack.c.bf16 %v722_v7, %v722_v7  ;;  %v851_v19 = vpack.c.bf16 %v723_v8, %v723_v8  ;;  %v348_v44 = vld [vmem:[%s1220_s15 + $0x200] sm:$0xff]  ;;  %v354_v7 = vld [vmem:[%s1220_s15 + $0x230] sm:$0xff]  ;;  %v355_v8 = vld [vmem:[%s1220_s15 + $0x238] sm:$0xff] }
  0x76   : > { %974 = vst.msk [vmem:[%s1272_s24 + $0xb4] sm:$0xf] %vm928_vm4, %v845_v45  ;;  %v852_v22 = vpack.c.bf16 %v724_v9, %v724_v9  ;;  %v853_v23 = vpack.c.bf16 %v725_v11, %v725_v11  ;;  %v726_v24 = vmax.f32 %v598_v12, 0.0  ;;  %v727_v25 = vmax.f32 %v599_v13, 0.0  ;;  %v349_v45 = vld [vmem:[%s1220_s15 + $0x208] sm:$0xff] }
  0x77   : > { %975 = vst.msk [vmem:[%s1272_s24 + $0xb8] sm:$0xf] %vm928_vm4, %v846_v54  ;;  %v469_v26 = vmul.f32 %v1233_v56, %v340_v3  ;;  %v470_v27 = vmul.f32 %v1233_v56, %v341_v4  ;;  %v471_v28 = vmul.f32 %v1233_v56, %v342_v14  ;;  %v472_v29 = vmul.f32 %v1233_v56, %v343_v15  ;;  %v350_v54 = vld [vmem:[%s1220_s15 + $0x210] sm:$0xff] }
  0x78   : > { %976 = vst.msk [vmem:[%s1272_s24 + $0xbc] sm:$0xf] %vm928_vm4, %v847_v55  ;;  %v854_v32 = vpack.c.bf16 %v726_v24, %v726_v24  ;;  %v855_v33 = vpack.c.bf16 %v727_v25, %v727_v25  ;;  %v473_v34 = vmul.f32 %v1233_v56, %v344_v20  ;;  %v474_v35 = vmul.f32 %v1233_v56, %v345_v21  ;;  %v351_v55 = vld [vmem:[%s1220_s15 + $0x218] sm:$0xff] }
  0x79   : > { %977 = vst.msk [vmem:[%s1272_s24 + $0xc0] sm:$0xf] %vm928_vm4, %v848_v16  ;;  %v600_v36 = vadd.f32 %v1251_v10, %v469_v26  ;;  %v601_v37 = vadd.f32 %v1251_v10, %v470_v27  ;;  %v602_v38 = vadd.f32 %v1251_v10, %v471_v28  ;;  %v603_v39 = vadd.f32 %v1251_v10, %v472_v29 }
  0x7a   : > { %978 = vst.msk [vmem:[%s1272_s24 + $0xc4] sm:$0xf] %vm928_vm4, %v849_v17  ;;  %v604_v40 = vadd.f32 %v1251_v10, %v473_v34  ;;  %v605_v41 = vadd.f32 %v1251_v10, %v474_v35  ;;  %v475_v42 = vmul.f32 %v1233_v56, %v346_v30  ;;  %v476_v43 = vmul.f32 %v1233_v56, %v347_v31 }
  0x7b   : > { %979 = vst.msk [vmem:[%s1272_s24 + $0xc8] sm:$0xf] %vm928_vm4, %v850_v18  ;;  %v728_v46 = vmax.f32 %v600_v36, 0.0  ;;  %v729_v47 = vmax.f32 %v601_v37, 0.0  ;;  %v730_v48 = vmax.f32 %v602_v38, 0.0  ;;  %v731_v49 = vmax.f32 %v603_v39, 0.0 }
  0x7c   : > { %980 = vst.msk [vmem:[%s1272_s24 + $0xcc] sm:$0xf] %vm928_vm4, %v851_v19  ;;  %v732_v50 = vmax.f32 %v604_v40, 0.0  ;;  %v733_v51 = vmax.f32 %v605_v41, 0.0  ;;  %v606_v52 = vadd.f32 %v1251_v10, %v475_v42  ;;  %v607_v53 = vadd.f32 %v1251_v10, %v476_v43  ;;  %v360_v38 = vld [vmem:[%s1220_s15 + $0x260] sm:$0xff]  ;;  %v361_v39 = vld [vmem:[%s1220_s15 + $0x268] sm:$0xff] }
  0x7d   : > { %981 = vst.msk [vmem:[%s1272_s24 + $0xd0] sm:$0xf] %vm928_vm4, %v852_v22  ;;  %v856_v57 = vpack.c.bf16 %v728_v46, %v728_v46  ;;  %v857_v58 = vpack.c.bf16 %v729_v47, %v729_v47  ;;  %v858_v59 = vpack.c.bf16 %v730_v48, %v730_v48  ;;  %v859_v60 = vpack.c.bf16 %v731_v49, %v731_v49  ;;  %v356_v22 = vld [vmem:[%s1220_s15 + $0x240] sm:$0xff]  ;;  %v362_v48 = vld [vmem:[%s1220_s15 + $0x270] sm:$0xff]  ;;  %v363_v49 = vld [vmem:[%s1220_s15 + $0x278] sm:$0xff] }
  0x7e   : > { %982 = vst.msk [vmem:[%s1272_s24 + $0xd4] sm:$0xf] %vm928_vm4, %v853_v23  ;;  %v860_v63 = vpack.c.bf16 %v732_v50, %v732_v50  ;;  %v861_v0 = vpack.c.bf16 %v733_v51, %v733_v51  ;;  %v734_v1 = vmax.f32 %v606_v52, 0.0  ;;  %v735_v2 = vmax.f32 %v607_v53, 0.0  ;;  %v357_v23 = vld [vmem:[%s1220_s15 + $0x248] sm:$0xff] }
  0x7f   : > { %983 = vst.msk [vmem:[%s1272_s24 + $0xd8] sm:$0xf] %vm928_vm4, %v854_v32  ;;  %v477_v3 = vmul.f32 %v1233_v56, %v348_v44  ;;  %v478_v4 = vmul.f32 %v1233_v56, %v349_v45  ;;  %v479_v5 = vmul.f32 %v1233_v56, %v350_v54  ;;  %v480_v6 = vmul.f32 %v1233_v56, %v351_v55  ;;  %v358_v32 = vld [vmem:[%s1220_s15 + $0x250] sm:$0xff] }
  0x80   : > { %984 = vst.msk [vmem:[%s1272_s24 + $0xdc] sm:$0xf] %vm928_vm4, %v855_v33  ;;  %v862_v9 = vpack.c.bf16 %v734_v1, %v734_v1  ;;  %v863_v11 = vpack.c.bf16 %v735_v2, %v735_v2  ;;  %v481_v12 = vmul.f32 %v1233_v56, %v352_v61  ;;  %v482_v13 = vmul.f32 %v1233_v56, %v353_v62  ;;  %v359_v33 = vld [vmem:[%s1220_s15 + $0x258] sm:$0xff] }
  0x81   : > { %985 = vst.msk [vmem:[%s1272_s24 + $0xe0] sm:$0xf] %vm928_vm4, %v856_v57  ;;  %v608_v14 = vadd.f32 %v1251_v10, %v477_v3  ;;  %v609_v15 = vadd.f32 %v1251_v10, %v478_v4  ;;  %v610_v16 = vadd.f32 %v1251_v10, %v479_v5  ;;  %v611_v17 = vadd.f32 %v1251_v10, %v480_v6 }
  0x82   : > { %986 = vst.msk [vmem:[%s1272_s24 + $0xe4] sm:$0xf] %vm928_vm4, %v857_v58  ;;  %v612_v18 = vadd.f32 %v1251_v10, %v481_v12  ;;  %v613_v19 = vadd.f32 %v1251_v10, %v482_v13  ;;  %v483_v20 = vmul.f32 %v1233_v56, %v354_v7  ;;  %v484_v21 = vmul.f32 %v1233_v56, %v355_v8 }
  0x83   : > { %987 = vst.msk [vmem:[%s1272_s24 + $0xe8] sm:$0xf] %vm928_vm4, %v858_v59  ;;  %v736_v24 = vmax.f32 %v608_v14, 0.0  ;;  %v737_v25 = vmax.f32 %v609_v15, 0.0  ;;  %v738_v26 = vmax.f32 %v610_v16, 0.0  ;;  %v739_v27 = vmax.f32 %v611_v17, 0.0 }
  0x84   : > { %988 = vst.msk [vmem:[%s1272_s24 + $0xec] sm:$0xf] %vm928_vm4, %v859_v60  ;;  %v740_v28 = vmax.f32 %v612_v18, 0.0  ;;  %v741_v29 = vmax.f32 %v613_v19, 0.0  ;;  %v614_v30 = vadd.f32 %v1251_v10, %v483_v20  ;;  %v615_v31 = vadd.f32 %v1251_v10, %v484_v21  ;;  %v368_v16 = vld [vmem:[%s1220_s15 + $0x2a0] sm:$0xff]  ;;  %v369_v17 = vld [vmem:[%s1220_s15 + $0x2a8] sm:$0xff] }
  0x85   : > { %989 = vst.msk [vmem:[%s1272_s24 + $0xf0] sm:$0xf] %vm928_vm4, %v860_v63  ;;  %v864_v34 = vpack.c.bf16 %v736_v24, %v736_v24  ;;  %v865_v35 = vpack.c.bf16 %v737_v25, %v737_v25  ;;  %v866_v36 = vpack.c.bf16 %v738_v26, %v738_v26  ;;  %v867_v37 = vpack.c.bf16 %v739_v27, %v739_v27  ;;  %v364_v63 = vld [vmem:[%s1220_s15 + $0x280] sm:$0xff]  ;;  %v370_v26 = vld [vmem:[%s1220_s15 + $0x2b0] sm:$0xff]  ;;  %v371_v27 = vld [vmem:[%s1220_s15 + $0x2b8] sm:$0xff] }
  0x86   : > { %990 = vst.msk [vmem:[%s1272_s24 + $0xf4] sm:$0xf] %vm928_vm4, %v861_v0  ;;  %v868_v40 = vpack.c.bf16 %v740_v28, %v740_v28  ;;  %v869_v41 = vpack.c.bf16 %v741_v29, %v741_v29  ;;  %v742_v42 = vmax.f32 %v614_v30, 0.0  ;;  %v743_v43 = vmax.f32 %v615_v31, 0.0  ;;  %v365_v0 = vld [vmem:[%s1220_s15 + $0x288] sm:$0xff] }
  0x87   : > { %991 = vst.msk [vmem:[%s1272_s24 + $0xf8] sm:$0xf] %vm928_vm4, %v862_v9  ;;  %v485_v44 = vmul.f32 %v1233_v56, %v356_v22  ;;  %v486_v45 = vmul.f32 %v1233_v56, %v357_v23  ;;  %v487_v46 = vmul.f32 %v1233_v56, %v358_v32  ;;  %v488_v47 = vmul.f32 %v1233_v56, %v359_v33  ;;  %v366_v9 = vld [vmem:[%s1220_s15 + $0x290] sm:$0xff] }
  0x88   : > { %992 = vst.msk [vmem:[%s1272_s24 + $0xfc] sm:$0xf] %vm928_vm4, %v863_v11  ;;  %v870_v50 = vpack.c.bf16 %v742_v42, %v742_v42  ;;  %v871_v51 = vpack.c.bf16 %v743_v43, %v743_v43  ;;  %v489_v52 = vmul.f32 %v1233_v56, %v360_v38  ;;  %v490_v53 = vmul.f32 %v1233_v56, %v361_v39  ;;  %v367_v11 = vld [vmem:[%s1220_s15 + $0x298] sm:$0xff] }
  0x89   : > { %993 = vst.msk [vmem:[%s1272_s24 + $0x100] sm:$0xf] %vm928_vm4, %v864_v34  ;;  %v616_v54 = vadd.f32 %v1251_v10, %v485_v44  ;;  %v617_v55 = vadd.f32 %v1251_v10, %v486_v45  ;;  %v618_v57 = vadd.f32 %v1251_v10, %v487_v46  ;;  %v619_v58 = vadd.f32 %v1251_v10, %v488_v47 }
  0x8a   : > { %994 = vst.msk [vmem:[%s1272_s24 + $0x104] sm:$0xf] %vm928_vm4, %v865_v35  ;;  %v620_v59 = vadd.f32 %v1251_v10, %v489_v52  ;;  %v621_v60 = vadd.f32 %v1251_v10, %v490_v53  ;;  %v491_v61 = vmul.f32 %v1233_v56, %v362_v48  ;;  %v492_v62 = vmul.f32 %v1233_v56, %v363_v49 }
  0x8b   : > { %995 = vst.msk [vmem:[%s1272_s24 + $0x108] sm:$0xf] %vm928_vm4, %v866_v36  ;;  %v744_v1 = vmax.f32 %v616_v54, 0.0  ;;  %v745_v2 = vmax.f32 %v617_v55, 0.0  ;;  %v746_v3 = vmax.f32 %v618_v57, 0.0  ;;  %v747_v4 = vmax.f32 %v619_v58, 0.0 }
  0x8c   : > { %996 = vst.msk [vmem:[%s1272_s24 + $0x10c] sm:$0xf] %vm928_vm4, %v867_v37  ;;  %v748_v5 = vmax.f32 %v620_v59, 0.0  ;;  %v749_v6 = vmax.f32 %v621_v60, 0.0  ;;  %v622_v7 = vadd.f32 %v1251_v10, %v491_v61  ;;  %v623_v8 = vadd.f32 %v1251_v10, %v492_v62  ;;  %v376_v57 = vld [vmem:[%s1220_s15 + $0x2e0] sm:$0xff]  ;;  %v377_v58 = vld [vmem:[%s1220_s15 + $0x2e8] sm:$0xff] }
  0x8d   : > { %997 = vst.msk [vmem:[%s1272_s24 + $0x110] sm:$0xf] %vm928_vm4, %v868_v40  ;;  %v872_v12 = vpack.c.bf16 %v744_v1, %v744_v1  ;;  %v873_v13 = vpack.c.bf16 %v745_v2, %v745_v2  ;;  %v874_v14 = vpack.c.bf16 %v746_v3, %v746_v3  ;;  %v875_v15 = vpack.c.bf16 %v747_v4, %v747_v4  ;;  %v372_v40 = vld [vmem:[%s1220_s15 + $0x2c0] sm:$0xff]  ;;  %v378_v3 = vld [vmem:[%s1220_s15 + $0x2f0] sm:$0xff]  ;;  %v379_v4 = vld [vmem:[%s1220_s15 + $0x2f8] sm:$0xff] }
  0x8e   : > { %998 = vst.msk [vmem:[%s1272_s24 + $0x114] sm:$0xf] %vm928_vm4, %v869_v41  ;;  %v876_v18 = vpack.c.bf16 %v748_v5, %v748_v5  ;;  %v877_v19 = vpack.c.bf16 %v749_v6, %v749_v6  ;;  %v750_v20 = vmax.f32 %v622_v7, 0.0  ;;  %v751_v21 = vmax.f32 %v623_v8, 0.0  ;;  %v373_v41 = vld [vmem:[%s1220_s15 + $0x2c8] sm:$0xff] }
  0x8f   : > { %999 = vst.msk [vmem:[%s1272_s24 + $0x118] sm:$0xf] %vm928_vm4, %v870_v50  ;;  %v493_v22 = vmul.f32 %v1233_v56, %v364_v63  ;;  %v494_v23 = vmul.f32 %v1233_v56, %v365_v0  ;;  %v495_v24 = vmul.f32 %v1233_v56, %v366_v9  ;;  %v496_v25 = vmul.f32 %v1233_v56, %v367_v11  ;;  %v374_v50 = vld [vmem:[%s1220_s15 + $0x2d0] sm:$0xff] }
  0x90   : > { %1000 = vst.msk [vmem:[%s1272_s24 + $0x11c] sm:$0xf] %vm928_vm4, %v871_v51  ;;  %v878_v28 = vpack.c.bf16 %v750_v20, %v750_v20  ;;  %v879_v29 = vpack.c.bf16 %v751_v21, %v751_v21  ;;  %v497_v30 = vmul.f32 %v1233_v56, %v368_v16  ;;  %v498_v31 = vmul.f32 %v1233_v56, %v369_v17  ;;  %v375_v51 = vld [vmem:[%s1220_s15 + $0x2d8] sm:$0xff] }
  0x91   : > { %1001 = vst.msk [vmem:[%s1272_s24 + $0x120] sm:$0xf] %vm928_vm4, %v872_v12  ;;  %v624_v32 = vadd.f32 %v1251_v10, %v493_v22  ;;  %v625_v33 = vadd.f32 %v1251_v10, %v494_v23  ;;  %v626_v34 = vadd.f32 %v1251_v10, %v495_v24  ;;  %v627_v35 = vadd.f32 %v1251_v10, %v496_v25 }
  0x92   : > { %1002 = vst.msk [vmem:[%s1272_s24 + $0x124] sm:$0xf] %vm928_vm4, %v873_v13  ;;  %v628_v36 = vadd.f32 %v1251_v10, %v497_v30  ;;  %v629_v37 = vadd.f32 %v1251_v10, %v498_v31  ;;  %v499_v38 = vmul.f32 %v1233_v56, %v370_v26  ;;  %v500_v39 = vmul.f32 %v1233_v56, %v371_v27 }
  0x93   : > { %1003 = vst.msk [vmem:[%s1272_s24 + $0x128] sm:$0xf] %vm928_vm4, %v874_v14  ;;  %v752_v42 = vmax.f32 %v624_v32, 0.0  ;;  %v753_v43 = vmax.f32 %v625_v33, 0.0  ;;  %v754_v44 = vmax.f32 %v626_v34, 0.0  ;;  %v755_v45 = vmax.f32 %v627_v35, 0.0 }
  0x94   : > { %1004 = vst.msk [vmem:[%s1272_s24 + $0x12c] sm:$0xf] %vm928_vm4, %v875_v15  ;;  %v756_v46 = vmax.f32 %v628_v36, 0.0  ;;  %v757_v47 = vmax.f32 %v629_v37, 0.0  ;;  %v630_v48 = vadd.f32 %v1251_v10, %v499_v38  ;;  %v631_v49 = vadd.f32 %v1251_v10, %v500_v39  ;;  %v384_v34 = vld [vmem:[%s1220_s15 + $0x320] sm:$0xff]  ;;  %v385_v35 = vld [vmem:[%s1220_s15 + $0x328] sm:$0xff] }
  0x95   : > { %1005 = vst.msk [vmem:[%s1272_s24 + $0x130] sm:$0xf] %vm928_vm4, %v876_v18  ;;  %v880_v52 = vpack.c.bf16 %v752_v42, %v752_v42  ;;  %v881_v53 = vpack.c.bf16 %v753_v43, %v753_v43  ;;  %v882_v54 = vpack.c.bf16 %v754_v44, %v754_v44  ;;  %v883_v55 = vpack.c.bf16 %v755_v45, %v755_v45  ;;  %v380_v18 = vld [vmem:[%s1220_s15 + $0x300] sm:$0xff]  ;;  %v386_v44 = vld [vmem:[%s1220_s15 + $0x330] sm:$0xff]  ;;  %v387_v45 = vld [vmem:[%s1220_s15 + $0x338] sm:$0xff] }
  0x96   : > { %1006 = vst.msk [vmem:[%s1272_s24 + $0x134] sm:$0xf] %vm928_vm4, %v877_v19  ;;  %v884_v59 = vpack.c.bf16 %v756_v46, %v756_v46  ;;  %v885_v60 = vpack.c.bf16 %v757_v47, %v757_v47  ;;  %v758_v61 = vmax.f32 %v630_v48, 0.0  ;;  %v759_v62 = vmax.f32 %v631_v49, 0.0  ;;  %v381_v19 = vld [vmem:[%s1220_s15 + $0x308] sm:$0xff] }
  0x97   : > { %1007 = vst.msk [vmem:[%s1272_s24 + $0x138] sm:$0xf] %vm928_vm4, %v878_v28  ;;  %v501_v63 = vmul.f32 %v1233_v56, %v372_v40  ;;  %v502_v0 = vmul.f32 %v1233_v56, %v373_v41  ;;  %v503_v1 = vmul.f32 %v1233_v56, %v374_v50  ;;  %v504_v2 = vmul.f32 %v1233_v56, %v375_v51  ;;  %v382_v28 = vld [vmem:[%s1220_s15 + $0x310] sm:$0xff] }
  0x98   : > { %1008 = vst.msk [vmem:[%s1272_s24 + $0x13c] sm:$0xf] %vm928_vm4, %v879_v29  ;;  %v886_v5 = vpack.c.bf16 %v758_v61, %v758_v61  ;;  %v887_v6 = vpack.c.bf16 %v759_v62, %v759_v62  ;;  %v505_v7 = vmul.f32 %v1233_v56, %v376_v57  ;;  %v506_v8 = vmul.f32 %v1233_v56, %v377_v58  ;;  %v383_v29 = vld [vmem:[%s1220_s15 + $0x318] sm:$0xff] }
  0x99   : > { %1009 = vst.msk [vmem:[%s1272_s24 + $0x140] sm:$0xf] %vm928_vm4, %v880_v52  ;;  %v632_v9 = vadd.f32 %v1251_v10, %v501_v63  ;;  %v633_v11 = vadd.f32 %v1251_v10, %v502_v0  ;;  %v634_v12 = vadd.f32 %v1251_v10, %v503_v1  ;;  %v635_v13 = vadd.f32 %v1251_v10, %v504_v2 }
  0x9a   : > { %1010 = vst.msk [vmem:[%s1272_s24 + $0x144] sm:$0xf] %vm928_vm4, %v881_v53  ;;  %v636_v14 = vadd.f32 %v1251_v10, %v505_v7  ;;  %v637_v15 = vadd.f32 %v1251_v10, %v506_v8  ;;  %v507_v16 = vmul.f32 %v1233_v56, %v378_v3  ;;  %v508_v17 = vmul.f32 %v1233_v56, %v379_v4 }
  0x9b   : > { %1011 = vst.msk [vmem:[%s1272_s24 + $0x148] sm:$0xf] %vm928_vm4, %v882_v54  ;;  %v760_v20 = vmax.f32 %v632_v9, 0.0  ;;  %v761_v21 = vmax.f32 %v633_v11, 0.0  ;;  %v762_v22 = vmax.f32 %v634_v12, 0.0  ;;  %v763_v23 = vmax.f32 %v635_v13, 0.0 }
  0x9c   : > { %1012 = vst.msk [vmem:[%s1272_s24 + $0x14c] sm:$0xf] %vm928_vm4, %v883_v55  ;;  %v764_v24 = vmax.f32 %v636_v14, 0.0  ;;  %v765_v25 = vmax.f32 %v637_v15, 0.0  ;;  %v638_v26 = vadd.f32 %v1251_v10, %v507_v16  ;;  %v639_v27 = vadd.f32 %v1251_v10, %v508_v17  ;;  %v392_v12 = vld [vmem:[%s1220_s15 + $0x360] sm:$0xff]  ;;  %v393_v13 = vld [vmem:[%s1220_s15 + $0x368] sm:$0xff] }
  0x9d   : > { %1013 = vst.msk [vmem:[%s1272_s24 + $0x150] sm:$0xf] %vm928_vm4, %v884_v59  ;;  %v888_v30 = vpack.c.bf16 %v760_v20, %v760_v20  ;;  %v889_v31 = vpack.c.bf16 %v761_v21, %v761_v21  ;;  %v890_v32 = vpack.c.bf16 %v762_v22, %v762_v22  ;;  %v891_v33 = vpack.c.bf16 %v763_v23, %v763_v23  ;;  %v388_v59 = vld [vmem:[%s1220_s15 + $0x340] sm:$0xff]  ;;  %v394_v22 = vld [vmem:[%s1220_s15 + $0x370] sm:$0xff]  ;;  %v395_v23 = vld [vmem:[%s1220_s15 + $0x378] sm:$0xff] }
  0x9e   : > { %1014 = vst.msk [vmem:[%s1272_s24 + $0x154] sm:$0xf] %vm928_vm4, %v885_v60  ;;  %v892_v36 = vpack.c.bf16 %v764_v24, %v764_v24  ;;  %v893_v37 = vpack.c.bf16 %v765_v25, %v765_v25  ;;  %v766_v38 = vmax.f32 %v638_v26, 0.0  ;;  %v767_v39 = vmax.f32 %v639_v27, 0.0  ;;  %v389_v60 = vld [vmem:[%s1220_s15 + $0x348] sm:$0xff] }
  0x9f   : > { %1015 = vst.msk [vmem:[%s1272_s24 + $0x158] sm:$0xf] %vm928_vm4, %v886_v5  ;;  %v509_v40 = vmul.f32 %v1233_v56, %v380_v18  ;;  %v510_v41 = vmul.f32 %v1233_v56, %v381_v19  ;;  %v511_v42 = vmul.f32 %v1233_v56, %v382_v28  ;;  %v512_v43 = vmul.f32 %v1233_v56, %v383_v29  ;;  %v390_v5 = vld [vmem:[%s1220_s15 + $0x350] sm:$0xff] }
  0xa0   : > { %1016 = vst.msk [vmem:[%s1272_s24 + $0x15c] sm:$0xf] %vm928_vm4, %v887_v6  ;;  %v894_v46 = vpack.c.bf16 %v766_v38, %v766_v38  ;;  %v895_v47 = vpack.c.bf16 %v767_v39, %v767_v39  ;;  %v513_v48 = vmul.f32 %v1233_v56, %v384_v34  ;;  %v514_v49 = vmul.f32 %v1233_v56, %v385_v35  ;;  %v391_v6 = vld [vmem:[%s1220_s15 + $0x358] sm:$0xff] }
  0xa1   : > { %1017 = vst.msk [vmem:[%s1272_s24 + $0x160] sm:$0xf] %vm928_vm4, %v888_v30  ;;  %v640_v50 = vadd.f32 %v1251_v10, %v509_v40  ;;  %v641_v51 = vadd.f32 %v1251_v10, %v510_v41  ;;  %v642_v52 = vadd.f32 %v1251_v10, %v511_v42  ;;  %v643_v53 = vadd.f32 %v1251_v10, %v512_v43 }
  0xa2   : > { %1018 = vst.msk [vmem:[%s1272_s24 + $0x164] sm:$0xf] %vm928_vm4, %v889_v31  ;;  %v644_v54 = vadd.f32 %v1251_v10, %v513_v48  ;;  %v645_v55 = vadd.f32 %v1251_v10, %v514_v49  ;;  %v515_v57 = vmul.f32 %v1233_v56, %v386_v44  ;;  %v516_v58 = vmul.f32 %v1233_v56, %v387_v45 }
  0xa3   : > { %1019 = vst.msk [vmem:[%s1272_s24 + $0x168] sm:$0xf] %vm928_vm4, %v890_v32  ;;  %v768_v61 = vmax.f32 %v640_v50, 0.0  ;;  %v769_v62 = vmax.f32 %v641_v51, 0.0  ;;  %v770_v63 = vmax.f32 %v642_v52, 0.0  ;;  %v771_v0 = vmax.f32 %v643_v53, 0.0 }
  0xa4   : > { %1020 = vst.msk [vmem:[%s1272_s24 + $0x16c] sm:$0xf] %vm928_vm4, %v891_v33  ;;  %v772_v1 = vmax.f32 %v644_v54, 0.0  ;;  %v773_v2 = vmax.f32 %v645_v55, 0.0  ;;  %v646_v3 = vadd.f32 %v1251_v10, %v515_v57  ;;  %v647_v4 = vadd.f32 %v1251_v10, %v516_v58  ;;  %v400_v52 = vld [vmem:[%s1220_s15 + $0x3a0] sm:$0xff]  ;;  %v401_v53 = vld [vmem:[%s1220_s15 + $0x3a8] sm:$0xff] }
  0xa5   : > { %1021 = vst.msk [vmem:[%s1272_s24 + $0x170] sm:$0xf] %vm928_vm4, %v892_v36  ;;  %v896_v7 = vpack.c.bf16 %v768_v61, %v768_v61  ;;  %v897_v8 = vpack.c.bf16 %v769_v62, %v769_v62  ;;  %v898_v9 = vpack.c.bf16 %v770_v63, %v770_v63  ;;  %v899_v11 = vpack.c.bf16 %v771_v0, %v771_v0  ;;  %v396_v36 = vld [vmem:[%s1220_s15 + $0x380] sm:$0xff]  ;;  %v402_v63 = vld [vmem:[%s1220_s15 + $0x3b0] sm:$0xff]  ;;  %v403_v0 = vld [vmem:[%s1220_s15 + $0x3b8] sm:$0xff] }
  0xa6   : > { %1022 = vst.msk [vmem:[%s1272_s24 + $0x174] sm:$0xf] %vm928_vm4, %v893_v37  ;;  %v900_v14 = vpack.c.bf16 %v772_v1, %v772_v1  ;;  %v901_v15 = vpack.c.bf16 %v773_v2, %v773_v2  ;;  %v774_v16 = vmax.f32 %v646_v3, 0.0  ;;  %v775_v17 = vmax.f32 %v647_v4, 0.0  ;;  %v397_v37 = vld [vmem:[%s1220_s15 + $0x388] sm:$0xff] }
  0xa7   : > { %1023 = vst.msk [vmem:[%s1272_s24 + $0x178] sm:$0xf] %vm928_vm4, %v894_v46  ;;  %v517_v18 = vmul.f32 %v1233_v56, %v388_v59  ;;  %v518_v19 = vmul.f32 %v1233_v56, %v389_v60  ;;  %v519_v20 = vmul.f32 %v1233_v56, %v390_v5  ;;  %v520_v21 = vmul.f32 %v1233_v56, %v391_v6  ;;  %v398_v46 = vld [vmem:[%s1220_s15 + $0x390] sm:$0xff] }
  0xa8   : > { %1024 = vst.msk [vmem:[%s1272_s24 + $0x17c] sm:$0xf] %vm928_vm4, %v895_v47  ;;  %v902_v24 = vpack.c.bf16 %v774_v16, %v774_v16  ;;  %v903_v25 = vpack.c.bf16 %v775_v17, %v775_v17  ;;  %v521_v26 = vmul.f32 %v1233_v56, %v392_v12  ;;  %v522_v27 = vmul.f32 %v1233_v56, %v393_v13  ;;  %v399_v47 = vld [vmem:[%s1220_s15 + $0x398] sm:$0xff] }
  0xa9   : > { %1025 = vst.msk [vmem:[%s1272_s24 + $0x180] sm:$0xf] %vm928_vm4, %v896_v7  ;;  %v648_v28 = vadd.f32 %v1251_v10, %v517_v18  ;;  %v649_v29 = vadd.f32 %v1251_v10, %v518_v19  ;;  %v650_v30 = vadd.f32 %v1251_v10, %v519_v20  ;;  %v651_v31 = vadd.f32 %v1251_v10, %v520_v21 }
  0xaa   : > { %1026 = vst.msk [vmem:[%s1272_s24 + $0x184] sm:$0xf] %vm928_vm4, %v897_v8  ;;  %v652_v32 = vadd.f32 %v1251_v10, %v521_v26  ;;  %v653_v33 = vadd.f32 %v1251_v10, %v522_v27  ;;  %v523_v34 = vmul.f32 %v1233_v56, %v394_v22  ;;  %v524_v35 = vmul.f32 %v1233_v56, %v395_v23 }
  0xab   : > { %1027 = vst.msk [vmem:[%s1272_s24 + $0x188] sm:$0xf] %vm928_vm4, %v898_v9  ;;  %v776_v38 = vmax.f32 %v648_v28, 0.0  ;;  %v777_v39 = vmax.f32 %v649_v29, 0.0  ;;  %v778_v40 = vmax.f32 %v650_v30, 0.0  ;;  %v779_v41 = vmax.f32 %v651_v31, 0.0 }
  0xac   : > { %1028 = vst.msk [vmem:[%s1272_s24 + $0x18c] sm:$0xf] %vm928_vm4, %v899_v11  ;;  %v780_v42 = vmax.f32 %v652_v32, 0.0  ;;  %v781_v43 = vmax.f32 %v653_v33, 0.0  ;;  %v654_v44 = vadd.f32 %v1251_v10, %v523_v34  ;;  %v655_v45 = vadd.f32 %v1251_v10, %v524_v35  ;;  %v408_v28 = vld [vmem:[%s1220_s15 + $0x3e0] sm:$0xff]  ;;  %v409_v29 = vld [vmem:[%s1220_s15 + $0x3e8] sm:$0xff] }
  0xad   : > { %1029 = vst.msk [vmem:[%s1272_s24 + $0x190] sm:$0xf] %vm928_vm4, %v900_v14  ;;  %v904_v48 = vpack.c.bf16 %v776_v38, %v776_v38  ;;  %v905_v49 = vpack.c.bf16 %v777_v39, %v777_v39  ;;  %v906_v50 = vpack.c.bf16 %v778_v40, %v778_v40  ;;  %v907_v51 = vpack.c.bf16 %v779_v41, %v779_v41  ;;  %v404_v14 = vld [vmem:[%s1220_s15 + $0x3c0] sm:$0xff]  ;;  %v410_v38 = vld [vmem:[%s1220_s15 + $0x3f0] sm:$0xff]  ;;  %v411_v39 = vld [vmem:[%s1220_s15 + $0x3f8] sm:$0xff] }
  0xae   : > { %1030 = vst.msk [vmem:[%s1272_s24 + $0x194] sm:$0xf] %vm928_vm4, %v901_v15  ;;  %v908_v54 = vpack.c.bf16 %v780_v42, %v780_v42  ;;  %v909_v55 = vpack.c.bf16 %v781_v43, %v781_v43  ;;  %v782_v57 = vmax.f32 %v654_v44, 0.0  ;;  %v783_v58 = vmax.f32 %v655_v45, 0.0  ;;  %v405_v15 = vld [vmem:[%s1220_s15 + $0x3c8] sm:$0xff] }
  0xaf   : > { %1031 = vst.msk [vmem:[%s1272_s24 + $0x198] sm:$0xf] %vm928_vm4, %v902_v24  ;;  %v525_v59 = vmul.f32 %v1233_v56, %v396_v36  ;;  %v526_v60 = vmul.f32 %v1233_v56, %v397_v37  ;;  %v527_v61 = vmul.f32 %v1233_v56, %v398_v46  ;;  %v528_v62 = vmul.f32 %v1233_v56, %v399_v47  ;;  %v406_v24 = vld [vmem:[%s1220_s15 + $0x3d0] sm:$0xff] }
  0xb0   : > { %1032 = vst.msk [vmem:[%s1272_s24 + $0x19c] sm:$0xf] %vm928_vm4, %v903_v25  ;;  %v910_v1 = vpack.c.bf16 %v782_v57, %v782_v57  ;;  %v911_v2 = vpack.c.bf16 %v783_v58, %v783_v58  ;;  %v529_v3 = vmul.f32 %v1233_v56, %v400_v52  ;;  %v530_v4 = vmul.f32 %v1233_v56, %v401_v53  ;;  %v407_v25 = vld [vmem:[%s1220_s15 + $0x3d8] sm:$0xff] }
  0xb1   : > { %1033 = vst.msk [vmem:[%s1272_s24 + $0x1a0] sm:$0xf] %vm928_vm4, %v904_v48  ;;  %v656_v5 = vadd.f32 %v1251_v10, %v525_v59  ;;  %v657_v6 = vadd.f32 %v1251_v10, %v526_v60  ;;  %v658_v7 = vadd.f32 %v1251_v10, %v527_v61  ;;  %v659_v8 = vadd.f32 %v1251_v10, %v528_v62 }
  0xb2   : > { %1034 = vst.msk [vmem:[%s1272_s24 + $0x1a4] sm:$0xf] %vm928_vm4, %v905_v49  ;;  %v660_v9 = vadd.f32 %v1251_v10, %v529_v3  ;;  %v661_v11 = vadd.f32 %v1251_v10, %v530_v4  ;;  %v531_v12 = vmul.f32 %v1233_v56, %v402_v63  ;;  %v532_v13 = vmul.f32 %v1233_v56, %v403_v0 }
  0xb3   : > { %1035 = vst.msk [vmem:[%s1272_s24 + $0x1a8] sm:$0xf] %vm928_vm4, %v906_v50  ;;  %v784_v16 = vmax.f32 %v656_v5, 0.0  ;;  %v785_v17 = vmax.f32 %v657_v6, 0.0  ;;  %v786_v18 = vmax.f32 %v658_v7, 0.0  ;;  %v787_v19 = vmax.f32 %v659_v8, 0.0 }
  0xb4   : > { %1036 = vst.msk [vmem:[%s1272_s24 + $0x1ac] sm:$0xf] %vm928_vm4, %v907_v51  ;;  %v788_v20 = vmax.f32 %v660_v9, 0.0  ;;  %v789_v21 = vmax.f32 %v661_v11, 0.0  ;;  %v662_v22 = vadd.f32 %v1251_v10, %v531_v12  ;;  %v663_v23 = vadd.f32 %v1251_v10, %v532_v13 }
  0xb5   : > { %1037 = vst.msk [vmem:[%s1272_s24 + $0x1b0] sm:$0xf] %vm928_vm4, %v908_v54  ;;  %v912_v26 = vpack.c.bf16 %v784_v16, %v784_v16  ;;  %v913_v27 = vpack.c.bf16 %v785_v17, %v785_v17  ;;  %v914_v30 = vpack.c.bf16 %v786_v18, %v786_v18  ;;  %v915_v31 = vpack.c.bf16 %v787_v19, %v787_v19 }
  0xb6   : > { %1038 = vst.msk [vmem:[%s1272_s24 + $0x1b4] sm:$0xf] %vm928_vm4, %v909_v55  ;;  %v916_v32 = vpack.c.bf16 %v788_v20, %v788_v20  ;;  %v790_v33 = vmax.f32 %v662_v22, 0.0  ;;  %v533_v34 = vmul.f32 %v1233_v56, %v404_v14  ;;  %v534_v35 = vmul.f32 %v1233_v56, %v405_v15 }
  0xb7   : > { %1039 = vst.msk [vmem:[%s1272_s24 + $0x1b8] sm:$0xf] %vm928_vm4, %v910_v1  ;;  %v535_v36 = vmul.f32 %v1233_v56, %v406_v24  ;;  %v536_v37 = vmul.f32 %v1233_v56, %v407_v25  ;;  %v917_v40 = vpack.c.bf16 %v789_v21, %v789_v21  ;;  %v791_v41 = vmax.f32 %v663_v23, 0.0 }
  0xb8   : > { %1040 = vst.msk [vmem:[%s1272_s24 + $0x1bc] sm:$0xf] %vm928_vm4, %v911_v2  ;;  %v537_v42 = vmul.f32 %v1233_v56, %v408_v28  ;;  %v538_v43 = vmul.f32 %v1233_v56, %v409_v29  ;;  %v664_v44 = vadd.f32 %v1251_v10, %v533_v34  ;;  %v665_v45 = vadd.f32 %v1251_v10, %v534_v35 }
  0xb9   : > { %1041 = vst.msk [vmem:[%s1272_s24 + $0x1c0] sm:$0xf] %vm928_vm4, %v912_v26  ;;  %v666_v46 = vadd.f32 %v1251_v10, %v535_v36  ;;  %v667_v47 = vadd.f32 %v1251_v10, %v536_v37  ;;  %v539_v50 = vmul.f32 %v1233_v56, %v410_v38  ;;  %v540_v51 = vmul.f32 %v1233_v56, %v411_v39 }
  0xba   : > { %1042 = vst.msk [vmem:[%s1272_s24 + $0x1c4] sm:$0xf] %vm928_vm4, %v913_v27  ;;  %v668_v48 = vadd.f32 %v1251_v10, %v537_v42  ;;  %v669_v49 = vadd.f32 %v1251_v10, %v538_v43  ;;  %v918_v52 = vpack.c.bf16 %v790_v33, %v790_v33  ;;  %v792_v53 = vmax.f32 %v664_v44, 0.0 }
  0xbb   : > { %1043 = vst.msk [vmem:[%s1272_s24 + $0x1c8] sm:$0xf] %vm928_vm4, %v914_v30  ;;  %v793_v54 = vmax.f32 %v665_v45, 0.0  ;;  %v794_v55 = vmax.f32 %v666_v46, 0.0  ;;  %v919_v57 = vpack.c.bf16 %v791_v41, %v791_v41  ;;  %v795_v58 = vmax.f32 %v667_v47, 0.0 }
  0xbc   : > { %1044 = vst.msk [vmem:[%s1272_s24 + $0x1cc] sm:$0xf] %vm928_vm4, %v915_v31  ;;  %v670_v59 = vadd.f32 %v1251_v10, %v539_v50  ;;  %v671_v60 = vadd.f32 %v1251_v10, %v540_v51  ;;  %v920_v56 = vpack.c.bf16 %v792_v53, %v792_v53  ;;  %v796_v61 = vmax.f32 %v668_v48, 0.0 }
  0xbd   : > { %1045 = vst.msk [vmem:[%s1272_s24 + $0x1d0] sm:$0xf] %vm928_vm4, %v916_v32  ;;  %v921_v62 = vpack.c.bf16 %v793_v54, %v793_v54  ;;  %v797_v63 = vmax.f32 %v669_v49, 0.0  ;;  %v922_v0 = vpack.c.bf16 %v794_v55, %v794_v55  ;;  %v923_v10 = vpack.c.bf16 %v795_v58, %v795_v58 }
  0xbe   : > { %1046 = vst.msk [vmem:[%s1272_s24 + $0x1d4] sm:$0xf] %vm928_vm4, %v917_v40  ;;  %v798_v1 = vmax.f32 %v670_v59, 0.0  ;;  %v799_v2 = vmax.f32 %v671_v60, 0.0  ;;  %v924_v3 = vpack.c.bf16 %v796_v61, %v796_v61 }
  0xbf   : > { %1047 = vst.msk [vmem:[%s1272_s24 + $0x1d8] sm:$0xf] %vm928_vm4, %v918_v52  ;;  %v925_v4 = vpack.c.bf16 %v797_v63, %v797_v63 }
  0xc0   : > { %1048 = vst.msk [vmem:[%s1272_s24 + $0x1dc] sm:$0xf] %vm928_vm4, %v919_v57  ;;  %v926_v5 = vpack.c.bf16 %v798_v1, %v798_v1  ;;  %v927_v6 = vpack.c.bf16 %v799_v2, %v799_v2 }
  0xc1   : > { %1049 = vst.msk [vmem:[%s1272_s24 + $0x1e0] sm:$0xf] %vm928_vm4, %v920_v56 }
  0xc2   : > { %1050 = vst.msk [vmem:[%s1272_s24 + $0x1e4] sm:$0xf] %vm928_vm4, %v921_v62 }
  0xc3   : > { %1051 = vst.msk [vmem:[%s1272_s24 + $0x1e8] sm:$0xf] %vm928_vm4, %v922_v0 }
  0xc4   : > { %1052 = vst.msk [vmem:[%s1272_s24 + $0x1ec] sm:$0xf] %vm928_vm4, %v923_v10 }
  0xc5   : > { %1053 = vst.msk [vmem:[%s1272_s24 + $0x1f0] sm:$0xf] %vm928_vm4, %v924_v3 }
  0xc6   : > { %1054 = vst.msk [vmem:[%s1272_s24 + $0x1f4] sm:$0xf] %vm928_vm4, %v925_v4 }
  0xc7   : > { %1055 = vst.msk [vmem:[%s1272_s24 + $0x1f8] sm:$0xf] %vm928_vm4, %v926_v5 }
  0xc8   : > { %1056 = vst.msk [vmem:[%s1272_s24 + $0x1fc] sm:$0xf] %vm928_vm4, %v927_v6 }
  0xc9 PF: > { %s15_s18 = sadd.s32 1, %s1140_s18  }
  0xca   : > { %p12_p4 = scmp.ge.s32.totalorder %s15_s18, 6  }
  0xcc   :  { %14 = sbr.rel (!%p12_p4) target bundleno = 1 (0x1), region = 70 }

// kernel: fx_cosine_classifier_forward.5
= control target key start
LH: loop header
LB: loop body
LE: loop exit
PB: predicated region body
PF: predicated region fallthrough
CT: control target
= control target key end

     0   :  { %s4893_s18 = smov 0   ;;  %s6480_s0 = inlined_call_operand.vmem [shape: bf16[4096,288], index: 0, kind: input, shape index: {}]   ;;  %s6481_s1 = inlined_call_operand.vmem [shape: bf16[288,32], index: 1, kind: input, shape index: {}]   ;;  %s6482_s2 = inlined_call_operand.vmem [shape: f32[1,32], index: 2, kind: input, shape index: {}]   ;;  %s6483_s3 = inlined_call_operand.vmem [shape: f32[4096,32], index: 3, kind: output, shape index: {0}]   ;;  %s6484_s4 = inlined_call_operand.vmem [shape: f32[32,32], index: 4, kind: output, shape index: {1}]   ;;  %s6485_s5 = inlined_call_operand.vmem [shape: f32[32,32], index: 5, kind: output, shape index: {2}]  }
   0x1 LB: > { %s4899_s19 = sadd.s32 4294967295, %s4861_s18   ;;  %p3701_p0 = scmp.ge.s32.totalorder %s4861_s18, 1  ;;  %s4861_s18 = sphi %s4893_s18, %s16_s18  }
   0x2   : > { %p194_p1 = scmp.lt.s32.totalorder %s4861_s18, 5 }
   0x4   : > { %p195_p2 = pnand %p3701_p0, %p194_p1 }
   0x5   : > { %s3702_s26 = sshll.u32 (!%p195_p2), %s4899_s19, 7  ;;  %p244_p4 = scmp.lt.s32.totalorder (!%p195_p2), %s4899_s19, 3 }
   0x6   : > { %198 = sbr.rel (%p195_p2) target bundleno = 1023 (0x3ff), region = 32  ;;  %p232_p3 = scmp.lt.s32.totalorder (!%p195_p2), %s3702_s26, 511 }
   0xb   : > { %v4813_v0 = vld [vmem:[%s6481_s1 + $0x38] sm:$0xff]  ;;  %v4914_v2 = vld [vmem:[%s6481_s1 + $0x88] sm:$0xff]  ;;  %v4812_v3 = vld [vmem:[%s6481_s1 + $0x30] sm:$0xff]  ;;  %s6487_s26 = smov (!%p232_p3, %s3702_s26), 511  ;;  %vm1617_vm0 = vcmask 261120   ;;  %s6489_s19 = smov (!%p244_p4, %s4899_s19), 3 }
   0xc   : > { %v4909_v1 = vld [vmem:[%s6481_s1 + $0x78] sm:$0xff]  ;;  %1810 = vmatpush.bf16.msra.mxu0 %v4813_v0  ;;  %4824 = vmatpush.bf16.msra.mxu3 %v4813_v0  ;;  %v4820_v4 = vld [vmem:[%s6481_s1 + $0x70] sm:$0xff]  ;;  %v4928_v5 = vld [vmem:[%s6481_s1 + $0x80] sm:$0xff]  ;;  %s4842_s8 = smul.u32 12, %s6487_s26  ;;  %s3705_s17 = sshll.u32 %s6487_s26, 3 }
   0xd   : > { %2139 = vmatpush.bf16.msra.mxu1 %v4909_v1  ;;  %2474 = vmatpush.bf16.msra.mxu2 %v4914_v2  ;;  %v4811_v6 = vld [vmem:[%s6481_s1 + $0x28] sm:$0xff]  ;;  %v4810_v11 = vld [vmem:[%s6481_s1 + $0x20] sm:$0xff]  ;;  %v4809_v13 = vld [vmem:[%s6481_s1 + $0x18] sm:$0xff]  ;;  %s5072_s22 = scalar_lea.vmem %s6483_s3, %s3705_s17 }
   0xe   : > { %v4819_v7 = vld [vmem:[%s6481_s1 + $0x68] sm:$0xff]  ;;  %s4943_s15 = scalar_lea.vmem %s6480_s0, %s4842_s8  ;;  %v4818_v12 = vld [vmem:[%s6481_s1 + $0x60] sm:$0xff]  ;;  %v4817_v14 = vld [vmem:[%s6481_s1 + $0x58] sm:$0xff] }
   0xf   : > { %v3718_v8 = vld [vmem:[%s4943_s15 + $0x8] sm:$0xf]  ;;  %v4616_v9 = vld [vmem:[%s4943_s15 + $0x10] sm:$0xf0]  ;;  %v3730_v17 = vld [vmem:[%s4943_s15 + $0x20] sm:$0xf] }
  0x10   : > { %1811 = vmatpush.bf16.msra.mxu0 %v4812_v3  ;;  %4825 = vmatpush.bf16.msra.mxu3 %v4812_v3  ;;  %v3719_v10 = vor.u32 %v4616_v9, %v3718_v8  ;;  %v4808_v15 = vld [vmem:[%s6481_s1 + $0x10] sm:$0xff]  ;;  %v4619_v18 = vld [vmem:[%s4943_s15 + $0x28] sm:$0xf0]  ;;  %v4806_v22 = vld [vmem:[%s6481_s1] sm:$0xff] }
  0x11   : > { %2140 = vmatpush.bf16.msra.mxu1 %v4820_v4  ;;  %2475 = vmatpush.bf16.msra.mxu2 %v4928_v5  ;;  %v4816_v16 = vld [vmem:[%s6481_s1 + $0x50] sm:$0xff]  ;;  %v4807_v19 = vld [vmem:[%s6481_s1 + $0x8] sm:$0xff]  ;;  %v3731_v21 = vor.u32 %v4619_v18, %v3730_v17  ;;  %v3710_v23 = vld [vmem:[%s4943_s15] sm:$0xf] }
  0x12   : > { %v4815_v20 = vld [vmem:[%s6481_s1 + $0x48] sm:$0xff]  ;;  %v4286_v25 = vld [vmem:[%s4943_s15 + $0x480] sm:$0xf]  ;;  %v4614_v28 = vld [vmem:[%s4943_s15 + $0x4] sm:$0xf] }
  0x13   : > { %v4615_v24 = vld [vmem:[%s4943_s15 + $0x8] sm:$0xf0]  ;;  %v4814_v27 = vld [vmem:[%s6481_s1 + $0x40] sm:$0xff]  ;;  %v3712_v29 = vld [vmem:[%s4943_s15 + $0xc] sm:$0xf0] }
  0x14   : > { %1812 = vmatpush.bf16.msra.mxu0 %v4811_v6  ;;  %4826 = vmatpush.bf16.msra.mxu3 %v4811_v6  ;;  %v4759_v26 = vld [vmem:[%s4943_s15 + $0x488] sm:$0xf0]  ;;  %v3711_v30 = vor.u32 %v4615_v24, %v3710_v23  ;;  %v3715_v32 = vor.u32 %v4614_v28, %v3712_v29  ;;  %v3742_v33 = vld [vmem:[%s4943_s15 + $0x38] sm:$0xf]  ;;  %v4622_v34 = vld [vmem:[%s4943_s15 + $0x40] sm:$0xf0] }
  0x15   : > { %2141 = vmatpush.bf16.msra.mxu1 %v4819_v7  ;;  %4548 = vmatmul.msk.bf16.vlgmr.msra.gmra.mxu2 %vm1617_vm0, %v3719_v10  ;;  %v4287_v31 = vor.u32 %v4759_v26, %v4286_v25  ;;  %v3743_v35 = vor.u32 %v4622_v34, %v3742_v33  ;;  %v3722_v36 = vld [vmem:[%s4943_s15 + $0x18] sm:$0xf]  ;;  %v4618_v37 = vld [vmem:[%s4943_s15 + $0x20] sm:$0xf0]  ;;  %v4617_v40 = vld [vmem:[%s4943_s15 + $0x1c] sm:$0xf] }
  0x16   : > { %v4298_v38 = vld [vmem:[%s4943_s15 + $0x498] sm:$0xf]  ;;  %v4762_v39 = vld [vmem:[%s4943_s15 + $0x4a0] sm:$0xf0]  ;;  %v3724_v41 = vld [vmem:[%s4943_s15 + $0x24] sm:$0xf0]  ;;  %v3723_v42 = vor.u32 %v4618_v37, %v3722_v36 }
  0x17   : > { %v4299_v43 = vor.u32 %v4762_v39, %v4298_v38  ;;  %v3727_v44 = vor.u32 %v4617_v40, %v3724_v41  ;;  %v3754_v45 = vld [vmem:[%s4943_s15 + $0x50] sm:$0xf]  ;;  %v4625_v46 = vld [vmem:[%s4943_s15 + $0x58] sm:$0xf0]  ;;  %v4620_v52 = vld [vmem:[%s4943_s15 + $0x34] sm:$0xf] }
  0x18   : > { %1813 = vmatpush.bf16.msra.mxu0 %v4810_v11  ;;  %4827 = vmatpush.bf16.msra.mxu3 %v4810_v11  ;;  %v3755_v47 = vor.u32 %v4625_v46, %v3754_v45  ;;  %v3734_v48 = vld [vmem:[%s4943_s15 + $0x30] sm:$0xf]  ;;  %v4621_v49 = vld [vmem:[%s4943_s15 + $0x38] sm:$0xf0]  ;;  %v3736_v53 = vld [vmem:[%s4943_s15 + $0x3c] sm:$0xf0] }
  0x19   : > { %2142 = vmatpush.bf16.msra.mxu1 %v4818_v12  ;;  %v4310_v50 = vld [vmem:[%s4943_s15 + $0x4b0] sm:$0xf]  ;;  %v4765_v51 = vld [vmem:[%s4943_s15 + $0x4b8] sm:$0xf0]  ;;  %v3735_v54 = vor.u32 %v4621_v49, %v3734_v48  ;;  %v3739_v56 = vor.u32 %v4620_v52, %v3736_v53  ;;  %v3766_v57 = vld [vmem:[%s4943_s15 + $0x68] sm:$0xf] }
  0x1a   : > { %v4311_v55 = vor.u32 %v4765_v51, %v4310_v50  ;;  %v4628_v58 = vld [vmem:[%s4943_s15 + $0x70] sm:$0xf0]  ;;  %v3746_v60 = vld [vmem:[%s4943_s15 + $0x48] sm:$0xf]  ;;  %v4623_v0 = vld [vmem:[%s4943_s15 + $0x4c] sm:$0xf] }
  0x1b   : > { %v3767_v59 = vor.u32 %v4628_v58, %v3766_v57  ;;  %v4624_v61 = vld [vmem:[%s4943_s15 + $0x50] sm:$0xf0]  ;;  %v4322_v62 = vld [vmem:[%s4943_s15 + $0x4c8] sm:$0xf]  ;;  %v4631_v6 = vld [vmem:[%s4943_s15 + $0x88] sm:$0xf0] }
  0x1c   : > { %1814 = vmatpush.bf16.msra.mxu0 %v4809_v13  ;;  %4828 = vmatpush.bf16.msra.mxu3 %v4809_v13  ;;  %v4768_v63 = vld [vmem:[%s4943_s15 + $0x4d0] sm:$0xf0]  ;;  %v3758_v8 = vld [vmem:[%s4943_s15 + $0x60] sm:$0xf]  ;;  %v4627_v9 = vld [vmem:[%s4943_s15 + $0x68] sm:$0xf0] }
  0x1d   : > { %2143 = vmatpush.bf16.msra.mxu1 %v4817_v14  ;;  %v4323_v3 = vor.u32 %v4768_v63, %v4322_v62  ;;  %v4334_v10 = vld [vmem:[%s4943_s15 + $0x4e0] sm:$0xf]  ;;  %v4771_v11 = vld [vmem:[%s4943_s15 + $0x4e8] sm:$0xf0]  ;;  %v3760_v13 = vld [vmem:[%s4943_s15 + $0x6c] sm:$0xf0] }
  0x1e   : > { %v3790_v17 = vld [vmem:[%s4943_s15 + $0x98] sm:$0xf]  ;;  %v4634_v18 = vld [vmem:[%s4943_s15 + $0xa0] sm:$0xf0]  ;;  %v4629_v24 = vld [vmem:[%s4943_s15 + $0x7c] sm:$0xf] }
  0x1f   : > { %v4774_v23 = vld [vmem:[%s4943_s15 + $0x500] sm:$0xf0]  ;;  %v3772_v25 = vld [vmem:[%s4943_s15 + $0x84] sm:$0xf0]  ;;  %v3802_v29 = vld [vmem:[%s4943_s15 + $0xb0] sm:$0xf] }
  0x20   : > { %1815 = vmatpush.bf16.msra.mxu0 %v4808_v15  ;;  %4829 = vmatpush.bf16.msra.mxu3 %v4808_v15  ;;  %v4335_v15 = vor.u32 %v4771_v11, %v4334_v10  ;;  %v3775_v28 = vor.u32 %v4629_v24, %v3772_v25  ;;  %v4633_v33 = vld [vmem:[%s4943_s15 + $0x98] sm:$0xf0]  ;;  %v4358_v34 = vld [vmem:[%s4943_s15 + $0x510] sm:$0xf]  ;;  %v4632_v36 = vld [vmem:[%s4943_s15 + $0x94] sm:$0xf] }
  0x21   : > { %2144 = vmatpush.bf16.msra.mxu1 %v4816_v16  ;;  %v3784_v37 = vld [vmem:[%s4943_s15 + $0x9c] sm:$0xf0]  ;;  %v3814_v41 = vld [vmem:[%s4943_s15 + $0xc8] sm:$0xf]  ;;  %v4636_v45 = vld [vmem:[%s4943_s15 + $0xb0] sm:$0xf0] }
  0x22   : > { %v3787_v40 = vor.u32 %v4632_v36, %v3784_v37  ;;  %v4370_v46 = vld [vmem:[%s4943_s15 + $0x528] sm:$0xf]  ;;  %v4635_v48 = vld [vmem:[%s4943_s15 + $0xac] sm:$0xf]  ;;  %v3796_v49 = vld [vmem:[%s4943_s15 + $0xb4] sm:$0xf0] }
  0x23   : > { %v3799_v53 = vor.u32 %v4635_v48, %v3796_v49  ;;  %v3806_v58 = vld [vmem:[%s4943_s15 + $0xc0] sm:$0xf]  ;;  %v4638_v63 = vld [vmem:[%s4943_s15 + $0xc4] sm:$0xf]  ;;  %v3838_v11 = vld [vmem:[%s4943_s15 + $0xf8] sm:$0xf] }
  0x24   : > { %1816 = vmatpush.bf16.msra.mxu0 %v4807_v19  ;;  %4830 = vmatpush.bf16.msra.mxu3 %v4807_v19  ;;  %v3791_v19 = vor.u32 %v4634_v18, %v3790_v17  ;;  %v5063_v62 = vld [vmem:[%s6482_s2] ss:$0 sm:$0xff]  ;;  %v4641_v25 = vld [vmem:[%s4943_s15 + $0xdc] sm:$0xf] }
  0x25   : > { %2145 = vmatpush.bf16.msra.mxu1 %v4815_v20  ;;  %4549 = vmatmul.msk.bf16.gmra.mxu2 %vm1617_vm0, %v3731_v21  ;;  %v4630_v21 = vld [vmem:[%s4943_s15 + $0x80] sm:$0xf0] }
  0x28   : > { %1817 = vmatpush.bf16.msra.mxu0 %v4806_v22  ;;  %4831 = vmatpush.bf16.msra.mxu3 %v4806_v22  ;;  %v4346_v22 = vld [vmem:[%s4943_s15 + $0x4f8] sm:$0xf] }
  0x29   : > { %2146 = vmatpush.bf16.msra.mxu1 %v4814_v27 }
  0x2b   : > { %1818 = vmatmul.bf16.vlgmr.msra.gmra.mxu0 %v3711_v30  ;;  %2058 = vmatmul.bf16.vlgmr.msra.gmra.mxu3 %v4287_v31  ;;  %v4637_v30 = vld [vmem:[%s4943_s15 + $0xb8] sm:$0xf0] }
  0x2c   : > { %4832 = vmatpush.bf16.msrb.mxu3 %v4909_v1  ;;  %2147 = vmatmul.bf16.vlgmr.msra.gmra.mxu1 %v3715_v32  ;;  %v3748_v1 = vld [vmem:[%s4943_s15 + $0x54] sm:$0xf0]  ;;  %v3803_v31 = vor.u32 %v4637_v30, %v3802_v29  ;;  %v3782_v32 = vld [vmem:[%s4943_s15 + $0x90] sm:$0xf] }
  0x2d   : > { %v3783_v38 = vor.u32 %v4633_v33, %v3782_v32 }
  0x30   : > { %4833 = vmatpush.bf16.msrb.mxu3 %v4820_v4  ;;  %v3751_v4 = vor.u32 %v4623_v0, %v3748_v1  ;;  %v3808_v0 = vld [vmem:[%s4943_s15 + $0xcc] sm:$0xf0] }
  0x34   : > { %4834 = vmatpush.bf16.msrb.mxu3 %v4819_v7 }
  0x35   : > { %4550 = vmatmul.msk.bf16.gmra.mxu2 %vm1617_vm0, %v3743_v35  ;;  %v4777_v35 = vld [vmem:[%s4943_s15 + $0x518] sm:$0xf0] }
  0x36   : > { %v4359_v39 = vor.u32 %v4777_v35, %v4358_v34 }
  0x38   : > { %4835 = vmatpush.bf16.msrb.mxu3 %v4818_v12  ;;  %v4626_v12 = vld [vmem:[%s4943_s15 + $0x64] sm:$0xf] }
  0x3b   : > { %1823 = vmatmul.bf16.gmra.mxu0 %v3723_v42  ;;  %2063 = vmatmul.bf16.gmra.mxu3 %v4299_v43  ;;  %v4640_v42 = vld [vmem:[%s4943_s15 + $0xd0] sm:$0xf0] }
  0x3c   : > { %4836 = vmatpush.bf16.msrb.mxu3 %v4817_v14  ;;  %2152 = vmatmul.bf16.gmra.mxu1 %v3727_v44  ;;  %v3759_v14 = vor.u32 %v4627_v9, %v3758_v8  ;;  %v3815_v43 = vor.u32 %v4640_v42, %v3814_v41  ;;  %v3794_v44 = vld [vmem:[%s4943_s15 + $0xa8] sm:$0xf] }
  0x3d   : > { %v3795_v50 = vor.u32 %v4636_v45, %v3794_v44  ;;  %v3850_v45 = vld [vmem:[%s4943_s15 + $0x110] sm:$0xf] }
  0x40   : > { %4837 = vmatpush.bf16.msrb.mxu3 %v4816_v16  ;;  %v3763_v16 = vor.u32 %v4626_v12, %v3760_v13  ;;  %v4646_v12 = vld [vmem:[%s4943_s15 + $0x100] sm:$0xf0] }
  0x41   : > { %v3839_v17 = vor.u32 %v4646_v12, %v3838_v11 }
  0x44   : > { %4838 = vmatpush.bf16.msrb.mxu3 %v4815_v20  ;;  %v3770_v20 = vld [vmem:[%s4943_s15 + $0x78] sm:$0xf] }
  0x45   : > { %4551 = vmatmul.msk.bf16.gmra.mxu2 %vm1617_vm0, %v3755_v47  ;;  %v3771_v26 = vor.u32 %v4630_v21, %v3770_v20  ;;  %v4780_v47 = vld [vmem:[%s4943_s15 + $0x530] sm:$0xf0]  ;;  %v4642_v20 = vld [vmem:[%s4943_s15 + $0xe0] sm:$0xf0]  ;;  %v4394_v21 = vld [vmem:[%s4943_s15 + $0x558] sm:$0xf] }
  0x46   : > { %v4371_v51 = vor.u32 %v4780_v47, %v4370_v46  ;;  %v4649_v46 = vld [vmem:[%s4943_s15 + $0x118] sm:$0xf0] }
  0x48   : > { %4839 = vmatpush.bf16.msrb.mxu3 %v4814_v27  ;;  %v4347_v27 = vor.u32 %v4774_v23, %v4346_v22  ;;  %v4786_v22 = vld [vmem:[%s4943_s15 + $0x560] sm:$0xf0] }
  0x49   : > { %v4395_v32 = vor.u32 %v4786_v22, %v4394_v21 }
  0x4b   : > { %1828 = vmatmul.bf16.gmra.mxu0 %v3735_v54  ;;  %2068 = vmatmul.bf16.gmra.mxu3 %v4311_v55  ;;  %v3826_v54 = vld [vmem:[%s4943_s15 + $0xe0] sm:$0xf]  ;;  %v4643_v55 = vld [vmem:[%s4943_s15 + $0xe8] sm:$0xf0] }
  0x4c   : > { %4840 = vmatpush.bf16.msra.mxu3 %v4914_v2  ;;  %2157 = vmatmul.bf16.gmra.mxu1 %v3739_v56  ;;  %v3747_v2 = vor.u32 %v4624_v61, %v3746_v60  ;;  %v3827_v57 = vor.u32 %v4643_v55, %v3826_v54  ;;  %v4382_v60 = vld [vmem:[%s4943_s15 + $0x540] sm:$0xf]  ;;  %v4783_v61 = vld [vmem:[%s4943_s15 + $0x548] sm:$0xf0]  ;;  %v3851_v55 = vor.u32 %v4649_v46, %v3850_v45 }
  0x50   : > { %4841 = vmatpush.bf16.msra.mxu3 %v4928_v5  ;;  %v3778_v5 = vld [vmem:[%s4943_s15 + $0x80] sm:$0xf] }
  0x51   : > { %v3779_v7 = vor.u32 %v4631_v6, %v3778_v5  ;;  %v3811_v5 = vor.u32 %v4638_v63, %v3808_v0  ;;  %v4644_v0 = vld [vmem:[%s4943_s15 + $0xf4] sm:$0xf] }
  0x55   : > { %4552 = vmatmul.msk.bf16.gmra.mxu2 %vm1617_vm0, %v3767_v59  ;;  %v4639_v59 = vld [vmem:[%s4943_s15 + $0xc8] sm:$0xf0] }
  0x56   : > { %v3807_v1 = vor.u32 %v4639_v59, %v3806_v58  ;;  %v3830_v58 = vld [vmem:[%s4943_s15 + $0xf0] sm:$0xf]  ;;  %v4645_v59 = vld [vmem:[%s4943_s15 + $0xf8] sm:$0xf0] }
  0x5b   : > { %1833 = vmatmul.bf16.gmra.mxu0 %v3747_v2  ;;  %2073 = vmatmul.bf16.gmra.mxu3 %v4323_v3  ;;  %v4383_v2 = vor.u32 %v4783_v61, %v4382_v60  ;;  %v4406_v60 = vld [vmem:[%s4943_s15 + $0x570] sm:$0xf]  ;;  %v4789_v61 = vld [vmem:[%s4943_s15 + $0x578] sm:$0xf0] }
  0x5c   : > { %2162 = vmatmul.bf16.gmra.mxu1 %v3751_v4 }
  0x65   : > { %4553 = vmatmul.msk.bf16.gmra.mxu2 %vm1617_vm0, %v3779_v7 }
  0x6b   : > { %1838 = vmatmul.bf16.gmra.mxu0 %v3759_v14  ;;  %2078 = vmatmul.bf16.gmra.mxu3 %v4335_v15 }
  0x6c   : > { %2167 = vmatmul.bf16.gmra.mxu1 %v3763_v16 }
  0x75   : > { %4554 = vmatmul.msk.bf16.gmra.mxu2 %vm1617_vm0, %v3791_v19  ;;  %v3818_v19 = vld [vmem:[%s4943_s15 + $0xd8] sm:$0xf] }
  0x7b   : > { %1843 = vmatmul.bf16.gmra.mxu0 %v3771_v26  ;;  %2083 = vmatmul.bf16.gmra.mxu3 %v4347_v27  ;;  %v3820_v26 = vld [vmem:[%s4943_s15 + $0xe4] sm:$0xf0] }
  0x7c   : > { %2172 = vmatmul.bf16.gmra.mxu1 %v3775_v28  ;;  %v3819_v28 = vor.u32 %v4642_v20, %v3818_v19  ;;  %v3823_v36 = vor.u32 %v4641_v25, %v3820_v26  ;;  %v3862_v19 = vld [vmem:[%s4943_s15 + $0x128] sm:$0xf]  ;;  %v4652_v20 = vld [vmem:[%s4943_s15 + $0x130] sm:$0xf0] }
  0x85   : > { %4555 = vmatmul.msk.bf16.gmra.mxu2 %vm1617_vm0, %v3803_v31 }
  0x8b   : > { %1848 = vmatmul.bf16.gmra.mxu0 %v3783_v38  ;;  %2088 = vmatmul.bf16.gmra.mxu3 %v4359_v39 }
  0x8c   : > { %2177 = vmatmul.bf16.gmra.mxu1 %v3787_v40 }
  0x95   : > { %4556 = vmatmul.msk.bf16.gmra.mxu2 %vm1617_vm0, %v3815_v43 }
  0x98   : > { %v2477_v52 = vpop.f32.mrf.mxu2 }
  0x9b   : > { %1853 = vmatmul.bf16.gmra.mxu0 %v3795_v50  ;;  %2093 = vmatmul.bf16.gmra.mxu3 %v4371_v51 }
  0x9c   : > { %2182 = vmatmul.bf16.gmra.mxu1 %v3799_v53 }
  0xa0   : > { %v2479_v56 = vpop.f32.mrf.mxu2 }
  0xa5   : > { %4557 = vmatmul.msk.bf16.gmra.mxu2 %vm1617_vm0, %v3827_v57 }
  0xa8   : > { %v2482_v3 = vpop.f32.mrf.mxu2  ;;  %v1819_v4 = vpop.f32.mrf.mxu0 }
  0xa9   : > { %v1820_v6 = vadd.f32 %v5063_v62, %v1819_v4  ;;  %v2148_v7 = vpop.f32.mrf.mxu1 }
  0xab   : > { %v2149_v8 = vadd.f32 %v2148_v7, %v1820_v6  ;;  %1858 = vmatmul.bf16.gmra.mxu0 %v3807_v1  ;;  %2098 = vmatmul.bf16.gmra.mxu3 %v4383_v2  ;;  %v3832_v1 = vld [vmem:[%s4943_s15 + $0xfc] sm:$0xf0]  ;;  %v4407_v6 = vor.u32 %v4789_v61, %v4406_v60 }
  0xac   : > { %2187 = vmatmul.bf16.gmra.mxu1 %v3811_v5  ;;  %v3831_v5 = vor.u32 %v4645_v59, %v3830_v58  ;;  %v3835_v11 = vor.u32 %v4644_v0, %v3832_v1  ;;  %v4655_v58 = vld [vmem:[%s4943_s15 + $0x148] sm:$0xf0] }
  0xad   : > { %v2478_v9 = vadd.f32 %v2477_v52, %v2149_v8 }
  0xae   : > { %v5074_v10 = vpop.f32.mrf.mxu3 }
  0xaf   : > { %2797 = vst.msk [vmem:[%s5072_s22] sm:$0xff] %vm1617_vm0, %v2478_v9  ;;  %v3187_v23 = vmul.f32 %v2478_v9, %v2478_v9  ;;  %v2925_v29 = vsel %vm1617_vm0, %v2478_v9, 0.0 }
  0xb0   : > { %v2484_v13 = vpop.f32.mrf.mxu2  ;;  %v1821_v14 = vpop.f32.mrf.mxu0 }
  0xb1   : > { %v1822_v15 = vadd.f32 %v5063_v62, %v1821_v14  ;;  %v2150_v16 = vpop.f32.mrf.mxu1  ;;  %v3315_v37 = vsel %vm1617_vm0, %v3187_v23, 0.0 }
  0xb3   : > { %v2151_v18 = vadd.f32 %v2150_v16, %v1822_v15 }
  0xb5   : > { %v2480_v24 = vadd.f32 %v2479_v56, %v2151_v18  ;;  %4558 = vmatmul.msk.bf16.gmra.mxu2 %vm1617_vm0, %v3839_v17 }
  0xb6   : > { %v5088_v27 = vpop.f32.mrf.mxu3 }
  0xb7   : > { %2798 = vst.msk [vmem:[%s5072_s22 + $0x8] sm:$0xff] %vm1617_vm0, %v2480_v24  ;;  %v2926_v30 = vsel %vm1617_vm0, %v2480_v24, 0.0  ;;  %v3188_v31 = vmul.f32 %v2480_v24, %v2480_v24 }
  0xb8   : > { %v2927_v33 = vadd.f32 %v2926_v30, %v2925_v29  ;;  %v2487_v34 = vpop.f32.mrf.mxu2  ;;  %v1824_v35 = vpop.f32.mrf.mxu0  ;;  %v3863_v30 = vor.u32 %v4652_v20, %v3862_v19 }
  0xb9   : > { %v3316_v38 = vsel %vm1617_vm0, %v3188_v31, 0.0  ;;  %v1825_v39 = vadd.f32 %v5063_v62, %v1824_v35  ;;  %v2153_v40 = vpop.f32.mrf.mxu1  ;;  %v4418_v35 = vld [vmem:[%s4943_s15 + $0x588] sm:$0xf] }
  0xba   : > { %v3317_v41 = vadd.f32 %v3316_v38, %v3315_v37  ;;  %v4647_v38 = vld [vmem:[%s4943_s15 + $0x10c] sm:$0xf] }
  0xbb   : > { %v2154_v42 = vadd.f32 %v2153_v40, %v1825_v39  ;;  %1863 = vmatmul.bf16.gmra.mxu0 %v3819_v28  ;;  %2103 = vmatmul.bf16.gmra.mxu3 %v4395_v32  ;;  %v3844_v39 = vld [vmem:[%s4943_s15 + $0x114] sm:$0xf0] }
  0xbc   : > { %2192 = vmatmul.bf16.gmra.mxu1 %v3823_v36  ;;  %v4792_v36 = vld [vmem:[%s4943_s15 + $0x590] sm:$0xf0] }
  0xbd   : > { %v2483_v43 = vadd.f32 %v2482_v3, %v2154_v42  ;;  %v4419_v45 = vor.u32 %v4792_v36, %v4418_v35  ;;  %v4658_v35 = vld [vmem:[%s4943_s15 + $0x160] sm:$0xf0] }
  0xbe   : > { %v5097_v44 = vpop.f32.mrf.mxu3 }
  0xbf   : > { %2799 = vst.msk [vmem:[%s5072_s22 + $0x10] sm:$0xff] %vm1617_vm0, %v2483_v43  ;;  %v2928_v47 = vsel %vm1617_vm0, %v2483_v43, 0.0  ;;  %v3189_v48 = vmul.f32 %v2483_v43, %v2483_v43 }
  0xc0   : > { %v2929_v49 = vadd.f32 %v2928_v47, %v2927_v33  ;;  %v2489_v50 = vpop.f32.mrf.mxu2  ;;  %v1826_v51 = vpop.f32.mrf.mxu0  ;;  %v3842_v33 = vld [vmem:[%s4943_s15 + $0x108] sm:$0xf] }
  0xc1   : > { %v3318_v52 = vsel %vm1617_vm0, %v3189_v48, 0.0  ;;  %v1827_v53 = vadd.f32 %v5063_v62, %v1826_v51  ;;  %v2155_v54 = vpop.f32.mrf.mxu1 }
  0xc2   : > { %v3319_v56 = vadd.f32 %v3318_v52, %v3317_v41 }
  0xc3   : > { %v2156_v57 = vadd.f32 %v2155_v54, %v1827_v53 }
  0xc5   : > { %v2485_v63 = vadd.f32 %v2484_v13, %v2156_v57  ;;  %4559 = vmatmul.msk.bf16.gmra.mxu2 %vm1617_vm0, %v3851_v55  ;;  %v3874_v57 = vld [vmem:[%s4943_s15 + $0x140] sm:$0xf] }
  0xc6   : > { %v5113_v2 = vpop.f32.mrf.mxu3 }
  0xc7   : > { %2800 = vst.msk [vmem:[%s5072_s22 + $0x18] sm:$0xff] %vm1617_vm0, %v2485_v63  ;;  %v2930_v3 = vsel %vm1617_vm0, %v2485_v63, 0.0  ;;  %v3190_v4 = vmul.f32 %v2485_v63, %v2485_v63 }
  0xc8   : > { %v2931_v7 = vadd.f32 %v2930_v3, %v2929_v49  ;;  %v2492_v8 = vpop.f32.mrf.mxu2  ;;  %v1829_v9 = vpop.f32.mrf.mxu0  ;;  %v3847_v49 = vor.u32 %v4647_v38, %v3844_v39 }
  0xc9   : > { %v3320_v12 = vsel %vm1617_vm0, %v3190_v4, 0.0  ;;  %v1830_v13 = vadd.f32 %v5063_v62, %v1829_v9  ;;  %v2158_v14 = vpop.f32.mrf.mxu1  ;;  %v4651_v9 = vld [vmem:[%s4943_s15 + $0x128] sm:$0xf0] }
  0xca   : > { %v3321_v15 = vadd.f32 %v3320_v12, %v3319_v56  ;;  %v4795_v12 = vld [vmem:[%s4943_s15 + $0x5a8] sm:$0xf0] }
  0xcb   : > { %v2159_v16 = vadd.f32 %v2158_v14, %v1830_v13  ;;  %1868 = vmatmul.bf16.gmra.mxu0 %v3831_v5  ;;  %2108 = vmatmul.bf16.gmra.mxu3 %v4407_v6  ;;  %v3875_v5 = vor.u32 %v4655_v58, %v3874_v57  ;;  %v4650_v14 = vld [vmem:[%s4943_s15 + $0x124] sm:$0xf] }
  0xcc   : > { %2197 = vmatmul.bf16.gmra.mxu1 %v3835_v11  ;;  %v4430_v11 = vld [vmem:[%s4943_s15 + $0x5a0] sm:$0xf] }
  0xcd   : > { %v2488_v17 = vadd.f32 %v2487_v34, %v2159_v16  ;;  %v4648_v34 = vld [vmem:[%s4943_s15 + $0x110] sm:$0xf0] }
  0xce   : > { %v5120_v18 = vpop.f32.mrf.mxu3  ;;  %v3843_v43 = vor.u32 %v4648_v34, %v3842_v33  ;;  %v3886_v34 = vld [vmem:[%s4943_s15 + $0x158] sm:$0xf] }
  0xcf   : > { %2801 = vst.msk [vmem:[%s5072_s22 + $0x20] sm:$0xff] %vm1617_vm0, %v2488_v17  ;;  %v2932_v21 = vsel %vm1617_vm0, %v2488_v17, 0.0  ;;  %v3191_v22 = vmul.f32 %v2488_v17, %v2488_v17 }
  0xd0   : > { %v2933_v23 = vadd.f32 %v2932_v21, %v2931_v7  ;;  %v2494_v24 = vpop.f32.mrf.mxu2  ;;  %v1831_v25 = vpop.f32.mrf.mxu0  ;;  %v4431_v21 = vor.u32 %v4795_v12, %v4430_v11  ;;  %v3898_v12 = vld [vmem:[%s4943_s15 + $0x170] sm:$0xf] }
  0xd1   : > { %v3322_v26 = vsel %vm1617_vm0, %v3191_v22, 0.0  ;;  %v1832_v28 = vadd.f32 %v5063_v62, %v1831_v25  ;;  %v2160_v29 = vpop.f32.mrf.mxu1 }
  0xd2   : > { %v3323_v31 = vadd.f32 %v3322_v26, %v3321_v15  ;;  %v3856_v15 = vld [vmem:[%s4943_s15 + $0x12c] sm:$0xf0] }
  0xd3   : > { %v2161_v32 = vadd.f32 %v2160_v29, %v1832_v28 }
  0xd5   : > { %v2490_v37 = vadd.f32 %v2489_v50, %v2161_v32  ;;  %4560 = vmatmul.msk.bf16.gmra.mxu2 %vm1617_vm0, %v3863_v30 }
  0xd6   : > { %v5136_v40 = vpop.f32.mrf.mxu3 }
  0xd7   : > { %2802 = vst.msk [vmem:[%s5072_s22 + $0x28] sm:$0xff] %vm1617_vm0, %v2490_v37  ;;  %v2934_v41 = vsel %vm1617_vm0, %v2490_v37, 0.0  ;;  %v3192_v42 = vmul.f32 %v2490_v37, %v2490_v37 }
  0xd8   : > { %v2935_v46 = vadd.f32 %v2934_v41, %v2933_v23  ;;  %v2497_v47 = vpop.f32.mrf.mxu2  ;;  %v1834_v48 = vpop.f32.mrf.mxu0 }
  0xd9   : > { %v3324_v50 = vsel %vm1617_vm0, %v3192_v42, 0.0  ;;  %v1835_v51 = vadd.f32 %v5063_v62, %v1834_v48  ;;  %v2163_v52 = vpop.f32.mrf.mxu1 }
  0xda   : > { %v3325_v53 = vadd.f32 %v3324_v50, %v3323_v31  ;;  %v4654_v50 = vld [vmem:[%s4943_s15 + $0x140] sm:$0xf0] }
  0xdb   : > { %v2164_v54 = vadd.f32 %v2163_v52, %v1835_v51  ;;  %1873 = vmatmul.bf16.gmra.mxu0 %v3843_v43  ;;  %2113 = vmatmul.bf16.gmra.mxu3 %v4419_v45  ;;  %v4442_v51 = vld [vmem:[%s4943_s15 + $0x5b8] sm:$0xf]  ;;  %v4798_v52 = vld [vmem:[%s4943_s15 + $0x5c0] sm:$0xf0] }
  0xdc   : > { %2202 = vmatmul.bf16.gmra.mxu1 %v3847_v49  ;;  %v3866_v49 = vld [vmem:[%s4943_s15 + $0x138] sm:$0xf] }
  0xdd   : > { %v2493_v55 = vadd.f32 %v2492_v8, %v2164_v54  ;;  %v3854_v8 = vld [vmem:[%s4943_s15 + $0x120] sm:$0xf]  ;;  %v4653_v54 = vld [vmem:[%s4943_s15 + $0x13c] sm:$0xf] }
  0xde   : > { %v5143_v56 = vpop.f32.mrf.mxu3  ;;  %v3855_v20 = vor.u32 %v4651_v9, %v3854_v8 }
  0xdf   : > { %2803 = vst.msk [vmem:[%s5072_s22 + $0x30] sm:$0xff] %vm1617_vm0, %v2493_v55  ;;  %v2936_v59 = vsel %vm1617_vm0, %v2493_v55, 0.0  ;;  %v3193_v60 = vmul.f32 %v2493_v55, %v2493_v55  ;;  %v3868_v55 = vld [vmem:[%s4943_s15 + $0x144] sm:$0xf0] }
  0xe0   : > { %v2937_v61 = vadd.f32 %v2936_v59, %v2935_v46  ;;  %v2499_v63 = vpop.f32.mrf.mxu2  ;;  %v1836_v0 = vpop.f32.mrf.mxu0  ;;  %v3887_v46 = vor.u32 %v4658_v35, %v3886_v34  ;;  %v4656_v34 = vld [vmem:[%s4943_s15 + $0x154] sm:$0xf]  ;;  %v3880_v35 = vld [vmem:[%s4943_s15 + $0x15c] sm:$0xf0] }
  0xe1   : > { %v3326_v1 = vsel %vm1617_vm0, %v3193_v60, 0.0  ;;  %v1837_v3 = vadd.f32 %v5063_v62, %v1836_v0  ;;  %v2165_v4 = vpop.f32.mrf.mxu1  ;;  %v3867_v60 = vor.u32 %v4654_v50, %v3866_v49 }
  0xe2   : > { %v3327_v6 = vadd.f32 %v3326_v1, %v3325_v53 }
  0xe3   : > { %v2166_v7 = vadd.f32 %v2165_v4, %v1837_v3 }
  0xe5   : > { %v2495_v13 = vadd.f32 %v2494_v24, %v2166_v7  ;;  %4561 = vmatmul.msk.bf16.gmra.mxu2 %vm1617_vm0, %v3875_v5  ;;  %v3859_v24 = vor.u32 %v4650_v14, %v3856_v15 }
  0xe6   : > { %v5159_v16 = vpop.f32.mrf.mxu3 }
  0xe7   : > { %2804 = vst.msk [vmem:[%s5072_s22 + $0x38] sm:$0xff] %vm1617_vm0, %v2495_v13  ;;  %v2938_v17 = vsel %vm1617_vm0, %v2495_v13, 0.0  ;;  %v3194_v19 = vmul.f32 %v2495_v13, %v2495_v13  ;;  %v4661_v13 = vld [vmem:[%s4943_s15 + $0x178] sm:$0xf0] }
  0xe8   : > { %v2939_v22 = vadd.f32 %v2938_v17, %v2937_v61  ;;  %v2502_v23 = vpop.f32.mrf.mxu2  ;;  %v1839_v25 = vpop.f32.mrf.mxu0  ;;  %v4443_v61 = vor.u32 %v4798_v52, %v4442_v51 }
  0xe9   : > { %v3328_v26 = vsel %vm1617_vm0, %v3194_v19, 0.0  ;;  %v1840_v28 = vadd.f32 %v5063_v62, %v1839_v25  ;;  %v2168_v29 = vpop.f32.mrf.mxu1  ;;  %v3899_v25 = vor.u32 %v4661_v13, %v3898_v12  ;;  %v4804_v12 = vld [vmem:[%s4943_s15 + $0x5f0] sm:$0xf0] }
  0xea   : > { %v3329_v30 = vadd.f32 %v3328_v26, %v3327_v6 }
  0xeb   : > { %v2169_v31 = vadd.f32 %v2168_v29, %v1840_v28  ;;  %1878 = vmatmul.bf16.gmra.mxu0 %v3855_v20  ;;  %2118 = vmatmul.bf16.gmra.mxu3 %v4431_v21  ;;  %v3878_v28 = vld [vmem:[%s4943_s15 + $0x150] sm:$0xf]  ;;  %v4657_v29 = vld [vmem:[%s4943_s15 + $0x158] sm:$0xf0] }
  0xec   : > { %2207 = vmatmul.bf16.gmra.mxu1 %v3859_v24 }
  0xed   : > { %v2498_v32 = vadd.f32 %v2497_v47, %v2169_v31  ;;  %v4801_v31 = vld [vmem:[%s4943_s15 + $0x5d8] sm:$0xf0] }
  0xee   : > { %v5166_v33 = vpop.f32.mrf.mxu3 }
  0xef   : > { %2805 = vst.msk [vmem:[%s5072_s22 + $0x40] sm:$0xff] %vm1617_vm0, %v2498_v32  ;;  %v2940_v36 = vsel %vm1617_vm0, %v2498_v32, 0.0  ;;  %v3195_v37 = vmul.f32 %v2498_v32, %v2498_v32 }
  0xf0   : > { %v2941_v38 = vadd.f32 %v2940_v36, %v2939_v22  ;;  %v2504_v39 = vpop.f32.mrf.mxu2  ;;  %v1841_v41 = vpop.f32.mrf.mxu0 }
  0xf1   : > { %v3330_v42 = vsel %vm1617_vm0, %v3195_v37, 0.0  ;;  %v1842_v43 = vadd.f32 %v5063_v62, %v1841_v41  ;;  %v2170_v45 = vpop.f32.mrf.mxu1  ;;  %v3879_v41 = vor.u32 %v4657_v29, %v3878_v28 }
  0xf2   : > { %v3331_v47 = vadd.f32 %v3330_v42, %v3329_v30  ;;  %v4454_v30 = vld [vmem:[%s4943_s15 + $0x5d0] sm:$0xf] }
  0xf3   : > { %v2171_v48 = vadd.f32 %v2170_v45, %v1842_v43  ;;  %v4455_v42 = vor.u32 %v4801_v31, %v4454_v30 }
  0xf5   : > { %v2500_v53 = vadd.f32 %v2499_v63, %v2171_v48  ;;  %4562 = vmatmul.msk.bf16.gmra.mxu2 %vm1617_vm0, %v3887_v46  ;;  %v3871_v63 = vor.u32 %v4653_v54, %v3868_v55  ;;  %v3910_v54 = vld [vmem:[%s4943_s15 + $0x188] sm:$0xf]  ;;  %v4664_v55 = vld [vmem:[%s4943_s15 + $0x190] sm:$0xf0] }
  0xf6   : > { %v5182_v57 = vpop.f32.mrf.mxu3 }
  0xf7   : > { %2806 = vst.msk [vmem:[%s5072_s22 + $0x48] sm:$0xff] %vm1617_vm0, %v2500_v53  ;;  %v2942_v58 = vsel %vm1617_vm0, %v2500_v53, 0.0  ;;  %v3196_v59 = vmul.f32 %v2500_v53, %v2500_v53 }
  0xf8   : > { %v2943_v0 = vadd.f32 %v2942_v58, %v2941_v38  ;;  %v2507_v1 = vpop.f32.mrf.mxu2  ;;  %v1844_v3 = vpop.f32.mrf.mxu0 }
  0xf9   : > { %v3332_v4 = vsel %vm1617_vm0, %v3196_v59, 0.0  ;;  %v1845_v5 = vadd.f32 %v5063_v62, %v1844_v3  ;;  %v2173_v6 = vpop.f32.mrf.mxu1 }
  0xfa   : > { %v3333_v7 = vadd.f32 %v3332_v4, %v3331_v47  ;;  %v3911_v4 = vor.u32 %v4664_v55, %v3910_v54  ;;  %v4663_v54 = vld [vmem:[%s4943_s15 + $0x188] sm:$0xf0]  ;;  %v4758_v55 = vld [vmem:[%s4943_s15 + $0x484] sm:$0xf] }
  0xfb   : > { %v2174_v8 = vadd.f32 %v2173_v6, %v1845_v5  ;;  %1883 = vmatmul.bf16.gmra.mxu0 %v3867_v60  ;;  %2123 = vmatmul.bf16.gmra.mxu3 %v4443_v61 }
  0xfc   : > { %2212 = vmatmul.bf16.gmra.mxu1 %v3871_v63 }
  0xfd   : > { %v2503_v9 = vadd.f32 %v2502_v23, %v2174_v8  ;;  %v4660_v8 = vld [vmem:[%s4943_s15 + $0x170] sm:$0xf0] }
  0xfe   : > { %v5189_v11 = vpop.f32.mrf.mxu3 }
  0xff   : > { %2807 = vst.msk [vmem:[%s5072_s22 + $0x50] sm:$0xff] %vm1617_vm0, %v2503_v9  ;;  %v2944_v14 = vsel %vm1617_vm0, %v2503_v9, 0.0  ;;  %v3197_v15 = vmul.f32 %v2503_v9, %v2503_v9  ;;  %v4466_v9 = vld [vmem:[%s4943_s15 + $0x5e8] sm:$0xf] }
 0x100   : > { %v2945_v17 = vadd.f32 %v2944_v14, %v2943_v0  ;;  %v2509_v19 = vpop.f32.mrf.mxu2  ;;  %v1846_v20 = vpop.f32.mrf.mxu0  ;;  %v4659_v14 = vld [vmem:[%s4943_s15 + $0x16c] sm:$0xf] }
 0x101   : > { %v3334_v21 = vsel %vm1617_vm0, %v3197_v15, 0.0  ;;  %v1847_v22 = vadd.f32 %v5063_v62, %v1846_v20  ;;  %v2175_v23 = vpop.f32.mrf.mxu1  ;;  %v3892_v15 = vld [vmem:[%s4943_s15 + $0x174] sm:$0xf0] }
 0x102   : > { %v3335_v24 = vadd.f32 %v3334_v21, %v3333_v7  ;;  %v3890_v7 = vld [vmem:[%s4943_s15 + $0x168] sm:$0xf] }
 0x103   : > { %v2176_v26 = vadd.f32 %v2175_v23, %v1847_v22  ;;  %v3891_v22 = vor.u32 %v4660_v8, %v3890_v7  ;;  %v4467_v23 = vor.u32 %v4804_v12, %v4466_v9 }
 0x105   : > { %v2505_v32 = vadd.f32 %v2504_v39, %v2176_v26  ;;  %4563 = vmatmul.msk.bf16.gmra.mxu2 %vm1617_vm0, %v3899_v25  ;;  %v3883_v39 = vor.u32 %v4656_v34, %v3880_v35 }
 0x106   : > { %v5205_v36 = vpop.f32.mrf.mxu3 }
 0x107   : > { %2808 = vst.msk [vmem:[%s5072_s22 + $0x58] sm:$0xff] %vm1617_vm0, %v2505_v32  ;;  %v2946_v37 = vsel %vm1617_vm0, %v2505_v32, 0.0  ;;  %v3198_v38 = vmul.f32 %v2505_v32, %v2505_v32 }
 0x108   : > { %v2947_v43 = vadd.f32 %v2946_v37, %v2945_v17  ;;  %v2512_v45 = vpop.f32.mrf.mxu2  ;;  %v1849_v46 = vpop.f32.mrf.mxu0  ;;  %v3922_v37 = vld [vmem:[%s4943_s15 + $0x1a0] sm:$0xf] }
 0x109   : > { %v3336_v47 = vsel %vm1617_vm0, %v3198_v38, 0.0  ;;  %v1850_v48 = vadd.f32 %v5063_v62, %v1849_v46  ;;  %v2178_v49 = vpop.f32.mrf.mxu1  ;;  %v4667_v38 = vld [vmem:[%s4943_s15 + $0x1a8] sm:$0xf0] }
 0x10a   : > { %v3337_v50 = vadd.f32 %v3336_v47, %v3335_v24 }
 0x10b   : > { %v2179_v51 = vadd.f32 %v2178_v49, %v1850_v48  ;;  %1888 = vmatmul.bf16.gmra.mxu0 %v3879_v41  ;;  %2128 = vmatmul.bf16.gmra.mxu3 %v4455_v42  ;;  %v3923_v49 = vor.u32 %v4667_v38, %v3922_v37  ;;  %v3914_v38 = vld [vmem:[%s4943_s15 + $0x198] sm:$0xf] }
 0x10c   : > { %2217 = vmatmul.bf16.gmra.mxu1 %v3883_v39 }
 0x10d   : > { %v2508_v52 = vadd.f32 %v2507_v1, %v2179_v51 }
 0x10e   : > { %v5212_v53 = vpop.f32.mrf.mxu3 }
 0x10f   : > { %2809 = vst.msk [vmem:[%s5072_s22 + $0x60] sm:$0xff] %vm1617_vm0, %v2508_v52  ;;  %v2948_v58 = vsel %vm1617_vm0, %v2508_v52, 0.0  ;;  %v3199_v59 = vmul.f32 %v2508_v52, %v2508_v52  ;;  %v3902_v52 = vld [vmem:[%s4943_s15 + $0x180] sm:$0xf] }
 0x110   : > { %v2949_v60 = vadd.f32 %v2948_v58, %v2947_v43  ;;  %v2514_v61 = vpop.f32.mrf.mxu2  ;;  %v1851_v0 = vpop.f32.mrf.mxu0  ;;  %v4288_v58 = vld [vmem:[%s4943_s15 + $0x48c] sm:$0xf0] }
 0x111   : > { %v3338_v1 = vsel %vm1617_vm0, %v3199_v59, 0.0  ;;  %v1852_v3 = vadd.f32 %v5063_v62, %v1851_v0  ;;  %v2180_v63 = vpop.f32.mrf.mxu1  ;;  %v3904_v0 = vld [vmem:[%s4943_s15 + $0x18c] sm:$0xf0] }
 0x112   : > { %v3339_v5 = vadd.f32 %v3338_v1, %v3337_v50 }
 0x113   : > { %v2181_v6 = vadd.f32 %v2180_v63, %v1852_v3 }
 0x115   : > { %v2510_v13 = vadd.f32 %v2509_v19, %v2181_v6  ;;  %4564 = vmatmul.msk.bf16.gmra.mxu2 %vm1617_vm0, %v3911_v4  ;;  %v3895_v19 = vor.u32 %v4659_v14, %v3892_v15  ;;  %v3903_v4 = vor.u32 %v4663_v54, %v3902_v52 }
 0x116   : > { %v5228_v17 = vpop.f32.mrf.mxu3 }
 0x117   : > { %2810 = vst.msk [vmem:[%s5072_s22 + $0x68] sm:$0xff] %vm1617_vm0, %v2510_v13  ;;  %v2950_v20 = vsel %vm1617_vm0, %v2510_v13, 0.0  ;;  %v3200_v21 = vmul.f32 %v2510_v13, %v2510_v13 }
 0x118   : > { %v2951_v25 = vadd.f32 %v2950_v20, %v2949_v60  ;;  %v2517_v24 = vpop.f32.mrf.mxu2  ;;  %v1854_v26 = vpop.f32.mrf.mxu0  ;;  %v4662_v60 = vld [vmem:[%s4943_s15 + $0x184] sm:$0xf] }
 0x119   : > { %v3340_v28 = vsel %vm1617_vm0, %v3200_v21, 0.0  ;;  %v1855_v29 = vadd.f32 %v5063_v62, %v1854_v26  ;;  %v2183_v30 = vpop.f32.mrf.mxu1 }
 0x11a   : > { %v3341_v31 = vadd.f32 %v3340_v28, %v3339_v5  ;;  %v4291_v5 = vor.u32 %v4758_v55, %v4288_v58 }
 0x11b   : > { %v2184_v32 = vadd.f32 %v2183_v30, %v1855_v29  ;;  %1893 = vmatmul.bf16.gmra.mxu0 %v3891_v22  ;;  %2133 = vmatmul.bf16.gmra.mxu3 %v4467_v23  ;;  %v3934_v22 = vld [vmem:[%s4943_s15 + $0x1b8] sm:$0xf]  ;;  %v4670_v23 = vld [vmem:[%s4943_s15 + $0x1c0] sm:$0xf0] }
 0x11c   : > { %2222 = vmatmul.bf16.gmra.mxu1 %v3895_v19 }
 0x11d   : > { %v2513_v34 = vadd.f32 %v2512_v45, %v2184_v32  ;;  %v3935_v32 = vor.u32 %v4670_v23, %v3934_v22 }
 0x11e   : > { %v5235_v35 = vpop.f32.mrf.mxu3 }
 0x11f   : > { %2811 = vst.msk [vmem:[%s5072_s22 + $0x70] sm:$0xff] %vm1617_vm0, %v2513_v34  ;;  %v2952_v41 = vsel %vm1617_vm0, %v2513_v34, 0.0  ;;  %v3201_v42 = vmul.f32 %v2513_v34, %v2513_v34 }
 0x120   : > { %v2953_v43 = vadd.f32 %v2952_v41, %v2951_v25  ;;  %v2519_v46 = vpop.f32.mrf.mxu2  ;;  %v1856_v39 = vpop.f32.mrf.mxu0  ;;  %v4666_v41 = vld [vmem:[%s4943_s15 + $0x1a0] sm:$0xf0] }
 0x121   : > { %v3342_v45 = vsel %vm1617_vm0, %v3201_v42, 0.0  ;;  %v1857_v47 = vadd.f32 %v5063_v62, %v1856_v39  ;;  %v2185_v48 = vpop.f32.mrf.mxu1  ;;  %v4761_v42 = vld [vmem:[%s4943_s15 + $0x49c] sm:$0xf] }
 0x122   : > { %v3343_v50 = vadd.f32 %v3342_v45, %v3341_v31  ;;  %v4665_v45 = vld [vmem:[%s4943_s15 + $0x19c] sm:$0xf] }
 0x123   : > { %v2186_v51 = vadd.f32 %v2185_v48, %v1857_v47  ;;  %v3916_v47 = vld [vmem:[%s4943_s15 + $0x1a4] sm:$0xf0] }
 0x125   : > { %v2515_v59 = vadd.f32 %v2514_v61, %v2186_v51  ;;  %4565 = vmatmul.msk.bf16.gmra.mxu2 %vm1617_vm0, %v3923_v49  ;;  %v3907_v61 = vor.u32 %v4662_v60, %v3904_v0  ;;  %v3915_v51 = vor.u32 %v4666_v41, %v3914_v38 }
 0x126   : > { %v5251_v1 = vpop.f32.mrf.mxu3 }
 0x127   : > { %2812 = vst.msk [vmem:[%s5072_s22 + $0x78] sm:$0xff] %vm1617_vm0, %v2515_v59  ;;  %v2954_v3 = vsel %vm1617_vm0, %v2515_v59, 0.0  ;;  %v3202_v63 = vmul.f32 %v2515_v59, %v2515_v59 }
 0x128   : > { %v2955_v6 = vadd.f32 %v2954_v3, %v2953_v43  ;;  %v2522_v7 = vpop.f32.mrf.mxu2  ;;  %v1859_v8 = vpop.f32.mrf.mxu0  ;;  %v4300_v43 = vld [vmem:[%s4943_s15 + $0x4a4] sm:$0xf0] }
 0x129   : > { %v3344_v9 = vsel %vm1617_vm0, %v3202_v63, 0.0  ;;  %v1860_v12 = vadd.f32 %v5063_v62, %v1859_v8  ;;  %v2188_v13 = vpop.f32.mrf.mxu1  ;;  %v4303_v52 = vor.u32 %v4761_v42, %v4300_v43  ;;  %v4673_v8 = vld [vmem:[%s4943_s15 + $0x1d8] sm:$0xf0] }
 0x12a   : > { %v3345_v14 = vadd.f32 %v3344_v9, %v3343_v50 }
 0x12b   : > { %v2189_v15 = vadd.f32 %v2188_v13, %v1860_v12  ;;  %1898 = vmatmul.bf16.gmra.mxu0 %v3903_v4  ;;  %2387 = vmatmul.bf16.vlgmr.msrb.gmra.mxu3 %v4291_v5 }
 0x12c   : > { %2227 = vmatmul.bf16.gmra.mxu1 %v3907_v61 }
 0x12d   : > { %v2518_v20 = vadd.f32 %v2517_v24, %v2189_v15 }
 0x12e   : > { %v5258_v21 = vpop.f32.mrf.mxu3 }
 0x12f   : > { %2813 = vst.msk [vmem:[%s5072_s22 + $0x80] sm:$0xff] %vm1617_vm0, %v2518_v20  ;;  %v2956_v25 = vsel %vm1617_vm0, %v2518_v20, 0.0  ;;  %v3203_v26 = vmul.f32 %v2518_v20, %v2518_v20 }
 0x130   : > { %v2957_v19 = vadd.f32 %v2956_v25, %v2955_v6  ;;  %v2524_v28 = vpop.f32.mrf.mxu2  ;;  %v1861_v29 = vpop.f32.mrf.mxu0  ;;  %v3946_v6 = vld [vmem:[%s4943_s15 + $0x1d0] sm:$0xf] }
 0x131   : > { %v3346_v24 = vsel %vm1617_vm0, %v3203_v26, 0.0  ;;  %v1862_v30 = vadd.f32 %v5063_v62, %v1861_v29  ;;  %v2190_v31 = vpop.f32.mrf.mxu1  ;;  %v3947_v22 = vor.u32 %v4673_v8, %v3946_v6  ;;  %v3926_v26 = vld [vmem:[%s4943_s15 + $0x1b0] sm:$0xf]  ;;  %v4764_v29 = vld [vmem:[%s4943_s15 + $0x4b4] sm:$0xf] }
 0x132   : > { %v3347_v34 = vadd.f32 %v3346_v24, %v3345_v14  ;;  %v4312_v24 = vld [vmem:[%s4943_s15 + $0x4bc] sm:$0xf0] }
 0x133   : > { %v2191_v37 = vadd.f32 %v2190_v31, %v1862_v30  ;;  %v4668_v31 = vld [vmem:[%s4943_s15 + $0x1b4] sm:$0xf]  ;;  %v4315_v42 = vor.u32 %v4764_v29, %v4312_v24 }
 0x135   : > { %v2520_v39 = vadd.f32 %v2519_v46, %v2191_v37  ;;  %4566 = vmatmul.msk.bf16.gmra.mxu2 %vm1617_vm0, %v3935_v32  ;;  %v3919_v46 = vor.u32 %v4665_v45, %v3916_v47  ;;  %v3928_v32 = vld [vmem:[%s4943_s15 + $0x1bc] sm:$0xf0] }
 0x136   : > { %v5274_v48 = vpop.f32.mrf.mxu3 }
 0x137   : > { %2814 = vst.msk [vmem:[%s5072_s22 + $0x88] sm:$0xff] %vm1617_vm0, %v2520_v39  ;;  %v2958_v49 = vsel %vm1617_vm0, %v2520_v39, 0.0  ;;  %v3204_v50 = vmul.f32 %v2520_v39, %v2520_v39 }
 0x138   : > { %v2959_v54 = vadd.f32 %v2958_v49, %v2957_v19  ;;  %v2527_v55 = vpop.f32.mrf.mxu2  ;;  %v1864_v58 = vpop.f32.mrf.mxu0  ;;  %v4669_v19 = vld [vmem:[%s4943_s15 + $0x1b8] sm:$0xf0] }
 0x139   : > { %v3348_v59 = vsel %vm1617_vm0, %v3204_v50, 0.0  ;;  %v1865_v60 = vadd.f32 %v5063_v62, %v1864_v58  ;;  %v2193_v0 = vpop.f32.mrf.mxu1  ;;  %v3927_v41 = vor.u32 %v4669_v19, %v3926_v26 }
 0x13a   : > { %v3349_v3 = vadd.f32 %v3348_v59, %v3347_v34  ;;  %v4676_v59 = vld [vmem:[%s4943_s15 + $0x1f0] sm:$0xf0] }
 0x13b   : > { %v2194_v63 = vadd.f32 %v2193_v0, %v1865_v60  ;;  %1903 = vmatmul.bf16.gmra.mxu0 %v3915_v51  ;;  %2392 = vmatmul.bf16.gmra.mxu3 %v4303_v52 }
 0x13c   : > { %2232 = vmatmul.bf16.gmra.mxu1 %v3919_v46  ;;  %v3958_v46 = vld [vmem:[%s4943_s15 + $0x1e8] sm:$0xf] }
 0x13d   : > { %v2523_v4 = vadd.f32 %v2522_v7, %v2194_v63 }
 0x13e   : > { %v5281_v5 = vpop.f32.mrf.mxu3 }
 0x13f   : > { %2815 = vst.msk [vmem:[%s5072_s22 + $0x90] sm:$0xff] %vm1617_vm0, %v2523_v4  ;;  %v2960_v61 = vsel %vm1617_vm0, %v2523_v4, 0.0  ;;  %v3205_v9 = vmul.f32 %v2523_v4, %v2523_v4 }
 0x140   : > { %v2961_v12 = vadd.f32 %v2960_v61, %v2959_v54  ;;  %v2529_v13 = vpop.f32.mrf.mxu2  ;;  %v1866_v14 = vpop.f32.mrf.mxu0  ;;  %v3959_v61 = vor.u32 %v4676_v59, %v3958_v46 }
 0x141   : > { %v3350_v7 = vsel %vm1617_vm0, %v3205_v9, 0.0  ;;  %v1867_v15 = vadd.f32 %v5063_v62, %v1866_v14  ;;  %v2195_v20 = vpop.f32.mrf.mxu1  ;;  %v3938_v14 = vld [vmem:[%s4943_s15 + $0x1c8] sm:$0xf] }
 0x142   : > { %v3351_v23 = vadd.f32 %v3350_v7, %v3349_v3  ;;  %v4672_v7 = vld [vmem:[%s4943_s15 + $0x1d0] sm:$0xf0] }
 0x143   : > { %v2196_v25 = vadd.f32 %v2195_v20, %v1867_v15  ;;  %v4767_v15 = vld [vmem:[%s4943_s15 + $0x4cc] sm:$0xf]  ;;  %v4324_v20 = vld [vmem:[%s4943_s15 + $0x4d4] sm:$0xf0]  ;;  %v3939_v24 = vor.u32 %v4672_v7, %v3938_v14  ;;  %v4674_v14 = vld [vmem:[%s4943_s15 + $0x1e4] sm:$0xf] }
 0x144   : > { %v3952_v7 = vld [vmem:[%s4943_s15 + $0x1ec] sm:$0xf0] }
 0x145   : > { %v2525_v30 = vadd.f32 %v2524_v28, %v2196_v25  ;;  %4567 = vmatmul.msk.bf16.gmra.mxu2 %vm1617_vm0, %v3947_v22  ;;  %v3931_v28 = vor.u32 %v4668_v31, %v3928_v32  ;;  %v3940_v25 = vld [vmem:[%s4943_s15 + $0x1d4] sm:$0xf0] }
 0x146   : > { %v5297_v34 = vpop.f32.mrf.mxu3 }
 0x147   : > { %2816 = vst.msk [vmem:[%s5072_s22 + $0x98] sm:$0xff] %vm1617_vm0, %v2525_v30  ;;  %v2962_v37 = vsel %vm1617_vm0, %v2525_v30, 0.0  ;;  %v3206_v38 = vmul.f32 %v2525_v30, %v2525_v30  ;;  %v4327_v30 = vor.u32 %v4767_v15, %v4324_v20 }
 0x148   : > { %v2963_v43 = vadd.f32 %v2962_v37, %v2961_v12  ;;  %v2532_v39 = vpop.f32.mrf.mxu2  ;;  %v1869_v45 = vpop.f32.mrf.mxu0 }
 0x149   : > { %v3352_v47 = vsel %vm1617_vm0, %v3206_v38, 0.0  ;;  %v1870_v49 = vadd.f32 %v5063_v62, %v1869_v45  ;;  %v2198_v50 = vpop.f32.mrf.mxu1 }
 0x14a   : > { %v3353_v51 = vadd.f32 %v3352_v47, %v3351_v23  ;;  %v4671_v23 = vld [vmem:[%s4943_s15 + $0x1cc] sm:$0xf] }
 0x14b   : > { %v2199_v52 = vadd.f32 %v2198_v50, %v1870_v49  ;;  %1908 = vmatmul.bf16.gmra.mxu0 %v3927_v41  ;;  %2397 = vmatmul.bf16.gmra.mxu3 %v4315_v42  ;;  %v3970_v49 = vld [vmem:[%s4943_s15 + $0x200] sm:$0xf]  ;;  %v4679_v50 = vld [vmem:[%s4943_s15 + $0x208] sm:$0xf0] }
 0x14c   : > { %2237 = vmatmul.bf16.gmra.mxu1 %v3931_v28 }
 0x14d   : > { %v2528_v54 = vadd.f32 %v2527_v55, %v2199_v52 }
 0x14e   : > { %v5304_v58 = vpop.f32.mrf.mxu3 }
 0x14f   : > { %2817 = vst.msk [vmem:[%s5072_s22 + $0xa0] sm:$0xff] %vm1617_vm0, %v2528_v54  ;;  %v2964_v60 = vsel %vm1617_vm0, %v2528_v54, 0.0  ;;  %v3207_v0 = vmul.f32 %v2528_v54, %v2528_v54 }
 0x150   : > { %v2965_v3 = vadd.f32 %v2964_v60, %v2963_v43  ;;  %v2534_v63 = vpop.f32.mrf.mxu2  ;;  %v1871_v4 = vpop.f32.mrf.mxu0 }
 0x151   : > { %v3354_v55 = vsel %vm1617_vm0, %v3207_v0, 0.0  ;;  %v1872_v6 = vadd.f32 %v5063_v62, %v1871_v4  ;;  %v2200_v8 = vpop.f32.mrf.mxu1 }
 0x152   : > { %v3355_v9 = vadd.f32 %v3354_v55, %v3353_v51 }
 0x153   : > { %v2201_v12 = vadd.f32 %v2200_v8, %v1872_v6  ;;  %v3950_v6 = vld [vmem:[%s4943_s15 + $0x1e0] sm:$0xf]  ;;  %v4675_v8 = vld [vmem:[%s4943_s15 + $0x1e8] sm:$0xf0] }
 0x155   : > { %v2530_v22 = vadd.f32 %v2529_v13, %v2201_v12  ;;  %4568 = vmatmul.msk.bf16.gmra.mxu2 %vm1617_vm0, %v3959_v61  ;;  %v3943_v13 = vor.u32 %v4671_v23, %v3940_v25  ;;  %v4770_v61 = vld [vmem:[%s4943_s15 + $0x4e4] sm:$0xf]  ;;  %v3951_v23 = vor.u32 %v4675_v8, %v3950_v6  ;;  %v4348_v6 = vld [vmem:[%s4943_s15 + $0x504] sm:$0xf0] }
 0x156   : > { %v5320_v26 = vpop.f32.mrf.mxu3 }
 0x157   : > { %2818 = vst.msk [vmem:[%s5072_s22 + $0xa8] sm:$0xff] %vm1617_vm0, %v2530_v22  ;;  %v2966_v19 = vsel %vm1617_vm0, %v2530_v22, 0.0  ;;  %v3208_v29 = vmul.f32 %v2530_v22, %v2530_v22 }
 0x158   : > { %v2967_v31 = vadd.f32 %v2966_v19, %v2965_v3  ;;  %v2537_v32 = vpop.f32.mrf.mxu2  ;;  %v1874_v37 = vpop.f32.mrf.mxu0  ;;  %v3971_v3 = vor.u32 %v4679_v50, %v3970_v49 }
 0x159   : > { %v3356_v38 = vsel %vm1617_vm0, %v3208_v29, 0.0  ;;  %v1875_v41 = vadd.f32 %v5063_v62, %v1874_v37  ;;  %v2203_v42 = vpop.f32.mrf.mxu1 }
 0x15a   : > { %v3357_v43 = vadd.f32 %v3356_v38, %v3355_v9  ;;  %v4336_v9 = vld [vmem:[%s4943_s15 + $0x4ec] sm:$0xf0] }
 0x15b   : > { %v2204_v45 = vadd.f32 %v2203_v42, %v1875_v41  ;;  %1913 = vmatmul.bf16.gmra.mxu0 %v3939_v24  ;;  %2402 = vmatmul.bf16.gmra.mxu3 %v4327_v30  ;;  %v4339_v25 = vor.u32 %v4770_v61, %v4336_v9  ;;  %v4677_v61 = vld [vmem:[%s4943_s15 + $0x1fc] sm:$0xf]  ;;  %v3964_v9 = vld [vmem:[%s4943_s15 + $0x204] sm:$0xf0] }
 0x15c   : > { %2242 = vmatmul.bf16.gmra.mxu1 %v3943_v13 }
 0x15d   : > { %v2533_v28 = vadd.f32 %v2532_v39, %v2204_v45  ;;  %v4682_v45 = vld [vmem:[%s4943_s15 + $0x220] sm:$0xf0] }
 0x15e   : > { %v5327_v47 = vpop.f32.mrf.mxu3 }
 0x15f   : > { %2819 = vst.msk [vmem:[%s5072_s22 + $0xb0] sm:$0xff] %vm1617_vm0, %v2533_v28  ;;  %v2968_v51 = vsel %vm1617_vm0, %v2533_v28, 0.0  ;;  %v3209_v52 = vmul.f32 %v2533_v28, %v2533_v28 }
 0x160   : > { %v2969_v54 = vadd.f32 %v2968_v51, %v2967_v31  ;;  %v2539_v46 = vpop.f32.mrf.mxu2  ;;  %v1876_v59 = vpop.f32.mrf.mxu0 }
 0x161   : > { %v3358_v39 = vsel %vm1617_vm0, %v3209_v52, 0.0  ;;  %v1877_v60 = vadd.f32 %v5063_v62, %v1876_v59  ;;  %v2205_v0 = vpop.f32.mrf.mxu1  ;;  %v5361_v52 = vld [vmem:[%s6482_s2] ss:$0 sm:$0xff] }
 0x162   : > { %v3359_v4 = vadd.f32 %v3358_v39, %v3357_v43  ;;  %v3982_v43 = vld [vmem:[%s4943_s15 + $0x218] sm:$0xf] }
 0x163   : > { %v2206_v55 = vadd.f32 %v2205_v0, %v1877_v60  ;;  %v3983_v39 = vor.u32 %v4682_v45, %v3982_v43  ;;  %v4685_v43 = vld [vmem:[%s4943_s15 + $0x238] sm:$0xf0] }
 0x165   : > { %v2535_v12 = vadd.f32 %v2534_v63, %v2206_v55  ;;  %4569 = vmatmul.msk.bf16.gmra.mxu2 %vm1617_vm0, %v3971_v3  ;;  %v3955_v63 = vor.u32 %v4674_v14, %v3952_v7  ;;  %v3962_v3 = vld [vmem:[%s4943_s15 + $0x1f8] sm:$0xf]  ;;  %v4773_v55 = vld [vmem:[%s4943_s15 + $0x4fc] sm:$0xf] }
 0x166   : > { %v5343_v15 = vpop.f32.mrf.mxu3 }
 0x167   : > { %2820 = vst.msk [vmem:[%s5072_s22 + $0xb8] sm:$0xff] %vm1617_vm0, %v2535_v12  ;;  %v2970_v20 = vsel %vm1617_vm0, %v2535_v12, 0.0  ;;  %v3210_v22 = vmul.f32 %v2535_v12, %v2535_v12 }
 0x168   : > { %v2971_v19 = vadd.f32 %v2970_v20, %v2969_v54  ;;  %v2542_v29 = vpop.f32.mrf.mxu2  ;;  %v1879_v24 = vpop.f32.mrf.mxu0 }
 0x169   : > { %v3360_v30 = vsel %vm1617_vm0, %v3210_v22, 0.0  ;;  %v1880_v31 = vadd.f32 %v5063_v62, %v1879_v24  ;;  %v2208_v37 = vpop.f32.mrf.mxu1  ;;  %v4351_v22 = vor.u32 %v4773_v55, %v4348_v6  ;;  %v4360_v55 = vld [vmem:[%s4943_s15 + $0x51c] sm:$0xf0] }
 0x16a   : > { %v3361_v13 = vadd.f32 %v3360_v30, %v3359_v4  ;;  %v4678_v4 = vld [vmem:[%s4943_s15 + $0x200] sm:$0xf0] }
 0x16b   : > { %v2209_v38 = vadd.f32 %v2208_v37, %v1880_v31  ;;  %1918 = vmatmul.bf16.gmra.mxu0 %v3951_v23  ;;  %2407 = vmatmul.bf16.gmra.mxu3 %v4339_v25  ;;  %v3963_v20 = vor.u32 %v4678_v4, %v3962_v3  ;;  %v4681_v3 = vld [vmem:[%s4943_s15 + $0x218] sm:$0xf0]  ;;  %v4776_v4 = vld [vmem:[%s4943_s15 + $0x514] sm:$0xf] }
 0x16c   : > { %2247 = vmatmul.bf16.gmra.mxu1 %v3955_v63 }
 0x16d   : > { %v2538_v41 = vadd.f32 %v2537_v32, %v2209_v38 }
 0x16e   : > { %v5350_v42 = vpop.f32.mrf.mxu3 }
 0x16f   : > { %2821 = vst.msk [vmem:[%s5072_s22 + $0xc0] sm:$0xff] %vm1617_vm0, %v2538_v41  ;;  %v2972_v28 = vsel %vm1617_vm0, %v2538_v41, 0.0  ;;  %v3211_v62 = vmul.f32 %v2538_v41, %v2538_v41  ;;  %v3994_v41 = vld [vmem:[%s4943_s15 + $0x230] sm:$0xf] }
 0x170   : > { %v2973_v49 = vadd.f32 %v2972_v28, %v2971_v19  ;;  %v2544_v50 = vpop.f32.mrf.mxu2  ;;  %v1881_v51 = vpop.f32.mrf.mxu0 }
 0x171   : > { %v3362_v32 = vsel %vm1617_vm0, %v3211_v62, 0.0  ;;  %v1882_v54 = vadd.f32 %v5361_v52, %v1881_v51  ;;  %v2210_v59 = vpop.f32.mrf.mxu1 }
 0x172   : > { %v3363_v60 = vadd.f32 %v3362_v32, %v3361_v13 }
 0x173   : > { %v2211_v0 = vadd.f32 %v2210_v59, %v1882_v54  ;;  %v3995_v59 = vor.u32 %v4685_v43, %v3994_v41  ;;  %v4006_v43 = vld [vmem:[%s4943_s15 + $0x248] sm:$0xf] }
 0x175   : > { %v2540_v8 = vadd.f32 %v2539_v46, %v2211_v0  ;;  %4570 = vmatmul.msk.bf16.gmra.mxu2 %vm1617_vm0, %v3983_v39  ;;  %v3967_v46 = vor.u32 %v4677_v61, %v3964_v9  ;;  %v3974_v0 = vld [vmem:[%s4943_s15 + $0x210] sm:$0xf]  ;;  %v3976_v61 = vld [vmem:[%s4943_s15 + $0x21c] sm:$0xf0] }
 0x176   : > { %v5371_v12 = vpop.f32.mrf.mxu3 }
 0x177   : > { %2822 = vst.msk [vmem:[%s5072_s22 + $0xc8] sm:$0xff] %vm1617_vm0, %v2540_v8  ;;  %v2974_v14 = vsel %vm1617_vm0, %v2540_v8, 0.0  ;;  %v3212_v7 = vmul.f32 %v2540_v8, %v2540_v8  ;;  %v4680_v8 = vld [vmem:[%s4943_s15 + $0x214] sm:$0xf] }
 0x178   : > { %v2975_v23 = vadd.f32 %v2974_v14, %v2973_v49  ;;  %v2547_v25 = vpop.f32.mrf.mxu2  ;;  %v1884_v19 = vpop.f32.mrf.mxu0 }
 0x179   : > { %v3364_v24 = vsel %vm1617_vm0, %v3212_v7, 0.0  ;;  %v1885_v63 = vadd.f32 %v5361_v52, %v1884_v19  ;;  %v2213_v30 = vpop.f32.mrf.mxu1 }
 0x17a   : > { %v3365_v31 = vadd.f32 %v3364_v24, %v3363_v60 }
 0x17b   : > { %v2214_v37 = vadd.f32 %v2213_v30, %v1885_v63  ;;  %1923 = vmatmul.bf16.gmra.mxu0 %v3963_v20  ;;  %2412 = vmatmul.bf16.gmra.mxu3 %v4351_v22  ;;  %v3975_v20 = vor.u32 %v4681_v3, %v3974_v0  ;;  %v4363_v22 = vor.u32 %v4776_v4, %v4360_v55  ;;  %v3986_v3 = vld [vmem:[%s4943_s15 + $0x228] sm:$0xf]  ;;  %v4684_v4 = vld [vmem:[%s4943_s15 + $0x230] sm:$0xf0]  ;;  %v4779_v55 = vld [vmem:[%s4943_s15 + $0x52c] sm:$0xf] }
 0x17c   : > { %2252 = vmatmul.bf16.gmra.mxu1 %v3967_v46 }
 0x17d   : > { %v2543_v13 = vadd.f32 %v2542_v29, %v2214_v37 }
 0x17e   : > { %v5378_v38 = vpop.f32.mrf.mxu3 }
 0x17f   : > { %2823 = vst.msk [vmem:[%s5072_s22 + $0xd0] sm:$0xff] %vm1617_vm0, %v2543_v13  ;;  %v2976_v45 = vsel %vm1617_vm0, %v2543_v13, 0.0  ;;  %v3213_v28 = vmul.f32 %v2543_v13, %v2543_v13 }
 0x180   : > { %v2977_v62 = vadd.f32 %v2976_v45, %v2975_v23  ;;  %v2549_v49 = vpop.f32.mrf.mxu2  ;;  %v1886_v51 = vpop.f32.mrf.mxu0  ;;  %v4688_v45 = vld [vmem:[%s4943_s15 + $0x250] sm:$0xf0] }
 0x181   : > { %v3366_v29 = vsel %vm1617_vm0, %v3213_v28, 0.0  ;;  %v1887_v32 = vadd.f32 %v5361_v52, %v1886_v51  ;;  %v2215_v54 = vpop.f32.mrf.mxu1 }
 0x182   : > { %v3367_v39 = vadd.f32 %v3366_v29, %v3365_v31 }
 0x183   : > { %v2216_v60 = vadd.f32 %v2215_v54, %v1887_v32 }
 0x185   : > { %v2545_v6 = vadd.f32 %v2544_v50, %v2216_v60  ;;  %4571 = vmatmul.msk.bf16.gmra.mxu2 %vm1617_vm0, %v3995_v59  ;;  %v3979_v50 = vor.u32 %v4680_v8, %v3976_v61  ;;  %v4683_v61 = vld [vmem:[%s4943_s15 + $0x22c] sm:$0xf] }
 0x186   : > { %v5394_v9 = vpop.f32.mrf.mxu3 }
 0x187   : > { %2824 = vst.msk [vmem:[%s5072_s22 + $0xd8] sm:$0xff] %vm1617_vm0, %v2545_v6  ;;  %v2978_v14 = vsel %vm1617_vm0, %v2545_v6, 0.0  ;;  %v3214_v7 = vmul.f32 %v2545_v6, %v2545_v6  ;;  %v4372_v6 = vld [vmem:[%s4943_s15 + $0x534] sm:$0xf0] }
 0x188   : > { %v2979_v23 = vadd.f32 %v2978_v14, %v2977_v62  ;;  %v2552_v19 = vpop.f32.mrf.mxu2  ;;  %v1889_v46 = vpop.f32.mrf.mxu0  ;;  %v3988_v14 = vld [vmem:[%s4943_s15 + $0x234] sm:$0xf0] }
 0x189   : > { %v3368_v24 = vsel %vm1617_vm0, %v3214_v7, 0.0  ;;  %v1890_v63 = vadd.f32 %v5361_v52, %v1889_v46  ;;  %v2218_v30 = vpop.f32.mrf.mxu1  ;;  %v4375_v46 = vor.u32 %v4779_v55, %v4372_v6  ;;  %v3998_v6 = vld [vmem:[%s4943_s15 + $0x240] sm:$0xf] }
 0x18a   : > { %v3369_v31 = vadd.f32 %v3368_v24, %v3367_v39  ;;  %v4007_v39 = vor.u32 %v4688_v45, %v4006_v43 }
 0x18b   : > { %v2219_v37 = vadd.f32 %v2218_v30, %v1890_v63  ;;  %1928 = vmatmul.bf16.gmra.mxu0 %v3975_v20  ;;  %2417 = vmatmul.bf16.gmra.mxu3 %v4363_v22 }
 0x18c   : > { %2257 = vmatmul.bf16.gmra.mxu1 %v3979_v50 }
 0x18d   : > { %v2548_v13 = vadd.f32 %v2547_v25, %v2219_v37 }
 0x18e   : > { %v5401_v41 = vpop.f32.mrf.mxu3 }
 0x18f   : > { %2825 = vst.msk [vmem:[%s5072_s22 + $0xe0] sm:$0xff] %vm1617_vm0, %v2548_v13  ;;  %v2980_v28 = vsel %vm1617_vm0, %v2548_v13, 0.0  ;;  %v3215_v62 = vmul.f32 %v2548_v13, %v2548_v13 }
 0x190   : > { %v2981_v51 = vadd.f32 %v2980_v28, %v2979_v23  ;;  %v2554_v29 = vpop.f32.mrf.mxu2  ;;  %v1891_v32 = vpop.f32.mrf.mxu0  ;;  %v3987_v23 = vor.u32 %v4684_v4, %v3986_v3 }
 0x191   : > { %v3370_v25 = vsel %vm1617_vm0, %v3215_v62, 0.0  ;;  %v1892_v54 = vadd.f32 %v5361_v52, %v1891_v32  ;;  %v2220_v59 = vpop.f32.mrf.mxu1  ;;  %v4018_v62 = vld [vmem:[%s4943_s15 + $0x260] sm:$0xf] }
 0x192   : > { %v3371_v60 = vadd.f32 %v3370_v25, %v3369_v31 }
 0x193   : > { %v2221_v0 = vadd.f32 %v2220_v59, %v1892_v54 }
 0x195   : > { %v2550_v8 = vadd.f32 %v2549_v49, %v2221_v0  ;;  %4572 = vmatmul.msk.bf16.gmra.mxu2 %vm1617_vm0, %v4007_v39  ;;  %v3991_v49 = vor.u32 %v4683_v61, %v3988_v14  ;;  %v4782_v61 = vld [vmem:[%s4943_s15 + $0x544] sm:$0xf]  ;;  %v4384_v14 = vld [vmem:[%s4943_s15 + $0x54c] sm:$0xf0] }
 0x196   : > { %v5417_v7 = vpop.f32.mrf.mxu3 }
 0x197   : > { %2826 = vst.msk [vmem:[%s5072_s22 + $0xe8] sm:$0xff] %vm1617_vm0, %v2550_v8  ;;  %v2982_v20 = vsel %vm1617_vm0, %v2550_v8, 0.0  ;;  %v3216_v22 = vmul.f32 %v2550_v8, %v2550_v8  ;;  %v4687_v8 = vld [vmem:[%s4943_s15 + $0x248] sm:$0xf0] }
 0x198   : > { %v2983_v50 = vadd.f32 %v2982_v20, %v2981_v51  ;;  %v2557_v24 = vpop.f32.mrf.mxu2  ;;  %v1894_v63 = vpop.f32.mrf.mxu0  ;;  %v4691_v51 = vld [vmem:[%s4943_s15 + $0x268] sm:$0xf0] }
 0x199   : > { %v3372_v30 = vsel %vm1617_vm0, %v3216_v22, 0.0  ;;  %v1895_v31 = vadd.f32 %v5361_v52, %v1894_v63  ;;  %v2223_v37 = vpop.f32.mrf.mxu1  ;;  %v4019_v3 = vor.u32 %v4691_v51, %v4018_v62  ;;  %v4686_v22 = vld [vmem:[%s4943_s15 + $0x244] sm:$0xf] }
 0x19a   : > { %v3373_v13 = vadd.f32 %v3372_v30, %v3371_v60  ;;  %v4387_v30 = vor.u32 %v4782_v61, %v4384_v14 }
 0x19b   : > { %v2224_v43 = vadd.f32 %v2223_v37, %v1895_v31  ;;  %1933 = vmatmul.bf16.gmra.mxu0 %v3987_v23  ;;  %2422 = vmatmul.bf16.gmra.mxu3 %v4375_v46  ;;  %v4000_v23 = vld [vmem:[%s4943_s15 + $0x24c] sm:$0xf0] }
 0x19c   : > { %2262 = vmatmul.bf16.gmra.mxu1 %v3991_v49  ;;  %v3999_v49 = vor.u32 %v4687_v8, %v3998_v6 }
 0x19d   : > { %v2553_v45 = vadd.f32 %v2552_v19, %v2224_v43 }
 0x19e   : > { %v5424_v28 = vpop.f32.mrf.mxu3 }
 0x19f   : > { %2827 = vst.msk [vmem:[%s5072_s22 + $0xf0] sm:$0xff] %vm1617_vm0, %v2553_v45  ;;  %v2984_v32 = vsel %vm1617_vm0, %v2553_v45, 0.0  ;;  %v3217_v25 = vmul.f32 %v2553_v45, %v2553_v45 }
 0x1a0   : > { %v2985_v54 = vadd.f32 %v2984_v32, %v2983_v50  ;;  %v2559_v59 = vpop.f32.mrf.mxu2  ;;  %v1896_v39 = vpop.f32.mrf.mxu0 }
 0x1a1   : > { %v3374_v19 = vsel %vm1617_vm0, %v3217_v25, 0.0  ;;  %v1897_v60 = vadd.f32 %v5361_v52, %v1896_v39  ;;  %v2225_v0 = vpop.f32.mrf.mxu1  ;;  %v2060_v25 = vadd.f32 %v5361_v52, %v5074_v10 }
 0x1a2   : > { %v3375_v4 = vadd.f32 %v3374_v19, %v3373_v13  ;;  %v4030_v19 = vld [vmem:[%s4943_s15 + $0x278] sm:$0xf] }
 0x1a3   : > { %v2226_v55 = vadd.f32 %v2225_v0, %v1897_v60  ;;  %v4694_v60 = vld [vmem:[%s4943_s15 + $0x280] sm:$0xf0] }
 0x1a4   : > { %v4031_v14 = vor.u32 %v4694_v60, %v4030_v19 }
 0x1a5   : > { %v2555_v20 = vadd.f32 %v2554_v29, %v2226_v55  ;;  %4573 = vmatmul.msk.bf16.gmra.mxu2 %vm1617_vm0, %v4019_v3  ;;  %v4003_v29 = vor.u32 %v4686_v22, %v4000_v23  ;;  %v4010_v23 = vld [vmem:[%s4943_s15 + $0x258] sm:$0xf] }
 0x1a6   : > { %v5440_v46 = vpop.f32.mrf.mxu3 }
 0x1a7   : > { %2828 = vst.msk [vmem:[%s5072_s22 + $0xf8] sm:$0xff] %vm1617_vm0, %v2555_v20  ;;  %v2986_v50 = vsel %vm1617_vm0, %v2555_v20, 0.0  ;;  %v3218_v63 = vmul.f32 %v2555_v20, %v2555_v20 }
 0x1a8   : > { %v2987_v31 = vadd.f32 %v2986_v50, %v2985_v54  ;;  %v2562_v37 = vpop.f32.mrf.mxu2  ;;  %v1899_v13 = vpop.f32.mrf.mxu0  ;;  %v4690_v50 = vld [vmem:[%s4943_s15 + $0x260] sm:$0xf0] }
 0x1a9   : > { %v3376_v43 = vsel %vm1617_vm0, %v3218_v63, 0.0  ;;  %v1900_v45 = vadd.f32 %v5361_v52, %v1899_v13  ;;  %v2228_v62 = vpop.f32.mrf.mxu1  ;;  %v4785_v63 = vld [vmem:[%s4943_s15 + $0x55c] sm:$0xf] }
 0x1aa   : > { %v3377_v51 = vadd.f32 %v3376_v43, %v3375_v4  ;;  %v4689_v13 = vld [vmem:[%s4943_s15 + $0x25c] sm:$0xf] }
 0x1ab   : > { %v2229_v32 = vadd.f32 %v2228_v62, %v1900_v45  ;;  %1938 = vmatmul.bf16.gmra.mxu0 %v3999_v49  ;;  %2427 = vmatmul.bf16.gmra.mxu3 %v4387_v30  ;;  %v4396_v49 = vld [vmem:[%s4943_s15 + $0x564] sm:$0xf0]  ;;  %v2062_v30 = vadd.f32 %v5361_v52, %v5088_v27  ;;  %v4011_v45 = vor.u32 %v4690_v50, %v4010_v23 }
 0x1ac   : > { %2267 = vmatmul.bf16.gmra.mxu1 %v4003_v29  ;;  %v4012_v29 = vld [vmem:[%s4943_s15 + $0x264] sm:$0xf0] }
 0x1ad   : > { %v2558_v39 = vadd.f32 %v2557_v24, %v2229_v32 }
 0x1ae   : > { %v2388_v54 = vpop.f32.mrf.mxu3 }
 0x1af   : > { %2829 = vst.msk [vmem:[%s5072_s22 + $0x100] sm:$0xff] %vm1617_vm0, %v2558_v39  ;;  %v2988_v0 = vsel %vm1617_vm0, %v2558_v39, 0.0  ;;  %v3219_v3 = vmul.f32 %v2558_v39, %v2558_v39  ;;  %v5454_v4 = vadd.f32 %v2388_v54, %v2060_v25  ;;  %v4399_v25 = vor.u32 %v4785_v63, %v4396_v49 }
 0x1b0   : > { %v2989_v55 = vadd.f32 %v2988_v0, %v2987_v31  ;;  %v2564_v6 = vpop.f32.mrf.mxu2  ;;  %v1901_v10 = vpop.f32.mrf.mxu0 }
 0x1b1   : > { %v3378_v24 = vsel %vm1617_vm0, %v3219_v3, 0.0  ;;  %v1902_v8 = vadd.f32 %v5361_v52, %v1901_v10  ;;  %v2230_v61 = vpop.f32.mrf.mxu1 }
 0x1b2   : > { %v3379_v20 = vadd.f32 %v3378_v24, %v3377_v51  ;;  %v2065_v24 = vadd.f32 %v5361_v52, %v5097_v44 }
 0x1b3   : > { %v2231_v22 = vadd.f32 %v2230_v61, %v1902_v8  ;;  %v4042_v61 = vld [vmem:[%s4943_s15 + $0x290] sm:$0xf] }
 0x1b5   : > { %v2560_v31 = vadd.f32 %v2559_v59, %v2231_v22  ;;  %4574 = vmatmul.msk.bf16.gmra.mxu2 %vm1617_vm0, %v4031_v14  ;;  %v4015_v59 = vor.u32 %v4689_v13, %v4012_v29  ;;  %v4697_v14 = vld [vmem:[%s4943_s15 + $0x298] sm:$0xf0] }
 0x1b6   : > { %v2390_v43 = vpop.f32.mrf.mxu3 }
 0x1b7   : > { %2830 = vst.msk [vmem:[%s5072_s22 + $0x108] sm:$0xff] %vm1617_vm0, %v2560_v31  ;;  %v2990_v62 = vsel %vm1617_vm0, %v2560_v31, 0.0  ;;  %v3220_v51 = vmul.f32 %v2560_v31, %v2560_v31  ;;  %v5470_v32 = vadd.f32 %v2390_v43, %v2062_v30  ;;  %v4043_v31 = vor.u32 %v4697_v14, %v4042_v61  ;;  %v4022_v43 = vld [vmem:[%s4943_s15 + $0x270] sm:$0xf] }
 0x1b8   : > { %v2991_v39 = vadd.f32 %v2990_v62, %v2989_v55  ;;  %v2567_v54 = vpop.f32.mrf.mxu2  ;;  %v1904_v27 = vpop.f32.mrf.mxu0  ;;  %v4788_v62 = vld [vmem:[%s4943_s15 + $0x574] sm:$0xf] }
 0x1b9   : > { %v3380_v19 = vsel %vm1617_vm0, %v3220_v51, 0.0  ;;  %v1905_v60 = vadd.f32 %v5361_v52, %v1904_v27  ;;  %v2233_v0 = vpop.f32.mrf.mxu1  ;;  %v4408_v51 = vld [vmem:[%s4943_s15 + $0x57c] sm:$0xf0]  ;;  %v4692_v27 = vld [vmem:[%s4943_s15 + $0x274] sm:$0xf] }
 0x1ba   : > { %v3381_v3 = vadd.f32 %v3380_v19, %v3379_v20 }
 0x1bb   : > { %v2234_v10 = vadd.f32 %v2233_v0, %v1905_v60  ;;  %1943 = vmatmul.bf16.gmra.mxu0 %v4011_v45  ;;  %2432 = vmatmul.bf16.gmra.mxu3 %v4399_v25  ;;  %v4693_v45 = vld [vmem:[%s4943_s15 + $0x278] sm:$0xf0]  ;;  %v2067_v25 = vadd.f32 %v5361_v52, %v5113_v2 }
 0x1bc   : > { %2272 = vmatmul.bf16.gmra.mxu1 %v4015_v59  ;;  %v4024_v59 = vld [vmem:[%s4943_s15 + $0x27c] sm:$0xf0]  ;;  %v4023_v60 = vor.u32 %v4693_v45, %v4022_v43 }
 0x1bd   : > { %v2563_v8 = vadd.f32 %v2562_v37, %v2234_v10 }
 0x1be   : > { %v2393_v55 = vpop.f32.mrf.mxu3 }
 0x1bf   : > { %2831 = vst.msk [vmem:[%s5072_s22 + $0x110] sm:$0xff] %vm1617_vm0, %v2563_v8  ;;  %v2992_v22 = vsel %vm1617_vm0, %v2563_v8, 0.0  ;;  %v3221_v20 = vmul.f32 %v2563_v8, %v2563_v8  ;;  %v5481_v23 = vadd.f32 %v2393_v55, %v2065_v24  ;;  %v4411_v24 = vor.u32 %v4788_v62, %v4408_v51 }
 0x1c0   : > { %v2993_v50 = vadd.f32 %v2992_v22, %v2991_v39  ;;  %v2569_v63 = vpop.f32.mrf.mxu2  ;;  %v1906_v44 = vpop.f32.mrf.mxu0 }
 0x1c1   : > { %v3382_v37 = vsel %vm1617_vm0, %v3221_v20, 0.0  ;;  %v1907_v49 = vadd.f32 %v5361_v52, %v1906_v44  ;;  %v2235_v30 = vpop.f32.mrf.mxu1 }
 0x1c2   : > { %v3383_v13 = vadd.f32 %v3382_v37, %v3381_v3  ;;  %v2070_v37 = vadd.f32 %v5361_v52, %v5120_v18 }
 0x1c3   : > { %v2236_v29 = vadd.f32 %v2235_v30, %v1907_v49  ;;  %v4054_v30 = vld [vmem:[%s4943_s15 + $0x2a8] sm:$0xf] }
 0x1c5   : > { %v2565_v39 = vadd.f32 %v2564_v6, %v2236_v29  ;;  %4575 = vmatmul.msk.bf16.gmra.mxu2 %vm1617_vm0, %v4043_v31  ;;  %v4027_v6 = vor.u32 %v4692_v27, %v4024_v59  ;;  %v4700_v31 = vld [vmem:[%s4943_s15 + $0x2b0] sm:$0xf0] }
 0x1c6   : > { %v2395_v19 = vpop.f32.mrf.mxu3 }
 0x1c7   : > { %2832 = vst.msk [vmem:[%s5072_s22 + $0x118] sm:$0xff] %vm1617_vm0, %v2565_v39  ;;  %v2994_v0 = vsel %vm1617_vm0, %v2565_v39, 0.0  ;;  %v3222_v3 = vmul.f32 %v2565_v39, %v2565_v39  ;;  %v5497_v10 = vadd.f32 %v2395_v19, %v2067_v25  ;;  %v4055_v39 = vor.u32 %v4700_v31, %v4054_v30  ;;  %v4034_v19 = vld [vmem:[%s4943_s15 + $0x288] sm:$0xf] }
 0x1c8   : > { %v2995_v8 = vadd.f32 %v2994_v0, %v2993_v50  ;;  %v2572_v55 = vpop.f32.mrf.mxu2  ;;  %v1909_v2 = vpop.f32.mrf.mxu0  ;;  %v4791_v0 = vld [vmem:[%s4943_s15 + $0x58c] sm:$0xf] }
 0x1c9   : > { %v3384_v61 = vsel %vm1617_vm0, %v3222_v3, 0.0  ;;  %v1910_v14 = vadd.f32 %v5361_v52, %v1909_v2  ;;  %v2238_v22 = vpop.f32.mrf.mxu1  ;;  %v4420_v3 = vld [vmem:[%s4943_s15 + $0x594] sm:$0xf0]  ;;  %v4695_v2 = vld [vmem:[%s4943_s15 + $0x28c] sm:$0xf] }
 0x1ca   : > { %v3385_v20 = vadd.f32 %v3384_v61, %v3383_v13 }
 0x1cb   : > { %v2239_v44 = vadd.f32 %v2238_v22, %v1910_v14  ;;  %1948 = vmatmul.bf16.gmra.mxu0 %v4023_v60  ;;  %2437 = vmatmul.bf16.gmra.mxu3 %v4411_v24  ;;  %v4696_v60 = vld [vmem:[%s4943_s15 + $0x290] sm:$0xf0]  ;;  %v2072_v24 = vadd.f32 %v5361_v52, %v5136_v40 }
 0x1cc   : > { %2277 = vmatmul.bf16.gmra.mxu1 %v4027_v6  ;;  %v4036_v6 = vld [vmem:[%s4943_s15 + $0x294] sm:$0xf0]  ;;  %v4035_v14 = vor.u32 %v4696_v60, %v4034_v19 }
 0x1cd   : > { %v2568_v49 = vadd.f32 %v2567_v54, %v2239_v44 }
 0x1ce   : > { %v2398_v50 = vpop.f32.mrf.mxu3 }
 0x1cf   : > { %2833 = vst.msk [vmem:[%s5072_s22 + $0x120] sm:$0xff] %vm1617_vm0, %v2568_v49  ;;  %v2996_v29 = vsel %vm1617_vm0, %v2568_v49, 0.0  ;;  %v3223_v13 = vmul.f32 %v2568_v49, %v2568_v49  ;;  %v5508_v43 = vadd.f32 %v2398_v50, %v2070_v37  ;;  %v4423_v37 = vor.u32 %v4791_v0, %v4420_v3 }
 0x1d0   : > { %v2997_v45 = vadd.f32 %v2996_v29, %v2995_v8  ;;  %v2574_v62 = vpop.f32.mrf.mxu2  ;;  %v1911_v18 = vpop.f32.mrf.mxu0 }
 0x1d1   : > { %v3386_v54 = vsel %vm1617_vm0, %v3223_v13, 0.0  ;;  %v1912_v51 = vadd.f32 %v5361_v52, %v1911_v18  ;;  %v2240_v25 = vpop.f32.mrf.mxu1 }
 0x1d2   : > { %v3387_v27 = vadd.f32 %v3386_v54, %v3385_v20  ;;  %v2075_v54 = vadd.f32 %v5361_v52, %v5143_v56 }
 0x1d3   : > { %v2241_v59 = vadd.f32 %v2240_v25, %v1912_v51  ;;  %v4066_v25 = vld [vmem:[%s4943_s15 + $0x2c0] sm:$0xf] }
 0x1d5   : > { %v2570_v8 = vadd.f32 %v2569_v63, %v2241_v59  ;;  %4576 = vmatmul.msk.bf16.gmra.mxu2 %vm1617_vm0, %v4055_v39  ;;  %v4039_v63 = vor.u32 %v4695_v2, %v4036_v6  ;;  %v4703_v39 = vld [vmem:[%s4943_s15 + $0x2c8] sm:$0xf0] }
 0x1d6   : > { %v2400_v61 = vpop.f32.mrf.mxu3 }
 0x1d7   : > { %2834 = vst.msk [vmem:[%s5072_s22 + $0x128] sm:$0xff] %vm1617_vm0, %v2570_v8  ;;  %v2998_v22 = vsel %vm1617_vm0, %v2570_v8, 0.0  ;;  %v3224_v20 = vmul.f32 %v2570_v8, %v2570_v8  ;;  %v5524_v44 = vadd.f32 %v2400_v61, %v2072_v24  ;;  %v4067_v8 = vor.u32 %v4703_v39, %v4066_v25  ;;  %v4046_v61 = vld [vmem:[%s4943_s15 + $0x2a0] sm:$0xf] }
 0x1d8   : > { %v2999_v49 = vadd.f32 %v2998_v22, %v2997_v45  ;;  %v2577_v50 = vpop.f32.mrf.mxu2  ;;  %v1914_v40 = vpop.f32.mrf.mxu0  ;;  %v4794_v22 = vld [vmem:[%s4943_s15 + $0x5a4] sm:$0xf] }
 0x1d9   : > { %v3388_v30 = vsel %vm1617_vm0, %v3224_v20, 0.0  ;;  %v1915_v31 = vadd.f32 %v5361_v52, %v1914_v40  ;;  %v2243_v29 = vpop.f32.mrf.mxu1  ;;  %v4432_v20 = vld [vmem:[%s4943_s15 + $0x5ac] sm:$0xf0]  ;;  %v4698_v40 = vld [vmem:[%s4943_s15 + $0x2a4] sm:$0xf] }
 0x1da   : > { %v3389_v13 = vadd.f32 %v3388_v30, %v3387_v27 }
 0x1db   : > { %v2244_v18 = vadd.f32 %v2243_v29, %v1915_v31  ;;  %1953 = vmatmul.bf16.gmra.mxu0 %v4035_v14  ;;  %2442 = vmatmul.bf16.gmra.mxu3 %v4423_v37  ;;  %v4699_v14 = vld [vmem:[%s4943_s15 + $0x2a8] sm:$0xf0]  ;;  %v2077_v37 = vadd.f32 %v5361_v52, %v5159_v16 }
 0x1dc   : > { %2282 = vmatmul.bf16.gmra.mxu1 %v4039_v63  ;;  %v4048_v63 = vld [vmem:[%s4943_s15 + $0x2ac] sm:$0xf0]  ;;  %v4047_v31 = vor.u32 %v4699_v14, %v4046_v61 }
 0x1dd   : > { %v2573_v51 = vadd.f32 %v2572_v55, %v2244_v18 }
 0x1de   : > { %v2403_v45 = vpop.f32.mrf.mxu3 }
 0x1df   : > { %2835 = vst.msk [vmem:[%s5072_s22 + $0x130] sm:$0xff] %vm1617_vm0, %v2573_v51  ;;  %v3000_v59 = vsel %vm1617_vm0, %v2573_v51, 0.0  ;;  %v3225_v27 = vmul.f32 %v2573_v51, %v2573_v51  ;;  %v5535_v19 = vadd.f32 %v2403_v45, %v2075_v54  ;;  %v4435_v54 = vor.u32 %v4794_v22, %v4432_v20 }
 0x1e0   : > { %v3001_v60 = vadd.f32 %v3000_v59, %v2999_v49  ;;  %v2579_v0 = vpop.f32.mrf.mxu2  ;;  %v1916_v56 = vpop.f32.mrf.mxu0 }
 0x1e1   : > { %v3390_v55 = vsel %vm1617_vm0, %v3225_v27, 0.0  ;;  %v1917_v3 = vadd.f32 %v5361_v52, %v1916_v56  ;;  %v2245_v24 = vpop.f32.mrf.mxu1 }
 0x1e2   : > { %v3391_v2 = vadd.f32 %v3390_v55, %v3389_v13  ;;  %v2080_v55 = vadd.f32 %v5361_v52, %v5166_v33 }
 0x1e3   : > { %v2246_v6 = vadd.f32 %v2245_v24, %v1917_v3  ;;  %v4078_v24 = vld [vmem:[%s4943_s15 + $0x2d8] sm:$0xf] }
 0x1e5   : > { %v2575_v49 = vadd.f32 %v2574_v62, %v2246_v6  ;;  %4577 = vmatmul.msk.bf16.gmra.mxu2 %vm1617_vm0, %v4067_v8  ;;  %v4051_v62 = vor.u32 %v4698_v40, %v4048_v63  ;;  %v4706_v8 = vld [vmem:[%s4943_s15 + $0x2e0] sm:$0xf0] }
 0x1e6   : > { %v2405_v30 = vpop.f32.mrf.mxu3 }
 0x1e7   : > { %2836 = vst.msk [vmem:[%s5072_s22 + $0x138] sm:$0xff] %vm1617_vm0, %v2575_v49  ;;  %v3002_v29 = vsel %vm1617_vm0, %v2575_v49, 0.0  ;;  %v3226_v13 = vmul.f32 %v2575_v49, %v2575_v49  ;;  %v5551_v18 = vadd.f32 %v2405_v30, %v2077_v37  ;;  %v4079_v49 = vor.u32 %v4706_v8, %v4078_v24  ;;  %v4058_v30 = vld [vmem:[%s4943_s15 + $0x2b8] sm:$0xf] }
 0x1e8   : > { %v3003_v51 = vadd.f32 %v3002_v29, %v3001_v60  ;;  %v2582_v45 = vpop.f32.mrf.mxu2  ;;  %v1919_v16 = vpop.f32.mrf.mxu0  ;;  %v4797_v29 = vld [vmem:[%s4943_s15 + $0x5bc] sm:$0xf] }
 0x1e9   : > { %v3392_v25 = vsel %vm1617_vm0, %v3226_v13, 0.0  ;;  %v1920_v39 = vadd.f32 %v5361_v52, %v1919_v16  ;;  %v2248_v59 = vpop.f32.mrf.mxu1  ;;  %v4444_v13 = vld [vmem:[%s4943_s15 + $0x5c4] sm:$0xf0]  ;;  %v4701_v16 = vld [vmem:[%s4943_s15 + $0x2bc] sm:$0xf] }
 0x1ea   : > { %v3393_v27 = vadd.f32 %v3392_v25, %v3391_v2 }
 0x1eb   : > { %v2249_v56 = vadd.f32 %v2248_v59, %v1920_v39  ;;  %1958 = vmatmul.bf16.gmra.mxu0 %v4047_v31  ;;  %2447 = vmatmul.bf16.gmra.mxu3 %v4435_v54  ;;  %v4702_v31 = vld [vmem:[%s4943_s15 + $0x2c0] sm:$0xf0]  ;;  %v2082_v54 = vadd.f32 %v5361_v52, %v5182_v57 }
 0x1ec   : > { %2287 = vmatmul.bf16.gmra.mxu1 %v4051_v62  ;;  %v4060_v62 = vld [vmem:[%s4943_s15 + $0x2c4] sm:$0xf0]  ;;  %v4059_v39 = vor.u32 %v4702_v31, %v4058_v30 }
 0x1ed   : > { %v2578_v3 = vadd.f32 %v2577_v50, %v2249_v56 }
 0x1ee   : > { %v2408_v60 = vpop.f32.mrf.mxu3 }
 0x1ef   : > { %2837 = vst.msk [vmem:[%s5072_s22 + $0x140] sm:$0xff] %vm1617_vm0, %v2578_v3  ;;  %v3004_v6 = vsel %vm1617_vm0, %v2578_v3, 0.0  ;;  %v3227_v2 = vmul.f32 %v2578_v3, %v2578_v3  ;;  %v5562_v61 = vadd.f32 %v2408_v60, %v2080_v55  ;;  %v4447_v55 = vor.u32 %v4797_v29, %v4444_v13 }
 0x1f0   : > { %v3005_v14 = vadd.f32 %v3004_v6, %v3003_v51  ;;  %v2584_v22 = vpop.f32.mrf.mxu2  ;;  %v1921_v33 = vpop.f32.mrf.mxu0 }
 0x1f1   : > { %v3394_v50 = vsel %vm1617_vm0, %v3227_v2, 0.0  ;;  %v1922_v20 = vadd.f32 %v5361_v52, %v1921_v33  ;;  %v2250_v37 = vpop.f32.mrf.mxu1 }
 0x1f2   : > { %v3395_v40 = vadd.f32 %v3394_v50, %v3393_v27  ;;  %v2085_v50 = vadd.f32 %v5361_v52, %v5189_v11 }
 0x1f3   : > { %v2251_v63 = vadd.f32 %v2250_v37, %v1922_v20  ;;  %v4090_v37 = vld [vmem:[%s4943_s15 + $0x2f0] sm:$0xf] }
 0x1f5   : > { %v2580_v51 = vadd.f32 %v2579_v0, %v2251_v63  ;;  %4578 = vmatmul.msk.bf16.gmra.mxu2 %vm1617_vm0, %v4079_v49  ;;  %v4063_v0 = vor.u32 %v4701_v16, %v4060_v62  ;;  %v4709_v49 = vld [vmem:[%s4943_s15 + $0x2f8] sm:$0xf0] }
 0x1f6   : > { %v2410_v25 = vpop.f32.mrf.mxu3 }
 0x1f7   : > { %2838 = vst.msk [vmem:[%s5072_s22 + $0x148] sm:$0xff] %vm1617_vm0, %v2580_v51  ;;  %v3006_v59 = vsel %vm1617_vm0, %v2580_v51, 0.0  ;;  %v3228_v27 = vmul.f32 %v2580_v51, %v2580_v51  ;;  %v5578_v56 = vadd.f32 %v2410_v25, %v2082_v54  ;;  %v4091_v51 = vor.u32 %v4709_v49, %v4090_v37  ;;  %v4070_v25 = vld [vmem:[%s4943_s15 + $0x2d0] sm:$0xf] }
 0x1f8   : > { %v3007_v3 = vadd.f32 %v3006_v59, %v3005_v14  ;;  %v2587_v60 = vpop.f32.mrf.mxu2  ;;  %v1924_v57 = vpop.f32.mrf.mxu0  ;;  %v4800_v59 = vld [vmem:[%s4943_s15 + $0x5d4] sm:$0xf] }
 0x1f9   : > { %v3396_v24 = vsel %vm1617_vm0, %v3228_v27, 0.0  ;;  %v1925_v8 = vadd.f32 %v5361_v52, %v1924_v57  ;;  %v2253_v6 = vpop.f32.mrf.mxu1  ;;  %v4456_v27 = vld [vmem:[%s4943_s15 + $0x5dc] sm:$0xf0]  ;;  %v4704_v57 = vld [vmem:[%s4943_s15 + $0x2d4] sm:$0xf] }
 0x1fa   : > { %v3397_v2 = vadd.f32 %v3396_v24, %v3395_v40 }
 0x1fb   : > { %v2254_v33 = vadd.f32 %v2253_v6, %v1925_v8  ;;  %1963 = vmatmul.bf16.gmra.mxu0 %v4059_v39  ;;  %2452 = vmatmul.bf16.gmra.mxu3 %v4447_v55  ;;  %v4705_v39 = vld [vmem:[%s4943_s15 + $0x2d8] sm:$0xf0]  ;;  %v2087_v55 = vadd.f32 %v5361_v52, %v5205_v36 }
 0x1fc   : > { %2292 = vmatmul.bf16.gmra.mxu1 %v4063_v0  ;;  %v4072_v0 = vld [vmem:[%s4943_s15 + $0x2dc] sm:$0xf0]  ;;  %v4071_v8 = vor.u32 %v4705_v39, %v4070_v25 }
 0x1fd   : > { %v2583_v20 = vadd.f32 %v2582_v45, %v2254_v33 }
 0x1fe   : > { %v2413_v14 = vpop.f32.mrf.mxu3 }
 0x1ff   : > { %2839 = vst.msk [vmem:[%s5072_s22 + $0x150] sm:$0xff] %vm1617_vm0, %v2583_v20  ;;  %v3008_v63 = vsel %vm1617_vm0, %v2583_v20, 0.0  ;;  %v3229_v40 = vmul.f32 %v2583_v20, %v2583_v20  ;;  %v5589_v30 = vadd.f32 %v2413_v14, %v2085_v50  ;;  %v4459_v50 = vor.u32 %v4800_v59, %v4456_v27 }
 0x200   : > { %v3009_v31 = vadd.f32 %v3008_v63, %v3007_v3  ;;  %v2589_v29 = vpop.f32.mrf.mxu2  ;;  %v1926_v11 = vpop.f32.mrf.mxu0 }
 0x201   : > { %v3398_v45 = vsel %vm1617_vm0, %v3229_v40, 0.0  ;;  %v1927_v13 = vadd.f32 %v5361_v52, %v1926_v11  ;;  %v2255_v54 = vpop.f32.mrf.mxu1 }
 0x202   : > { %v3399_v16 = vadd.f32 %v3398_v45, %v3397_v2  ;;  %v2090_v45 = vadd.f32 %v5361_v52, %v5212_v53 }
 0x203   : > { %v2256_v62 = vadd.f32 %v2255_v54, %v1927_v13  ;;  %v4102_v54 = vld [vmem:[%s4943_s15 + $0x308] sm:$0xf] }
 0x205   : > { %v2585_v3 = vadd.f32 %v2584_v22, %v2256_v62  ;;  %4579 = vmatmul.msk.bf16.gmra.mxu2 %vm1617_vm0, %v4091_v51  ;;  %v4075_v22 = vor.u32 %v4704_v57, %v4072_v0  ;;  %v4712_v51 = vld [vmem:[%s4943_s15 + $0x310] sm:$0xf0] }
 0x206   : > { %v2415_v24 = vpop.f32.mrf.mxu3 }
 0x207   : > { %2840 = vst.msk [vmem:[%s5072_s22 + $0x158] sm:$0xff] %vm1617_vm0, %v2585_v3  ;;  %v3010_v6 = vsel %vm1617_vm0, %v2585_v3, 0.0  ;;  %v3230_v2 = vmul.f32 %v2585_v3, %v2585_v3  ;;  %v5605_v33 = vadd.f32 %v2415_v24, %v2087_v55  ;;  %v4103_v3 = vor.u32 %v4712_v51, %v4102_v54  ;;  %v4082_v24 = vld [vmem:[%s4943_s15 + $0x2e8] sm:$0xf] }
 0x208   : > { %v3011_v20 = vadd.f32 %v3010_v6, %v3009_v31  ;;  %v2592_v14 = vpop.f32.mrf.mxu2  ;;  %v1929_v36 = vpop.f32.mrf.mxu0  ;;  %v4803_v6 = vld [vmem:[%s4943_s15 + $0x5ec] sm:$0xf] }
 0x209   : > { %v3400_v37 = vsel %vm1617_vm0, %v3230_v2, 0.0  ;;  %v1930_v49 = vadd.f32 %v5361_v52, %v1929_v36  ;;  %v2258_v63 = vpop.f32.mrf.mxu1  ;;  %v4468_v2 = vld [vmem:[%s4943_s15 + $0x5f4] sm:$0xf0]  ;;  %v4707_v36 = vld [vmem:[%s4943_s15 + $0x2ec] sm:$0xf] }
 0x20a   : > { %v3401_v40 = vadd.f32 %v3400_v37, %v3399_v16 }
 0x20b   : > { %v2259_v11 = vadd.f32 %v2258_v63, %v1930_v49  ;;  %1968 = vmatmul.bf16.gmra.mxu0 %v4071_v8  ;;  %2457 = vmatmul.bf16.gmra.mxu3 %v4459_v50  ;;  %v4708_v8 = vld [vmem:[%s4943_s15 + $0x2f0] sm:$0xf0]  ;;  %v2092_v50 = vadd.f32 %v5361_v52, %v5228_v17 }
 0x20c   : > { %2297 = vmatmul.bf16.gmra.mxu1 %v4075_v22  ;;  %v4084_v22 = vld [vmem:[%s4943_s15 + $0x2f4] sm:$0xf0]  ;;  %v4083_v49 = vor.u32 %v4708_v8, %v4082_v24 }
 0x20d   : > { %v2588_v13 = vadd.f32 %v2587_v60, %v2259_v11 }
 0x20e   : > { %v2418_v31 = vpop.f32.mrf.mxu3 }
 0x20f   : > { %2841 = vst.msk [vmem:[%s5072_s22 + $0x160] sm:$0xff] %vm1617_vm0, %v2588_v13  ;;  %v3012_v62 = vsel %vm1617_vm0, %v2588_v13, 0.0  ;;  %v3231_v16 = vmul.f32 %v2588_v13, %v2588_v13  ;;  %v5616_v25 = vadd.f32 %v2418_v31, %v2090_v45  ;;  %v4471_v45 = vor.u32 %v4803_v6, %v4468_v2 }
 0x210   : > { %v3013_v39 = vadd.f32 %v3012_v62, %v3011_v20  ;;  %v2594_v59 = vpop.f32.mrf.mxu2  ;;  %v1931_v53 = vpop.f32.mrf.mxu0 }
 0x211   : > { %v3402_v60 = vsel %vm1617_vm0, %v3231_v16, 0.0  ;;  %v1932_v27 = vadd.f32 %v5361_v52, %v1931_v53  ;;  %v2260_v55 = vpop.f32.mrf.mxu1 }
 0x212   : > { %v3403_v57 = vadd.f32 %v3402_v60, %v3401_v40  ;;  %v2095_v60 = vadd.f32 %v5361_v52, %v5235_v35 }
 0x213   : > { %v2261_v0 = vadd.f32 %v2260_v55, %v1932_v27  ;;  %v4114_v55 = vld [vmem:[%s4943_s15 + $0x320] sm:$0xf] }
 0x215   : > { %v2590_v20 = vadd.f32 %v2589_v29, %v2261_v0  ;;  %4580 = vmatmul.msk.bf16.gmra.mxu2 %vm1617_vm0, %v4103_v3  ;;  %v4087_v29 = vor.u32 %v4707_v36, %v4084_v22  ;;  %v4715_v3 = vld [vmem:[%s4943_s15 + $0x328] sm:$0xf0] }
 0x216   : > { %v2420_v37 = vpop.f32.mrf.mxu3 }
 0x217   : > { %2842 = vst.msk [vmem:[%s5072_s22 + $0x168] sm:$0xff] %vm1617_vm0, %v2590_v20  ;;  %v3014_v63 = vsel %vm1617_vm0, %v2590_v20, 0.0  ;;  %v3232_v40 = vmul.f32 %v2590_v20, %v2590_v20  ;;  %v5632_v11 = vadd.f32 %v2420_v37, %v2092_v50  ;;  %v4115_v20 = vor.u32 %v4715_v3, %v4114_v55  ;;  %v4094_v37 = vld [vmem:[%s4943_s15 + $0x300] sm:$0xf] }
 0x218   : > { %v3015_v13 = vadd.f32 %v3014_v63, %v3013_v39  ;;  %v2597_v31 = vpop.f32.mrf.mxu2  ;;  %v1934_v17 = vpop.f32.mrf.mxu0  ;;  %v4318_v63 = vld [vmem:[%s4943_s15 + $0x4b8] sm:$0xf]  ;;  %v5665_v55 = vld [vmem:[%s6482_s2] ss:$0 sm:$0xff] }
 0x219   : > { %v3404_v54 = vsel %vm1617_vm0, %v3232_v40, 0.0  ;;  %v1935_v51 = vadd.f32 %v5361_v52, %v1934_v17  ;;  %v2263_v62 = vpop.f32.mrf.mxu1  ;;  %v4766_v40 = vld [vmem:[%s4943_s15 + $0x4c0] sm:$0xf0] }
 0x21a   : > { %v3405_v16 = vadd.f32 %v3404_v54, %v3403_v57  ;;  %v4710_v17 = vld [vmem:[%s4943_s15 + $0x304] sm:$0xf] }
 0x21b   : > { %v2264_v53 = vadd.f32 %v2263_v62, %v1935_v51  ;;  %1973 = vmatmul.bf16.gmra.mxu0 %v4083_v49  ;;  %2462 = vmatmul.bf16.gmra.mxu3 %v4471_v45  ;;  %v4711_v49 = vld [vmem:[%s4943_s15 + $0x308] sm:$0xf0]  ;;  %v2097_v45 = vadd.f32 %v5361_v52, %v5251_v1 }
 0x21c   : > { %2302 = vmatmul.bf16.gmra.mxu1 %v4087_v29  ;;  %v4096_v29 = vld [vmem:[%s4943_s15 + $0x30c] sm:$0xf0]  ;;  %v4095_v51 = vor.u32 %v4711_v49, %v4094_v37 }
 0x21d   : > { %v2593_v27 = vadd.f32 %v2592_v14, %v2264_v53 }
 0x21e   : > { %v2423_v39 = vpop.f32.mrf.mxu3 }
 0x21f   : > { %2843 = vst.msk [vmem:[%s5072_s22 + $0x170] sm:$0xff] %vm1617_vm0, %v2593_v27  ;;  %v3016_v0 = vsel %vm1617_vm0, %v2593_v27, 0.0  ;;  %v3233_v57 = vmul.f32 %v2593_v27, %v2593_v27  ;;  %v5643_v24 = vadd.f32 %v2423_v39, %v2095_v60  ;;  %v4319_v60 = vor.u32 %v4766_v40, %v4318_v63 }
 0x220   : > { %v3017_v8 = vadd.f32 %v3016_v0, %v3015_v13  ;;  %v2599_v6 = vpop.f32.mrf.mxu2  ;;  %v1936_v35 = vpop.f32.mrf.mxu0 }
 0x221   : > { %v3406_v14 = vsel %vm1617_vm0, %v3233_v57, 0.0  ;;  %v1937_v2 = vadd.f32 %v5361_v52, %v1936_v35  ;;  %v2265_v50 = vpop.f32.mrf.mxu1  ;;  %v4099_v52 = vor.u32 %v4710_v17, %v4096_v29 }
 0x222   : > { %v3407_v36 = vadd.f32 %v3406_v14, %v3405_v16 }
 0x223   : > { %v2266_v22 = vadd.f32 %v2265_v50, %v1937_v2  ;;  %v4126_v50 = vld [vmem:[%s4943_s15 + $0x338] sm:$0xf] }
 0x225   : > { %v2595_v13 = vadd.f32 %v2594_v59, %v2266_v22  ;;  %4581 = vmatmul.msk.bf16.gmra.mxu2 %vm1617_vm0, %v4115_v20  ;;  %v4718_v20 = vld [vmem:[%s4943_s15 + $0x340] sm:$0xf0] }
 0x226   : > { %v2425_v54 = vpop.f32.mrf.mxu3 }
 0x227   : > { %2844 = vst.msk [vmem:[%s5072_s22 + $0x178] sm:$0xff] %vm1617_vm0, %v2595_v13  ;;  %v3018_v62 = vsel %vm1617_vm0, %v2595_v13, 0.0  ;;  %v3234_v16 = vmul.f32 %v2595_v13, %v2595_v13  ;;  %v5659_v53 = vadd.f32 %v2425_v54, %v2097_v45  ;;  %v4127_v13 = vor.u32 %v4718_v20, %v4126_v50  ;;  %v4106_v54 = vld [vmem:[%s4943_s15 + $0x318] sm:$0xf] }
 0x228   : > { %v3019_v27 = vadd.f32 %v3018_v62, %v3017_v8  ;;  %v2602_v39 = vpop.f32.mrf.mxu2  ;;  %v1939_v1 = vpop.f32.mrf.mxu0  ;;  %v2100_v8 = vadd.f32 %v5665_v55, %v5258_v21  ;;  %v4330_v62 = vld [vmem:[%s4943_s15 + $0x4d0] sm:$0xf] }
 0x229   : > { %v3408_v59 = vsel %vm1617_vm0, %v3234_v16, 0.0  ;;  %v1940_v3 = vadd.f32 %v5665_v55, %v1939_v1  ;;  %v2268_v0 = vpop.f32.mrf.mxu1  ;;  %v4769_v16 = vld [vmem:[%s4943_s15 + $0x4d8] sm:$0xf0] }
 0x22a   : > { %v3409_v57 = vadd.f32 %v3408_v59, %v3407_v36  ;;  %v4713_v1 = vld [vmem:[%s4943_s15 + $0x31c] sm:$0xf] }
 0x22b   : > { %v2269_v35 = vadd.f32 %v2268_v0, %v1940_v3  ;;  %1978 = vmatmul.bf16.gmra.mxu0 %v4095_v51  ;;  %4598 = vmatmul.msk.bf16.vlgmr.msra.gmra.mxu3 %vm1617_vm0, %v4319_v60  ;;  %v4714_v51 = vld [vmem:[%s4943_s15 + $0x320] sm:$0xf0]  ;;  %v2102_v60 = vadd.f32 %v5665_v55, %v5274_v48 }
 0x22c   : > { %2307 = vmatmul.bf16.gmra.mxu1 %v4099_v52  ;;  %v4108_v52 = vld [vmem:[%s4943_s15 + $0x324] sm:$0xf0]  ;;  %v4107_v3 = vor.u32 %v4714_v51, %v4106_v54 }
 0x22d   : > { %v2598_v14 = vadd.f32 %v2597_v31, %v2269_v35 }
 0x22e   : > { %v2428_v2 = vpop.f32.mrf.mxu3 }
 0x22f   : > { %2845 = vst.msk [vmem:[%s5072_s22 + $0x180] sm:$0xff] %vm1617_vm0, %v2598_v14  ;;  %v3020_v36 = vsel %vm1617_vm0, %v2598_v14, 0.0  ;;  %v3235_v22 = vmul.f32 %v2598_v14, %v2598_v14  ;;  %v5676_v37 = vadd.f32 %v2428_v2, %v2100_v8  ;;  %v4331_v8 = vor.u32 %v4769_v16, %v4330_v62 }
 0x230   : > { %v3021_v49 = vadd.f32 %v3020_v36, %v3019_v27  ;;  %v2604_v63 = vpop.f32.mrf.mxu2  ;;  %v1941_v21 = vpop.f32.mrf.mxu0 }
 0x231   : > { %v3410_v31 = vsel %vm1617_vm0, %v3235_v22, 0.0  ;;  %v1942_v40 = vadd.f32 %v5665_v55, %v1941_v21  ;;  %v2270_v45 = vpop.f32.mrf.mxu1 }
 0x232   : > { %v3411_v17 = vadd.f32 %v3410_v31, %v3409_v57  ;;  %v2105_v31 = vadd.f32 %v5665_v55, %v5281_v5 }
 0x233   : > { %v2271_v29 = vadd.f32 %v2270_v45, %v1942_v40  ;;  %v4138_v45 = vld [vmem:[%s4943_s15 + $0x350] sm:$0xf] }
 0x235   : > { %v2600_v27 = vadd.f32 %v2599_v6, %v2271_v29  ;;  %4582 = vmatmul.msk.bf16.gmra.mxu2 %vm1617_vm0, %v4127_v13  ;;  %v4111_v6 = vor.u32 %v4713_v1, %v4108_v52  ;;  %v4721_v13 = vld [vmem:[%s4943_s15 + $0x358] sm:$0xf0] }
 0x236   : > { %v2430_v59 = vpop.f32.mrf.mxu3 }
 0x237   : > { %2846 = vst.msk [vmem:[%s5072_s22 + $0x188] sm:$0xff] %vm1617_vm0, %v2600_v27  ;;  %v3022_v0 = vsel %vm1617_vm0, %v2600_v27, 0.0  ;;  %v3236_v57 = vmul.f32 %v2600_v27, %v2600_v27  ;;  %v5692_v35 = vadd.f32 %v2430_v59, %v2102_v60  ;;  %v4139_v27 = vor.u32 %v4721_v13, %v4138_v45  ;;  %v4118_v59 = vld [vmem:[%s4943_s15 + $0x330] sm:$0xf] }
 0x238   : > { %v3023_v14 = vadd.f32 %v3022_v0, %v3021_v49  ;;  %v2607_v2 = vpop.f32.mrf.mxu2  ;;  %v1944_v48 = vpop.f32.mrf.mxu0  ;;  %v4342_v0 = vld [vmem:[%s4943_s15 + $0x4e8] sm:$0xf] }
 0x239   : > { %v3412_v50 = vsel %vm1617_vm0, %v3236_v57, 0.0  ;;  %v1945_v20 = vadd.f32 %v5665_v55, %v1944_v48  ;;  %v2273_v36 = vpop.f32.mrf.mxu1  ;;  %v4772_v57 = vld [vmem:[%s4943_s15 + $0x4f0] sm:$0xf0] }
 0x23a   : > { %v3413_v22 = vadd.f32 %v3412_v50, %v3411_v17  ;;  %v4716_v48 = vld [vmem:[%s4943_s15 + $0x334] sm:$0xf] }
 0x23b   : > { %v2274_v21 = vadd.f32 %v2273_v36, %v1945_v20  ;;  %1983 = vmatmul.bf16.gmra.mxu0 %v4107_v3  ;;  %4599 = vmatmul.msk.bf16.gmra.mxu3 %vm1617_vm0, %v4331_v8  ;;  %v4717_v3 = vld [vmem:[%s4943_s15 + $0x338] sm:$0xf0]  ;;  %v2107_v8 = vadd.f32 %v5665_v55, %v5297_v34 }
 0x23c   : > { %2312 = vmatmul.bf16.gmra.mxu1 %v4111_v6  ;;  %v4120_v6 = vld [vmem:[%s4943_s15 + $0x33c] sm:$0xf0]  ;;  %v4119_v20 = vor.u32 %v4717_v3, %v4118_v59 }
 0x23d   : > { %v2603_v49 = vadd.f32 %v2602_v39, %v2274_v21 }
 0x23e   : > { %v2433_v40 = vpop.f32.mrf.mxu3 }
 0x23f   : > { %2847 = vst.msk [vmem:[%s5072_s22 + $0x190] sm:$0xff] %vm1617_vm0, %v2603_v49  ;;  %v3024_v17 = vsel %vm1617_vm0, %v2603_v49, 0.0  ;;  %v3237_v29 = vmul.f32 %v2603_v49, %v2603_v49  ;;  %v5704_v54 = vadd.f32 %v2433_v40, %v2105_v31  ;;  %v4343_v31 = vor.u32 %v4772_v57, %v4342_v0 }
 0x240   : > { %v3025_v51 = vadd.f32 %v3024_v17, %v3023_v14  ;;  %v2609_v62 = vpop.f32.mrf.mxu2  ;;  %v1946_v5 = vpop.f32.mrf.mxu0 }
 0x241   : > { %v3414_v39 = vsel %vm1617_vm0, %v3237_v29, 0.0  ;;  %v1947_v16 = vadd.f32 %v5665_v55, %v1946_v5  ;;  %v2275_v60 = vpop.f32.mrf.mxu1 }
 0x242   : > { %v3415_v1 = vadd.f32 %v3414_v39, %v3413_v22  ;;  %v2110_v39 = vadd.f32 %v5665_v55, %v5304_v58 }
 0x243   : > { %v2276_v52 = vadd.f32 %v2275_v60, %v1947_v16  ;;  %v4150_v60 = vld [vmem:[%s4943_s15 + $0x368] sm:$0xf] }
 0x245   : > { %v2605_v14 = vadd.f32 %v2604_v63, %v2276_v52  ;;  %4583 = vmatmul.msk.bf16.gmra.mxu2 %vm1617_vm0, %v4139_v27  ;;  %v4123_v63 = vor.u32 %v4716_v48, %v4120_v6  ;;  %v4724_v27 = vld [vmem:[%s4943_s15 + $0x370] sm:$0xf0] }
 0x246   : > { %v2435_v50 = vpop.f32.mrf.mxu3 }
 0x247   : > { %2848 = vst.msk [vmem:[%s5072_s22 + $0x198] sm:$0xff] %vm1617_vm0, %v2605_v14  ;;  %v3026_v36 = vsel %vm1617_vm0, %v2605_v14, 0.0  ;;  %v3238_v22 = vmul.f32 %v2605_v14, %v2605_v14  ;;  %v5720_v21 = vadd.f32 %v2435_v50, %v2107_v8  ;;  %v4151_v14 = vor.u32 %v4724_v27, %v4150_v60  ;;  %v4130_v50 = vld [vmem:[%s4943_s15 + $0x348] sm:$0xf] }
 0x248   : > { %v3027_v49 = vadd.f32 %v3026_v36, %v3025_v51  ;;  %v2612_v40 = vpop.f32.mrf.mxu2  ;;  %v1949_v34 = vpop.f32.mrf.mxu0  ;;  %v4354_v36 = vld [vmem:[%s4943_s15 + $0x500] sm:$0xf] }
 0x249   : > { %v3416_v45 = vsel %vm1617_vm0, %v3238_v22, 0.0  ;;  %v1950_v13 = vadd.f32 %v5665_v55, %v1949_v34  ;;  %v2278_v17 = vpop.f32.mrf.mxu1  ;;  %v4775_v22 = vld [vmem:[%s4943_s15 + $0x508] sm:$0xf0] }
 0x24a   : > { %v3417_v29 = vadd.f32 %v3416_v45, %v3415_v1  ;;  %v4719_v34 = vld [vmem:[%s4943_s15 + $0x34c] sm:$0xf] }
 0x24b   : > { %v2279_v5 = vadd.f32 %v2278_v17, %v1950_v13  ;;  %1988 = vmatmul.bf16.gmra.mxu0 %v4119_v20  ;;  %4600 = vmatmul.msk.bf16.gmra.mxu3 %vm1617_vm0, %v4343_v31  ;;  %v4720_v20 = vld [vmem:[%s4943_s15 + $0x350] sm:$0xf0]  ;;  %v2112_v31 = vadd.f32 %v5665_v55, %v5320_v26 }
 0x24c   : > { %2317 = vmatmul.bf16.gmra.mxu1 %v4123_v63  ;;  %v4132_v63 = vld [vmem:[%s4943_s15 + $0x354] sm:$0xf0]  ;;  %v4131_v13 = vor.u32 %v4720_v20, %v4130_v50 }
 0x24d   : > { %v2608_v51 = vadd.f32 %v2607_v2, %v2279_v5 }
 0x24e   : > { %v2438_v16 = vpop.f32.mrf.mxu3 }
 0x24f   : > { %2849 = vst.msk [vmem:[%s5072_s22 + $0x1a0] sm:$0xff] %vm1617_vm0, %v2608_v51  ;;  %v3028_v1 = vsel %vm1617_vm0, %v2608_v51, 0.0  ;;  %v3239_v52 = vmul.f32 %v2608_v51, %v2608_v51  ;;  %v5732_v59 = vadd.f32 %v2438_v16, %v2110_v39  ;;  %v4355_v39 = vor.u32 %v4775_v22, %v4354_v36 }
 0x250   : > { %v3029_v3 = vadd.f32 %v3028_v1, %v3027_v49  ;;  %v2614_v0 = vpop.f32.mrf.mxu2  ;;  %v1951_v58 = vpop.f32.mrf.mxu0 }
 0x251   : > { %v3418_v2 = vsel %vm1617_vm0, %v3239_v52, 0.0  ;;  %v1952_v57 = vadd.f32 %v5665_v55, %v1951_v58  ;;  %v2280_v8 = vpop.f32.mrf.mxu1 }
 0x252   : > { %v3419_v48 = vadd.f32 %v3418_v2, %v3417_v29  ;;  %v2115_v2 = vadd.f32 %v5665_v55, %v5327_v47 }
 0x253   : > { %v2281_v6 = vadd.f32 %v2280_v8, %v1952_v57  ;;  %v4162_v8 = vld [vmem:[%s4943_s15 + $0x380] sm:$0xf] }
 0x255   : > { %v2610_v49 = vadd.f32 %v2609_v62, %v2281_v6  ;;  %4584 = vmatmul.msk.bf16.gmra.mxu2 %vm1617_vm0, %v4151_v14  ;;  %v4135_v62 = vor.u32 %v4719_v34, %v4132_v63  ;;  %v4727_v14 = vld [vmem:[%s4943_s15 + $0x388] sm:$0xf0] }
 0x256   : > { %v2440_v45 = vpop.f32.mrf.mxu3 }
 0x257   : > { %2850 = vst.msk [vmem:[%s5072_s22 + $0x1a8] sm:$0xff] %vm1617_vm0, %v2610_v49  ;;  %v3030_v17 = vsel %vm1617_vm0, %v2610_v49, 0.0  ;;  %v3240_v29 = vmul.f32 %v2610_v49, %v2610_v49  ;;  %v5748_v5 = vadd.f32 %v2440_v45, %v2112_v31  ;;  %v4163_v49 = vor.u32 %v4727_v14, %v4162_v8  ;;  %v4142_v45 = vld [vmem:[%s4943_s15 + $0x360] sm:$0xf] }
 0x258   : > { %v3031_v51 = vadd.f32 %v3030_v17, %v3029_v3  ;;  %v2617_v16 = vpop.f32.mrf.mxu2  ;;  %v1954_v26 = vpop.f32.mrf.mxu0  ;;  %v4366_v17 = vld [vmem:[%s4943_s15 + $0x518] sm:$0xf] }
 0x259   : > { %v3420_v60 = vsel %vm1617_vm0, %v3240_v29, 0.0  ;;  %v1955_v27 = vadd.f32 %v5665_v55, %v1954_v26  ;;  %v2283_v1 = vpop.f32.mrf.mxu1  ;;  %v4778_v29 = vld [vmem:[%s4943_s15 + $0x520] sm:$0xf0] }
 0x25a   : > { %v3421_v52 = vadd.f32 %v3420_v60, %v3419_v48  ;;  %v4722_v26 = vld [vmem:[%s4943_s15 + $0x364] sm:$0xf] }
 0x25b   : > { %v2284_v58 = vadd.f32 %v2283_v1, %v1955_v27  ;;  %1993 = vmatmul.bf16.gmra.mxu0 %v4131_v13  ;;  %4601 = vmatmul.msk.bf16.gmra.mxu3 %vm1617_vm0, %v4355_v39  ;;  %v4723_v13 = vld [vmem:[%s4943_s15 + $0x368] sm:$0xf0]  ;;  %v2117_v39 = vadd.f32 %v5665_v55, %v5343_v15 }
 0x25c   : > { %2322 = vmatmul.bf16.gmra.mxu1 %v4135_v62  ;;  %v4144_v62 = vld [vmem:[%s4943_s15 + $0x36c] sm:$0xf0]  ;;  %v4143_v27 = vor.u32 %v4723_v13, %v4142_v45 }
 0x25d   : > { %v2613_v3 = vadd.f32 %v2612_v40, %v2284_v58 }
 0x25e   : > { %v2443_v57 = vpop.f32.mrf.mxu3 }
 0x25f   : > { %2851 = vst.msk [vmem:[%s5072_s22 + $0x1b0] sm:$0xff] %vm1617_vm0, %v2613_v3  ;;  %v3032_v48 = vsel %vm1617_vm0, %v2613_v3, 0.0  ;;  %v3241_v6 = vmul.f32 %v2613_v3, %v2613_v3  ;;  %v5760_v50 = vadd.f32 %v2443_v57, %v2115_v2  ;;  %v4367_v2 = vor.u32 %v4778_v29, %v4366_v17 }
 0x260   : > { %v3033_v20 = vadd.f32 %v3032_v48, %v3031_v51  ;;  %v2619_v36 = vpop.f32.mrf.mxu2  ;;  %v1956_v47 = vpop.f32.mrf.mxu0 }
 0x261   : > { %v3422_v40 = vsel %vm1617_vm0, %v3241_v6, 0.0  ;;  %v1957_v22 = vadd.f32 %v5665_v55, %v1956_v47  ;;  %v2285_v31 = vpop.f32.mrf.mxu1 }
 0x262   : > { %v3423_v34 = vadd.f32 %v3422_v40, %v3421_v52  ;;  %v2120_v40 = vadd.f32 %v5665_v55, %v5350_v42 }
 0x263   : > { %v2286_v63 = vadd.f32 %v2285_v31, %v1957_v22  ;;  %v4174_v31 = vld [vmem:[%s4943_s15 + $0x398] sm:$0xf] }
 0x265   : > { %v2615_v51 = vadd.f32 %v2614_v0, %v2286_v63  ;;  %4585 = vmatmul.msk.bf16.gmra.mxu2 %vm1617_vm0, %v4163_v49  ;;  %v4147_v0 = vor.u32 %v4722_v26, %v4144_v62  ;;  %v4730_v49 = vld [vmem:[%s4943_s15 + $0x3a0] sm:$0xf0] }
 0x266   : > { %v2445_v60 = vpop.f32.mrf.mxu3 }
 0x267   : > { %2852 = vst.msk [vmem:[%s5072_s22 + $0x1b8] sm:$0xff] %vm1617_vm0, %v2615_v51  ;;  %v3034_v1 = vsel %vm1617_vm0, %v2615_v51, 0.0  ;;  %v3242_v52 = vmul.f32 %v2615_v51, %v2615_v51  ;;  %v5776_v58 = vadd.f32 %v2445_v60, %v2117_v39  ;;  %v4175_v51 = vor.u32 %v4730_v49, %v4174_v31  ;;  %v4154_v60 = vld [vmem:[%s4943_s15 + $0x378] sm:$0xf] }
 0x268   : > { %v3035_v3 = vadd.f32 %v3034_v1, %v3033_v20  ;;  %v2622_v57 = vpop.f32.mrf.mxu2  ;;  %v1959_v15 = vpop.f32.mrf.mxu0  ;;  %v4378_v1 = vld [vmem:[%s4943_s15 + $0x530] sm:$0xf] }
 0x269   : > { %v3424_v8 = vsel %vm1617_vm0, %v3242_v52, 0.0  ;;  %v1960_v14 = vadd.f32 %v5665_v55, %v1959_v15  ;;  %v2288_v48 = vpop.f32.mrf.mxu1  ;;  %v4781_v52 = vld [vmem:[%s4943_s15 + $0x538] sm:$0xf0] }
 0x26a   : > { %v3425_v6 = vadd.f32 %v3424_v8, %v3423_v34  ;;  %v4725_v15 = vld [vmem:[%s4943_s15 + $0x37c] sm:$0xf] }
 0x26b   : > { %v2289_v47 = vadd.f32 %v2288_v48, %v1960_v14  ;;  %1998 = vmatmul.bf16.gmra.mxu0 %v4143_v27  ;;  %4602 = vmatmul.msk.bf16.gmra.mxu3 %vm1617_vm0, %v4367_v2  ;;  %v4726_v27 = vld [vmem:[%s4943_s15 + $0x380] sm:$0xf0]  ;;  %v2122_v2 = vadd.f32 %v5665_v55, %v5371_v12 }
 0x26c   : > { %2327 = vmatmul.bf16.gmra.mxu1 %v4147_v0  ;;  %v4156_v0 = vld [vmem:[%s4943_s15 + $0x384] sm:$0xf0]  ;;  %v4155_v14 = vor.u32 %v4726_v27, %v4154_v60 }
 0x26d   : > { %v2618_v20 = vadd.f32 %v2617_v16, %v2289_v47 }
 0x26e   : > { %v2448_v22 = vpop.f32.mrf.mxu3 }
 0x26f   : > { %2853 = vst.msk [vmem:[%s5072_s22 + $0x1c0] sm:$0xff] %vm1617_vm0, %v2618_v20  ;;  %v3036_v34 = vsel %vm1617_vm0, %v2618_v20, 0.0  ;;  %v3243_v63 = vmul.f32 %v2618_v20, %v2618_v20  ;;  %v5788_v45 = vadd.f32 %v2448_v22, %v2120_v40  ;;  %v4379_v40 = vor.u32 %v4781_v52, %v4378_v1 }
 0x270   : > { %v3037_v13 = vadd.f32 %v3036_v34, %v3035_v3  ;;  %v2624_v17 = vpop.f32.mrf.mxu2  ;;  %v1961_v42 = vpop.f32.mrf.mxu0 }
 0x271   : > { %v3426_v16 = vsel %vm1617_vm0, %v3243_v63, 0.0  ;;  %v1962_v29 = vadd.f32 %v5665_v55, %v1961_v42  ;;  %v2290_v39 = vpop.f32.mrf.mxu1 }
 0x272   : > { %v3427_v26 = vadd.f32 %v3426_v16, %v3425_v6  ;;  %v2125_v16 = vadd.f32 %v5665_v55, %v5378_v38 }
 0x273   : > { %v2291_v62 = vadd.f32 %v2290_v39, %v1962_v29  ;;  %v4186_v39 = vld [vmem:[%s4943_s15 + $0x3b0] sm:$0xf] }
 0x275   : > { %v2620_v3 = vadd.f32 %v2619_v36, %v2291_v62  ;;  %4586 = vmatmul.msk.bf16.gmra.mxu2 %vm1617_vm0, %v4175_v51  ;;  %v4159_v36 = vor.u32 %v4725_v15, %v4156_v0  ;;  %v4733_v51 = vld [vmem:[%s4943_s15 + $0x3b8] sm:$0xf0] }
 0x276   : > { %v2450_v8 = vpop.f32.mrf.mxu3 }
 0x277   : > { %2854 = vst.msk [vmem:[%s5072_s22 + $0x1c8] sm:$0xff] %vm1617_vm0, %v2620_v3  ;;  %v3038_v48 = vsel %vm1617_vm0, %v2620_v3, 0.0  ;;  %v3244_v6 = vmul.f32 %v2620_v3, %v2620_v3  ;;  %v5804_v47 = vadd.f32 %v2450_v8, %v2122_v2  ;;  %v4187_v3 = vor.u32 %v4733_v51, %v4186_v39  ;;  %v4166_v8 = vld [vmem:[%s4943_s15 + $0x390] sm:$0xf] }
 0x278   : > { %v3039_v20 = vadd.f32 %v3038_v48, %v3037_v13  ;;  %v2627_v22 = vpop.f32.mrf.mxu2  ;;  %v1964_v12 = vpop.f32.mrf.mxu0  ;;  %v4390_v48 = vld [vmem:[%s4943_s15 + $0x548] sm:$0xf] }
 0x279   : > { %v3428_v31 = vsel %vm1617_vm0, %v3244_v6, 0.0  ;;  %v1965_v49 = vadd.f32 %v5665_v55, %v1964_v12  ;;  %v2293_v34 = vpop.f32.mrf.mxu1  ;;  %v4784_v6 = vld [vmem:[%s4943_s15 + $0x550] sm:$0xf0] }
 0x27a   : > { %v3429_v63 = vadd.f32 %v3428_v31, %v3427_v26  ;;  %v4728_v12 = vld [vmem:[%s4943_s15 + $0x394] sm:$0xf] }
 0x27b   : > { %v2294_v42 = vadd.f32 %v2293_v34, %v1965_v49  ;;  %2003 = vmatmul.bf16.gmra.mxu0 %v4155_v14  ;;  %4603 = vmatmul.msk.bf16.gmra.mxu3 %vm1617_vm0, %v4379_v40  ;;  %v4729_v14 = vld [vmem:[%s4943_s15 + $0x398] sm:$0xf0]  ;;  %v2127_v40 = vadd.f32 %v5665_v55, %v5394_v9 }
 0x27c   : > { %2332 = vmatmul.bf16.gmra.mxu1 %v4159_v36  ;;  %v4168_v36 = vld [vmem:[%s4943_s15 + $0x39c] sm:$0xf0]  ;;  %v4167_v49 = vor.u32 %v4729_v14, %v4166_v8 }
 0x27d   : > { %v2623_v13 = vadd.f32 %v2622_v57, %v2294_v42 }
 0x27e   : > { %v2453_v29 = vpop.f32.mrf.mxu3 }
 0x27f   : > { %2855 = vst.msk [vmem:[%s5072_s22 + $0x1d0] sm:$0xff] %vm1617_vm0, %v2623_v13  ;;  %v3040_v26 = vsel %vm1617_vm0, %v2623_v13, 0.0  ;;  %v3245_v62 = vmul.f32 %v2623_v13, %v2623_v13  ;;  %v5816_v60 = vadd.f32 %v2453_v29, %v2125_v16  ;;  %v4391_v16 = vor.u32 %v4784_v6, %v4390_v48 }
 0x280   : > { %v3041_v27 = vadd.f32 %v3040_v26, %v3039_v20  ;;  %v2629_v1 = vpop.f32.mrf.mxu2  ;;  %v1966_v38 = vpop.f32.mrf.mxu0 }
 0x281   : > { %v3430_v57 = vsel %vm1617_vm0, %v3245_v62, 0.0  ;;  %v1967_v52 = vadd.f32 %v5665_v55, %v1966_v38  ;;  %v2295_v2 = vpop.f32.mrf.mxu1 }
 0x282   : > { %v3431_v15 = vadd.f32 %v3430_v57, %v3429_v63  ;;  %v2130_v57 = vadd.f32 %v5665_v55, %v5401_v41 }
 0x283   : > { %v2296_v0 = vadd.f32 %v2295_v2, %v1967_v52  ;;  %v4198_v2 = vld [vmem:[%s4943_s15 + $0x3c8] sm:$0xf] }
 0x285   : > { %v2625_v20 = vadd.f32 %v2624_v17, %v2296_v0  ;;  %4587 = vmatmul.msk.bf16.gmra.mxu2 %vm1617_vm0, %v4187_v3  ;;  %v4171_v17 = vor.u32 %v4728_v12, %v4168_v36  ;;  %v4736_v3 = vld [vmem:[%s4943_s15 + $0x3d0] sm:$0xf0] }
 0x286   : > { %v2455_v31 = vpop.f32.mrf.mxu3 }
 0x287   : > { %2856 = vst.msk [vmem:[%s5072_s22 + $0x1d8] sm:$0xff] %vm1617_vm0, %v2625_v20  ;;  %v3042_v34 = vsel %vm1617_vm0, %v2625_v20, 0.0  ;;  %v3246_v63 = vmul.f32 %v2625_v20, %v2625_v20  ;;  %v5832_v42 = vadd.f32 %v2455_v31, %v2127_v40  ;;  %v4199_v20 = vor.u32 %v4736_v3, %v4198_v2  ;;  %v4178_v31 = vld [vmem:[%s4943_s15 + $0x3a8] sm:$0xf] }
 0x288   : > { %v3043_v13 = vadd.f32 %v3042_v34, %v3041_v27  ;;  %v2632_v29 = vpop.f32.mrf.mxu2  ;;  %v1969_v9 = vpop.f32.mrf.mxu0  ;;  %v4402_v34 = vld [vmem:[%s4943_s15 + $0x560] sm:$0xf] }
 0x289   : > { %v3432_v39 = vsel %vm1617_vm0, %v3246_v63, 0.0  ;;  %v1970_v51 = vadd.f32 %v5665_v55, %v1969_v9  ;;  %v2298_v26 = vpop.f32.mrf.mxu1  ;;  %v4787_v63 = vld [vmem:[%s4943_s15 + $0x568] sm:$0xf0] }
 0x28a   : > { %v3433_v62 = vadd.f32 %v3432_v39, %v3431_v15  ;;  %v4731_v9 = vld [vmem:[%s4943_s15 + $0x3ac] sm:$0xf] }
 0x28b   : > { %v2299_v38 = vadd.f32 %v2298_v26, %v1970_v51  ;;  %2008 = vmatmul.bf16.gmra.mxu0 %v4167_v49  ;;  %4604 = vmatmul.msk.bf16.gmra.mxu3 %vm1617_vm0, %v4391_v16  ;;  %v4732_v49 = vld [vmem:[%s4943_s15 + $0x3b0] sm:$0xf0]  ;;  %v2132_v16 = vadd.f32 %v5665_v55, %v5417_v7 }
 0x28c   : > { %2337 = vmatmul.bf16.gmra.mxu1 %v4171_v17  ;;  %v4180_v17 = vld [vmem:[%s4943_s15 + $0x3b4] sm:$0xf0]  ;;  %v4179_v51 = vor.u32 %v4732_v49, %v4178_v31 }
 0x28d   : > { %v2628_v27 = vadd.f32 %v2627_v22, %v2299_v38 }
 0x28e   : > { %v2458_v52 = vpop.f32.mrf.mxu3 }
 0x28f   : > { %2857 = vst.msk [vmem:[%s5072_s22 + $0x1e0] sm:$0xff] %vm1617_vm0, %v2628_v27  ;;  %v3044_v15 = vsel %vm1617_vm0, %v2628_v27, 0.0  ;;  %v3247_v0 = vmul.f32 %v2628_v27, %v2628_v27  ;;  %v5844_v8 = vadd.f32 %v2458_v52, %v2130_v57  ;;  %v4403_v57 = vor.u32 %v4787_v63, %v4402_v34 }
 0x290   : > { %v3045_v14 = vadd.f32 %v3044_v15, %v3043_v13  ;;  %v2634_v48 = vpop.f32.mrf.mxu2  ;;  %v1971_v41 = vpop.f32.mrf.mxu0 }
 0x291   : > { %v3434_v22 = vsel %vm1617_vm0, %v3247_v0, 0.0  ;;  %v1972_v6 = vadd.f32 %v5665_v55, %v1971_v41  ;;  %v2300_v40 = vpop.f32.mrf.mxu1 }
 0x292   : > { %v3435_v12 = vadd.f32 %v3434_v22, %v3433_v62  ;;  %v2135_v22 = vadd.f32 %v5665_v55, %v5424_v28 }
 0x293   : > { %v2301_v36 = vadd.f32 %v2300_v40, %v1972_v6  ;;  %v4210_v40 = vld [vmem:[%s4943_s15 + $0x3e0] sm:$0xf] }
 0x295   : > { %v2630_v13 = vadd.f32 %v2629_v1, %v2301_v36  ;;  %4588 = vmatmul.msk.bf16.gmra.mxu2 %vm1617_vm0, %v4199_v20  ;;  %v4183_v1 = vor.u32 %v4731_v9, %v4180_v17  ;;  %v4739_v20 = vld [vmem:[%s4943_s15 + $0x3e8] sm:$0xf0] }
 0x296   : > { %v2460_v39 = vpop.f32.mrf.mxu3 }
 0x297   : > { %2858 = vst.msk [vmem:[%s5072_s22 + $0x1e8] sm:$0xff] %vm1617_vm0, %v2630_v13  ;;  %v3046_v26 = vsel %vm1617_vm0, %v2630_v13, 0.0  ;;  %v3248_v62 = vmul.f32 %v2630_v13, %v2630_v13  ;;  %v5860_v38 = vadd.f32 %v2460_v39, %v2132_v16  ;;  %v4211_v13 = vor.u32 %v4739_v20, %v4210_v40  ;;  %v4190_v39 = vld [vmem:[%s4943_s15 + $0x3c0] sm:$0xf] }
 0x298   : > { %v3047_v27 = vadd.f32 %v3046_v26, %v3045_v14  ;;  %v2637_v52 = vpop.f32.mrf.mxu2  ;;  %v1974_v7 = vpop.f32.mrf.mxu0  ;;  %v4414_v26 = vld [vmem:[%s4943_s15 + $0x578] sm:$0xf] }
 0x299   : > { %v3436_v2 = vsel %vm1617_vm0, %v3248_v62, 0.0  ;;  %v1975_v3 = vadd.f32 %v5665_v55, %v1974_v7  ;;  %v2303_v15 = vpop.f32.mrf.mxu1  ;;  %v4790_v62 = vld [vmem:[%s4943_s15 + $0x580] sm:$0xf0] }
 0x29a   : > { %v3437_v0 = vadd.f32 %v3436_v2, %v3435_v12  ;;  %v4734_v7 = vld [vmem:[%s4943_s15 + $0x3c4] sm:$0xf] }
 0x29b   : > { %v2304_v41 = vadd.f32 %v2303_v15, %v1975_v3  ;;  %2013 = vmatmul.bf16.gmra.mxu0 %v4179_v51  ;;  %4605 = vmatmul.msk.bf16.gmra.mxu3 %vm1617_vm0, %v4403_v57  ;;  %v4735_v51 = vld [vmem:[%s4943_s15 + $0x3c8] sm:$0xf0]  ;;  %v2137_v57 = vadd.f32 %v5665_v55, %v5440_v46 }
 0x29c   : > { %2342 = vmatmul.bf16.gmra.mxu1 %v4183_v1  ;;  %v4192_v1 = vld [vmem:[%s4943_s15 + $0x3cc] sm:$0xf0]  ;;  %v4191_v3 = vor.u32 %v4735_v51, %v4190_v39 }
 0x29d   : > { %v2633_v14 = vadd.f32 %v2632_v29, %v2304_v41 }
 0x29e   : > { %v2463_v6 = vpop.f32.mrf.mxu3 }
 0x29f   : > { %2859 = vst.msk [vmem:[%s5072_s22 + $0x1f0] sm:$0xff] %vm1617_vm0, %v2633_v14  ;;  %v3048_v12 = vsel %vm1617_vm0, %v2633_v14, 0.0  ;;  %v3249_v36 = vmul.f32 %v2633_v14, %v2633_v14  ;;  %v5872_v31 = vadd.f32 %v2463_v6, %v2135_v22  ;;  %v4415_v22 = vor.u32 %v4790_v62, %v4414_v26 }
 0x2a0   : > { %v3049_v49 = vadd.f32 %v3048_v12, %v3047_v27  ;;  %v2639_v34 = vpop.f32.mrf.mxu2  ;;  %v1976_v28 = vpop.f32.mrf.mxu0  ;;  %v4195_v6 = vor.u32 %v4734_v7, %v4192_v1 }
 0x2a1   : > { %v3438_v29 = vsel %vm1617_vm0, %v3249_v36, 0.0  ;;  %v1977_v63 = vadd.f32 %v5665_v55, %v1976_v28  ;;  %v2305_v16 = vpop.f32.mrf.mxu1 }
 0x2a2   : > { %v3439_v9 = vadd.f32 %v3438_v29, %v3437_v0 }
 0x2a3   : > { %v2306_v17 = vadd.f32 %v2305_v16, %v1977_v63  ;;  %v4222_v16 = vld [vmem:[%s4943_s15 + $0x3f8] sm:$0xf] }
 0x2a5   : > { %v2635_v27 = vadd.f32 %v2634_v48, %v2306_v17  ;;  %4589 = vmatmul.msk.bf16.gmra.mxu2 %vm1617_vm0, %v4211_v13 }
 0x2a6   : > { %v2465_v2 = vpop.f32.mrf.mxu3 }
 0x2a7   : > { %2860 = vst.msk [vmem:[%s5072_s22 + $0x1f8] sm:$0xff] %vm1617_vm0, %v2635_v27  ;;  %v3050_v15 = vsel %vm1617_vm0, %v2635_v27, 0.0  ;;  %v3250_v0 = vmul.f32 %v2635_v27, %v2635_v27  ;;  %v5888_v41 = vadd.f32 %v2465_v2, %v2137_v57  ;;  %v4202_v2 = vld [vmem:[%s4943_s15 + $0x3d8] sm:$0xf] }
 0x2a8   : > { %v3051_v14 = vadd.f32 %v3050_v15, %v3049_v49  ;;  %v2642_v46 = vpop.f32.mrf.mxu2  ;;  %v1979_v48 = vpop.f32.mrf.mxu0  ;;  %v4742_v49 = vld [vmem:[%s4943_s15 + $0x400] sm:$0xf0]  ;;  %v4793_v15 = vld [vmem:[%s4943_s15 + $0x598] sm:$0xf0] }
 0x2a9   : > { %v3440_v40 = vsel %vm1617_vm0, %v3250_v0, 0.0  ;;  %v1980_v20 = vadd.f32 %v5665_v55, %v1979_v48  ;;  %v2308_v12 = vpop.f32.mrf.mxu1  ;;  %v4223_v27 = vor.u32 %v4742_v49, %v4222_v16 }
 0x2aa   : > { %v3441_v36 = vadd.f32 %v3440_v40, %v3439_v9 }
 0x2ab   : > { %v2309_v28 = vadd.f32 %v2308_v12, %v1980_v20  ;;  %2018 = vmatmul.bf16.gmra.mxu0 %v4191_v3  ;;  %4606 = vmatmul.msk.bf16.gmra.mxu3 %vm1617_vm0, %v4415_v22  ;;  %v4426_v3 = vld [vmem:[%s4943_s15 + $0x590] sm:$0xf]  ;;  %v4737_v22 = vld [vmem:[%s4943_s15 + $0x3dc] sm:$0xf] }
 0x2ac   : > { %2347 = vmatmul.bf16.gmra.mxu1 %v4195_v6 }
 0x2ad   : > { %v2638_v29 = vadd.f32 %v2637_v52, %v2309_v28 }
 0x2ae   : > { %v2727_v63 = vpop.f32.mrf.mxu3 }
 0x2af   : > { %2861 = vst.msk [vmem:[%s5072_s22 + $0x200] sm:$0xff] %vm1617_vm0, %v2638_v29  ;;  %v3052_v13 = vsel %vm1617_vm0, %v2638_v29, 0.0  ;;  %v3251_v17 = vmul.f32 %v2638_v29, %v2638_v29  ;;  %v5899_v9 = vadd.f32 %v2727_v63, %v5508_v43  ;;  %v4738_v43 = vld [vmem:[%s4943_s15 + $0x3e0] sm:$0xf0] }
 0x2b0   : > { %v3053_v39 = vadd.f32 %v3052_v13, %v3051_v14  ;;  %v2644_v51 = vpop.f32.mrf.mxu2  ;;  %v1981_v52 = vpop.f32.mrf.mxu0  ;;  %v4204_v14 = vld [vmem:[%s4943_s15 + $0x3e4] sm:$0xf0]  ;;  %v4203_v6 = vor.u32 %v4738_v43, %v4202_v2 }
 0x2b1   : > { %v3442_v26 = vsel %vm1617_vm0, %v3251_v17, 0.0  ;;  %2897 = vst.msk [vmem:[%s5072_s22 + $0x320] sm:$0xff] %vm1617_vm0, %v5899_v9  ;;  %v1982_v62 = vadd.f32 %v5665_v55, %v1981_v52  ;;  %v2310_v57 = vpop.f32.mrf.mxu1  ;;  %v4207_v63 = vor.u32 %v4737_v22, %v4204_v14 }
 0x2b2   : > { %v3443_v7 = vadd.f32 %v3442_v26, %v3441_v36  ;;  %v4427_v36 = vor.u32 %v4793_v15, %v4426_v3  ;;  %v4234_v26 = vld [vmem:[%s4943_s15 + $0x410] sm:$0xf] }
 0x2b3   : > { %v2311_v1 = vadd.f32 %v2310_v57, %v1982_v62  ;;  %v4745_v62 = vld [vmem:[%s4943_s15 + $0x418] sm:$0xf0] }
 0x2b5   : > { %v2640_v0 = vadd.f32 %v2639_v34, %v2311_v1  ;;  %4590 = vmatmul.msk.bf16.gmra.mxu2 %vm1617_vm0, %v4223_v27 }
 0x2b6   : > { %v2729_v48 = vpop.f32.mrf.mxu3 }
 0x2b7   : > { %2862 = vst.msk [vmem:[%s5072_s22 + $0x208] sm:$0xff] %vm1617_vm0, %v2640_v0  ;;  %v3054_v40 = vsel %vm1617_vm0, %v2640_v0, 0.0  ;;  %v3252_v20 = vmul.f32 %v2640_v0, %v2640_v0  ;;  %v5917_v12 = vadd.f32 %v2729_v48, %v5524_v44  ;;  %v4235_v0 = vor.u32 %v4745_v62, %v4234_v26  ;;  %v4214_v48 = vld [vmem:[%s4943_s15 + $0x3f0] sm:$0xf] }
 0x2b8   : > { %v3055_v28 = vadd.f32 %v3054_v40, %v3053_v39  ;;  %v2647_v34 = vpop.f32.mrf.mxu2  ;;  %v1984_v29 = vpop.f32.mrf.mxu0  ;;  %v4796_v40 = vld [vmem:[%s4943_s15 + $0x5b0] sm:$0xf0] }
 0x2b9   : > { %v3444_v16 = vsel %vm1617_vm0, %v3252_v20, 0.0  ;;  %2898 = vst.msk [vmem:[%s5072_s22 + $0x328] sm:$0xff] %vm1617_vm0, %v5917_v12  ;;  %v1985_v49 = vadd.f32 %v5665_v55, %v1984_v29  ;;  %v2313_v13 = vpop.f32.mrf.mxu1 }
 0x2ba   : > { %v3445_v17 = vadd.f32 %v3444_v16, %v3443_v7 }
 0x2bb   : > { %v2314_v52 = vadd.f32 %v2313_v13, %v1985_v49  ;;  %2023 = vmatmul.bf16.gmra.mxu0 %v4203_v6  ;;  %4607 = vmatmul.msk.bf16.gmra.mxu3 %vm1617_vm0, %v4427_v36  ;;  %v4438_v6 = vld [vmem:[%s4943_s15 + $0x5a8] sm:$0xf]  ;;  %v4740_v36 = vld [vmem:[%s4943_s15 + $0x3f4] sm:$0xf] }
 0x2bc   : > { %2352 = vmatmul.bf16.gmra.mxu1 %v4207_v63 }
 0x2bd   : > { %v2643_v44 = vadd.f32 %v2642_v46, %v2314_v52 }
 0x2be   : > { %v2732_v39 = vpop.f32.mrf.mxu3 }
 0x2bf   : > { %2863 = vst.msk [vmem:[%s5072_s22 + $0x210] sm:$0xff] %vm1617_vm0, %v2643_v44  ;;  %v3056_v57 = vsel %vm1617_vm0, %v2643_v44, 0.0  ;;  %v3253_v27 = vmul.f32 %v2643_v44, %v2643_v44  ;;  %v5931_v7 = vadd.f32 %v2732_v39, %v5535_v19  ;;  %v4741_v19 = vld [vmem:[%s4943_s15 + $0x3f8] sm:$0xf0] }
 0x2c0   : > { %v3057_v1 = vadd.f32 %v3056_v57, %v3055_v28  ;;  %v2649_v2 = vpop.f32.mrf.mxu2  ;;  %v1986_v46 = vpop.f32.mrf.mxu0  ;;  %v4216_v28 = vld [vmem:[%s4943_s15 + $0x3fc] sm:$0xf0]  ;;  %v4215_v63 = vor.u32 %v4741_v19, %v4214_v48 }
 0x2c1   : > { %v3446_v43 = vsel %vm1617_vm0, %v3253_v27, 0.0  ;;  %2899 = vst.msk [vmem:[%s5072_s22 + $0x330] sm:$0xff] %vm1617_vm0, %v5931_v7  ;;  %v1987_v3 = vadd.f32 %v5665_v55, %v1986_v46  ;;  %v2315_v15 = vpop.f32.mrf.mxu1  ;;  %v4219_v39 = vor.u32 %v4740_v36, %v4216_v28 }
 0x2c2   : > { %v3447_v22 = vadd.f32 %v3446_v43, %v3445_v17  ;;  %v4439_v17 = vor.u32 %v4796_v40, %v4438_v6  ;;  %v4246_v43 = vld [vmem:[%s4943_s15 + $0x428] sm:$0xf] }
 0x2c3   : > { %v2316_v14 = vadd.f32 %v2315_v15, %v1987_v3  ;;  %v4748_v3 = vld [vmem:[%s4943_s15 + $0x430] sm:$0xf0] }
 0x2c5   : > { %v2645_v20 = vadd.f32 %v2644_v51, %v2316_v14  ;;  %4591 = vmatmul.msk.bf16.gmra.mxu2 %vm1617_vm0, %v4235_v0 }
 0x2c6   : > { %v2734_v29 = vpop.f32.mrf.mxu3 }
 0x2c7   : > { %2864 = vst.msk [vmem:[%s5072_s22 + $0x218] sm:$0xff] %vm1617_vm0, %v2645_v20  ;;  %v3058_v16 = vsel %vm1617_vm0, %v2645_v20, 0.0  ;;  %v3254_v49 = vmul.f32 %v2645_v20, %v2645_v20  ;;  %v5949_v13 = vadd.f32 %v2734_v29, %v5551_v18  ;;  %v4247_v20 = vor.u32 %v4748_v3, %v4246_v43  ;;  %v4226_v29 = vld [vmem:[%s4943_s15 + $0x408] sm:$0xf] }
 0x2c8   : > { %v3059_v52 = vadd.f32 %v3058_v16, %v3057_v1  ;;  %v2652_v51 = vpop.f32.mrf.mxu2  ;;  %v1989_v44 = vpop.f32.mrf.mxu0  ;;  %v4799_v16 = vld [vmem:[%s4943_s15 + $0x5c8] sm:$0xf0] }
 0x2c9   : > { %v3448_v26 = vsel %vm1617_vm0, %v3254_v49, 0.0  ;;  %2900 = vst.msk [vmem:[%s5072_s22 + $0x338] sm:$0xff] %vm1617_vm0, %v5949_v13  ;;  %v1990_v62 = vadd.f32 %v5665_v55, %v1989_v44  ;;  %v2318_v57 = vpop.f32.mrf.mxu1 }
 0x2ca   : > { %v3449_v27 = vadd.f32 %v3448_v26, %v3447_v22 }
 0x2cb   : > { %v2319_v46 = vadd.f32 %v2318_v57, %v1990_v62  ;;  %2028 = vmatmul.bf16.gmra.mxu0 %v4215_v63  ;;  %4608 = vmatmul.msk.bf16.gmra.mxu3 %vm1617_vm0, %v4439_v17  ;;  %v4450_v63 = vld [vmem:[%s4943_s15 + $0x5c0] sm:$0xf]  ;;  %v4743_v17 = vld [vmem:[%s4943_s15 + $0x40c] sm:$0xf] }
 0x2cc   : > { %2357 = vmatmul.bf16.gmra.mxu1 %v4219_v39 }
 0x2cd   : > { %v2648_v18 = vadd.f32 %v2647_v34, %v2319_v46 }
 0x2ce   : > { %v2737_v1 = vpop.f32.mrf.mxu3 }
 0x2cf   : > { %2865 = vst.msk [vmem:[%s5072_s22 + $0x220] sm:$0xff] %vm1617_vm0, %v2648_v18  ;;  %v3060_v15 = vsel %vm1617_vm0, %v2648_v18, 0.0  ;;  %v3255_v0 = vmul.f32 %v2648_v18, %v2648_v18  ;;  %v5963_v22 = vadd.f32 %v2737_v1, %v5562_v61  ;;  %v4744_v61 = vld [vmem:[%s4943_s15 + $0x410] sm:$0xf0] }
 0x2d0   : > { %v3061_v14 = vadd.f32 %v3060_v15, %v3059_v52  ;;  %v2654_v48 = vpop.f32.mrf.mxu2  ;;  %v1991_v34 = vpop.f32.mrf.mxu0  ;;  %v4228_v52 = vld [vmem:[%s4943_s15 + $0x414] sm:$0xf0]  ;;  %v4227_v39 = vor.u32 %v4744_v61, %v4226_v29  ;;  %v6004_v61 = vld [vmem:[%s6482_s2] ss:$0 sm:$0xff] }
 0x2d1   : > { %v3450_v19 = vsel %vm1617_vm0, %v3255_v0, 0.0  ;;  %2901 = vst.msk [vmem:[%s5072_s22 + $0x340] sm:$0xff] %vm1617_vm0, %v5963_v22  ;;  %v1992_v6 = vadd.f32 %v5665_v55, %v1991_v34  ;;  %v2320_v40 = vpop.f32.mrf.mxu1  ;;  %v4231_v1 = vor.u32 %v4743_v17, %v4228_v52  ;;  %v4238_v52 = vld [vmem:[%s4943_s15 + $0x420] sm:$0xf] }
 0x2d2   : > { %v3451_v36 = vadd.f32 %v3450_v19, %v3449_v27  ;;  %v4451_v27 = vor.u32 %v4799_v16, %v4450_v63  ;;  %v4258_v19 = vld [vmem:[%s4943_s15 + $0x440] sm:$0xf] }
 0x2d3   : > { %v2321_v28 = vadd.f32 %v2320_v40, %v1992_v6  ;;  %v4751_v6 = vld [vmem:[%s4943_s15 + $0x448] sm:$0xf0] }
 0x2d4   : > { %v4259_v16 = vor.u32 %v4751_v6, %v4258_v19 }
 0x2d5   : > { %v2650_v49 = vadd.f32 %v2649_v2, %v2321_v28  ;;  %4592 = vmatmul.msk.bf16.gmra.mxu2 %vm1617_vm0, %v4247_v20 }
 0x2d6   : > { %v2739_v44 = vpop.f32.mrf.mxu3 }
 0x2d7   : > { %2866 = vst.msk [vmem:[%s5072_s22 + $0x228] sm:$0xff] %vm1617_vm0, %v2650_v49  ;;  %v3062_v26 = vsel %vm1617_vm0, %v2650_v49, 0.0  ;;  %v3256_v62 = vmul.f32 %v2650_v49, %v2650_v49  ;;  %v5981_v57 = vadd.f32 %v2739_v44, %v5578_v56  ;;  %v4747_v44 = vld [vmem:[%s4943_s15 + $0x428] sm:$0xf0] }
 0x2d8   : > { %v3063_v46 = vadd.f32 %v3062_v26, %v3061_v14  ;;  %v2657_v2 = vpop.f32.mrf.mxu2  ;;  %v1994_v18 = vpop.f32.mrf.mxu0  ;;  %v4802_v26 = vld [vmem:[%s4943_s15 + $0x5e0] sm:$0xf0] }
 0x2d9   : > { %v3452_v43 = vsel %vm1617_vm0, %v3256_v62, 0.0  ;;  %2902 = vst.msk [vmem:[%s5072_s22 + $0x348] sm:$0xff] %vm1617_vm0, %v5981_v57  ;;  %v1995_v3 = vadd.f32 %v5665_v55, %v1994_v18  ;;  %v2323_v15 = vpop.f32.mrf.mxu1 }
 0x2da   : > { %v3453_v0 = vadd.f32 %v3452_v43, %v3451_v36 }
 0x2db   : > { %v2324_v34 = vadd.f32 %v2323_v15, %v1995_v3  ;;  %2033 = vmatmul.bf16.gmra.mxu0 %v4227_v39  ;;  %4609 = vmatmul.msk.bf16.gmra.mxu3 %vm1617_vm0, %v4451_v27  ;;  %v4462_v39 = vld [vmem:[%s4943_s15 + $0x5d8] sm:$0xf]  ;;  %v4746_v27 = vld [vmem:[%s4943_s15 + $0x424] sm:$0xf] }
 0x2dc   : > { %2362 = vmatmul.bf16.gmra.mxu1 %v4231_v1  ;;  %v4239_v1 = vor.u32 %v4747_v44, %v4238_v52 }
 0x2dd   : > { %v2653_v56 = vadd.f32 %v2652_v51, %v2324_v34 }
 0x2de   : > { %v2742_v14 = vpop.f32.mrf.mxu3 }
 0x2df   : > { %2867 = vst.msk [vmem:[%s5072_s22 + $0x230] sm:$0xff] %vm1617_vm0, %v2653_v56  ;;  %v3064_v40 = vsel %vm1617_vm0, %v2653_v56, 0.0  ;;  %v3257_v55 = vmul.f32 %v2653_v56, %v2653_v56  ;;  %v5995_v20 = vadd.f32 %v2742_v14, %v5589_v30 }
 0x2e0   : > { %v3065_v36 = vadd.f32 %v3064_v40, %v3063_v46  ;;  %v2659_v28 = vpop.f32.mrf.mxu2  ;;  %v1996_v29 = vpop.f32.mrf.mxu0  ;;  %v4240_v46 = vld [vmem:[%s4943_s15 + $0x42c] sm:$0xf0] }
 0x2e1   : > { %v3454_v51 = vsel %vm1617_vm0, %v3257_v55, 0.0  ;;  %2903 = vst.msk [vmem:[%s5072_s22 + $0x350] sm:$0xff] %vm1617_vm0, %v5995_v20  ;;  %v1997_v63 = vadd.f32 %v6004_v61, %v1996_v29  ;;  %v2325_v30 = vpop.f32.mrf.mxu1  ;;  %v4243_v14 = vor.u32 %v4746_v27, %v4240_v46 }
 0x2e2   : > { %v3455_v49 = vadd.f32 %v3454_v51, %v3453_v0  ;;  %v4463_v0 = vor.u32 %v4802_v26, %v4462_v39  ;;  %v4270_v51 = vld [vmem:[%s4943_s15 + $0x458] sm:$0xf] }
 0x2e3   : > { %v2326_v17 = vadd.f32 %v2325_v30, %v1997_v63  ;;  %v4754_v63 = vld [vmem:[%s4943_s15 + $0x460] sm:$0xf0] }
 0x2e5   : > { %v2655_v62 = vadd.f32 %v2654_v48, %v2326_v17  ;;  %4593 = vmatmul.msk.bf16.gmra.mxu2 %vm1617_vm0, %v4259_v16 }
 0x2e6   : > { %v2744_v18 = vpop.f32.mrf.mxu3 }
 0x2e7   : > { %2868 = vst.msk [vmem:[%s5072_s22 + $0x238] sm:$0xff] %vm1617_vm0, %v2655_v62  ;;  %v3066_v43 = vsel %vm1617_vm0, %v2655_v62, 0.0  ;;  %v3258_v3 = vmul.f32 %v2655_v62, %v2655_v62  ;;  %v6018_v15 = vadd.f32 %v2744_v18, %v5605_v33  ;;  %v4271_v62 = vor.u32 %v4754_v63, %v4270_v51  ;;  %v4250_v18 = vld [vmem:[%s4943_s15 + $0x438] sm:$0xf] }
 0x2e8   : > { %v3067_v34 = vadd.f32 %v3066_v43, %v3065_v36  ;;  %v2662_v48 = vpop.f32.mrf.mxu2  ;;  %v1999_v56 = vpop.f32.mrf.mxu0  ;;  %v4805_v43 = vld [vmem:[%s4943_s15 + $0x5f8] sm:$0xf0] }
 0x2e9   : > { %v3456_v19 = vsel %vm1617_vm0, %v3258_v3, 0.0  ;;  %2904 = vst.msk [vmem:[%s5072_s22 + $0x358] sm:$0xff] %vm1617_vm0, %v6018_v15  ;;  %v2000_v6 = vadd.f32 %v6004_v61, %v1999_v56  ;;  %v2328_v40 = vpop.f32.mrf.mxu1 }
 0x2ea   : > { %v3457_v55 = vadd.f32 %v3456_v19, %v3455_v49 }
 0x2eb   : > { %v2329_v29 = vadd.f32 %v2328_v40, %v2000_v6  ;;  %2038 = vmatmul.bf16.gmra.mxu0 %v4239_v1  ;;  %4610 = vmatmul.msk.bf16.gmra.mxu3 %vm1617_vm0, %v4463_v0  ;;  %v4474_v1 = vld [vmem:[%s4943_s15 + $0x5f0] sm:$0xf]  ;;  %v4749_v0 = vld [vmem:[%s4943_s15 + $0x43c] sm:$0xf] }
 0x2ec   : > { %2367 = vmatmul.bf16.gmra.mxu1 %v4243_v14 }
 0x2ed   : > { %v2658_v33 = vadd.f32 %v2657_v2, %v2329_v29 }
 0x2ee   : > { %v2747_v36 = vpop.f32.mrf.mxu3 }
 0x2ef   : > { %2869 = vst.msk [vmem:[%s5072_s22 + $0x240] sm:$0xff] %vm1617_vm0, %v2658_v33  ;;  %v3068_v30 = vsel %vm1617_vm0, %v2658_v33, 0.0  ;;  %v3259_v16 = vmul.f32 %v2658_v33, %v2658_v33  ;;  %v6032_v49 = vadd.f32 %v2747_v36, %v5616_v25  ;;  %v4750_v25 = vld [vmem:[%s4943_s15 + $0x440] sm:$0xf0] }
 0x2f0   : > { %v3069_v17 = vadd.f32 %v3068_v30, %v3067_v34  ;;  %v2664_v52 = vpop.f32.mrf.mxu2  ;;  %v2001_v2 = vpop.f32.mrf.mxu0  ;;  %v4252_v34 = vld [vmem:[%s4943_s15 + $0x444] sm:$0xf0]  ;;  %v4251_v14 = vor.u32 %v4750_v25, %v4250_v18 }
 0x2f1   : > { %v3458_v44 = vsel %vm1617_vm0, %v3259_v16, 0.0  ;;  %2905 = vst.msk [vmem:[%s5072_s22 + $0x360] sm:$0xff] %vm1617_vm0, %v6032_v49  ;;  %v2002_v39 = vadd.f32 %v6004_v61, %v2001_v2  ;;  %v2330_v26 = vpop.f32.mrf.mxu1  ;;  %v4255_v36 = vor.u32 %v4749_v0, %v4252_v34 }
 0x2f2   : > { %v3459_v27 = vadd.f32 %v3458_v44, %v3457_v55  ;;  %v4475_v55 = vor.u32 %v4805_v43, %v4474_v1  ;;  %v4282_v44 = vld [vmem:[%s4943_s15 + $0x470] sm:$0xf] }
 0x2f3   : > { %v2331_v46 = vadd.f32 %v2330_v26, %v2002_v39  ;;  %v4757_v39 = vld [vmem:[%s4943_s15 + $0x478] sm:$0xf0] }
 0x2f5   : > { %v2660_v3 = vadd.f32 %v2659_v28, %v2331_v46  ;;  %4594 = vmatmul.msk.bf16.gmra.mxu2 %vm1617_vm0, %v4271_v62 }
 0x2f6   : > { %v2749_v56 = vpop.f32.mrf.mxu3 }
 0x2f7   : > { %2870 = vst.msk [vmem:[%s5072_s22 + $0x248] sm:$0xff] %vm1617_vm0, %v2660_v3  ;;  %v3070_v19 = vsel %vm1617_vm0, %v2660_v3, 0.0  ;;  %v3260_v6 = vmul.f32 %v2660_v3, %v2660_v3  ;;  %v6050_v40 = vadd.f32 %v2749_v56, %v5632_v11  ;;  %v4283_v3 = vor.u32 %v4757_v39, %v4282_v44  ;;  %v4262_v56 = vld [vmem:[%s4943_s15 + $0x450] sm:$0xf] }
 0x2f8   : > { %v3071_v29 = vadd.f32 %v3070_v19, %v3069_v17  ;;  %v2667_v28 = vpop.f32.mrf.mxu2  ;;  %v2004_v33 = vpop.f32.mrf.mxu0  ;;  %v4752_v19 = vld [vmem:[%s4943_s15 + $0x454] sm:$0xf] }
 0x2f9   : > { %v3460_v51 = vsel %vm1617_vm0, %v3260_v6, 0.0  ;;  %2906 = vst.msk [vmem:[%s5072_s22 + $0x368] sm:$0xff] %vm1617_vm0, %v6050_v40  ;;  %v2005_v63 = vadd.f32 %v6004_v61, %v2004_v33  ;;  %v2333_v30 = vpop.f32.mrf.mxu1  ;;  %v4264_v6 = vld [vmem:[%s4943_s15 + $0x45c] sm:$0xf0] }
 0x2fa   : > { %v3461_v16 = vadd.f32 %v3460_v51, %v3459_v27 }
 0x2fb   : > { %v2334_v2 = vadd.f32 %v2333_v30, %v2005_v63  ;;  %2043 = vmatmul.bf16.gmra.mxu0 %v4251_v14  ;;  %4611 = vmatmul.msk.bf16.gmra.mxu3 %vm1617_vm0, %v4475_v55  ;;  %v4753_v14 = vld [vmem:[%s4943_s15 + $0x458] sm:$0xf0] }
 0x2fc   : > { %2372 = vmatmul.bf16.gmra.mxu1 %v4255_v36  ;;  %v4263_v51 = vor.u32 %v4753_v14, %v4262_v56 }
 0x2fd   : > { %v2663_v11 = vadd.f32 %v2662_v48, %v2334_v2 }
 0x2fe   : > { %v2752_v17 = vpop.f32.mrf.mxu3 }
 0x2ff   : > { %2871 = vst.msk [vmem:[%s5072_s22 + $0x250] sm:$0xff] %vm1617_vm0, %v2663_v11  ;;  %v3072_v26 = vsel %vm1617_vm0, %v2663_v11, 0.0  ;;  %v3261_v62 = vmul.f32 %v2663_v11, %v2663_v11  ;;  %v6064_v27 = vadd.f32 %v2752_v17, %v5643_v24 }
 0x300   : > { %v3073_v46 = vadd.f32 %v3072_v26, %v3071_v29  ;;  %v2669_v18 = vpop.f32.mrf.mxu2  ;;  %v2006_v25 = vpop.f32.mrf.mxu0 }
 0x301   : > { %v3462_v48 = vsel %vm1617_vm0, %v3261_v62, 0.0  ;;  %2907 = vst.msk [vmem:[%s5072_s22 + $0x370] sm:$0xff] %vm1617_vm0, %v6064_v27  ;;  %v2007_v1 = vadd.f32 %v6004_v61, %v2006_v25  ;;  %v2335_v43 = vpop.f32.mrf.mxu1  ;;  %v4294_v62 = vld [vmem:[%s4943_s15 + $0x488] sm:$0xf] }
 0x302   : > { %v3463_v0 = vadd.f32 %v3462_v48, %v3461_v16  ;;  %v4267_v16 = vor.u32 %v4752_v19, %v4264_v6  ;;  %v4274_v6 = vld [vmem:[%s4943_s15 + $0x468] sm:$0xf] }
 0x303   : > { %v2336_v34 = vadd.f32 %v2335_v43, %v2007_v1 }
 0x305   : > { %v2665_v24 = vadd.f32 %v2664_v52, %v2336_v34  ;;  %4595 = vmatmul.msk.bf16.gmra.mxu2 %vm1617_vm0, %v4283_v3 }
 0x306   : > { %v2754_v55 = vpop.f32.mrf.mxu3 }
 0x307   : > { %2872 = vst.msk [vmem:[%s5072_s22 + $0x258] sm:$0xff] %vm1617_vm0, %v2665_v24  ;;  %v3074_v29 = vsel %vm1617_vm0, %v2665_v24, 0.0  ;;  %v3262_v33 = vmul.f32 %v2665_v24, %v2665_v24  ;;  %v6080_v36 = vadd.f32 %v2754_v55, %v5659_v53  ;;  %v4756_v55 = vld [vmem:[%s4943_s15 + $0x470] sm:$0xf0] }
 0x308   : > { %v3075_v63 = vadd.f32 %v3074_v29, %v3073_v46  ;;  %v2672_v30 = vpop.f32.mrf.mxu2  ;;  %v2009_v52 = vpop.f32.mrf.mxu0  ;;  %v4760_v46 = vld [vmem:[%s4943_s15 + $0x490] sm:$0xf0]  ;;  %v4755_v29 = vld [vmem:[%s4943_s15 + $0x46c] sm:$0xf] }
 0x309   : > { %v3464_v2 = vsel %vm1617_vm0, %v3262_v33, 0.0  ;;  %2908 = vst.msk [vmem:[%s5072_s22 + $0x378] sm:$0xff] %vm1617_vm0, %v6080_v36  ;;  %v2010_v11 = vadd.f32 %v6004_v61, %v2009_v52  ;;  %v2338_v17 = vpop.f32.mrf.mxu1  ;;  %v4295_v14 = vor.u32 %v4760_v46, %v4294_v62  ;;  %v4276_v33 = vld [vmem:[%s4943_s15 + $0x474] sm:$0xf0] }
 0x30a   : > { %v3465_v44 = vadd.f32 %v3464_v2, %v3463_v0  ;;  %v4275_v2 = vor.u32 %v4756_v55, %v4274_v6 }
 0x30b   : > { %v2339_v53 = vadd.f32 %v2338_v17, %v2010_v11  ;;  %2048 = vmatmul.bf16.gmra.mxu0 %v4263_v51 }
 0x30c   : > { %2377 = vmatmul.bf16.gmra.mxu1 %v4267_v16 }
 0x30d   : > { %v2668_v39 = vadd.f32 %v2667_v28, %v2339_v53 }
 0x30e   : > { %v2757_v26 = vpop.f32.mrf.mxu3 }
 0x30f   : > { %2873 = vst.msk [vmem:[%s5072_s22 + $0x260] sm:$0xff] %vm1617_vm0, %v2668_v39  ;;  %v3076_v25 = vsel %vm1617_vm0, %v2668_v39, 0.0  ;;  %v3263_v48 = vmul.f32 %v2668_v39, %v2668_v39  ;;  %v6093_v1 = vadd.f32 %v2757_v26, %v5676_v37 }
 0x310   : > { %v3077_v43 = vadd.f32 %v3076_v25, %v3075_v63  ;;  %v2674_v3 = vpop.f32.mrf.mxu2  ;;  %v2011_v0 = vpop.f32.mrf.mxu0 }
 0x311   : > { %v3466_v28 = vsel %vm1617_vm0, %v3263_v48, 0.0  ;;  %2909 = vst.msk [vmem:[%s5072_s22 + $0x380] sm:$0xff] %vm1617_vm0, %v6093_v1  ;;  %v2012_v34 = vadd.f32 %v6004_v61, %v2011_v0  ;;  %v2340_v56 = vpop.f32.mrf.mxu1  ;;  %v4306_v48 = vld [vmem:[%s4943_s15 + $0x4a0] sm:$0xf] }
 0x312   : > { %v3467_v24 = vadd.f32 %v3466_v28, %v3465_v44  ;;  %v4279_v44 = vor.u32 %v4755_v29, %v4276_v33 }
 0x313   : > { %v2341_v19 = vadd.f32 %v2340_v56, %v2012_v34 }
 0x315   : > { %v2670_v37 = vadd.f32 %v2669_v18, %v2341_v19  ;;  %4596 = vmatmul.msk.bf16.gmra.mxu2 %vm1617_vm0, %v4295_v14 }
 0x316   : > { %v2759_v51 = vpop.f32.mrf.mxu3 }
 0x317   : > { %2874 = vst.msk [vmem:[%s5072_s22 + $0x268] sm:$0xff] %vm1617_vm0, %v2670_v37  ;;  %v3078_v63 = vsel %vm1617_vm0, %v2670_v37, 0.0  ;;  %v3264_v52 = vmul.f32 %v2670_v37, %v2670_v37  ;;  %v6109_v16 = vadd.f32 %v2759_v51, %v5692_v35 }
 0x318   : > { %v3079_v11 = vadd.f32 %v3078_v63, %v3077_v43  ;;  %v2677_v17 = vpop.f32.mrf.mxu2  ;;  %v2014_v18 = vpop.f32.mrf.mxu0  ;;  %v4763_v43 = vld [vmem:[%s4943_s15 + $0x4a8] sm:$0xf0]  ;;  %s3706_s15 = sshll.u32 %s6489_s19, 3 }
 0x319   : > { %v3468_v53 = vsel %vm1617_vm0, %v3264_v52, 0.0  ;;  %2910 = vst.msk [vmem:[%s5072_s22 + $0x388] sm:$0xff] %vm1617_vm0, %v6109_v16  ;;  %v2015_v39 = vadd.f32 %v6004_v61, %v2014_v18  ;;  %v2343_v26 = vpop.f32.mrf.mxu1  ;;  %v4307_v55 = vor.u32 %v4763_v43, %v4306_v48  ;;  %s247_s6 = scalar_lea.vmem %s6484_s4, %s3706_s15  ;;  %s251_s9 = scalar_lea.vmem %s6485_s5, %s3706_s15 }
 0x31a   : > { %v3469_v62 = vadd.f32 %v3468_v53, %v3467_v24 }
 0x31b   : > { %v2344_v35 = vadd.f32 %v2343_v26, %v2015_v39  ;;  %2053 = vmatmul.bf16.gmra.mxu0 %v4275_v2 }
 0x31c   : > { %2382 = vmatmul.bf16.gmra.mxu1 %v4279_v44 }
 0x31d   : > { %v2673_v46 = vadd.f32 %v2672_v30, %v2344_v35 }
 0x31e   : > { %v2762_v25 = vpop.f32.mrf.mxu3 }
 0x31f   : > { %2875 = vst.msk [vmem:[%s5072_s22 + $0x270] sm:$0xff] %vm1617_vm0, %v2673_v46  ;;  %v3080_v0 = vsel %vm1617_vm0, %v2673_v46, 0.0  ;;  %v3265_v28 = vmul.f32 %v2673_v46, %v2673_v46  ;;  %v6122_v34 = vadd.f32 %v2762_v25, %v5704_v54 }
 0x320   : > { %v3081_v56 = vadd.f32 %v3080_v0, %v3079_v11  ;;  %v2679_v14 = vpop.f32.mrf.mxu2  ;;  %v2016_v24 = vpop.f32.mrf.mxu0 }
 0x321   : > { %v3470_v19 = vsel %vm1617_vm0, %v3265_v28, 0.0  ;;  %2911 = vst.msk [vmem:[%s5072_s22 + $0x390] sm:$0xff] %vm1617_vm0, %v6122_v34  ;;  %v2017_v30 = vadd.f32 %v6004_v61, %v2016_v24  ;;  %v2345_v6 = vpop.f32.mrf.mxu1 }
 0x322   : > { %v3471_v37 = vadd.f32 %v3470_v19, %v3469_v62 }
 0x323   : > { %v2346_v29 = vadd.f32 %v2345_v6, %v2017_v30 }
 0x325   : > { %v2675_v33 = vadd.f32 %v2674_v3, %v2346_v29  ;;  %4597 = vmatmul.msk.bf16.gmra.mxu2 %vm1617_vm0, %v4307_v55 }
 0x326   : > { %v2764_v54 = vpop.f32.mrf.mxu3 }
 0x327   : > { %2876 = vst.msk [vmem:[%s5072_s22 + $0x278] sm:$0xff] %vm1617_vm0, %v2675_v33  ;;  %v3082_v51 = vsel %vm1617_vm0, %v2675_v33, 0.0  ;;  %v3266_v63 = vmul.f32 %v2675_v33, %v2675_v33  ;;  %v6134_v52 = vadd.f32 %v2764_v54, %v5720_v21 }
 0x328   : > { %v3083_v2 = vadd.f32 %v3082_v51, %v3081_v56  ;;  %v2682_v11 = vpop.f32.mrf.mxu2  ;;  %v2019_v18 = vpop.f32.mrf.mxu0 }
 0x329   : > { %v3472_v44 = vsel %vm1617_vm0, %v3266_v63, 0.0  ;;  %2912 = vst.msk [vmem:[%s5072_s22 + $0x398] sm:$0xff] %vm1617_vm0, %v6134_v52  ;;  %v2020_v3 = vadd.f32 %v6004_v61, %v2019_v18  ;;  %v2348_v53 = vpop.f32.mrf.mxu1 }
 0x32a   : > { %v3473_v39 = vadd.f32 %v3472_v44, %v3471_v37 }
 0x32b   : > { %v2349_v26 = vadd.f32 %v2348_v53, %v2020_v3 }
 0x32d   : > { %v2678_v62 = vadd.f32 %v2677_v17, %v2349_v26 }
 0x32e   : > { %v2767_v35 = vpop.f32.mrf.mxu3 }
 0x32f   : > { %2877 = vst.msk [vmem:[%s5072_s22 + $0x280] sm:$0xff] %vm1617_vm0, %v2678_v62  ;;  %v3084_v21 = vsel %vm1617_vm0, %v2678_v62, 0.0  ;;  %v3267_v46 = vmul.f32 %v2678_v62, %v2678_v62  ;;  %v6145_v25 = vadd.f32 %v2767_v35, %v5732_v59 }
 0x330   : > { %v3085_v48 = vadd.f32 %v3084_v21, %v3083_v2  ;;  %v2684_v43 = vpop.f32.mrf.mxu2  ;;  %v2021_v0 = vpop.f32.mrf.mxu0 }
 0x331   : > { %v3474_v28 = vsel %vm1617_vm0, %v3267_v46, 0.0  ;;  %2913 = vst.msk [vmem:[%s5072_s22 + $0x3a0] sm:$0xff] %vm1617_vm0, %v6145_v25  ;;  %v2022_v17 = vadd.f32 %v6004_v61, %v2021_v0  ;;  %v2350_v56 = vpop.f32.mrf.mxu1 }
 0x332   : > { %v3475_v24 = vadd.f32 %v3474_v28, %v3473_v39 }
 0x333   : > { %v2351_v19 = vadd.f32 %v2350_v56, %v2022_v17 }
 0x335   : > { %v2680_v30 = vadd.f32 %v2679_v14, %v2351_v19 }
 0x336   : > { %v2769_v6 = vpop.f32.mrf.mxu3 }
 0x337   : > { %2878 = vst.msk [vmem:[%s5072_s22 + $0x288] sm:$0xff] %vm1617_vm0, %v2680_v30  ;;  %v3086_v59 = vsel %vm1617_vm0, %v2680_v30, 0.0  ;;  %v3268_v55 = vmul.f32 %v2680_v30, %v2680_v30  ;;  %v6156_v37 = vadd.f32 %v2769_v6, %v5748_v5 }
 0x338   : > { %v3087_v29 = vadd.f32 %v3086_v59, %v3085_v48  ;;  %v2687_v33 = vpop.f32.mrf.mxu2  ;;  %v2024_v54 = vpop.f32.mrf.mxu0 }
 0x339   : > { %v3476_v51 = vsel %vm1617_vm0, %v3268_v55, 0.0  ;;  %2914 = vst.msk [vmem:[%s5072_s22 + $0x3a8] sm:$0xff] %vm1617_vm0, %v6156_v37  ;;  %v2025_v14 = vadd.f32 %v6004_v61, %v2024_v54  ;;  %v2353_v63 = vpop.f32.mrf.mxu1 }
 0x33a   : > { %v3477_v2 = vadd.f32 %v3476_v51, %v3475_v24 }
 0x33b   : > { %v2354_v18 = vadd.f32 %v2353_v63, %v2025_v14 }
 0x33d   : > { %v2683_v44 = vadd.f32 %v2682_v11, %v2354_v18 }
 0x33e   : > { %v2772_v3 = vpop.f32.mrf.mxu3 }
 0x33f   : > { %2879 = vst.msk [vmem:[%s5072_s22 + $0x290] sm:$0xff] %vm1617_vm0, %v2683_v44  ;;  %v3088_v5 = vsel %vm1617_vm0, %v2683_v44, 0.0  ;;  %v3269_v53 = vmul.f32 %v2683_v44, %v2683_v44  ;;  %v6167_v39 = vadd.f32 %v2772_v3, %v5760_v50 }
 0x340   : > { %v3089_v26 = vadd.f32 %v3088_v5, %v3087_v29  ;;  %v2689_v62 = vpop.f32.mrf.mxu2  ;;  %v2026_v35 = vpop.f32.mrf.mxu0 }
 0x341   : > { %v3478_v21 = vsel %vm1617_vm0, %v3269_v53, 0.0  ;;  %2915 = vst.msk [vmem:[%s5072_s22 + $0x3b0] sm:$0xff] %vm1617_vm0, %v6167_v39  ;;  %v2027_v11 = vadd.f32 %v6004_v61, %v2026_v35  ;;  %v2355_v46 = vpop.f32.mrf.mxu1 }
 0x342   : > { %v3479_v48 = vadd.f32 %v3478_v21, %v3477_v2 }
 0x343   : > { %v2356_v0 = vadd.f32 %v2355_v46, %v2027_v11 }
 0x345   : > { %v2685_v28 = vadd.f32 %v2684_v43, %v2356_v0 }
 0x346   : > { %v2774_v17 = vpop.f32.mrf.mxu3 }
 0x347   : > { %2880 = vst.msk [vmem:[%s5072_s22 + $0x298] sm:$0xff] %vm1617_vm0, %v2685_v28  ;;  %v3090_v50 = vsel %vm1617_vm0, %v2685_v28, 0.0  ;;  %v3270_v56 = vmul.f32 %v2685_v28, %v2685_v28  ;;  %v6178_v24 = vadd.f32 %v2774_v17, %v5776_v58 }
 0x348   : > { %v3091_v19 = vadd.f32 %v3090_v50, %v3089_v26  ;;  %v2692_v30 = vpop.f32.mrf.mxu2  ;;  %v2029_v6 = vpop.f32.mrf.mxu0 }
 0x349   : > { %v3480_v59 = vsel %vm1617_vm0, %v3270_v56, 0.0  ;;  %2916 = vst.msk [vmem:[%s5072_s22 + $0x3b8] sm:$0xff] %vm1617_vm0, %v6178_v24  ;;  %v2030_v43 = vadd.f32 %v6004_v61, %v2029_v6  ;;  %v2358_v55 = vpop.f32.mrf.mxu1 }
 0x34a   : > { %v3481_v29 = vadd.f32 %v3480_v59, %v3479_v48 }
 0x34b   : > { %v2359_v54 = vadd.f32 %v2358_v55, %v2030_v43 }
 0x34d   : > { %v2688_v51 = vadd.f32 %v2687_v33, %v2359_v54 }
 0x34e   : > { %v2777_v14 = vpop.f32.mrf.mxu3 }
 0x34f   : > { %2881 = vst.msk [vmem:[%s5072_s22 + $0x2a0] sm:$0xff] %vm1617_vm0, %v2688_v51  ;;  %v3092_v58 = vsel %vm1617_vm0, %v2688_v51, 0.0  ;;  %v3271_v63 = vmul.f32 %v2688_v51, %v2688_v51  ;;  %v6189_v2 = vadd.f32 %v2777_v14, %v5788_v45 }
 0x350   : > { %v3093_v18 = vadd.f32 %v3092_v58, %v3091_v19  ;;  %v2694_v44 = vpop.f32.mrf.mxu2  ;;  %v2031_v3 = vpop.f32.mrf.mxu0 }
 0x351   : > { %v3482_v5 = vsel %vm1617_vm0, %v3271_v63, 0.0  ;;  %2917 = vst.msk [vmem:[%s5072_s22 + $0x3c0] sm:$0xff] %vm1617_vm0, %v6189_v2  ;;  %v2032_v33 = vadd.f32 %v6004_v61, %v2031_v3  ;;  %v2360_v53 = vpop.f32.mrf.mxu1 }
 0x352   : > { %v3483_v26 = vadd.f32 %v3482_v5, %v3481_v29 }
 0x353   : > { %v2361_v35 = vadd.f32 %v2360_v53, %v2032_v33 }
 0x355   : > { %v2690_v21 = vadd.f32 %v2689_v62, %v2361_v35 }
 0x356   : > { %v2779_v11 = vpop.f32.mrf.mxu3 }
 0x357   : > { %2882 = vst.msk [vmem:[%s5072_s22 + $0x2a8] sm:$0xff] %vm1617_vm0, %v2690_v21  ;;  %v3094_v45 = vsel %vm1617_vm0, %v2690_v21, 0.0  ;;  %v3272_v46 = vmul.f32 %v2690_v21, %v2690_v21  ;;  %v6200_v48 = vadd.f32 %v2779_v11, %v5804_v47 }
 0x358   : > { %v6202_v0 = vadd.f32 %v3094_v45, %v3093_v18  ;;  %v2697_v28 = vpop.f32.mrf.mxu2  ;;  %v2034_v17 = vpop.f32.mrf.mxu0 }
 0x359   : > { %v3484_v50 = vsel %vm1617_vm0, %v3272_v46, 0.0  ;;  %2918 = vst.msk [vmem:[%s5072_s22 + $0x3c8] sm:$0xff] %vm1617_vm0, %v6200_v48  ;;  %v2035_v62 = vadd.f32 %v6004_v61, %v2034_v17  ;;  %v2363_v56 = vpop.f32.mrf.mxu1 }
 0x35a   : > { %v6209_v19 = vadd.f32 %v3484_v50, %v3483_v26 }
 0x35b   : > { %v2364_v6 = vadd.f32 %v2363_v56, %v2035_v62 }
 0x35d   : > { %v6211_v59 = vadd.f32 %v2692_v30, %v2364_v6 }
 0x35e   : > { %v2782_v47 = vpop.f32.mrf.mxu3 }
 0x35f   : > { %2883 = vst.msk [vmem:[%s5072_s22 + $0x2b0] sm:$0xff] %vm1617_vm0, %v6211_v59  ;;  %v6217_v43 = vadd.f32 %v2782_v47, %v5816_v60 }
 0x360   : > { %v2699_v55 = vpop.f32.mrf.mxu2  ;;  %v2036_v29 = vpop.f32.mrf.mxu0 }
 0x361   : > { %2919 = vst.msk [vmem:[%s5072_s22 + $0x3d0] sm:$0xff] %vm1617_vm0, %v6217_v43  ;;  %v2037_v54 = vadd.f32 %v6004_v61, %v2036_v29  ;;  %v2365_v51 = vpop.f32.mrf.mxu1 }
 0x363   : > { %v2366_v14 = vadd.f32 %v2365_v51, %v2037_v54 }
 0x365   : > { %v2695_v30 = vadd.f32 %v2694_v44, %v2366_v14 }
 0x366   : > { %v2784_v58 = vpop.f32.mrf.mxu3 }
 0x367   : > { %2884 = vst.msk [vmem:[%s5072_s22 + $0x2b8] sm:$0xff] %vm1617_vm0, %v2695_v30  ;;  %v6226_v63 = vadd.f32 %v2784_v58, %v5832_v42 }
 0x368   : > { %v2702_v60 = vpop.f32.mrf.mxu2  ;;  %v2039_v18 = vpop.f32.mrf.mxu0 }
 0x369   : > { %2920 = vst.msk [vmem:[%s5072_s22 + $0x3d8] sm:$0xff] %vm1617_vm0, %v6226_v63  ;;  %v2040_v3 = vadd.f32 %v6004_v61, %v2039_v18  ;;  %v2368_v5 = vpop.f32.mrf.mxu1 }
 0x36b   : > { %v2369_v33 = vadd.f32 %v2368_v5, %v2040_v3 }
 0x36d   : > { %v2698_v53 = vadd.f32 %v2697_v28, %v2369_v33 }
 0x36e   : > { %v2787_v44 = vpop.f32.mrf.mxu3 }
 0x36f   : > { %2885 = vst.msk [vmem:[%s5072_s22 + $0x2c0] sm:$0xff] %vm1617_vm0, %v2698_v53  ;;  %v6235_v26 = vadd.f32 %v2787_v44, %v5844_v8 }
 0x370   : > { %v2704_v42 = vpop.f32.mrf.mxu2  ;;  %v2041_v35 = vpop.f32.mrf.mxu0 }
 0x371   : > { %2921 = vst.msk [vmem:[%s5072_s22 + $0x3e0] sm:$0xff] %vm1617_vm0, %v6235_v26  ;;  %v2042_v21 = vadd.f32 %v6004_v61, %v2041_v35  ;;  %v2370_v11 = vpop.f32.mrf.mxu1 }
 0x373   : > { %v2371_v45 = vadd.f32 %v2370_v11, %v2042_v21 }
 0x375   : > { %v2700_v46 = vadd.f32 %v2699_v55, %v2371_v45 }
 0x376   : > { %v2789_v28 = vpop.f32.mrf.mxu3 }
 0x377   : > { %2886 = vst.msk [vmem:[%s5072_s22 + $0x2c8] sm:$0xff] %vm1617_vm0, %v2700_v46  ;;  %v6244_v17 = vadd.f32 %v2789_v28, %v5860_v38 }
 0x378   : > { %v2707_v8 = vpop.f32.mrf.mxu2  ;;  %v2044_v50 = vpop.f32.mrf.mxu0 }
 0x379   : > { %2922 = vst.msk [vmem:[%s5072_s22 + $0x3e8] sm:$0xff] %vm1617_vm0, %v6244_v17  ;;  %v2045_v62 = vadd.f32 %v6004_v61, %v2044_v50  ;;  %v2373_v56 = vpop.f32.mrf.mxu1  ;;  %v3096_v50 = vsel %vm1617_vm0, %v6211_v59, 0.0 }
 0x37b   : > { %v2374_v6 = vadd.f32 %v2373_v56, %v2045_v62  ;;  %v3274_v62 = vmul.f32 %v2695_v30, %v2695_v30 }
 0x37d   : > { %v2703_v47 = vadd.f32 %v2702_v60, %v2374_v6  ;;  %v3275_v6 = vmul.f32 %v2698_v53, %v2698_v53 }
 0x37e   : > { %v2792_v55 = vpop.f32.mrf.mxu3 }
 0x37f   : > { %2887 = vst.msk [vmem:[%s5072_s22 + $0x2d0] sm:$0xff] %vm1617_vm0, %v2703_v47  ;;  %v6253_v29 = vadd.f32 %v2792_v55, %v5872_v31  ;;  %v3098_v55 = vsel %vm1617_vm0, %v2695_v30, 0.0  ;;  %v3102_v30 = vsel %vm1617_vm0, %v2700_v46, 0.0 }
 0x380   : > { %v2709_v38 = vpop.f32.mrf.mxu2  ;;  %v2046_v54 = vpop.f32.mrf.mxu0 }
 0x381   : > { %2923 = vst.msk [vmem:[%s5072_s22 + $0x3f0] sm:$0xff] %vm1617_vm0, %v6253_v29  ;;  %v2047_v51 = vadd.f32 %v6004_v61, %v2046_v54  ;;  %v2375_v14 = vpop.f32.mrf.mxu1 }
 0x383   : > { %v2376_v58 = vadd.f32 %v2375_v14, %v2047_v51  ;;  %v3097_v51 = vadd.f32 %v3096_v50, %v6202_v0  ;;  %v3488_v14 = vsel %vm1617_vm0, %v3274_v62, 0.0 }
 0x385   : > { %v2705_v18 = vadd.f32 %v2704_v42, %v2376_v58  ;;  %v3100_v58 = vsel %vm1617_vm0, %v2698_v53, 0.0 }
 0x386   : > { %v2794_v3 = vpop.f32.mrf.mxu3 }
 0x387   : > { %2888 = vst.msk [vmem:[%s5072_s22 + $0x2d8] sm:$0xff] %vm1617_vm0, %v2705_v18  ;;  %v6262_v60 = vadd.f32 %v2794_v3, %v5888_v41  ;;  %v3273_v41 = vmul.f32 %v6211_v59, %v6211_v59  ;;  %v3276_v3 = vmul.f32 %v2700_v46, %v2700_v46  ;;  %v3278_v50 = vmul.f32 %v2705_v18, %v2705_v18 }
 0x388   : > { %v2712_v5 = vpop.f32.mrf.mxu2  ;;  %v2049_v31 = vpop.f32.mrf.mxu0 }
 0x389   : > { %2924 = vst.msk [vmem:[%s5072_s22 + $0x3f8] sm:$0xff] %vm1617_vm0, %v6262_v60  ;;  %v2050_v33 = vadd.f32 %v6004_v61, %v2049_v31  ;;  %v2378_v44 = vpop.f32.mrf.mxu1  ;;  %v3099_v31 = vadd.f32 %v3098_v55, %v3097_v51 }
 0x38b   : > { %v2379_v35 = vadd.f32 %v2378_v44, %v2050_v33  ;;  %v3490_v33 = vsel %vm1617_vm0, %v3275_v6, 0.0 }
 0x38d   : > { %v2708_v21 = vadd.f32 %v2707_v8, %v2379_v35  ;;  %v3486_v8 = vsel %vm1617_vm0, %v3273_v41, 0.0 }
 0x38e   : > { %v3487_v59 = vadd.f32 %v3486_v8, %v6209_v19  ;;  %v3104_v19 = vsel %vm1617_vm0, %v2703_v47, 0.0 }
 0x38f   : > { %2889 = vst.msk [vmem:[%s5072_s22 + $0x2e0] sm:$0xff] %vm1617_vm0, %v2708_v21  ;;  %v3279_v46 = vmul.f32 %v2708_v21, %v2708_v21 }
 0x390   : > { %v6270_v11 = vpop.f32.mrf.mxu2  ;;  %v2051_v42 = vpop.f32.mrf.mxu0  ;;  %v3489_v53 = vadd.f32 %v3488_v14, %v3487_v59 }
 0x391   : > { %v2052_v45 = vadd.f32 %v6004_v61, %v2051_v42  ;;  %v2380_v28 = vpop.f32.mrf.mxu1 }
 0x393   : > { %v2381_v56 = vadd.f32 %v2380_v28, %v2052_v45  ;;  %v3101_v45 = vadd.f32 %v3100_v58, %v3099_v31  ;;  %v3492_v28 = vsel %vm1617_vm0, %v3276_v3, 0.0  ;;  %v3496_v58 = vsel %vm1617_vm0, %v3278_v50, 0.0 }
 0x394   : > { %v3108_v3 = vsel %vm1617_vm0, %v2708_v21, 0.0 }
 0x395   : > { %v2710_v54 = vadd.f32 %v2709_v38, %v2381_v56  ;;  %v3277_v38 = vmul.f32 %v2703_v47, %v2703_v47  ;;  %v3491_v56 = vadd.f32 %v3490_v33, %v3489_v53  ;;  %v3103_v6 = vadd.f32 %v3102_v30, %v3101_v45 }
 0x396   : > { %v3498_v33 = vsel %vm1617_vm0, %v3279_v46, 0.0 }
 0x397   : > { %2890 = vst.msk [vmem:[%s5072_s22 + $0x2e8] sm:$0xff] %vm1617_vm0, %v2710_v54  ;;  %v3494_v8 = vsel %vm1617_vm0, %v3277_v38, 0.0  ;;  %v3493_v51 = vadd.f32 %v3492_v28, %v3491_v56  ;;  %v3105_v14 = vadd.f32 %v3104_v19, %v3103_v6  ;;  %v3280_v59 = vmul.f32 %v2710_v54, %v2710_v54 }
 0x398   : > { %v2717_v44 = vpop.f32.mrf.mxu2  ;;  %v2054_v35 = vpop.f32.mrf.mxu0  ;;  %v3110_v30 = vsel %vm1617_vm0, %v2710_v54, 0.0 }
 0x399   : > { %v2718_v0 = vadd.f32 %v2717_v44, %v5454_v4  ;;  %v2055_v42 = vadd.f32 %v6004_v61, %v2054_v35  ;;  %v2383_v41 = vpop.f32.mrf.mxu1  ;;  %v3106_v4 = vsel %vm1617_vm0, %v2705_v18, 0.0  ;;  %v3495_v47 = vadd.f32 %v3494_v8, %v3493_v51 }
 0x39a   : > { %v3107_v31 = vadd.f32 %v3106_v4, %v3105_v14  ;;  %v3500_v53 = vsel %vm1617_vm0, %v3280_v59, 0.0 }
 0x39b   : > { %2893 = vst.msk [vmem:[%s5072_s22 + $0x300] sm:$0xff] %vm1617_vm0, %v2718_v0  ;;  %v2384_v62 = vadd.f32 %v2383_v41, %v2055_v42  ;;  %v3497_v42 = vadd.f32 %v3496_v58, %v3495_v47  ;;  %v3116_v51 = vsel %vm1617_vm0, %v2718_v0, 0.0 }
 0x39c   : > { %v3109_v21 = vadd.f32 %v3108_v3, %v3107_v31 }
 0x39d   : > { %v2713_v55 = vadd.f32 %v2712_v5, %v2384_v62  ;;  %v3499_v19 = vadd.f32 %v3498_v33, %v3497_v42 }
 0x39e   : > { %v3111_v50 = vadd.f32 %v3110_v30, %v3109_v21 }
 0x39f   : > { %2891 = vst.msk [vmem:[%s5072_s22 + $0x2f0] sm:$0xff] %vm1617_vm0, %v2713_v55  ;;  %v3281_v18 = vmul.f32 %v2713_v55, %v2713_v55  ;;  %v3112_v45 = vsel %vm1617_vm0, %v2713_v55, 0.0 }
 0x3a0   : > { %v2719_v44 = vpop.f32.mrf.mxu2  ;;  %v2056_v35 = vpop.f32.mrf.mxu0  ;;  %v3113_v56 = vadd.f32 %v3112_v45, %v3111_v50  ;;  %v3288_v50 = vmul.f32 %v5917_v12, %v5917_v12 }
 0x3a1   : > { %v2720_v5 = vadd.f32 %v2719_v44, %v5470_v32  ;;  %v2057_v38 = vadd.f32 %v6004_v61, %v2056_v35  ;;  %v2385_v41 = vpop.f32.mrf.mxu1  ;;  %v3502_v54 = vsel %vm1617_vm0, %v3281_v18, 0.0  ;;  %v3501_v32 = vadd.f32 %v3500_v53, %v3499_v19 }
 0x3a2   : > { %v3283_v61 = vmul.f32 %v2718_v0, %v2718_v0  ;;  %v3124_v19 = vsel %vm1617_vm0, %v5899_v9, 0.0 }
 0x3a3   : > { %2894 = vst.msk [vmem:[%s5072_s22 + $0x308] sm:$0xff] %vm1617_vm0, %v2720_v5  ;;  %v2386_v28 = vadd.f32 %v2385_v41, %v2057_v38  ;;  %v3503_v8 = vadd.f32 %v3502_v54, %v3501_v32  ;;  %v3284_v14 = vmul.f32 %v2720_v5, %v2720_v5  ;;  %v3118_v31 = vsel %vm1617_vm0, %v2720_v5, 0.0 }
 0x3a4   : > { %v3506_v47 = vsel %vm1617_vm0, %v3283_v61, 0.0  ;;  %v3287_v5 = vmul.f32 %v5899_v9, %v5899_v9  ;;  %v3289_v61 = vmul.f32 %v5931_v7, %v5931_v7  ;;  %v3128_v9 = vsel %vm1617_vm0, %v5931_v7, 0.0 }
 0x3a5   : > { %v2715_v62 = vadd.f32 %v6270_v11, %v2386_v28  ;;  %v3508_v30 = vsel %vm1617_vm0, %v3284_v14, 0.0  ;;  %v3132_v7 = vsel %vm1617_vm0, %v5963_v22, 0.0 }
 0x3a6   : > { %v3518_v14 = vsel %vm1617_vm0, %v3289_v61, 0.0  ;;  %v3298_v61 = vmul.f32 %v6080_v36, %v6080_v36 }
 0x3a7   : > { %2892 = vst.msk [vmem:[%s5072_s22 + $0x2f8] sm:$0xff] %vm1617_vm0, %v2715_v62  ;;  %v3114_v6 = vsel %vm1617_vm0, %v2715_v62, 0.0  ;;  %v3282_v46 = vmul.f32 %v2715_v62, %v2715_v62 }
 0x3a8   : > { %v3115_v4 = vadd.f32 %v3114_v6, %v3113_v56  ;;  %v2722_v55 = vpop.f32.mrf.mxu2  ;;  %v3126_v56 = vsel %vm1617_vm0, %v5917_v12, 0.0  ;;  %v3130_v12 = vsel %vm1617_vm0, %v5949_v13, 0.0 }
 0x3a9   : > { %v3504_v58 = vsel %vm1617_vm0, %v3282_v46, 0.0  ;;  %v2723_v3 = vadd.f32 %v2722_v55, %v5481_v23 }
 0x3aa   : > { %v3505_v11 = vadd.f32 %v3504_v58, %v3503_v8  ;;  %v3117_v59 = vadd.f32 %v3116_v51, %v3115_v4  ;;  %v3516_v8 = vsel %vm1617_vm0, %v3288_v50, 0.0  ;;  %v3290_v4 = vmul.f32 %v5949_v13, %v5949_v13 }
 0x3ab   : > { %2895 = vst.msk [vmem:[%s5072_s22 + $0x310] sm:$0xff] %vm1617_vm0, %v2723_v3  ;;  %v3285_v33 = vmul.f32 %v2723_v3, %v2723_v3  ;;  %v3120_v0 = vsel %vm1617_vm0, %v2723_v3, 0.0  ;;  %v3291_v58 = vmul.f32 %v5963_v22, %v5963_v22  ;;  %v3134_v13 = vsel %vm1617_vm0, %v5981_v57, 0.0 }
 0x3ac   : > { %v3119_v44 = vadd.f32 %v3118_v31, %v3117_v59  ;;  %v3507_v35 = vadd.f32 %v3506_v47, %v3505_v11  ;;  %v3520_v59 = vsel %vm1617_vm0, %v3290_v4, 0.0  ;;  %v3292_v47 = vmul.f32 %v5981_v57, %v5981_v57 }
 0x3ad   : > { %v3510_v23 = vsel %vm1617_vm0, %v3285_v33, 0.0  ;;  %v3136_v22 = vsel %vm1617_vm0, %v5995_v20, 0.0  ;;  %v3138_v57 = vsel %vm1617_vm0, %v6018_v15, 0.0 }
 0x3ae   : > { %v3121_v18 = vadd.f32 %v3120_v0, %v3119_v44  ;;  %v3509_v38 = vadd.f32 %v3508_v30, %v3507_v35  ;;  %v3522_v44 = vsel %vm1617_vm0, %v3291_v58, 0.0  ;;  %v3293_v35 = vmul.f32 %v5995_v20, %v5995_v20 }
 0x3af   : > { %v3140_v20 = vsel %vm1617_vm0, %v6032_v49, 0.0 }
 0x3b0   : > { %v3511_v42 = vadd.f32 %v3510_v23, %v3509_v38  ;;  %v2724_v21 = vpop.f32.mrf.mxu2  ;;  %v3294_v38 = vmul.f32 %v6018_v15, %v6018_v15  ;;  %v3142_v15 = vsel %vm1617_vm0, %v6050_v40, 0.0 }
 0x3b1   : > { %v2725_v41 = vadd.f32 %v2724_v21, %v5497_v10  ;;  %v3514_v10 = vsel %vm1617_vm0, %v3287_v5, 0.0  ;;  %v3526_v21 = vsel %vm1617_vm0, %v3293_v35, 0.0  ;;  %v3303_v35 = vmul.f32 %v6145_v25, %v6145_v25 }
 0x3b3   : > { %2896 = vst.msk [vmem:[%s5072_s22 + $0x318] sm:$0xff] %vm1617_vm0, %v2725_v41  ;;  %v3122_v53 = vsel %vm1617_vm0, %v2725_v41, 0.0  ;;  %v3286_v45 = vmul.f32 %v2725_v41, %v2725_v41  ;;  %v3295_v41 = vmul.f32 %v6032_v49, %v6032_v49  ;;  %v3144_v49 = vsel %vm1617_vm0, %v6064_v27, 0.0 }
 0x3b4   : > { %v3123_v28 = vadd.f32 %v3122_v53, %v3121_v18  ;;  %v3524_v18 = vsel %vm1617_vm0, %v3292_v47, 0.0 }
 0x3b5   : > { %v3512_v54 = vsel %vm1617_vm0, %v3286_v45, 0.0  ;;  %v3528_v45 = vsel %vm1617_vm0, %v3294_v38, 0.0 }
 0x3b6   : > { %v3125_v62 = vadd.f32 %v3124_v19, %v3123_v28  ;;  %v3513_v32 = vadd.f32 %v3512_v54, %v3511_v42  ;;  %v3296_v28 = vmul.f32 %v6050_v40, %v6050_v40  ;;  %v3530_v54 = vsel %vm1617_vm0, %v3295_v41, 0.0 }
 0x3b7   : > { %v3146_v40 = vsel %vm1617_vm0, %v6080_v36, 0.0  ;;  %v3150_v36 = vsel %vm1617_vm0, %v6109_v16, 0.0 }
 0x3b8   : > { %v3127_v6 = vadd.f32 %v3126_v56, %v3125_v62  ;;  %v3515_v46 = vadd.f32 %v3514_v10, %v3513_v32  ;;  %v3297_v62 = vmul.f32 %v6064_v27, %v6064_v27  ;;  %v3532_v56 = vsel %vm1617_vm0, %v3296_v28, 0.0 }
 0x3b9   : > { %v3148_v27 = vsel %vm1617_vm0, %v6093_v1, 0.0 }
 0x3ba   : > { %v3129_v55 = vadd.f32 %v3128_v9, %v3127_v6  ;;  %v3517_v51 = vadd.f32 %v3516_v8, %v3515_v46  ;;  %v3534_v8 = vsel %vm1617_vm0, %v3297_v62, 0.0  ;;  %v3299_v9 = vmul.f32 %v6093_v1, %v6093_v1 }
 0x3bb   : > { %v3152_v1 = vsel %vm1617_vm0, %v6122_v34, 0.0  ;;  %v3308_v62 = vmul.f32 %v6200_v48, %v6200_v48 }
 0x3bc   : > { %v3131_v3 = vadd.f32 %v3130_v12, %v3129_v55  ;;  %v3519_v11 = vadd.f32 %v3518_v14, %v3517_v51  ;;  %v3536_v51 = vsel %vm1617_vm0, %v3298_v61, 0.0  ;;  %v3300_v14 = vmul.f32 %v6109_v16, %v6109_v16 }
 0x3bd   : > { %v3154_v16 = vsel %vm1617_vm0, %v6134_v52, 0.0 }
 0x3be   : > { %v3133_v31 = vadd.f32 %v3132_v7, %v3131_v3  ;;  %v3521_v33 = vadd.f32 %v3520_v59, %v3519_v11  ;;  %v3538_v3 = vsel %vm1617_vm0, %v3299_v9, 0.0  ;;  %v3301_v11 = vmul.f32 %v6122_v34, %v6122_v34 }
 0x3bf   : > { %v3540_v47 = vsel %vm1617_vm0, %v3300_v14, 0.0  ;;  %v3156_v34 = vsel %vm1617_vm0, %v6145_v25, 0.0  ;;  %v3160_v25 = vsel %vm1617_vm0, %v6167_v39, 0.0 }
 0x3c0   : > { %v3135_v30 = vadd.f32 %v3134_v13, %v3133_v31  ;;  %v3523_v0 = vadd.f32 %v3522_v44, %v3521_v33  ;;  %v3302_v31 = vmul.f32 %v6134_v52, %v6134_v52  ;;  %v3542_v13 = vsel %vm1617_vm0, %v3301_v11, 0.0 }
 0x3c1   : > { %v3158_v52 = vsel %vm1617_vm0, %v6156_v37, 0.0  ;;  %v3313_v11 = vmul.f32 %v6253_v29, %v6253_v29 }
 0x3c2   : > { %v3137_v23 = vadd.f32 %v3136_v22, %v3135_v30  ;;  %v3525_v42 = vadd.f32 %v3524_v18, %v3523_v0  ;;  %v3544_v18 = vsel %vm1617_vm0, %v3302_v31, 0.0  ;;  %v3304_v22 = vmul.f32 %v6156_v37, %v6156_v37 }
 0x3c3   : > { %v3162_v37 = vsel %vm1617_vm0, %v6178_v24, 0.0 }
 0x3c4   : > { %v3139_v5 = vadd.f32 %v3138_v57, %v3137_v23  ;;  %v3527_v53 = vadd.f32 %v3526_v21, %v3525_v42  ;;  %v3546_v42 = vsel %vm1617_vm0, %v3303_v35, 0.0  ;;  %v3305_v21 = vmul.f32 %v6167_v39, %v6167_v39 }
 0x3c5   : > { %v3164_v39 = vsel %vm1617_vm0, %v6189_v2, 0.0 }
 0x3c6   : > { %v3141_v19 = vadd.f32 %v3140_v20, %v3139_v5  ;;  %v3529_v50 = vadd.f32 %v3528_v45, %v3527_v53  ;;  %v3548_v5 = vsel %vm1617_vm0, %v3304_v22, 0.0  ;;  %v3306_v53 = vmul.f32 %v6178_v24, %v6178_v24 }
 0x3c7   : > { %v3550_v28 = vsel %vm1617_vm0, %v3305_v21, 0.0  ;;  %v3166_v24 = vsel %vm1617_vm0, %v6200_v48, 0.0  ;;  %v3170_v48 = vsel %vm1617_vm0, %v6226_v63, 0.0 }
 0x3c8   : > { %v3143_v32 = vadd.f32 %v3142_v15, %v3141_v19  ;;  %v3531_v10 = vadd.f32 %v3530_v54, %v3529_v50  ;;  %v3307_v19 = vmul.f32 %v6189_v2, %v6189_v2  ;;  %v3552_v15 = vsel %vm1617_vm0, %v3306_v53, 0.0 }
 0x3c9   : > { %v3168_v2 = vsel %vm1617_vm0, %v6217_v43, 0.0 }
 0x3ca   : > { %v3145_v6 = vadd.f32 %v3144_v49, %v3143_v32  ;;  %v3533_v46 = vadd.f32 %v3532_v56, %v3531_v10  ;;  %v3554_v56 = vsel %vm1617_vm0, %v3307_v19, 0.0  ;;  %v3309_v49 = vmul.f32 %v6217_v43, %v6217_v43 }
 0x3cb   : > { %v3172_v43 = vsel %vm1617_vm0, %v6235_v26, 0.0 }
 0x3cc   : > { %v3147_v4 = vadd.f32 %v3146_v40, %v3145_v6  ;;  %v3535_v55 = vadd.f32 %v3534_v8, %v3533_v46  ;;  %v3556_v46 = vsel %vm1617_vm0, %v3308_v62, 0.0  ;;  %v3310_v8 = vmul.f32 %v6226_v63, %v6226_v63 }
 0x3cd   : > { %v3174_v63 = vsel %vm1617_vm0, %v6244_v17, 0.0 }
 0x3ce   : > { %v3149_v12 = vadd.f32 %v3148_v27, %v3147_v4  ;;  %v3537_v58 = vadd.f32 %v3536_v51, %v3535_v55  ;;  %v3558_v4 = vsel %vm1617_vm0, %v3309_v49, 0.0  ;;  %v3311_v55 = vmul.f32 %v6235_v26, %v6235_v26 }
 0x3cf   : > { %v3560_v14 = vsel %vm1617_vm0, %v3310_v8, 0.0  ;;  %v3176_v26 = vsel %vm1617_vm0, %v6253_v29, 0.0 }
 0x3d0   : > { %v3151_v59 = vadd.f32 %v3150_v36, %v3149_v12  ;;  %v3539_v7 = vadd.f32 %v3538_v3, %v3537_v58  ;;  %v3312_v12 = vmul.f32 %v6244_v17, %v6244_v17  ;;  %v3562_v36 = vsel %vm1617_vm0, %v3311_v55, 0.0 }
 0x3d1   : > { %v3178_v17 = vsel %vm1617_vm0, %v6262_v60, 0.0 }
 0x3d2   : > { %v3153_v33 = vadd.f32 %v3152_v1, %v3151_v59  ;;  %v3541_v44 = vadd.f32 %v3540_v47, %v3539_v7  ;;  %v3564_v47 = vsel %vm1617_vm0, %v3312_v12, 0.0  ;;  %v3314_v1 = vmul.f32 %v6262_v60, %v6262_v60 }
 0x3d4   : > { %v3155_v30 = vadd.f32 %v3154_v16, %v3153_v33  ;;  %v3543_v0 = vadd.f32 %v3542_v13, %v3541_v44  ;;  %v3566_v44 = vsel %vm1617_vm0, %v3313_v11, 0.0  ;;  %v3568_v35 = vsel %vm1617_vm0, %v3314_v1, 0.0 }
 0x3d6   : > { %v3157_v38 = vadd.f32 %v3156_v34, %v3155_v30  ;;  %v3545_v23 = vadd.f32 %v3544_v18, %v3543_v0 }
 0x3d8   : > { %v3159_v57 = vadd.f32 %v3158_v52, %v3157_v38  ;;  %v3547_v41 = vadd.f32 %v3546_v42, %v3545_v23 }
 0x3da   : > { %v3161_v45 = vadd.f32 %v3160_v25, %v3159_v57  ;;  %v3549_v20 = vadd.f32 %v3548_v5, %v3547_v41 }
 0x3dc   : > { %v3163_v50 = vadd.f32 %v3162_v37, %v3161_v45  ;;  %v3551_v54 = vadd.f32 %v3550_v28, %v3549_v20 }
 0x3de   : > { %v3165_v32 = vadd.f32 %v3164_v39, %v3163_v50  ;;  %v3553_v10 = vadd.f32 %v3552_v15, %v3551_v54 }
 0x3e0   : > { %v3167_v61 = vadd.f32 %v3166_v24, %v3165_v32  ;;  %v3555_v6 = vadd.f32 %v3554_v56, %v3553_v10 }
 0x3e2   : > { %v3169_v40 = vadd.f32 %v3168_v2, %v3167_v61  ;;  %v3557_v9 = vadd.f32 %v3556_v46, %v3555_v6 }
 0x3e4   : > { %v3171_v51 = vadd.f32 %v3170_v48, %v3169_v40  ;;  %v3559_v27 = vadd.f32 %v3558_v4, %v3557_v9 }
 0x3e6   : > { %v3173_v58 = vadd.f32 %v3172_v43, %v3171_v51  ;;  %v3561_v3 = vadd.f32 %v3560_v14, %v3559_v27 }
 0x3e8   : > { %v3175_v59 = vadd.f32 %v3174_v63, %v3173_v58  ;;  %v3563_v7 = vadd.f32 %v3562_v36, %v3561_v3 }
 0x3ea   : > { %v3177_v31 = vadd.f32 %v3176_v26, %v3175_v59  ;;  %v3565_v33 = vadd.f32 %v3564_v47, %v3563_v7 }
 0x3ec   : > { %v3179_v13 = vadd.f32 %v3178_v17, %v3177_v31  ;;  %v3567_v16 = vadd.f32 %v3566_v44, %v3565_v33 }
 0x3ee   : > { %v3180_v30 = vrot.slane %v3179_v13, 4  ;;  %v3569_v0 = vadd.f32 %v3568_v35, %v3567_v16 }
 0x3f0   : > { %v3181_v18 = vadd.f32 %v3180_v30, %v3179_v13  ;;  %v3570_v34 = vrot.slane %v3569_v0, 4 }
 0x3f2   : > { %v3182_v29 = vrot.slane %v3181_v18, 2  ;;  %v3571_v22 = vadd.f32 %v3570_v34, %v3569_v0 }
 0x3f4   : > { %v3183_v38 = vadd.f32 %v3182_v29, %v3181_v18  ;;  %v3572_v23 = vrot.slane %v3571_v22, 2 }
 0x3f6   : > { %v3184_v42 = vrot.slane %v3183_v38, 1  ;;  %v3573_v52 = vadd.f32 %v3572_v23, %v3571_v22 }
 0x3f8   : > { %v3185_v21 = vadd.f32 %v3184_v42, %v3183_v38  ;;  %v3574_v57 = vrot.slane %v3573_v52, 1 }
 0x3fa   : > { %v3186_v60 = vmul.f32 0.125, %v3185_v21  ;;  %v3575_v41 = vadd.f32 %v3574_v57, %v3573_v52 }
 0x3fc   : > { %v3576_v5 = vmul.f32 0.125, %v3575_v41  ;;  %3577 = vst.msk [vmem:[%s247_s6] sm:$0xff] %vm1617_vm0, %v3186_v60 }
 0x3fe   : > { %3578 = vst.msk [vmem:[%s251_s9] sm:$0xff] %vm1617_vm0, %v3576_v5 }
 0x3ff PF: > { %s16_s18 = sadd.s32 1, %s4861_s18  }
 0x400   : > { %p13_p5 = scmp.ge.s32.totalorder %s16_s18, 6  }
 0x402   :  { %15 = sbr.rel (!%p13_p5) target bundleno = 1 (0x1), region = 86 }

// kernel: fx_cosine_classifier_forward.8
= control target key start
LH: loop header
LB: loop body
LE: loop exit
PB: predicated region body
PF: predicated region fallthrough
CT: control target
= control target key end

     0   :  { %vm21_vm0 = vcmask 261120   ;;  %vm949_vm5 = vcmask 1041409   ;;  %vm951_vm6 = vcmask 1042434   ;;  %vm953_vm7 = vcmask 1043459   ;;  %s2890_s1 = inlined_call_operand.vmem [shape: f32[8,32], index: 1, kind: input, shape index: {}]   ;;  %s2891_s2 = inlined_call_operand.vmem [shape: f32[8,32], index: 2, kind: input, shape index: {}]   ;;  %s2892_s3 = inlined_call_operand.vmem [shape: f32[1,32], index: 3, kind: input, shape index: {}]   ;;  %s2893_s0 = inlined_call_operand.vmem [shape: f32[16,64,32], index: 0, kind: input, shape index: {}]   ;;  %s2894_s4 = inlined_call_operand.vmem [shape: f32[1,32], index: 4, kind: input, shape index: {}]   ;;  %s2895_s5 = inlined_call_operand.vmem [shape: f32[16,32], index: 5, kind: output, shape index: {}]  }
   0x1   :  { %v20_v0 = vld [vmem:[%s2890_s1] sm:$0xff]  ;;  %v59_v34 = vld [vmem:[%s2893_s0 + $0x8] sm:$0xff]  ;;  %v60_v35 = vld [vmem:[%s2893_s0 + $0x10] sm:$0xff]  ;;  %vm955_vm8 = vcmask 1044484   ;;  %vm957_vm9 = vcmask 1045509   ;;  %vm959_vm10 = vcmask 1046534  }
   0x2   :  { %v30_v1 = vld [vmem:[%s2891_s2] sm:$0xff]  ;;  %v22_v2 = vsel %vm21_vm0, %v20_v0, 0.0  ;;  %v61_v36 = vld [vmem:[%s2893_s0 + $0x18] sm:$0xff]  ;;  %v63_v39 = vld [vmem:[%s2893_s0 + $0x28] sm:$0xff]  ;;  %vm961_vm11 = vcmask 1047559  }
   0x3   :  { %v31_v3 = vsel %vm21_vm0, %v30_v1, 0.0  ;;  %v23_v4 = vrot.slane %v22_v2, 4  ;;  %v53_v29 = vld [vmem:[%s2892_s3] sm:$0x1]  ;;  %v64_v40 = vld [vmem:[%s2893_s0 + $0x30] sm:$0xff]  ;;  %v65_v41 = vld [vmem:[%s2893_s0 + $0x38] sm:$0xff] }
   0x4   :  { %v32_v5 = vrot.slane %v31_v3, 4  ;;  %v1028_v31 = vld [vmem:[%s2894_s4] sm:$0x1]  ;;  %v67_v43 = vld [vmem:[%s2893_s0 + $0x48] sm:$0xff]  ;;  %v68_v44 = vld [vmem:[%s2893_s0 + $0x50] sm:$0xff] }
   0x5   :  { %v24_v6 = vadd.f32 %v23_v4, %v22_v2  ;;  %v58_v32 = vld [vmem:[%s2893_s0] sm:$0xff]  ;;  %v69_v45 = vld [vmem:[%s2893_s0 + $0x58] sm:$0xff]  ;;  %v71_v47 = vld [vmem:[%s2893_s0 + $0x68] sm:$0xff] }
   0x6   :  { %v33_v7 = vadd.f32 %v32_v5, %v31_v3  ;;  %v62_v37 = vld [vmem:[%s2893_s0 + $0x20] sm:$0xff]  ;;  %v72_v48 = vld [vmem:[%s2893_s0 + $0x70] sm:$0xff]  ;;  %v73_v49 = vld [vmem:[%s2893_s0 + $0x78] sm:$0xff] }
   0x7   :  { %v25_v8 = vrot.slane %v24_v6, 2  ;;  %v66_v42 = vld [vmem:[%s2893_s0 + $0x40] sm:$0xff]  ;;  %v75_v52 = vld [vmem:[%s2893_s0 + $0x88] sm:$0xff]  ;;  %v76_v53 = vld [vmem:[%s2893_s0 + $0x90] sm:$0xff] }
   0x8   :  { %v34_v9 = vrot.slane %v33_v7, 2  ;;  %v70_v46 = vld [vmem:[%s2893_s0 + $0x60] sm:$0xff]  ;;  %v77_v54 = vld [vmem:[%s2893_s0 + $0x98] sm:$0xff]  ;;  %v79_v57 = vld [vmem:[%s2893_s0 + $0xa8] sm:$0xff] }
   0x9   :  { %v26_v10 = vadd.f32 %v25_v8, %v24_v6  ;;  %v74_v50 = vld [vmem:[%s2893_s0 + $0x80] sm:$0xff]  ;;  %v80_v58 = vld [vmem:[%s2893_s0 + $0xb0] sm:$0xff]  ;;  %v81_v59 = vld [vmem:[%s2893_s0 + $0xb8] sm:$0xff] }
   0xa   :  { %v35_v11 = vadd.f32 %v34_v9, %v33_v7  ;;  %v78_v55 = vld [vmem:[%s2893_s0 + $0xa0] sm:$0xff]  ;;  %v83_v1 = vld [vmem:[%s2893_s0 + $0xc8] sm:$0xff]  ;;  %v84_v2 = vld [vmem:[%s2893_s0 + $0xd0] sm:$0xff] }
   0xb   :  { %v27_v12 = vrot.slane %v26_v10, 1  ;;  %v82_v60 = vld [vmem:[%s2893_s0 + $0xc0] sm:$0xff]  ;;  %v85_v3 = vld [vmem:[%s2893_s0 + $0xd8] sm:$0xff]  ;;  %v87_v9 = vld [vmem:[%s2893_s0 + $0xe8] sm:$0xff] }
   0xc   :  { %v36_v13 = vrot.slane %v35_v11, 1  ;;  %v86_v4 = vld [vmem:[%s2893_s0 + $0xe0] sm:$0xff] }
   0xd   :  { %v28_v14 = vadd.f32 %v27_v12, %v26_v10  ;;  %v88_v10 = vld [vmem:[%s2893_s0 + $0xf0] sm:$0xff]  ;;  %v90_v12 = vld [vmem:[%s2893_s0 + $0x100] sm:$0xff] }
   0xe   :  { %v37_v15 = vadd.f32 %v36_v13, %v35_v11  ;;  %v89_v11 = vld [vmem:[%s2893_s0 + $0xf8] sm:$0xff] }
   0xf   :  { %v29_v16 = vmul.f32 0.0009765625, %v28_v14 }
  0x10   :  { %v38_v17 = vmul.f32 0.0009765625, %v37_v15 }
  0x11   :  { %v39_v18 = vmul.f32 %v29_v16, %v29_v16 }
  0x13   :  { %v40_v19 = vsub.f32 %v38_v17, %v39_v18  ;;  %v91_v17 = vld [vmem:[%s2893_s0 + $0x108] sm:$0xff]  ;;  %v92_v18 = vld [vmem:[%s2893_s0 + $0x110] sm:$0xff] }
  0x15   :  { %v41_v20 = vmax.f32 %v40_v19, 0.0  ;;  %v93_v19 = vld [vmem:[%s2893_s0 + $0x118] sm:$0xff] }
  0x17   :  { %v42_v21 = vadd.f32 1e-05, %v41_v20  ;;  %v94_v20 = vld [vmem:[%s2893_s0 + $0x120] sm:$0xff] }
  0x19   :  { %979 = vrsqrt.f32 %v42_v21  ;;  %vm49_vm1 = vweird.f32 %v42_v21 }
  0x1f   :  { %v980_v22 = vpop.eup %979 }
  0x20   :  { %v44_v23 = vmul.f32 %v980_v22, %v42_v21  ;;  %vm50_vm2 = vweird.f32 %v980_v22 }
  0x21   :  { %vm51_vm3 = vmor %vm49_vm1, %vm50_vm2 }
  0x22   :  { %v45_v24 = vmul.f32 %v980_v22, %v44_v23 }
  0x24   :  { %v46_v25 = vmul.f32 0.5, %v45_v24 }
  0x26   :  { %v47_v26 = vsub.f32 1.5, %v46_v25  ;;  %v95_v25 = vld [vmem:[%s2893_s0 + $0x128] sm:$0xff] }
  0x28   :  { %v48_v27 = vmul.f32 %v980_v22, %v47_v26  ;;  %v96_v26 = vld [vmem:[%s2893_s0 + $0x130] sm:$0xff] }
  0x2a   :  { %v52_v28 = vsel %vm51_vm3, %v980_v22, %v48_v27  ;;  %v97_v27 = vld [vmem:[%s2893_s0 + $0x138] sm:$0xff] }
  0x2b   :  { %v54_v30 = vmul.f32 %v53_v29, %v52_v28  ;;  %v98_v28 = vld [vmem:[%s2893_s0 + $0x140] sm:$0xff] }
  0x2d   :  { %v1033_v33 = vmul.f32 %v54_v30, %v29_v16  ;;  %v1047_v38 = vperm.slane %v54_v30, 0 }
  0x2f   :  { %v1100_v56 = vmul.f32 %v1047_v38, %v58_v32  ;;  %v1115_v61 = vmul.f32 %v1047_v38, %v59_v34  ;;  %v1118_v62 = vmul.f32 %v1047_v38, %v60_v35  ;;  %v1121_v63 = vmul.f32 %v1047_v38, %v61_v36  ;;  %v99_v35 = vld [vmem:[%s2893_s0 + $0x148] sm:$0xff]  ;;  %v100_v36 = vld [vmem:[%s2893_s0 + $0x150] sm:$0xff] }
  0x30   :  { %v1124_v0 = vmul.f32 %v1047_v38, %v62_v37  ;;  %v1139_v5 = vmul.f32 %v1047_v38, %v63_v39  ;;  %v1142_v6 = vmul.f32 %v1047_v38, %v64_v40  ;;  %v1145_v7 = vmul.f32 %v1047_v38, %v65_v41  ;;  %v101_v37 = vld [vmem:[%s2893_s0 + $0x158] sm:$0xff]  ;;  %v102_v39 = vld [vmem:[%s2893_s0 + $0x160] sm:$0xff] }
  0x31   :  { %v1148_v8 = vmul.f32 %v1047_v38, %v66_v42  ;;  %v1163_v13 = vmul.f32 %v1047_v38, %v67_v43  ;;  %v1166_v14 = vmul.f32 %v1047_v38, %v68_v44  ;;  %v1169_v15 = vmul.f32 %v1047_v38, %v69_v45  ;;  %v103_v44 = vld [vmem:[%s2893_s0 + $0x168] sm:$0xff]  ;;  %v104_v45 = vld [vmem:[%s2893_s0 + $0x170] sm:$0xff] }
  0x32   :  { %v1172_v16 = vmul.f32 %v1047_v38, %v70_v46  ;;  %v1187_v21 = vmul.f32 %v1047_v38, %v71_v47  ;;  %v1190_v22 = vmul.f32 %v1047_v38, %v72_v48  ;;  %v1193_v23 = vmul.f32 %v1047_v38, %v73_v49  ;;  %v105_v46 = vld [vmem:[%s2893_s0 + $0x178] sm:$0xff]  ;;  %v106_v47 = vld [vmem:[%s2893_s0 + $0x180] sm:$0xff] }
  0x33   :  { %v1196_v24 = vmul.f32 %v1047_v38, %v74_v50  ;;  %v1211_v29 = vmul.f32 %v1047_v38, %v75_v52  ;;  %v1214_v30 = vmul.f32 %v1047_v38, %v76_v53  ;;  %v1217_v32 = vmul.f32 %v1047_v38, %v77_v54  ;;  %v107_v53 = vld [vmem:[%s2893_s0 + $0x188] sm:$0xff]  ;;  %v108_v54 = vld [vmem:[%s2893_s0 + $0x190] sm:$0xff] }
  0x34   :  { %v1220_v34 = vmul.f32 %v1047_v38, %v78_v55  ;;  %v1235_v40 = vmul.f32 %v1047_v38, %v79_v57  ;;  %v1238_v41 = vmul.f32 %v1047_v38, %v80_v58  ;;  %v1241_v42 = vmul.f32 %v1047_v38, %v81_v59  ;;  %v109_v55 = vld [vmem:[%s2893_s0 + $0x198] sm:$0xff]  ;;  %v110_v57 = vld [vmem:[%s2893_s0 + $0x1a0] sm:$0xff] }
  0x35   :  { %v1244_v43 = vmul.f32 %v1047_v38, %v82_v60  ;;  %v1259_v48 = vmul.f32 %v1047_v38, %v83_v1  ;;  %v1262_v49 = vmul.f32 %v1047_v38, %v84_v2  ;;  %v1265_v50 = vmul.f32 %v1047_v38, %v85_v3  ;;  %v111_v2 = vld [vmem:[%s2893_s0 + $0x1a8] sm:$0xff]  ;;  %v112_v3 = vld [vmem:[%s2893_s0 + $0x1b0] sm:$0xff] }
  0x36   :  { %v1268_v52 = vmul.f32 %v1047_v38, %v86_v4  ;;  %v1283_v58 = vmul.f32 %v1047_v38, %v87_v9  ;;  %v1286_v59 = vmul.f32 %v1047_v38, %v88_v10  ;;  %v1289_v60 = vmul.f32 %v1047_v38, %v89_v11  ;;  %v113_v4 = vld [vmem:[%s2893_s0 + $0x1b8] sm:$0xff]  ;;  %v114_v9 = vld [vmem:[%s2893_s0 + $0x1c0] sm:$0xff] }
  0x37   :  { %v1292_v1 = vmul.f32 %v1047_v38, %v90_v12  ;;  %v1307_v10 = vmul.f32 %v1047_v38, %v91_v17  ;;  %v1310_v11 = vmul.f32 %v1047_v38, %v92_v18  ;;  %v1313_v12 = vmul.f32 %v1047_v38, %v93_v19  ;;  %v117_v17 = vld [vmem:[%s2893_s0 + $0x1d8] sm:$0xff]  ;;  %v118_v18 = vld [vmem:[%s2893_s0 + $0x1e0] sm:$0xff] }
  0x38   :  { %2991 = vst [vmem:[#allocation2_spill] sm:$0xff] %v1289_v60  ;;  %v1316_v51 = vmul.f32 %v1047_v38, %v94_v20  ;;  %v116_v60 = vld [vmem:[%s2893_s0 + $0x1d0] sm:$0xff]  ;;  %v1331_v19 = vmul.f32 %v1047_v38, %v95_v25  ;;  %v1334_v20 = vmul.f32 %v1047_v38, %v96_v26  ;;  %v121_v25 = vld [vmem:[%s2893_s0 + $0x1f8] sm:$0xff]  ;;  %v122_v26 = vld [vmem:[%s2893_s0 + $0x200] sm:$0xff] }
  0x39   :  { %2992 = vst [vmem:[#allocation3_spill] sm:$0xff] %v1292_v1  ;;  %v115_v1 = vld [vmem:[%s2893_s0 + $0x1c8] sm:$0xff] }
  0x3a   :  { %2993 = vst [vmem:[#allocation4_spill] sm:$0xff] %v1307_v10  ;;  %v120_v10 = vld [vmem:[%s2893_s0 + $0x1f0] sm:$0xff] }
  0x3b   :  { %2994 = vst [vmem:[#allocation5_spill] sm:$0xff] %v1310_v11  ;;  %v119_v11 = vld [vmem:[%s2893_s0 + $0x1e8] sm:$0xff] }
  0x3c   :  { %2995 = vst [vmem:[#allocation6_spill] sm:$0xff] %v1313_v12  ;;  %v1340_v12 = vmul.f32 %v1047_v38, %v98_v28  ;;  %v1358_v28 = vmul.f32 %v1047_v38, %v100_v36  ;;  %v126_v36 = vld [vmem:[%s2893_s0 + $0x220] sm:$0xff] }
  0x3d   :  { %2996 = vst [vmem:[#allocation7_spill] sm:$0xff] %v1316_v51  ;;  %v1337_v51 = vmul.f32 %v1047_v38, %v97_v27  ;;  %v1355_v27 = vmul.f32 %v1047_v38, %v99_v35  ;;  %v125_v35 = vld [vmem:[%s2893_s0 + $0x218] sm:$0xff] }
  0x3e   :  { %2997 = vst [vmem:[#allocation8_spill] sm:$0xff] %v1331_v19  ;;  %v124_v19 = vld [vmem:[%s2893_s0 + $0x210] sm:$0xff] }
  0x3f   :  { %2998 = vst [vmem:[#allocation9_spill] sm:$0xff] %v1334_v20  ;;  %v123_v20 = vld [vmem:[%s2893_s0 + $0x208] sm:$0xff] }
  0x40   :  { %2999 = vst [vmem:[#allocation10_spill] sm:$0xff] %v1337_v51  ;;  %v1364_v51 = vmul.f32 %v1047_v38, %v102_v39  ;;  %v1382_v39 = vmul.f32 %v1047_v38, %v104_v45  ;;  %v130_v45 = vld [vmem:[%s2893_s0 + $0x240] sm:$0xff] }
  0x41   :  { %3000 = vst [vmem:[#allocation11_spill] sm:$0xff] %v1340_v12  ;;  %v1361_v12 = vmul.f32 %v1047_v38, %v101_v37  ;;  %v1379_v37 = vmul.f32 %v1047_v38, %v103_v44  ;;  %v129_v44 = vld [vmem:[%s2893_s0 + $0x238] sm:$0xff] }
  0x42   :  { %3001 = vst [vmem:[#allocation12_spill] sm:$0xff] %v1355_v27  ;;  %v128_v27 = vld [vmem:[%s2893_s0 + $0x230] sm:$0xff] }
  0x43   :  { %3002 = vst [vmem:[#allocation13_spill] sm:$0xff] %v1358_v28  ;;  %v127_v28 = vld [vmem:[%s2893_s0 + $0x228] sm:$0xff] }
  0x44   :  { %3003 = vst [vmem:[#allocation14_spill] sm:$0xff] %v1361_v12  ;;  %v1388_v12 = vmul.f32 %v1047_v38, %v106_v47  ;;  %v1406_v47 = vmul.f32 %v1047_v38, %v108_v54  ;;  %v134_v54 = vld [vmem:[%s2893_s0 + $0x260] sm:$0xff] }
  0x45   :  { %3004 = vst [vmem:[#allocation15_spill] sm:$0xff] %v1364_v51  ;;  %v1385_v51 = vmul.f32 %v1047_v38, %v105_v46  ;;  %v1403_v46 = vmul.f32 %v1047_v38, %v107_v53  ;;  %v133_v53 = vld [vmem:[%s2893_s0 + $0x258] sm:$0xff] }
  0x46   :  { %3005 = vst [vmem:[#allocation16_spill] sm:$0xff] %v1379_v37  ;;  %v132_v37 = vld [vmem:[%s2893_s0 + $0x250] sm:$0xff] }
  0x47   :  { %3006 = vst [vmem:[#allocation17_spill] sm:$0xff] %v1382_v39  ;;  %v131_v39 = vld [vmem:[%s2893_s0 + $0x248] sm:$0xff] }
  0x48   :  { %3007 = vst [vmem:[#allocation18_spill] sm:$0xff] %v1385_v51  ;;  %v1412_v51 = vmul.f32 %v1047_v38, %v110_v57  ;;  %v1430_v57 = vmul.f32 %v1047_v38, %v112_v3  ;;  %v138_v3 = vld [vmem:[%s2893_s0 + $0x280] sm:$0xff] }
  0x49   :  { %3008 = vst [vmem:[#allocation19_spill] sm:$0xff] %v1388_v12  ;;  %v1409_v12 = vmul.f32 %v1047_v38, %v109_v55  ;;  %v1427_v55 = vmul.f32 %v1047_v38, %v111_v2  ;;  %v137_v2 = vld [vmem:[%s2893_s0 + $0x278] sm:$0xff] }
  0x4a   :  { %3009 = vst [vmem:[#allocation20_spill] sm:$0xff] %v1403_v46  ;;  %v136_v46 = vld [vmem:[%s2893_s0 + $0x270] sm:$0xff] }
  0x4b   :  { %3010 = vst [vmem:[#allocation21_spill] sm:$0xff] %v1406_v47  ;;  %v135_v47 = vld [vmem:[%s2893_s0 + $0x268] sm:$0xff] }
  0x4c   :  { %3011 = vst [vmem:[#allocation22_spill] sm:$0xff] %v1409_v12  ;;  %v1436_v12 = vmul.f32 %v1047_v38, %v114_v9  ;;  %v1454_v9 = vmul.f32 %v1047_v38, %v116_v60  ;;  %v142_v60 = vld [vmem:[%s2893_s0 + $0x2a0] sm:$0xff] }
  0x4d   :  { %3012 = vst [vmem:[#allocation23_spill] sm:$0xff] %v1412_v51  ;;  %v1433_v51 = vmul.f32 %v1047_v38, %v113_v4  ;;  %v1451_v4 = vmul.f32 %v1047_v38, %v115_v1  ;;  %v141_v1 = vld [vmem:[%s2893_s0 + $0x298] sm:$0xff] }
  0x4e   :  { %3013 = vst [vmem:[#allocation24_spill] sm:$0xff] %v1427_v55  ;;  %v140_v55 = vld [vmem:[%s2893_s0 + $0x290] sm:$0xff] }
  0x4f   :  { %3014 = vst [vmem:[#allocation25_spill] sm:$0xff] %v1430_v57  ;;  %v139_v57 = vld [vmem:[%s2893_s0 + $0x288] sm:$0xff] }
  0x50   :  { %3015 = vst [vmem:[#allocation26_spill] sm:$0xff] %v1433_v51  ;;  %v1460_v51 = vmul.f32 %v1047_v38, %v118_v18  ;;  %v1478_v18 = vmul.f32 %v1047_v38, %v120_v10  ;;  %v146_v10 = vld [vmem:[%s2893_s0 + $0x2c0] sm:$0xff] }
  0x51   :  { %3016 = vst [vmem:[#allocation27_spill] sm:$0xff] %v1436_v12  ;;  %v1457_v12 = vmul.f32 %v1047_v38, %v117_v17  ;;  %v1475_v17 = vmul.f32 %v1047_v38, %v119_v11  ;;  %v145_v11 = vld [vmem:[%s2893_s0 + $0x2b8] sm:$0xff] }
  0x52   :  { %3017 = vst [vmem:[#allocation28_spill] sm:$0xff] %v1451_v4  ;;  %v144_v4 = vld [vmem:[%s2893_s0 + $0x2b0] sm:$0xff] }
  0x53   :  { %3018 = vst [vmem:[#allocation29_spill] sm:$0xff] %v1454_v9  ;;  %v143_v9 = vld [vmem:[%s2893_s0 + $0x2a8] sm:$0xff] }
  0x54   :  { %3019 = vst [vmem:[#allocation30_spill] sm:$0xff] %v1457_v12  ;;  %v1484_v12 = vmul.f32 %v1047_v38, %v122_v26  ;;  %v1502_v26 = vmul.f32 %v1047_v38, %v124_v19  ;;  %v150_v19 = vld [vmem:[%s2893_s0 + $0x2e0] sm:$0xff] }
  0x55   :  { %3020 = vst [vmem:[#allocation31_spill] sm:$0xff] %v1460_v51  ;;  %v1481_v51 = vmul.f32 %v1047_v38, %v121_v25  ;;  %v1499_v25 = vmul.f32 %v1047_v38, %v123_v20  ;;  %v149_v20 = vld [vmem:[%s2893_s0 + $0x2d8] sm:$0xff] }
  0x56   :  { %3021 = vst [vmem:[#allocation32_spill] sm:$0xff] %v1475_v17  ;;  %v148_v17 = vld [vmem:[%s2893_s0 + $0x2d0] sm:$0xff] }
  0x57   :  { %3022 = vst [vmem:[#allocation33_spill] sm:$0xff] %v1478_v18  ;;  %v147_v18 = vld [vmem:[%s2893_s0 + $0x2c8] sm:$0xff] }
  0x58   :  { %3023 = vst [vmem:[#allocation34_spill] sm:$0xff] %v1481_v51  ;;  %v1508_v51 = vmul.f32 %v1047_v38, %v126_v36  ;;  %v1526_v36 = vmul.f32 %v1047_v38, %v128_v27  ;;  %v154_v27 = vld [vmem:[%s2893_s0 + $0x300] sm:$0xff] }
  0x59   :  { %3024 = vst [vmem:[#allocation35_spill] sm:$0xff] %v1484_v12  ;;  %v1505_v12 = vmul.f32 %v1047_v38, %v125_v35  ;;  %v1523_v35 = vmul.f32 %v1047_v38, %v127_v28  ;;  %v153_v28 = vld [vmem:[%s2893_s0 + $0x2f8] sm:$0xff] }
  0x5a   :  { %3025 = vst [vmem:[#allocation36_spill] sm:$0xff] %v1499_v25  ;;  %v152_v25 = vld [vmem:[%s2893_s0 + $0x2f0] sm:$0xff] }
  0x5b   :  { %3026 = vst [vmem:[#allocation37_spill] sm:$0xff] %v1502_v26  ;;  %v151_v26 = vld [vmem:[%s2893_s0 + $0x2e8] sm:$0xff] }
  0x5c   :  { %3027 = vst [vmem:[#allocation38_spill] sm:$0xff] %v1505_v12  ;;  %v1532_v12 = vmul.f32 %v1047_v38, %v130_v45  ;;  %v1550_v45 = vmul.f32 %v1047_v38, %v132_v37  ;;  %v158_v37 = vld [vmem:[%s2893_s0 + $0x320] sm:$0xff] }
  0x5d   :  { %3028 = vst [vmem:[#allocation39_spill] sm:$0xff] %v1508_v51  ;;  %v1529_v51 = vmul.f32 %v1047_v38, %v129_v44  ;;  %v1547_v44 = vmul.f32 %v1047_v38, %v131_v39  ;;  %v157_v39 = vld [vmem:[%s2893_s0 + $0x318] sm:$0xff] }
  0x5e   :  { %3029 = vst [vmem:[#allocation40_spill] sm:$0xff] %v1523_v35  ;;  %v156_v35 = vld [vmem:[%s2893_s0 + $0x310] sm:$0xff] }
  0x5f   :  { %3030 = vst [vmem:[#allocation41_spill] sm:$0xff] %v1526_v36  ;;  %v155_v36 = vld [vmem:[%s2893_s0 + $0x308] sm:$0xff] }
  0x60   :  { %3031 = vst [vmem:[#allocation42_spill] sm:$0xff] %v1529_v51  ;;  %v1556_v51 = vmul.f32 %v1047_v38, %v134_v54  ;;  %v1574_v54 = vmul.f32 %v1047_v38, %v136_v46  ;;  %v1592_v46 = vmul.f32 %v1047_v38, %v139_v57  ;;  %v164_v57 = vld [vmem:[%s2893_s0 + $0x350] sm:$0xff] }
  0x61   :  { %3032 = vst [vmem:[#allocation43_spill] sm:$0xff] %v1532_v12  ;;  %v1553_v12 = vmul.f32 %v1047_v38, %v133_v53  ;;  %v1571_v53 = vmul.f32 %v1047_v38, %v135_v47  ;;  %v161_v47 = vld [vmem:[%s2893_s0 + $0x338] sm:$0xff] }
  0x62   :  { %3033 = vst [vmem:[#allocation44_spill] sm:$0xff] %v1547_v44  ;;  %v160_v44 = vld [vmem:[%s2893_s0 + $0x330] sm:$0xff] }
  0x63   :  { %3034 = vst [vmem:[#allocation45_spill] sm:$0xff] %v1550_v45  ;;  %v159_v45 = vld [vmem:[%s2893_s0 + $0x328] sm:$0xff] }
  0x64   :  { %3035 = vst [vmem:[#allocation46_spill] sm:$0xff] %v1553_v12  ;;  %v1580_v12 = vmul.f32 %v1047_v38, %v138_v3  ;;  %v1598_v3 = vmul.f32 %v1047_v38, %v141_v1  ;;  %v1616_v1 = vmul.f32 %v1047_v38, %v144_v4  ;;  %v1634_v4 = vmul.f32 %v1047_v38, %v147_v18  ;;  %v170_v18 = vld [vmem:[%s2893_s0 + $0x380] sm:$0xff] }
  0x65   :  { %3036 = vst [vmem:[#allocation47_spill] sm:$0xff] %v1556_v51  ;;  %v1577_v51 = vmul.f32 %v1047_v38, %v137_v2  ;;  %v1595_v2 = vmul.f32 %v1047_v38, %v140_v55  ;;  %v1613_v55 = vmul.f32 %v1047_v38, %v143_v9  ;;  %v167_v9 = vld [vmem:[%s2893_s0 + $0x368] sm:$0xff] }
  0x66   :  { %3037 = vst [vmem:[#allocation48_spill] sm:$0xff] %v1574_v54  ;;  %v163_v54 = vld [vmem:[%s2893_s0 + $0x348] sm:$0xff] }
  0x67   :  { %3038 = vst [vmem:[#allocation49_spill] sm:$0xff] %v1577_v51  ;;  %v162_v51 = vld [vmem:[%s2893_s0 + $0x340] sm:$0xff] }
  0x68   :  { %3039 = vst [vmem:[#allocation50_spill] sm:$0xff] %v1580_v12  ;;  %v1601_v12 = vmul.f32 %v1047_v38, %v142_v60  ;;  %v1619_v60 = vmul.f32 %v1047_v38, %v145_v11  ;;  %v1637_v11 = vmul.f32 %v1047_v38, %v148_v17  ;;  %v1655_v17 = vmul.f32 %v1047_v38, %v151_v26  ;;  %v173_v26 = vld [vmem:[%s2893_s0 + $0x398] sm:$0xff] }
  0x69   :  { %3040 = vst [vmem:[#allocation51_spill] sm:$0xff] %v1595_v2  ;;  %v166_v2 = vld [vmem:[%s2893_s0 + $0x360] sm:$0xff] }
  0x6a   :  { %3041 = vst [vmem:[#allocation52_spill] sm:$0xff] %v1598_v3  ;;  %v165_v3 = vld [vmem:[%s2893_s0 + $0x358] sm:$0xff] }
  0x6b   :  { %3042 = vst [vmem:[#allocation53_spill] sm:$0xff] %v1601_v12  ;;  %v1622_v12 = vmul.f32 %v1047_v38, %v146_v10  ;;  %v1640_v10 = vmul.f32 %v1047_v38, %v149_v20  ;;  %v1658_v20 = vmul.f32 %v1047_v38, %v152_v25  ;;  %v1676_v25 = vmul.f32 %v1047_v38, %v155_v36  ;;  %v176_v36 = vld [vmem:[%s2893_s0 + $0x3b0] sm:$0xff] }
  0x6c   :  { %3043 = vst [vmem:[#allocation54_spill] sm:$0xff] %v1616_v1  ;;  %v169_v1 = vld [vmem:[%s2893_s0 + $0x378] sm:$0xff] }
  0x6d   :  { %3044 = vst [vmem:[#allocation55_spill] sm:$0xff] %v1619_v60  ;;  %v168_v60 = vld [vmem:[%s2893_s0 + $0x370] sm:$0xff] }
  0x6e   :  { %3045 = vst [vmem:[#allocation56_spill] sm:$0xff] %v1622_v12  ;;  %v1643_v12 = vmul.f32 %v1047_v38, %v150_v19  ;;  %v1661_v19 = vmul.f32 %v1047_v38, %v153_v28  ;;  %v1679_v28 = vmul.f32 %v1047_v38, %v156_v35  ;;  %v1697_v35 = vmul.f32 %v1047_v38, %v159_v45  ;;  %v179_v45 = vld [vmem:[%s2893_s0 + $0x3c8] sm:$0xff] }
  0x6f   :  { %3046 = vst [vmem:[#allocation57_spill] sm:$0xff] %v1637_v11  ;;  %v172_v11 = vld [vmem:[%s2893_s0 + $0x390] sm:$0xff] }
  0x70   :  { %3047 = vst [vmem:[#allocation58_spill] sm:$0xff] %v1640_v10  ;;  %v171_v10 = vld [vmem:[%s2893_s0 + $0x388] sm:$0xff] }
  0x71   :  { %3048 = vst [vmem:[#allocation59_spill] sm:$0xff] %v1643_v12  ;;  %v1664_v12 = vmul.f32 %v1047_v38, %v154_v27  ;;  %v1682_v27 = vmul.f32 %v1047_v38, %v157_v39  ;;  %v1700_v39 = vmul.f32 %v1047_v38, %v160_v44  ;;  %v1718_v44 = vmul.f32 %v1047_v38, %v163_v54  ;;  %v182_v54 = vld [vmem:[%s2893_s0 + $0x3e0] sm:$0xff] }
  0x72   :  { %3049 = vst [vmem:[#allocation60_spill] sm:$0xff] %v1658_v20  ;;  %v175_v20 = vld [vmem:[%s2893_s0 + $0x3a8] sm:$0xff] }
  0x73   :  { %3050 = vst [vmem:[#allocation61_spill] sm:$0xff] %v1661_v19  ;;  %v174_v19 = vld [vmem:[%s2893_s0 + $0x3a0] sm:$0xff] }
  0x74   :  { %3051 = vst [vmem:[#allocation62_spill] sm:$0xff] %v1664_v12  ;;  %v1685_v12 = vmul.f32 %v1047_v38, %v158_v37  ;;  %v1703_v37 = vmul.f32 %v1047_v38, %v161_v47  ;;  %v1721_v47 = vmul.f32 %v1047_v38, %v164_v57  ;;  %v1739_v57 = vmul.f32 %v1047_v38, %v167_v9  ;;  %v185_v9 = vld [vmem:[%s2893_s0 + $0x3f8] sm:$0xff] }
  0x75   :  { %3052 = vst [vmem:[#allocation63_spill] sm:$0xff] %v1679_v28  ;;  %v178_v28 = vld [vmem:[%s2893_s0 + $0x3c0] sm:$0xff] }
  0x76   :  { %3053 = vst [vmem:[#allocation64_spill] sm:$0xff] %v1682_v27  ;;  %v177_v27 = vld [vmem:[%s2893_s0 + $0x3b8] sm:$0xff] }
  0x77   :  { %3054 = vst [vmem:[#allocation65_spill] sm:$0xff] %v1685_v12  ;;  %v1706_v12 = vmul.f32 %v1047_v38, %v162_v51  ;;  %v1724_v51 = vmul.f32 %v1047_v38, %v165_v3  ;;  %v1742_v3 = vmul.f32 %v1047_v38, %v168_v60  ;;  %v1760_v60 = vmul.f32 %v1047_v38, %v171_v10 }
  0x78   :  { %3055 = vst [vmem:[#allocation66_spill] sm:$0xff] %v1700_v39  ;;  %v181_v39 = vld [vmem:[%s2893_s0 + $0x3d8] sm:$0xff]  ;;  %v1780_v10 = vmul.f32 %v1047_v38, %v176_v36 }
  0x79   :  { %3056 = vst [vmem:[#allocation67_spill] sm:$0xff] %v1703_v37  ;;  %v180_v37 = vld [vmem:[%s2893_s0 + $0x3d0] sm:$0xff] }
  0x7a   :  { %3057 = vst [vmem:[#allocation68_spill] sm:$0xff] %v1706_v12  ;;  %v1727_v12 = vmul.f32 %v1047_v38, %v166_v2  ;;  %v1745_v2 = vmul.f32 %v1047_v38, %v169_v1  ;;  %v1763_v1 = vmul.f32 %v1047_v38, %v172_v11  ;;  %v1783_v11 = vmul.f32 %v1047_v38, %v177_v27 }
  0x7b   :  { %3058 = vst [vmem:[#allocation69_spill] sm:$0xff] %v1721_v47  ;;  %v184_v47 = vld [vmem:[%s2893_s0 + $0x3f0] sm:$0xff] }
  0x7c   :  { %3059 = vst [vmem:[#allocation70_spill] sm:$0xff] %v1724_v51  ;;  %v183_v51 = vld [vmem:[%s2893_s0 + $0x3e8] sm:$0xff] }
  0x7d   :  { %3060 = vst [vmem:[#allocation71_spill] sm:$0xff] %v1727_v12  ;;  %v1748_v12 = vmul.f32 %v1047_v38, %v170_v18  ;;  %v1766_v18 = vmul.f32 %v1047_v38, %v173_v26  ;;  %v1786_v26 = vmul.f32 %v1047_v38, %v178_v28  ;;  %v1807_v28 = vmul.f32 %v1047_v38, %v185_v9  ;;  %v3080_v9 = vld [vmem:[#allocation6_spill] sm:$0xff] }
  0x7e   :  { %3061 = vst [vmem:[#allocation72_spill] sm:$0xff] %v1739_v57  ;;  %v1777_v57 = vmul.f32 %v1047_v38, %v175_v20  ;;  %v1801_v20 = vmul.f32 %v1047_v38, %v183_v51  ;;  %v3076_v51 = vld [vmem:[#allocation4_spill] sm:$0xff] }
  0x7f   :  { %3062 = vst [vmem:[#allocation73_spill] sm:$0xff] %v1742_v3  ;;  %v1774_v3 = vmul.f32 %v1047_v38, %v174_v19  ;;  %v1804_v19 = vmul.f32 %v1047_v38, %v184_v47  ;;  %v3074_v47 = vld [vmem:[#allocation3_spill] sm:$0xff] }
  0x80   :  { %3063 = vst [vmem:[#allocation74_spill] sm:$0xff] %v1745_v2 }
  0x81   :  { %3064 = vst [vmem:[#allocation75_spill] sm:$0xff] %v1748_v12  ;;  %v3066_v12 = vsub.f32 %v1028_v31, %v1033_v33  ;;  %v1792_v31 = vmul.f32 %v1047_v38, %v180_v37  ;;  %v1795_v33 = vmul.f32 %v1047_v38, %v181_v39 }
  0x82   :  { %3065 = vst [vmem:[#allocation76_spill] sm:$0xff] %v1766_v18  ;;  %v1789_v18 = vmul.f32 %v1047_v38, %v179_v45  ;;  %v3072_v45 = vld [vmem:[#allocation2_spill] sm:$0xff] }
  0x83   :  { %v1771_v2 = vperm.slane %v3066_v12, 0  ;;  %v1798_v12 = vmul.f32 %v1047_v38, %v182_v54  ;;  %v3078_v54 = vld [vmem:[#allocation5_spill] sm:$0xff] }
  0x85   :  { %v1811_v27 = vadd.f32 %v1771_v2, %v1100_v56  ;;  %v1815_v36 = vadd.f32 %v1771_v2, %v1115_v61  ;;  %v1819_v39 = vadd.f32 %v1771_v2, %v1118_v62  ;;  %v1823_v37 = vadd.f32 %v1771_v2, %v1121_v63 }
  0x86   :  { %v1827_v38 = vadd.f32 %v1771_v2, %v1124_v0  ;;  %v1831_v56 = vadd.f32 %v1771_v2, %v1139_v5  ;;  %v1835_v61 = vadd.f32 %v1771_v2, %v1142_v6  ;;  %v1839_v62 = vadd.f32 %v1771_v2, %v1145_v7 }
  0x87   :  { %v1843_v63 = vadd.f32 %v1771_v2, %v1148_v8  ;;  %v1847_v0 = vadd.f32 %v1771_v2, %v1163_v13  ;;  %v1851_v5 = vadd.f32 %v1771_v2, %v1166_v14  ;;  %v1855_v6 = vadd.f32 %v1771_v2, %v1169_v15 }
  0x88   :  { %v1859_v7 = vadd.f32 %v1771_v2, %v1172_v16  ;;  %v1863_v8 = vadd.f32 %v1771_v2, %v1187_v21  ;;  %v1867_v13 = vadd.f32 %v1771_v2, %v1190_v22  ;;  %v1871_v14 = vadd.f32 %v1771_v2, %v1193_v23 }
  0x89   :  { %v1875_v15 = vadd.f32 %v1771_v2, %v1196_v24  ;;  %v1879_v16 = vadd.f32 %v1771_v2, %v1211_v29  ;;  %v1883_v21 = vadd.f32 %v1771_v2, %v1214_v30  ;;  %v1887_v22 = vadd.f32 %v1771_v2, %v1217_v32 }
  0x8a   :  { %3067 = vst [vmem:[#allocation77_spill] sm:$0xff] %v1871_v14  ;;  %v1891_v23 = vadd.f32 %v1771_v2, %v1220_v34  ;;  %v1895_v24 = vadd.f32 %v1771_v2, %v1235_v40  ;;  %v1899_v29 = vadd.f32 %v1771_v2, %v1238_v41  ;;  %v1903_v30 = vadd.f32 %v1771_v2, %v1241_v42 }
  0x8b   :  { %v1907_v32 = vadd.f32 %v1771_v2, %v1244_v43  ;;  %v1911_v34 = vadd.f32 %v1771_v2, %v1259_v48  ;;  %v1915_v40 = vadd.f32 %v1771_v2, %v1262_v49  ;;  %v1919_v41 = vadd.f32 %v1771_v2, %v1265_v50 }
  0x8c   :  { %3068 = vst [vmem:[#allocation78_spill] sm:$0xff] %v1899_v29  ;;  %v1923_v42 = vadd.f32 %v1771_v2, %v1268_v52  ;;  %v1927_v43 = vadd.f32 %v1771_v2, %v1283_v58  ;;  %v1931_v48 = vadd.f32 %v1771_v2, %v1286_v59  ;;  %v1935_v49 = vadd.f32 %v1771_v2, %v3072_v45 }
  0x8d   :  { %3069 = vst [vmem:[#allocation79_spill] sm:$0xff] %v1903_v30  ;;  %v1939_v50 = vadd.f32 %v1771_v2, %v3074_v47  ;;  %v1943_v52 = vadd.f32 %v1771_v2, %v3076_v51  ;;  %v1947_v58 = vadd.f32 %v1771_v2, %v3078_v54  ;;  %v1951_v59 = vadd.f32 %v1771_v2, %v3080_v9 }
  0x8e   :  { %3070 = vst [vmem:[#allocation80_spill] sm:$0xff] %v1927_v43 }
  0x8f   :  { %3071 = vst [vmem:[#allocation81_spill] sm:$0xff] %v1931_v48  ;;  %v3082_v48 = vld [vmem:[#allocation7_spill] sm:$0xff] }
  0x90   :  { %3073 = vst [vmem:[#allocation2_spill] sm:$0xff] %v1935_v49  ;;  %v1955_v45 = vadd.f32 %v1771_v2, %v3082_v48  ;;  %v3084_v49 = vld [vmem:[#allocation8_spill] sm:$0xff] }
  0x91   :  { %3075 = vst [vmem:[#allocation3_spill] sm:$0xff] %v1939_v50  ;;  %v1959_v47 = vadd.f32 %v1771_v2, %v3084_v49  ;;  %v3086_v50 = vld [vmem:[#allocation9_spill] sm:$0xff] }
  0x92   :  { %3077 = vst [vmem:[#allocation4_spill] sm:$0xff] %v1943_v52  ;;  %v1963_v51 = vadd.f32 %v1771_v2, %v3086_v50  ;;  %v3088_v52 = vld [vmem:[#allocation10_spill] sm:$0xff] }
  0x93   :  { %3079 = vst [vmem:[#allocation5_spill] sm:$0xff] %v1947_v58  ;;  %v1967_v54 = vadd.f32 %v1771_v2, %v3088_v52  ;;  %v3090_v58 = vld [vmem:[#allocation11_spill] sm:$0xff] }
  0x94   :  { %3081 = vst [vmem:[#allocation6_spill] sm:$0xff] %v1951_v59  ;;  %v1971_v9 = vadd.f32 %v1771_v2, %v3090_v58  ;;  %v3092_v59 = vld [vmem:[#allocation12_spill] sm:$0xff] }
  0x95   :  { %3083 = vst [vmem:[#allocation7_spill] sm:$0xff] %v1955_v45  ;;  %v1975_v48 = vadd.f32 %v1771_v2, %v3092_v59  ;;  %v3094_v45 = vld [vmem:[#allocation13_spill] sm:$0xff] }
  0x96   :  { %3085 = vst [vmem:[#allocation8_spill] sm:$0xff] %v1959_v47  ;;  %v1979_v49 = vadd.f32 %v1771_v2, %v3094_v45  ;;  %v3096_v47 = vld [vmem:[#allocation14_spill] sm:$0xff] }
  0x97   :  { %3087 = vst [vmem:[#allocation9_spill] sm:$0xff] %v1963_v51  ;;  %v1983_v50 = vadd.f32 %v1771_v2, %v3096_v47  ;;  %v3098_v51 = vld [vmem:[#allocation15_spill] sm:$0xff] }
  0x98   :  { %3089 = vst [vmem:[#allocation10_spill] sm:$0xff] %v1967_v54  ;;  %v1987_v52 = vadd.f32 %v1771_v2, %v3098_v51  ;;  %v3100_v54 = vld [vmem:[#allocation16_spill] sm:$0xff] }
  0x99   :  { %3091 = vst [vmem:[#allocation11_spill] sm:$0xff] %v1971_v9  ;;  %v1991_v58 = vadd.f32 %v1771_v2, %v3100_v54  ;;  %v3102_v9 = vld [vmem:[#allocation17_spill] sm:$0xff] }
  0x9a   :  { %3093 = vst [vmem:[#allocation12_spill] sm:$0xff] %v1975_v48  ;;  %v1995_v59 = vadd.f32 %v1771_v2, %v3102_v9  ;;  %v3104_v48 = vld [vmem:[#allocation18_spill] sm:$0xff]  ;;  %v3241_v30 = vld [vmem:[#allocation5_spill] sm:$0xff] }
  0x9b   :  { %3095 = vst [vmem:[#allocation13_spill] sm:$0xff] %v1979_v49  ;;  %v1999_v45 = vadd.f32 %v1771_v2, %v3104_v48  ;;  %v3106_v49 = vld [vmem:[#allocation19_spill] sm:$0xff] }
  0x9c   :  { %3097 = vst [vmem:[#allocation14_spill] sm:$0xff] %v1983_v50  ;;  %v2003_v47 = vadd.f32 %v1771_v2, %v3106_v49  ;;  %v3108_v50 = vld [vmem:[#allocation20_spill] sm:$0xff] }
  0x9d   :  { %3099 = vst [vmem:[#allocation15_spill] sm:$0xff] %v1987_v52  ;;  %v2007_v51 = vadd.f32 %v1771_v2, %v3108_v50  ;;  %v3110_v52 = vld [vmem:[#allocation21_spill] sm:$0xff] }
  0x9e   :  { %3101 = vst [vmem:[#allocation16_spill] sm:$0xff] %v1991_v58  ;;  %v2011_v54 = vadd.f32 %v1771_v2, %v3110_v52  ;;  %v3112_v58 = vld [vmem:[#allocation22_spill] sm:$0xff] }
  0x9f   :  { %3103 = vst [vmem:[#allocation17_spill] sm:$0xff] %v1995_v59  ;;  %v2015_v9 = vadd.f32 %v1771_v2, %v3112_v58  ;;  %v3114_v59 = vld [vmem:[#allocation23_spill] sm:$0xff] }
  0xa0   :  { %3105 = vst [vmem:[#allocation18_spill] sm:$0xff] %v1999_v45  ;;  %v2019_v48 = vadd.f32 %v1771_v2, %v3114_v59  ;;  %v3116_v45 = vld [vmem:[#allocation24_spill] sm:$0xff] }
  0xa1   :  { %3107 = vst [vmem:[#allocation19_spill] sm:$0xff] %v2003_v47  ;;  %v2023_v49 = vadd.f32 %v1771_v2, %v3116_v45  ;;  %v3118_v47 = vld [vmem:[#allocation25_spill] sm:$0xff] }
  0xa2   :  { %3109 = vst [vmem:[#allocation20_spill] sm:$0xff] %v2007_v51  ;;  %v2027_v50 = vadd.f32 %v1771_v2, %v3118_v47  ;;  %v3120_v51 = vld [vmem:[#allocation26_spill] sm:$0xff] }
  0xa3   :  { %3111 = vst [vmem:[#allocation21_spill] sm:$0xff] %v2011_v54  ;;  %v2031_v52 = vadd.f32 %v1771_v2, %v3120_v51  ;;  %v3122_v54 = vld [vmem:[#allocation27_spill] sm:$0xff] }
  0xa4   :  { %3113 = vst [vmem:[#allocation22_spill] sm:$0xff] %v2015_v9  ;;  %v2035_v58 = vadd.f32 %v1771_v2, %v3122_v54  ;;  %v3124_v9 = vld [vmem:[#allocation28_spill] sm:$0xff] }
  0xa5   :  { %3115 = vst [vmem:[#allocation23_spill] sm:$0xff] %v2019_v48  ;;  %v2039_v59 = vadd.f32 %v1771_v2, %v3124_v9  ;;  %v3126_v48 = vld [vmem:[#allocation29_spill] sm:$0xff] }
  0xa6   :  { %3117 = vst [vmem:[#allocation24_spill] sm:$0xff] %v2023_v49  ;;  %v2043_v45 = vadd.f32 %v1771_v2, %v3126_v48  ;;  %v3128_v49 = vld [vmem:[#allocation30_spill] sm:$0xff] }
  0xa7   :  { %3119 = vst [vmem:[#allocation25_spill] sm:$0xff] %v2027_v50  ;;  %v2047_v47 = vadd.f32 %v1771_v2, %v3128_v49  ;;  %v3130_v50 = vld [vmem:[#allocation31_spill] sm:$0xff] }
  0xa8   :  { %3121 = vst [vmem:[#allocation26_spill] sm:$0xff] %v2031_v52  ;;  %v2051_v51 = vadd.f32 %v1771_v2, %v3130_v50  ;;  %v3132_v52 = vld [vmem:[#allocation32_spill] sm:$0xff] }
  0xa9   :  { %3123 = vst [vmem:[#allocation27_spill] sm:$0xff] %v2035_v58  ;;  %v2055_v54 = vadd.f32 %v1771_v2, %v3132_v52  ;;  %v3134_v58 = vld [vmem:[#allocation33_spill] sm:$0xff] }
  0xaa   :  { %3125 = vst [vmem:[#allocation28_spill] sm:$0xff] %v2039_v59  ;;  %v2059_v9 = vadd.f32 %v1771_v2, %v3134_v58  ;;  %v3136_v59 = vld [vmem:[#allocation34_spill] sm:$0xff] }
  0xab   :  { %3127 = vst [vmem:[#allocation29_spill] sm:$0xff] %v2043_v45  ;;  %v2063_v48 = vadd.f32 %v1771_v2, %v3136_v59  ;;  %v3138_v45 = vld [vmem:[#allocation35_spill] sm:$0xff] }
  0xac   :  { %3129 = vst [vmem:[#allocation30_spill] sm:$0xff] %v2047_v47  ;;  %v2067_v49 = vadd.f32 %v1771_v2, %v3138_v45  ;;  %v3140_v47 = vld [vmem:[#allocation36_spill] sm:$0xff] }
  0xad   :  { %3131 = vst [vmem:[#allocation31_spill] sm:$0xff] %v2051_v51  ;;  %v2071_v50 = vadd.f32 %v1771_v2, %v3140_v47  ;;  %v3142_v51 = vld [vmem:[#allocation37_spill] sm:$0xff] }
  0xae   :  { %3133 = vst [vmem:[#allocation32_spill] sm:$0xff] %v2055_v54  ;;  %v2075_v52 = vadd.f32 %v1771_v2, %v3142_v51  ;;  %v3144_v54 = vld [vmem:[#allocation38_spill] sm:$0xff] }
  0xaf   :  { %3135 = vst [vmem:[#allocation33_spill] sm:$0xff] %v2059_v9  ;;  %v2079_v58 = vadd.f32 %v1771_v2, %v3144_v54  ;;  %v3146_v9 = vld [vmem:[#allocation39_spill] sm:$0xff] }
  0xb0   :  { %3137 = vst [vmem:[#allocation34_spill] sm:$0xff] %v2063_v48  ;;  %v2083_v59 = vadd.f32 %v1771_v2, %v3146_v9  ;;  %v3148_v48 = vld [vmem:[#allocation40_spill] sm:$0xff] }
  0xb1   :  { %3139 = vst [vmem:[#allocation35_spill] sm:$0xff] %v2067_v49  ;;  %v2087_v45 = vadd.f32 %v1771_v2, %v3148_v48  ;;  %v3150_v49 = vld [vmem:[#allocation41_spill] sm:$0xff] }
  0xb2   :  { %3141 = vst [vmem:[#allocation36_spill] sm:$0xff] %v2071_v50  ;;  %v2091_v47 = vadd.f32 %v1771_v2, %v3150_v49  ;;  %v3152_v50 = vld [vmem:[#allocation42_spill] sm:$0xff] }
  0xb3   :  { %3143 = vst [vmem:[#allocation37_spill] sm:$0xff] %v2075_v52  ;;  %v2095_v51 = vadd.f32 %v1771_v2, %v3152_v50  ;;  %v3154_v52 = vld [vmem:[#allocation43_spill] sm:$0xff] }
  0xb4   :  { %3145 = vst [vmem:[#allocation38_spill] sm:$0xff] %v2079_v58  ;;  %v2099_v54 = vadd.f32 %v1771_v2, %v3154_v52  ;;  %v3156_v58 = vld [vmem:[#allocation44_spill] sm:$0xff]  ;;  %v2119_v52 = vadd.f32 %v1771_v2, %v1571_v53 }
  0xb5   :  { %3147 = vst [vmem:[#allocation39_spill] sm:$0xff] %v2083_v59  ;;  %v2103_v9 = vadd.f32 %v1771_v2, %v3156_v58  ;;  %v3158_v59 = vld [vmem:[#allocation45_spill] sm:$0xff] }
  0xb6   :  { %3149 = vst [vmem:[#allocation40_spill] sm:$0xff] %v2087_v45  ;;  %v2107_v48 = vadd.f32 %v1771_v2, %v3158_v59  ;;  %v3160_v45 = vld [vmem:[#allocation46_spill] sm:$0xff] }
  0xb7   :  { %3151 = vst [vmem:[#allocation41_spill] sm:$0xff] %v2091_v47  ;;  %v2111_v49 = vadd.f32 %v1771_v2, %v3160_v45  ;;  %v3162_v47 = vld [vmem:[#allocation47_spill] sm:$0xff] }
  0xb8   :  { %3153 = vst [vmem:[#allocation42_spill] sm:$0xff] %v2095_v51  ;;  %v2115_v50 = vadd.f32 %v1771_v2, %v3162_v47  ;;  %v2135_v47 = vadd.f32 %v1771_v2, %v1592_v46 }
  0xb9   :  { %3155 = vst [vmem:[#allocation43_spill] sm:$0xff] %v2099_v54  ;;  %v3165_v54 = vld [vmem:[#allocation48_spill] sm:$0xff] }
  0xba   :  { %3157 = vst [vmem:[#allocation44_spill] sm:$0xff] %v2103_v9  ;;  %v2123_v58 = vadd.f32 %v1771_v2, %v3165_v54  ;;  %v3167_v9 = vld [vmem:[#allocation49_spill] sm:$0xff] }
  0xbb   :  { %3159 = vst [vmem:[#allocation45_spill] sm:$0xff] %v2107_v48  ;;  %v2127_v59 = vadd.f32 %v1771_v2, %v3167_v9  ;;  %v3169_v48 = vld [vmem:[#allocation50_spill] sm:$0xff] }
  0xbc   :  { %3161 = vst [vmem:[#allocation46_spill] sm:$0xff] %v2111_v49  ;;  %v2131_v45 = vadd.f32 %v1771_v2, %v3169_v48  ;;  %v2151_v48 = vadd.f32 %v1771_v2, %v1613_v55 }
  0xbd   :  { %3163 = vst [vmem:[#allocation47_spill] sm:$0xff] %v2115_v50  ;;  %v3172_v50 = vld [vmem:[#allocation51_spill] sm:$0xff] }
  0xbe   :  { %3164 = vst [vmem:[#allocation82_spill] sm:$0xff] %v2119_v52  ;;  %v2139_v53 = vadd.f32 %v1771_v2, %v3172_v50  ;;  %v3174_v52 = vld [vmem:[#allocation52_spill] sm:$0xff] }
  0xbf   :  { %3166 = vst [vmem:[#allocation48_spill] sm:$0xff] %v2123_v58  ;;  %v2143_v54 = vadd.f32 %v1771_v2, %v3174_v52  ;;  %v3176_v58 = vld [vmem:[#allocation53_spill] sm:$0xff] }
  0xc0   :  { %3168 = vst [vmem:[#allocation49_spill] sm:$0xff] %v2127_v59  ;;  %v2147_v9 = vadd.f32 %v1771_v2, %v3176_v58  ;;  %v2167_v58 = vadd.f32 %v1771_v2, %v1634_v4 }
  0xc1   :  { %3170 = vst [vmem:[#allocation50_spill] sm:$0xff] %v2131_v45  ;;  %v3179_v45 = vld [vmem:[#allocation54_spill] sm:$0xff]  ;;  %v3279_v43 = vld [vmem:[#allocation44_spill] sm:$0xff] }
  0xc2   :  { %3171 = vst [vmem:[#allocation83_spill] sm:$0xff] %v2135_v47  ;;  %v2155_v46 = vadd.f32 %v1771_v2, %v3179_v45  ;;  %v3181_v47 = vld [vmem:[#allocation55_spill] sm:$0xff] }
  0xc3   :  { %3173 = vst [vmem:[#allocation51_spill] sm:$0xff] %v2139_v53  ;;  %v2159_v50 = vadd.f32 %v1771_v2, %v3181_v47  ;;  %v3183_v53 = vld [vmem:[#allocation56_spill] sm:$0xff] }
  0xc4   :  { %3175 = vst [vmem:[#allocation52_spill] sm:$0xff] %v2143_v54  ;;  %v2163_v52 = vadd.f32 %v1771_v2, %v3183_v53  ;;  %v2183_v53 = vadd.f32 %v1771_v2, %v1655_v17 }
  0xc5   :  { %3177 = vst [vmem:[#allocation53_spill] sm:$0xff] %v2147_v9  ;;  %v3186_v9 = vld [vmem:[#allocation57_spill] sm:$0xff] }
  0xc6   :  { %3178 = vst [vmem:[#allocation84_spill] sm:$0xff] %v2151_v48  ;;  %v2171_v55 = vadd.f32 %v1771_v2, %v3186_v9  ;;  %v3188_v48 = vld [vmem:[#allocation58_spill] sm:$0xff] }
  0xc7   :  { %3180 = vst [vmem:[#allocation54_spill] sm:$0xff] %v2155_v46  ;;  %v2175_v45 = vadd.f32 %v1771_v2, %v3188_v48  ;;  %v3189_v46 = vld [vmem:[#allocation59_spill] sm:$0xff] }
  0xc8   :  { %3182 = vst [vmem:[#allocation55_spill] sm:$0xff] %v2159_v50  ;;  %v2179_v47 = vadd.f32 %v1771_v2, %v3189_v46  ;;  %v2199_v46 = vadd.f32 %v1771_v2, %v1676_v25 }
  0xc9   :  { %3184 = vst [vmem:[#allocation56_spill] sm:$0xff] %v2163_v52  ;;  %v3192_v52 = vld [vmem:[#allocation60_spill] sm:$0xff]  ;;  %v3285_v14 = vld [vmem:[#allocation83_spill] sm:$0xff] }
  0xca   :  { %3185 = vst [vmem:[#allocation85_spill] sm:$0xff] %v2167_v58  ;;  %v2187_v4 = vadd.f32 %v1771_v2, %v3192_v52  ;;  %v3194_v58 = vld [vmem:[#allocation61_spill] sm:$0xff] }
  0xcb   :  { %3187 = vst [vmem:[#allocation57_spill] sm:$0xff] %v2171_v55  ;;  %v2191_v9 = vadd.f32 %v1771_v2, %v3194_v58  ;;  %v3196_v55 = vld [vmem:[#allocation62_spill] sm:$0xff] }
  0xcc   :  { %3190 = vst [vmem:[#allocation58_spill] sm:$0xff] %v2179_v47  ;;  %v2195_v48 = vadd.f32 %v1771_v2, %v3196_v55  ;;  %v3199_v47 = vld [vmem:[#allocation63_spill] sm:$0xff]  ;;  %v2215_v55 = vadd.f32 %v1771_v2, %v1697_v35 }
  0xcd   :  { %3191 = vst [vmem:[#allocation59_spill] sm:$0xff] %v2183_v53  ;;  %v2203_v17 = vadd.f32 %v1771_v2, %v3199_v47  ;;  %v3201_v53 = vld [vmem:[#allocation64_spill] sm:$0xff] }
  0xce   :  { %3193 = vst [vmem:[#allocation60_spill] sm:$0xff] %v2187_v4  ;;  %v2207_v52 = vadd.f32 %v1771_v2, %v3201_v53  ;;  %v3203_v4 = vld [vmem:[#allocation65_spill] sm:$0xff] }
  0xcf   :  { %3195 = vst [vmem:[#allocation61_spill] sm:$0xff] %v2191_v9  ;;  %v2211_v58 = vadd.f32 %v1771_v2, %v3203_v4  ;;  %v2231_v4 = vadd.f32 %v1771_v2, %v1718_v44 }
  0xd0   :  { %3197 = vst [vmem:[#allocation62_spill] sm:$0xff] %v2195_v48  ;;  %v3206_v48 = vld [vmem:[#allocation66_spill] sm:$0xff]  ;;  %v3290_v29 = vld [vmem:[#allocation56_spill] sm:$0xff] }
  0xd1   :  { %3198 = vst [vmem:[#allocation86_spill] sm:$0xff] %v2199_v46  ;;  %v2219_v25 = vadd.f32 %v1771_v2, %v3206_v48  ;;  %v3208_v46 = vld [vmem:[#allocation67_spill] sm:$0xff] }
  0xd2   :  { %3200 = vst [vmem:[#allocation63_spill] sm:$0xff] %v2203_v17  ;;  %v2223_v47 = vadd.f32 %v1771_v2, %v3208_v46  ;;  %v3210_v17 = vld [vmem:[#allocation68_spill] sm:$0xff]  ;;  %v3292_v59 = vld [vmem:[#allocation57_spill] sm:$0xff] }
  0xd3   :  { %3202 = vst [vmem:[#allocation64_spill] sm:$0xff] %v2207_v52  ;;  %v2227_v53 = vadd.f32 %v1771_v2, %v3210_v17 }
  0xd4   :  { %3204 = vst [vmem:[#allocation65_spill] sm:$0xff] %v2211_v58  ;;  %v3213_v58 = vld [vmem:[#allocation69_spill] sm:$0xff]  ;;  %v3294_v51 = vld [vmem:[#allocation59_spill] sm:$0xff] }
  0xd5   :  { %3205 = vst [vmem:[#allocation87_spill] sm:$0xff] %v2215_v55  ;;  %v2235_v35 = vadd.f32 %v1771_v2, %v3213_v58  ;;  %v3215_v55 = vld [vmem:[#allocation70_spill] sm:$0xff] }
  0xd6   :  { %3207 = vst [vmem:[#allocation66_spill] sm:$0xff] %v2219_v25  ;;  %v2239_v48 = vadd.f32 %v1771_v2, %v3215_v55  ;;  %v3216_v25 = vld [vmem:[#allocation71_spill] sm:$0xff] }
  0xd7   :  { %3209 = vst [vmem:[#allocation67_spill] sm:$0xff] %v2223_v47  ;;  %v2243_v46 = vadd.f32 %v1771_v2, %v3216_v25  ;;  %v3217_v47 = vld [vmem:[#allocation72_spill] sm:$0xff]  ;;  %v2263_v25 = vadd.f32 %v1771_v2, %v1760_v60  ;;  %v2283_v60 = vadd.f32 %v1771_v2, %v1780_v10  ;;  %v2303_v10 = vadd.f32 %v1771_v2, %v1795_v33 }
  0xd8   :  { %3211 = vst [vmem:[#allocation68_spill] sm:$0xff] %v2227_v53  ;;  %v2247_v17 = vadd.f32 %v1771_v2, %v3217_v47  ;;  %v3219_v53 = vld [vmem:[#allocation73_spill] sm:$0xff]  ;;  %v2267_v47 = vadd.f32 %v1771_v2, %v1763_v1  ;;  %v2287_v1 = vadd.f32 %v1771_v2, %v1783_v11  ;;  %v2307_v11 = vadd.f32 %v1771_v2, %v1798_v12  ;;  %v3300_v50 = vld [vmem:[#allocation86_spill] sm:$0xff] }
  0xd9   :  { %3212 = vst [vmem:[#allocation88_spill] sm:$0xff] %v2231_v4  ;;  %v2251_v44 = vadd.f32 %v1771_v2, %v3219_v53  ;;  %v3220_v4 = vld [vmem:[#allocation74_spill] sm:$0xff]  ;;  %v3299_v33 = vmax.f32 %v1819_v39, 0.0 }
  0xda   :  { %3214 = vst [vmem:[#allocation69_spill] sm:$0xff] %v2235_v35  ;;  %v2255_v58 = vadd.f32 %v1771_v2, %v3220_v4  ;;  %v3221_v35 = vld [vmem:[#allocation75_spill] sm:$0xff]  ;;  %v2275_v4 = vadd.f32 %v1771_v2, %v1774_v3  ;;  %v2295_v3 = vadd.f32 %v1771_v2, %v1789_v18  ;;  %v2315_v18 = vadd.f32 %v1771_v2, %v1804_v19 }
  0xdb   :  { %3218 = vst [vmem:[#allocation70_spill] sm:$0xff] %v2247_v17  ;;  %v2259_v55 = vadd.f32 %v1771_v2, %v3221_v35  ;;  %v3223_v17 = vld [vmem:[#allocation76_spill] sm:$0xff]  ;;  %v2279_v35 = vadd.f32 %v1771_v2, %v1777_v57  ;;  %v2299_v57 = vadd.f32 %v1771_v2, %v1792_v31  ;;  %v2319_v31 = vadd.f32 %v1771_v2, %v1807_v28 }
  0xdc   :  { %3222 = vst [vmem:[#allocation71_spill] sm:$0xff] %v2267_v47  ;;  %v2271_v53 = vadd.f32 %v1771_v2, %v3223_v17  ;;  %v2291_v17 = vadd.f32 %v1771_v2, %v1786_v26  ;;  %v2311_v26 = vadd.f32 %v1771_v2, %v1801_v20  ;;  %v3291_v47 = vld [vmem:[#allocation85_spill] sm:$0xff]  ;;  %v3297_v19 = vmax.f32 %v1811_v27, 0.0  ;;  %v3307_v20 = vld [vmem:[#allocation87_spill] sm:$0xff] }
  0xdd   :  { %3225 = vst [vmem:[#allocation73_spill] sm:$0xff] %v2275_v4  ;;  %v3278_v4 = vld [vmem:[#allocation43_spill] sm:$0xff]  ;;  %v3298_v2 = vmax.f32 %v1815_v36, 0.0  ;;  %v3308_v52 = vld [vmem:[#allocation66_spill] sm:$0xff] }
  0xde   :  { %3224 = vst [vmem:[#allocation72_spill] sm:$0xff] %v2271_v53  ;;  %v3293_v53 = vld [vmem:[#allocation58_spill] sm:$0xff] }
  0xdf   :  { %3226 = vst [vmem:[#allocation74_spill] sm:$0xff] %v2279_v35  ;;  %v3267_v35 = vld [vmem:[#allocation31_spill] sm:$0xff]  ;;  %v575_v28 = vsel %vm21_vm0, %v3298_v2, 0.0  ;;  %v3304_v2 = vmax.f32 %v1847_v0, 0.0  ;;  %v3310_v0 = vmax.f32 %v1855_v6, 0.0 }
  0xe0   :  { %3227 = vst [vmem:[#allocation75_spill] sm:$0xff] %v2283_v60  ;;  %v3284_v60 = vld [vmem:[#allocation50_spill] sm:$0xff] }
  0xe1   :  { %3228 = vst [vmem:[#allocation76_spill] sm:$0xff] %v2287_v1  ;;  %v3287_v1 = vld [vmem:[#allocation53_spill] sm:$0xff]  ;;  %v596_v39 = vsel %vm21_vm0, %v3304_v2, 0.0  ;;  %v600_v2 = vsel %vm21_vm0, %v3310_v0, 0.0  ;;  %v3316_v0 = vmax.f32 %v1831_v56, 0.0  ;;  %v3320_v56 = vmax.f32 %v1911_v34, 0.0 }
  0xe2   :  { %3229 = vst [vmem:[#allocation89_spill] sm:$0xff] %v2291_v17  ;;  %v3240_v17 = vld [vmem:[#allocation4_spill] sm:$0xff] }
  0xe3   :  { %3230 = vst [vmem:[#allocation90_spill] sm:$0xff] %v2295_v3  ;;  %v3239_v3 = vld [vmem:[#allocation3_spill] sm:$0xff] }
  0xe4   :  { %3231 = vst [vmem:[#allocation91_spill] sm:$0xff] %v2299_v57  ;;  %v3296_v57 = vld [vmem:[#allocation62_spill] sm:$0xff] }
  0xe5   :  { %3232 = vst [vmem:[#allocation92_spill] sm:$0xff] %v2303_v10  ;;  %v577_v10 = vsel %vm21_vm0, %v3299_v33, 0.0  ;;  %v3305_v33 = vmax.f32 %v1851_v5, 0.0  ;;  %v3311_v5 = vmax.f32 %v1875_v15, 0.0  ;;  %v583_v15 = vsel %vm21_vm0, %v3316_v0, 0.0 }
  0xe6   :  { %3233 = vst [vmem:[#allocation93_spill] sm:$0xff] %v2307_v11  ;;  %v3306_v11 = vld [vmem:[#allocation65_spill] sm:$0xff]  ;;  %v638_v0 = vsel %vm21_vm0, %v3320_v56, 0.0  ;;  %v3326_v56 = vmax.f32 %v1863_v8, 0.0 }
  0xe7   :  { %3234 = vst [vmem:[#allocation94_spill] sm:$0xff] %v2311_v26  ;;  %v3302_v26 = vmax.f32 %v1823_v37, 0.0  ;;  %v598_v12 = vsel %vm21_vm0, %v3305_v33, 0.0  ;;  %v616_v33 = vsel %vm21_vm0, %v3311_v5, 0.0 }
  0xe8   :  { %3235 = vst [vmem:[#allocation95_spill] sm:$0xff] %v2315_v18  ;;  %v574_v18 = vsel %vm21_vm0, %v3297_v19, 0.0  ;;  %v3303_v19 = vmax.f32 %v1843_v63, 0.0  ;;  %v3309_v63 = vmax.f32 %v1827_v38, 0.0 }
  0xe9   :  { %3236 = vst [vmem:[#allocation96_spill] sm:$0xff] %v2319_v31  ;;  %v3271_v31 = vld [vmem:[#allocation35_spill] sm:$0xff]  ;;  %v576_v9 = vadd.f32 %v575_v28, %v574_v18  ;;  %v579_v27 = vsel %vm21_vm0, %v3302_v26, 0.0  ;;  %v3312_v18 = vmax.f32 %v1879_v16, 0.0 }
  0xea   :  { %v595_v36 = vsel %vm21_vm0, %v3303_v19, 0.0  ;;  %v581_v19 = vsel %vm21_vm0, %v3309_v63, 0.0  ;;  %v3315_v63 = vld [vmem:[#allocation68_spill] sm:$0xff] }
  0xeb   :  { %v578_v28 = vadd.f32 %v577_v10, %v576_v9  ;;  %v597_v37 = vadd.f32 %v596_v39, %v595_v36  ;;  %v617_v9 = vsel %vm21_vm0, %v3312_v18, 0.0  ;;  %v3313_v10 = vmax.f32 %v1883_v21, 0.0  ;;  %v3314_v36 = vld [vmem:[#allocation67_spill] sm:$0xff] }
  0xec   :  { %v618_v26 = vadd.f32 %v617_v9, %v616_v33  ;;  %v3318_v18 = vmax.f32 %v1887_v22, 0.0  ;;  %v3323_v22 = vmax.f32 %v1891_v23, 0.0  ;;  %v3324_v9 = vld [vmem:[#allocation69_spill] sm:$0xff] }
  0xed   :  { %v580_v49 = vadd.f32 %v579_v27, %v578_v28  ;;  %v599_v54 = vadd.f32 %v598_v12, %v597_v37  ;;  %v619_v38 = vsel %vm21_vm0, %v3313_v10, 0.0  ;;  %v3317_v12 = vmax.f32 %v1859_v7, 0.0  ;;  %v3322_v7 = vld [vmem:[#allocation88_spill] sm:$0xff] }
  0xee   :  { %v621_v21 = vsel %vm21_vm0, %v3318_v18, 0.0  ;;  %v620_v28 = vadd.f32 %v619_v38, %v618_v26  ;;  %v3319_v37 = vmax.f32 %v1907_v32, 0.0  ;;  %v623_v33 = vsel %vm21_vm0, %v3323_v22, 0.0 }
  0xef   :  { %v582_v5 = vadd.f32 %v581_v19, %v580_v49  ;;  %v601_v27 = vadd.f32 %v600_v2, %v599_v54  ;;  %v602_v16 = vsel %vm21_vm0, %v3317_v12, 0.0  ;;  %v3321_v49 = vmax.f32 %v1915_v40, 0.0 }
  0xf0   :  { %v637_v10 = vsel %vm21_vm0, %v3319_v37, 0.0  ;;  %v3325_v38 = vmax.f32 %v1835_v61, 0.0  ;;  %v622_v18 = vadd.f32 %v621_v21, %v620_v28  ;;  %v3328_v61 = vmax.f32 %v3239_v3, 0.0  ;;  %v3416_v3 = vld [vmem:[#allocation32_spill] sm:$0xff] }
  0xf1   :  { %v640_v54 = vsel %vm21_vm0, %v3321_v49, 0.0  ;;  %v584_v2 = vadd.f32 %v583_v15, %v582_v5  ;;  %v639_v26 = vadd.f32 %v638_v0, %v637_v10  ;;  %v603_v12 = vadd.f32 %v602_v16, %v601_v27 }
  0xf2   :  { %v585_v34 = vsel %vm21_vm0, %v3325_v38, 0.0  ;;  %v604_v15 = vsel %vm21_vm0, %v3326_v56, 0.0  ;;  %v624_v5 = vadd.f32 %v623_v33, %v622_v18  ;;  %v3327_v10 = vmax.f32 %v1919_v41, 0.0  ;;  %v3332_v33 = vld [vmem:[#allocation70_spill] sm:$0xff] }
  0xf3   :  { %v641_v23 = vadd.f32 %v640_v54, %v639_v26  ;;  %v658_v49 = vsel %vm21_vm0, %v3328_v61, 0.0  ;;  %v3329_v27 = vmax.f32 %v3240_v17, 0.0  ;;  %v586_v21 = vadd.f32 %v585_v34, %v584_v2  ;;  %v3339_v2 = vld [vmem:[#allocation6_spill] sm:$0xff] }
  0xf4   :  { %v642_v0 = vsel %vm21_vm0, %v3327_v10, 0.0  ;;  %v3330_v28 = vmax.f32 %v1895_v24, 0.0  ;;  %v3331_v54 = vmax.f32 %v3241_v30, 0.0  ;;  %v3333_v38 = vmax.f32 %v1839_v62, 0.0 }
  0xf5   :  { %v659_v16 = vsel %vm21_vm0, %v3329_v27, 0.0  ;;  %v605_v18 = vadd.f32 %v604_v15, %v603_v12  ;;  %v3334_v34 = vmax.f32 %v1867_v13, 0.0  ;;  %v643_v30 = vadd.f32 %v642_v0, %v641_v23  ;;  %v3337_v15 = vld [vmem:[#allocation78_spill] sm:$0xff]  ;;  %v3341_v23 = vld [vmem:[#allocation72_spill] sm:$0xff] }
  0xf6   :  { %v625_v8 = vsel %vm21_vm0, %v3330_v28, 0.0  ;;  %v660_v22 = vadd.f32 %v659_v16, %v658_v49  ;;  %v661_v41 = vsel %vm21_vm0, %v3331_v54, 0.0  ;;  %v587_v17 = vsel %vm21_vm0, %v3333_v38, 0.0  ;;  %v3336_v16 = vld [vmem:[#allocation71_spill] sm:$0xff]  ;;  %v3348_v28 = vld [vmem:[#allocation12_spill] sm:$0xff] }
  0xf7   :  { %v606_v56 = vsel %vm21_vm0, %v3334_v34, 0.0  ;;  %v626_v61 = vadd.f32 %v625_v8, %v624_v5  ;;  %v3335_v49 = vmax.f32 %v1923_v42, 0.0  ;;  %v588_v12 = vadd.f32 %v587_v17, %v586_v21  ;;  %v3346_v17 = vld [vmem:[#allocation11_spill] sm:$0xff]  ;;  %v3351_v5 = vld [vmem:[#allocation80_spill] sm:$0xff] }
  0xf8   :  { %v662_v62 = vadd.f32 %v661_v41, %v660_v22  ;;  %v3338_v54 = vmax.f32 %v3337_v15, 0.0  ;;  %v3340_v13 = vmax.f32 %v3339_v2, 0.0  ;;  %v607_v26 = vadd.f32 %v606_v56, %v605_v18 }
  0xf9   :  { %v644_v27 = vsel %vm21_vm0, %v3335_v49, 0.0  ;;  %v3344_v49 = vld [vmem:[#allocation77_spill] sm:$0xff]  ;;  %v3347_v15 = vmax.f32 %v3346_v17, 0.0  ;;  %v3349_v2 = vmax.f32 %v3348_v28, 0.0  ;;  %v3352_v37 = vmax.f32 %v3351_v5, 0.0 }
  0xfa   :  { %v627_v38 = vsel %vm21_vm0, %v3338_v54, 0.0  ;;  %v663_v34 = vsel %vm21_vm0, %v3340_v13, 0.0  ;;  %v3345_v22 = vmax.f32 %v3344_v49, 0.0  ;;  %v645_v21 = vadd.f32 %v644_v27, %v643_v30  ;;  %v3354_v30 = vld [vmem:[#allocation79_spill] sm:$0xff] }
  0xfb   :  { %v679_v54 = vsel %vm21_vm0, %v3347_v15, 0.0  ;;  %v680_v13 = vsel %vm21_vm0, %v3349_v2, 0.0  ;;  %v628_v24 = vadd.f32 %v627_v38, %v626_v61  ;;  %v646_v18 = vsel %vm21_vm0, %v3352_v37, 0.0  ;;  %v3356_v15 = vld [vmem:[#allocation7_spill] sm:$0xff]  ;;  %v3367_v61 = vld [vmem:[#allocation20_spill] sm:$0xff] }
  0xfc   :  { %v608_v41 = vsel %vm21_vm0, %v3345_v22, 0.0  ;;  %v664_v56 = vadd.f32 %v663_v34, %v662_v62  ;;  %v589_v22 = vrot.slane %v588_v12, 4  ;;  %v3355_v27 = vmax.f32 %v3354_v30, 0.0  ;;  %v3361_v34 = vld [vmem:[#allocation81_spill] sm:$0xff] }
  0xfd   :  { %v3357_v39 = vmax.f32 %v3356_v15, 0.0  ;;  %v609_v38 = vadd.f32 %v608_v41, %v607_v26  ;;  %v681_v5 = vadd.f32 %v680_v13, %v679_v54  ;;  %v647_v62 = vadd.f32 %v646_v18, %v645_v21  ;;  %v3363_v30 = vld [vmem:[#allocation13_spill] sm:$0xff]  ;;  %v3378_v18 = vld [vmem:[#allocation22_spill] sm:$0xff]  ;;  %v3386_v54 = vld [vmem:[#allocation15_spill] sm:$0xff] }
  0xfe   :  { %v629_v17 = vsel %vm21_vm0, %v3355_v27, 0.0  ;;  %v3362_v42 = vmax.f32 %v3361_v34, 0.0  ;;  %v3364_v6 = vmax.f32 %v3363_v30, 0.0  ;;  %v3368_v26 = vmax.f32 %v3367_v61, 0.0 }
  0xff   :  { %v665_v28 = vsel %vm21_vm0, %v3357_v39, 0.0  ;;  %v630_v15 = vadd.f32 %v629_v17, %v628_v24  ;;  %v3365_v39 = vld [vmem:[#allocation19_spill] sm:$0xff]  ;;  %v590_v34 = vadd.f32 %v589_v22, %v588_v12  ;;  %v3373_v17 = vld [vmem:[#allocation21_spill] sm:$0xff]  ;;  %v3379_v12 = vmax.f32 %v3378_v18, 0.0 }
 0x100   :  { %v648_v19 = vsel %vm21_vm0, %v3362_v42, 0.0  ;;  %v682_v27 = vsel %vm21_vm0, %v3364_v6, 0.0  ;;  %v666_v49 = vadd.f32 %v665_v28, %v664_v56  ;;  %v3366_v10 = vmax.f32 %v3365_v39, 0.0  ;;  %v3371_v42 = vld [vmem:[#allocation8_spill] sm:$0xff] }
 0x101   :  { %v701_v41 = vsel %vm21_vm0, %v3368_v26, 0.0  ;;  %v3372_v37 = vmax.f32 %v3371_v42, 0.0  ;;  %v610_v6 = vrot.slane %v609_v38, 4  ;;  %v683_v24 = vadd.f32 %v682_v27, %v681_v5  ;;  %v3376_v26 = vld [vmem:[#allocation14_spill] sm:$0xff] }
 0x102   :  { %v700_v40 = vsel %vm21_vm0, %v3366_v10, 0.0  ;;  %v3374_v28 = vmax.f32 %v3373_v17, 0.0  ;;  %v649_v32 = vadd.f32 %v648_v19, %v647_v62  ;;  %v3377_v0 = vmax.f32 %v3376_v26, 0.0  ;;  %v3384_v62 = vld [vmem:[#allocation9_spill] sm:$0xff]  ;;  %v3392_v17 = vld [vmem:[#allocation28_spill] sm:$0xff] }
 0x103   :  { %v667_v30 = vsel %vm21_vm0, %v3372_v37, 0.0  ;;  %v702_v56 = vadd.f32 %v701_v41, %v700_v40  ;;  %v705_v22 = vsel %vm21_vm0, %v3379_v12, 0.0  ;;  %v631_v42 = vrot.slane %v630_v15, 4  ;;  %v3380_v37 = vld [vmem:[#allocation2_spill] sm:$0xff] }
 0x104   :  { %v703_v10 = vsel %vm21_vm0, %v3374_v28, 0.0  ;;  %v684_v21 = vsel %vm21_vm0, %v3377_v0, 0.0  ;;  %v3381_v13 = vmax.f32 %v3380_v37, 0.0  ;;  %v668_v5 = vadd.f32 %v667_v30, %v666_v49  ;;  %v3412_v28 = vld [vmem:[#allocation18_spill] sm:$0xff] }
 0x105   :  { %v704_v27 = vadd.f32 %v703_v10, %v702_v56  ;;  %v591_v19 = vrot.slane %v590_v34, 2  ;;  %v3385_v26 = vmax.f32 %v3384_v62, 0.0  ;;  %v611_v39 = vadd.f32 %v610_v6, %v609_v38  ;;  %v3390_v56 = vld [vmem:[#allocation27_spill] sm:$0xff] }
 0x106   :  { %v650_v40 = vsel %vm21_vm0, %v3381_v13, 0.0  ;;  %v685_v18 = vadd.f32 %v684_v21, %v683_v24  ;;  %v3387_v12 = vmax.f32 %v3386_v54, 0.0  ;;  %v3388_v13 = vld [vmem:[#allocation23_spill] sm:$0xff]  ;;  %v3391_v10 = vmax.f32 %v3390_v56, 0.0  ;;  %v3394_v54 = vld [vmem:[#allocation29_spill] sm:$0xff] }
 0x107   :  { %v669_v0 = vsel %vm21_vm0, %v3385_v26, 0.0  ;;  %v706_v37 = vadd.f32 %v705_v22, %v704_v27  ;;  %v651_v2 = vadd.f32 %v650_v40, %v649_v32  ;;  %v3389_v49 = vmax.f32 %v3388_v13, 0.0  ;;  %v3396_v40 = vld [vmem:[#allocation10_spill] sm:$0xff]  ;;  %v3398_v13 = vld [vmem:[#allocation16_spill] sm:$0xff] }
 0x108   :  { %v686_v8 = vsel %vm21_vm0, %v3387_v12, 0.0  ;;  %v721_v61 = vsel %vm21_vm0, %v3391_v10, 0.0  ;;  %v3393_v62 = vmax.f32 %v3392_v17, 0.0  ;;  %v632_v38 = vadd.f32 %v631_v42, %v630_v15  ;;  %v3400_v10 = vld [vmem:[#allocation30_spill] sm:$0xff] }
 0x109   :  { %v707_v30 = vsel %vm21_vm0, %v3389_v49, 0.0  ;;  %v670_v21 = vadd.f32 %v669_v0, %v668_v5  ;;  %v3395_v24 = vmax.f32 %v3394_v54, 0.0  ;;  %v592_v32 = vadd.f32 %v591_v19, %v590_v34 }
 0x10a   :  { %v722_v26 = vsel %vm21_vm0, %v3393_v62, 0.0  ;;  %v3397_v27 = vmax.f32 %v3396_v40, 0.0  ;;  %v3399_v49 = vmax.f32 %v3398_v13, 0.0  ;;  %v3401_v17 = vmax.f32 %v3400_v10, 0.0 }
 0x10b   :  { %v723_v6 = vadd.f32 %v722_v26, %v721_v61  ;;  %v724_v22 = vsel %vm21_vm0, %v3395_v24, 0.0  ;;  %v612_v15 = vrot.slane %v611_v39, 2  ;;  %v687_v42 = vadd.f32 %v686_v8, %v685_v18  ;;  %v3402_v26 = vld [vmem:[#allocation24_spill] sm:$0xff] }
 0x10c   :  { %v671_v12 = vsel %vm21_vm0, %v3397_v27, 0.0  ;;  %v688_v56 = vsel %vm21_vm0, %v3399_v49, 0.0  ;;  %v726_v62 = vsel %vm21_vm0, %v3401_v17, 0.0  ;;  %v708_v61 = vadd.f32 %v707_v30, %v706_v37  ;;  %v3406_v17 = vld [vmem:[#allocation36_spill] sm:$0xff]  ;;  %v3408_v30 = vld [vmem:[#allocation17_spill] sm:$0xff] }
 0x10d   :  { %v725_v5 = vadd.f32 %v724_v22, %v723_v6  ;;  %v652_v0 = vrot.slane %v651_v2, 4  ;;  %v3403_v54 = vmax.f32 %v3402_v26, 0.0  ;;  %v3404_v19 = vmax.f32 %v3267_v35, 0.0  ;;  %v3410_v35 = vld [vmem:[#allocation37_spill] sm:$0xff] }
 0x10e   :  { %v3405_v40 = vmax.f32 %v3271_v31, 0.0  ;;  %v633_v13 = vrot.slane %v632_v38, 2  ;;  %v672_v49 = vadd.f32 %v671_v12, %v670_v21  ;;  %v3407_v8 = vmax.f32 %v3406_v17, 0.0 }
 0x10f   :  { %v709_v34 = vsel %vm21_vm0, %v3403_v54, 0.0  ;;  %v728_v24 = vsel %vm21_vm0, %v3404_v19, 0.0  ;;  %v727_v10 = vadd.f32 %v726_v62, %v725_v5  ;;  %v593_v37 = vrot.slane %v592_v32, 1 }
 0x110   :  { %v742_v27 = vsel %vm21_vm0, %v3405_v40, 0.0  ;;  %v743_v18 = vsel %vm21_vm0, %v3407_v8, 0.0  ;;  %v3409_v6 = vmax.f32 %v3408_v30, 0.0  ;;  %v3411_v54 = vmax.f32 %v3410_v35, 0.0  ;;  %v3414_v8 = vld [vmem:[#allocation25_spill] sm:$0xff] }
 0x111   :  { %v744_v26 = vadd.f32 %v743_v18, %v742_v27  ;;  %v689_v31 = vadd.f32 %v688_v56, %v687_v42  ;;  %v3413_v40 = vmax.f32 %v3412_v28, 0.0  ;;  %v710_v12 = vadd.f32 %v709_v34, %v708_v61  ;;  %v3419_v61 = vld [vmem:[#allocation38_spill] sm:$0xff] }
 0x112   :  { %v690_v22 = vsel %vm21_vm0, %v3409_v6, 0.0  ;;  %v745_v19 = vsel %vm21_vm0, %v3411_v54, 0.0  ;;  %v729_v62 = vadd.f32 %v728_v24, %v727_v10  ;;  %v613_v5 = vadd.f32 %v612_v15, %v611_v39 }
 0x113   :  { %v692_v21 = vsel %vm21_vm0, %v3413_v40, 0.0  ;;  %v653_v17 = vadd.f32 %v652_v0, %v651_v2  ;;  %v3415_v41 = vmax.f32 %v3414_v8, 0.0  ;;  %v3417_v6 = vmax.f32 %v3416_v3, 0.0  ;;  %v3422_v3 = vld [vmem:[#allocation45_spill] sm:$0xff] }
 0x114   :  { %v634_v18 = vadd.f32 %v633_v13, %v632_v38  ;;  %v673_v35 = vrot.slane %v672_v49, 4  ;;  %v746_v54 = vadd.f32 %v745_v19, %v744_v26  ;;  %v3418_v56 = vmax.f32 %v3278_v4, 0.0  ;;  %v3426_v40 = vld [vmem:[#allocation33_spill] sm:$0xff] }
 0x115   :  { %v711_v30 = vsel %vm21_vm0, %v3415_v41, 0.0  ;;  %v730_v27 = vsel %vm21_vm0, %v3417_v6, 0.0  ;;  %v2644_v42 = vadd.f32 %v593_v37, %v592_v32  ;;  %v3420_v39 = vmax.f32 %v3419_v61, 0.0  ;;  %v3424_v32 = vld [vmem:[#allocation26_spill] sm:$0xff] }
 0x116   :  { %v763_v28 = vsel %vm21_vm0, %v3418_v56, 0.0  ;;  %v3421_v15 = vmax.f32 %v3279_v43, 0.0  ;;  %v3423_v0 = vmax.f32 %v3422_v3, 0.0  ;;  %v691_v34 = vadd.f32 %v690_v22, %v689_v31  ;;  %v3430_v31 = vld [vmem:[#allocation46_spill] sm:$0xff] }
 0x117   :  { %v747_v2 = vsel %vm21_vm0, %v3420_v39, 0.0  ;;  %v712_v24 = vadd.f32 %v711_v30, %v710_v12  ;;  %v731_v13 = vadd.f32 %v730_v27, %v729_v62  ;;  %v614_v10 = vrot.slane %v613_v5, 1 }
 0x118   :  { %v764_v41 = vsel %vm21_vm0, %v3421_v15, 0.0  ;;  %v766_v38 = vsel %vm21_vm0, %v3423_v0, 0.0  ;;  %v654_v26 = vrot.slane %v653_v17, 2  ;;  %v3425_v37 = vmax.f32 %v3424_v32, 0.0  ;;  %v3428_v15 = vld [vmem:[#allocation39_spill] sm:$0xff] }
 0x119   :  { %v765_v4 = vadd.f32 %v764_v41, %v763_v28  ;;  %v3427_v8 = vmax.f32 %v3426_v40, 0.0  ;;  %v635_v6 = vrot.slane %v634_v18, 1  ;;  %v674_v56 = vadd.f32 %v673_v35, %v672_v49 }
 0x11a   :  { %v713_v19 = vsel %vm21_vm0, %v3425_v37, 0.0  ;;  %v748_v61 = vadd.f32 %v747_v2, %v746_v54  ;;  %v3429_v3 = vmax.f32 %v3428_v15, 0.0  ;;  %v3431_v12 = vmax.f32 %v3430_v31, 0.0  ;;  %v3436_v37 = vld [vmem:[#allocation51_spill] sm:$0xff] }
 0x11b   :  { %v732_v43 = vsel %vm21_vm0, %v3427_v8, 0.0  ;;  %v767_v39 = vadd.f32 %v766_v38, %v765_v4  ;;  %v3432_v30 = vmax.f32 %v3284_v60, 0.0  ;;  %v3433_v28 = vmax.f32 %v3285_v14, 0.0  ;;  %v3434_v38 = vld [vmem:[#allocation34_spill] sm:$0xff]  ;;  %v3438_v8 = vld [vmem:[#allocation52_spill] sm:$0xff]  ;;  %v3442_v31 = vld [vmem:[#allocation47_spill] sm:$0xff] }
 0x11c   :  { %v749_v22 = vsel %vm21_vm0, %v3429_v3, 0.0  ;;  %v768_v62 = vsel %vm21_vm0, %v3431_v12, 0.0  ;;  %v693_v0 = vadd.f32 %v692_v21, %v691_v34  ;;  %v714_v49 = vadd.f32 %v713_v19, %v712_v24 }
 0x11d   :  { %v784_v27 = vsel %vm21_vm0, %v3432_v30, 0.0  ;;  %v785_v41 = vsel %vm21_vm0, %v3433_v28, 0.0  ;;  %v733_v35 = vadd.f32 %v732_v43, %v731_v13  ;;  %v2673_v2 = vadd.f32 %v614_v10, %v613_v5  ;;  %v3440_v10 = vld [vmem:[#allocation40_spill] sm:$0xff] }
 0x11e   :  { %v786_v54 = vadd.f32 %v785_v41, %v784_v27  ;;  %v3435_v4 = vmax.f32 %v3434_v38, 0.0  ;;  %v3437_v40 = vmax.f32 %v3436_v37, 0.0  ;;  %v3439_v15 = vmax.f32 %v3438_v8, 0.0  ;;  %v3448_v37 = vld [vmem:[#allocation41_spill] sm:$0xff] }
 0x11f   :  { %v2684_v3 = vadd.f32 %v654_v26, %v653_v17  ;;  %v750_v21 = vadd.f32 %v749_v22, %v748_v61  ;;  %v769_v34 = vadd.f32 %v768_v62, %v767_v39  ;;  %v2686_v13 = vadd.f32 %v635_v6, %v634_v18 }
 0x120   :  { %v734_v32 = vsel %vm21_vm0, %v3435_v4, 0.0  ;;  %v787_v60 = vsel %vm21_vm0, %v3437_v40, 0.0  ;;  %v789_v14 = vsel %vm21_vm0, %v3439_v15, 0.0  ;;  %v675_v5 = vrot.slane %v674_v56, 2 }
 0x121   :  { %v788_v24 = vadd.f32 %v787_v60, %v786_v54  ;;  %v3441_v19 = vmax.f32 %v3440_v10, 0.0  ;;  %v3443_v12 = vmax.f32 %v3442_v31, 0.0  ;;  %v694_v27 = vrot.slane %v693_v0, 4  ;;  %v3450_v60 = vld [vmem:[#allocation82_spill] sm:$0xff] }
 0x122   :  { %v715_v28 = vrot.slane %v714_v49, 4  ;;  %v735_v41 = vadd.f32 %v734_v32, %v733_v35  ;;  %v3444_v17 = vmax.f32 %v3287_v1, 0.0  ;;  %v3445_v18 = vmax.f32 %v3290_v29, 0.0 }
 0x123   :  { %v751_v43 = vsel %vm21_vm0, %v3441_v19, 0.0  ;;  %v770_v30 = vsel %vm21_vm0, %v3443_v12, 0.0  ;;  %v790_v38 = vadd.f32 %v789_v14, %v788_v24  ;;  %v3446_v61 = vmax.f32 %v3291_v47, 0.0 }
 0x124   :  { %v791_v26 = vsel %vm21_vm0, %v3444_v17, 0.0  ;;  %v805_v6 = vsel %vm21_vm0, %v3445_v18, 0.0  ;;  %v3447_v22 = vmax.f32 %v3292_v59, 0.0  ;;  %v656_v54 = vrot.slane %v2684_v3, 1  ;;  %v3459_v17 = vld [vmem:[#allocation48_spill] sm:$0xff] }
 0x125   :  { %v806_v39 = vsel %vm21_vm0, %v3446_v61, 0.0  ;;  %v752_v35 = vadd.f32 %v751_v43, %v750_v21  ;;  %v771_v4 = vadd.f32 %v770_v30, %v769_v34  ;;  %v2707_v1 = vadd.f32 %v675_v5, %v674_v56  ;;  %v3453_v5 = vld [vmem:[#allocation84_spill] sm:$0xff] }
 0x126   :  { %v808_v62 = vsel %vm21_vm0, %v3447_v22, 0.0  ;;  %v807_v32 = vadd.f32 %v806_v39, %v805_v6  ;;  %v3449_v40 = vmax.f32 %v3448_v37, 0.0  ;;  %v3451_v8 = vmax.f32 %v3450_v60, 0.0  ;;  %v3463_v39 = vld [vmem:[#allocation63_spill] sm:$0xff] }
 0x127   :  { %v3452_v15 = vmax.f32 %v2175_v45, 0.0  ;;  %v2718_v14 = vadd.f32 %v694_v27, %v693_v0  ;;  %v2720_v24 = vadd.f32 %v715_v28, %v714_v49  ;;  %v792_v21 = vadd.f32 %v791_v26, %v790_v38  ;;  %v3457_v0 = vld [vmem:[#allocation42_spill] sm:$0xff] }
 0x128   :  { %v753_v29 = vsel %vm21_vm0, %v3449_v40, 0.0  ;;  %v772_v47 = vsel %vm21_vm0, %v3451_v8, 0.0  ;;  %v809_v34 = vadd.f32 %v808_v62, %v807_v32  ;;  %v736_v56 = vrot.slane %v735_v41, 4 }
 0x129   :  { %v810_v59 = vsel %vm21_vm0, %v3452_v15, 0.0  ;;  %v3454_v10 = vmax.f32 %v3453_v5, 0.0  ;;  %v3455_v43 = vmax.f32 %v3293_v53, 0.0  ;;  %v3456_v12 = vmax.f32 %v3296_v57, 0.0 }
 0x12a   :  { %v754_v30 = vadd.f32 %v753_v29, %v752_v35  ;;  %v3458_v27 = vmax.f32 %v3457_v0, 0.0  ;;  %v773_v28 = vadd.f32 %v772_v47, %v771_v4  ;;  %v811_v38 = vadd.f32 %v810_v59, %v809_v34 }
 0x12b   :  { %v793_v19 = vsel %vm21_vm0, %v3454_v10, 0.0  ;;  %v812_v31 = vsel %vm21_vm0, %v3455_v43, 0.0  ;;  %v826_v45 = vsel %vm21_vm0, %v3456_v12, 0.0  ;;  %v3460_v26 = vmax.f32 %v3459_v17, 0.0  ;;  %v3469_v43 = vld [vmem:[#allocation60_spill] sm:$0xff] }
 0x12c   :  { %v755_v49 = vsel %vm21_vm0, %v3458_v27, 0.0  ;;  %v3461_v6 = vmax.f32 %v3294_v51, 0.0  ;;  %v3462_v61 = vmax.f32 %v3300_v50, 0.0  ;;  %v3464_v22 = vmax.f32 %v3463_v39, 0.0  ;;  %v3465_v51 = vld [vmem:[#allocation54_spill] sm:$0xff]  ;;  %v3467_v50 = vld [vmem:[#allocation64_spill] sm:$0xff] }
 0x12d   :  { %v774_v18 = vsel %vm21_vm0, %v3460_v26, 0.0  ;;  %v696_v35 = vrot.slane %v2718_v14, 2  ;;  %v794_v4 = vadd.f32 %v793_v19, %v792_v21  ;;  %v813_v32 = vadd.f32 %v812_v31, %v811_v38  ;;  %v3476_v38 = vld [vmem:[#allocation55_spill] sm:$0xff] }
 0x12e   :  { %v814_v53 = vsel %vm21_vm0, %v3461_v6, 0.0  ;;  %v827_v57 = vsel %vm21_vm0, %v3462_v61, 0.0  ;;  %v829_v62 = vsel %vm21_vm0, %v3464_v22, 0.0  ;;  %v717_v40 = vrot.slane %v2720_v24, 2 }
 0x12f   :  { %v828_v37 = vadd.f32 %v827_v57, %v826_v45  ;;  %v2748_v29 = vadd.f32 %v736_v56, %v735_v41  ;;  %v3466_v60 = vmax.f32 %v3465_v51, 0.0  ;;  %v3468_v47 = vmax.f32 %v3467_v50, 0.0 }
 0x130   :  { %v756_v59 = vadd.f32 %v755_v49, %v754_v30  ;;  %v775_v34 = vadd.f32 %v774_v18, %v773_v28  ;;  %v815_v5 = vadd.f32 %v814_v53, %v813_v32  ;;  %v3470_v21 = vmax.f32 %v3469_v43, 0.0  ;;  %v3474_v30 = vld [vmem:[#allocation49_spill] sm:$0xff] }
 0x131   :  { %v795_v8 = vsel %vm21_vm0, %v3466_v60, 0.0  ;;  %v831_v15 = vsel %vm21_vm0, %v3468_v47, 0.0  ;;  %v830_v10 = vadd.f32 %v829_v62, %v828_v37  ;;  %v3471_v31 = vmax.f32 %v3306_v11, 0.0  ;;  %v3481_v37 = vld [vmem:[#allocation61_spill] sm:$0xff] }
 0x132   :  { %v816_v19 = vsel %vm21_vm0, %v3470_v21, 0.0  ;;  %v3472_v56 = vmax.f32 %v3315_v63, 0.0  ;;  %v3473_v45 = vmax.f32 %v3322_v7, 0.0  ;;  %v3475_v27 = vmax.f32 %v3474_v30, 0.0 }
 0x133   :  { %v833_v41 = vsel %vm21_vm0, %v3471_v31, 0.0  ;;  %v796_v28 = vadd.f32 %v795_v8, %v794_v4  ;;  %v3477_v17 = vmax.f32 %v3476_v38, 0.0  ;;  %v832_v11 = vadd.f32 %v831_v15, %v830_v10 }
 0x134   :  { %v847_v12 = vsel %vm21_vm0, %v3472_v56, 0.0  ;;  %v848_v0 = vsel %vm21_vm0, %v3473_v45, 0.0  ;;  %v776_v49 = vsel %vm21_vm0, %v3475_v27, 0.0  ;;  %v738_v18 = vrot.slane %v2748_v29, 2 }
 0x135   :  { %v797_v26 = vsel %vm21_vm0, %v3477_v17, 0.0  ;;  %v3478_v63 = vmax.f32 %v3307_v20, 0.0  ;;  %v849_v53 = vadd.f32 %v848_v0, %v847_v12  ;;  %v3479_v7 = vmax.f32 %v3324_v9, 0.0 }
 0x136   :  { %v757_v57 = vrot.slane %v756_v59, 4  ;;  %v817_v39 = vadd.f32 %v816_v19, %v815_v5  ;;  %v834_v22 = vadd.f32 %v833_v41, %v832_v11  ;;  %v3480_v62 = vmax.f32 %v2239_v48, 0.0 }
 0x137   :  { %v835_v6 = vsel %vm21_vm0, %v3478_v63, 0.0  ;;  %v850_v61 = vsel %vm21_vm0, %v3479_v7, 0.0  ;;  %v777_v32 = vadd.f32 %v776_v49, %v775_v34  ;;  %v3482_v51 = vmax.f32 %v3481_v37, 0.0  ;;  %v3493_v63 = vld [vmem:[#allocation73_spill] sm:$0xff] }
 0x138   :  { %v852_v4 = vsel %vm21_vm0, %v3480_v62, 0.0  ;;  %v3483_v20 = vmax.f32 %v3308_v52, 0.0  ;;  %v851_v50 = vadd.f32 %v850_v61, %v849_v53  ;;  %v798_v9 = vadd.f32 %v797_v26, %v796_v28  ;;  %v3495_v53 = vld [vmem:[#allocation89_spill] sm:$0xff]  ;;  %v3499_v62 = vld [vmem:[#allocation90_spill] sm:$0xff] }
 0x139   :  { %v818_v60 = vsel %vm21_vm0, %v3482_v51, 0.0  ;;  %v836_v47 = vadd.f32 %v835_v6, %v834_v22  ;;  %v3484_v15 = vmax.f32 %v3314_v36, 0.0  ;;  %v3485_v48 = vmax.f32 %v2243_v46, 0.0 }
 0x13a   :  { %v837_v8 = vsel %vm21_vm0, %v3483_v20, 0.0  ;;  %v853_v34 = vadd.f32 %v852_v4, %v851_v50  ;;  %v3486_v43 = vmax.f32 %v2259_v55, 0.0  ;;  %v3487_v52 = vmax.f32 %v2263_v25, 0.0  ;;  %v3501_v20 = vld [vmem:[#allocation91_spill] sm:$0xff] }
 0x13b   :  { %v839_v5 = vsel %vm21_vm0, %v3484_v15, 0.0  ;;  %v854_v10 = vsel %vm21_vm0, %v3485_v48, 0.0  ;;  %v3488_v31 = vmax.f32 %v3336_v16, 0.0  ;;  %v819_v36 = vadd.f32 %v818_v60, %v817_v39  ;;  %v3497_v39 = vld [vmem:[#allocation74_spill] sm:$0xff]  ;;  %v3503_v48 = vld [vmem:[#allocation92_spill] sm:$0xff] }
 0x13c   :  { %v868_v21 = vsel %vm21_vm0, %v3486_v43, 0.0  ;;  %v869_v19 = vsel %vm21_vm0, %v3487_v52, 0.0  ;;  %v838_v56 = vadd.f32 %v837_v8, %v836_v47  ;;  %v3489_v12 = vmax.f32 %v3332_v33, 0.0  ;;  %v3505_v52 = vld [vmem:[#allocation75_spill] sm:$0xff] }
 0x13d   :  { %v871_v41 = vsel %vm21_vm0, %v3488_v31, 0.0  ;;  %v870_v45 = vadd.f32 %v869_v19, %v868_v21  ;;  %v758_v0 = vadd.f32 %v757_v57, %v756_v59  ;;  %v778_v30 = vrot.slane %v777_v32, 4 }
 0x13e   :  { %v856_v46 = vsel %vm21_vm0, %v3489_v12, 0.0  ;;  %v855_v55 = vadd.f32 %v854_v10, %v853_v34  ;;  %v3490_v27 = vmax.f32 %v3341_v23, 0.0  ;;  %v799_v49 = vrot.slane %v798_v9, 4 }
 0x13f   :  { %v840_v28 = vadd.f32 %v839_v5, %v838_v56  ;;  %v3491_v16 = vmax.f32 %v2251_v44, 0.0  ;;  %v872_v17 = vadd.f32 %v871_v41, %v870_v45  ;;  %v3492_v33 = vmax.f32 %v2255_v58, 0.0 }
 0x140   :  { %v873_v25 = vsel %vm21_vm0, %v3490_v27, 0.0  ;;  %v857_v26 = vadd.f32 %v856_v46, %v855_v55  ;;  %v3494_v59 = vmax.f32 %v3493_v63, 0.0  ;;  %v3496_v23 = vmax.f32 %v3495_v53, 0.0  ;;  %v3507_v46 = vld [vmem:[#allocation76_spill] sm:$0xff]  ;;  %v3509_v27 = vld [vmem:[#allocation93_spill] sm:$0xff] }
 0x141   :  { %v858_v38 = vsel %vm21_vm0, %v3491_v16, 0.0  ;;  %v860_v11 = vsel %vm21_vm0, %v3492_v33, 0.0  ;;  %v820_v61 = vrot.slane %v819_v36, 4  ;;  %v874_v57 = vadd.f32 %v873_v25, %v872_v17  ;;  %v3511_v17 = vld [vmem:[#allocation94_spill] sm:$0xff] }
 0x142   :  { %v875_v6 = vsel %vm21_vm0, %v3494_v59, 0.0  ;;  %v889_v7 = vsel %vm21_vm0, %v3496_v23, 0.0  ;;  %v3498_v44 = vmax.f32 %v3497_v39, 0.0  ;;  %v3500_v4 = vmax.f32 %v3499_v62, 0.0 }
 0x143   :  { %v841_v37 = vrot.slane %v840_v28, 4  ;;  %v859_v51 = vadd.f32 %v858_v38, %v857_v26  ;;  %v3502_v8 = vmax.f32 %v3501_v20, 0.0  ;;  %v759_v47 = vrot.slane %v758_v0, 2 }
 0x144   :  { %v877_v22 = vsel %vm21_vm0, %v3498_v44, 0.0  ;;  %v890_v58 = vsel %vm21_vm0, %v3500_v4, 0.0  ;;  %v779_v15 = vadd.f32 %v778_v30, %v777_v32  ;;  %v876_v5 = vadd.f32 %v875_v6, %v874_v57 }
 0x145   :  { %v891_v60 = vadd.f32 %v890_v58, %v889_v7  ;;  %v892_v50 = vsel %vm21_vm0, %v3502_v8, 0.0  ;;  %v3504_v10 = vmax.f32 %v3503_v48, 0.0  ;;  %v800_v43 = vadd.f32 %v799_v49, %v798_v9  ;;  %v3513_v7 = vld [vmem:[#allocation95_spill] sm:$0xff]  ;;  %v3515_v58 = vld [vmem:[#allocation96_spill] sm:$0xff] }
 0x146   :  { %v861_v21 = vadd.f32 %v860_v11, %v859_v51  ;;  %v3506_v19 = vmax.f32 %v3505_v52, 0.0  ;;  %v821_v56 = vadd.f32 %v820_v61, %v819_v36  ;;  %v878_v12 = vadd.f32 %v877_v22, %v876_v5 }
 0x147   :  { %v894_v34 = vsel %vm21_vm0, %v3504_v10, 0.0  ;;  %v893_v41 = vadd.f32 %v892_v50, %v891_v60  ;;  %v3508_v45 = vmax.f32 %v3507_v46, 0.0  ;;  %v3510_v32 = vmax.f32 %v3509_v27, 0.0 }
 0x148   :  { %v879_v31 = vsel %vm21_vm0, %v3506_v19, 0.0  ;;  %v842_v25 = vadd.f32 %v841_v37, %v840_v28  ;;  %v862_v16 = vrot.slane %v861_v21, 4  ;;  %v780_v9 = vrot.slane %v779_v15, 2 }
 0x149   :  { %v881_v55 = vsel %vm21_vm0, %v3508_v45, 0.0  ;;  %v896_v30 = vsel %vm21_vm0, %v3510_v32, 0.0  ;;  %v895_v38 = vadd.f32 %v894_v34, %v893_v41  ;;  %v880_v49 = vadd.f32 %v879_v31, %v878_v12 }
 0x14a   :  { %v3512_v26 = vmax.f32 %v3511_v17, 0.0  ;;  %v983_v11 = vmov 64.0   ;;  %v697_v36 = vadd.f32 %v696_v35, %v2718_v14  ;;  %v801_v63 = vrot.slane %v800_v43, 2 }
 0x14b   :  { %981 = vrcp.f32 %v983_v11  ;;  %v863_v59 = vadd.f32 %v862_v16, %v861_v21  ;;  %v897_v6 = vadd.f32 %v896_v30, %v895_v38  ;;  %v718_v28 = vadd.f32 %v717_v40, %v2720_v24 }
 0x14c   :  { %v898_v33 = vsel %vm21_vm0, %v3512_v26, 0.0  ;;  %v822_v53 = vrot.slane %v821_v56, 2  ;;  %v882_v23 = vadd.f32 %v881_v55, %v880_v49  ;;  %v3514_v61 = vmax.f32 %v3513_v7, 0.0 }
 0x14d   :  { %v739_v39 = vadd.f32 %v738_v18, %v2748_v29  ;;  %v760_v44 = vadd.f32 %v759_v47, %v758_v0  ;;  %v843_v22 = vrot.slane %v842_v25, 2  ;;  %v899_v14 = vadd.f32 %v898_v33, %v897_v6 }
 0x14e   :  { %v900_v57 = vsel %vm21_vm0, %v3514_v61, 0.0  ;;  %v781_v35 = vadd.f32 %v780_v9, %v779_v15  ;;  %v864_v62 = vrot.slane %v863_v59, 2  ;;  %v883_v4 = vrot.slane %v882_v23, 4 }
 0x14f   :  { %v3516_v37 = vmax.f32 %v3515_v58, 0.0  ;;  %v657_v40 = vadd.f32 %v656_v54, %v2684_v3  ;;  %v677_v51 = vrot.slane %v2707_v1, 1  ;;  %v802_v60 = vadd.f32 %v801_v63, %v800_v43 }
 0x150   :  { %v901_v20 = vadd.f32 %v900_v57, %v899_v14  ;;  %v698_v29 = vrot.slane %v697_v36, 1  ;;  %v719_v18 = vrot.slane %v718_v28, 1  ;;  %v823_v0 = vadd.f32 %v822_v53, %v821_v56 }
 0x151   :  { %v902_v24 = vsel %vm21_vm0, %v3516_v37, 0.0  ;;  %v982_v8 = vpop.eup %981  ;;  %v884_v50 = vadd.f32 %v883_v4, %v882_v23  ;;  %v740_v47 = vrot.slane %v739_v39, 1  ;;  %v844_v15 = vadd.f32 %v843_v22, %v842_v25 }
 0x152   :  { %v903_v5 = vadd.f32 %v902_v24, %v901_v20  ;;  %v911_v48 = vmul.f32 64.0, %v982_v8  ;;  %v761_v10 = vrot.slane %v760_v44, 1  ;;  %v782_v34 = vrot.slane %v781_v35, 1 }
 0x153   :  { %v865_v21 = vadd.f32 %v864_v62, %v863_v59  ;;  %v885_v52 = vrot.slane %v884_v50, 2  ;;  %v678_v19 = vadd.f32 %v677_v51, %v2707_v1  ;;  %v803_v3 = vrot.slane %v802_v60, 1 }
 0x154   :  { %v904_v54 = vrot.slane %v903_v5, 4  ;;  %v912_v31 = vsub.f32 1.0, %v911_v48  ;;  %v699_v43 = vadd.f32 %v698_v29, %v697_v36  ;;  %v720_v41 = vadd.f32 %v719_v18, %v718_v28 }
 0x155   :  { %v824_v12 = vrot.slane %v823_v0, 1  ;;  %v886_v46 = vadd.f32 %v885_v52, %v884_v50  ;;  %v741_v45 = vadd.f32 %v740_v47, %v739_v39  ;;  %v845_v56 = vrot.slane %v844_v15, 1 }
 0x156   :  { %v905_v55 = vadd.f32 %v904_v54, %v903_v5  ;;  %v913_v27 = vmul.f32 %v982_v8, %v912_v31  ;;  %v762_v32 = vadd.f32 %v761_v10, %v760_v44  ;;  %v783_v30 = vadd.f32 %v782_v34, %v781_v35 }
 0x157   :  { %v866_v25 = vrot.slane %v865_v21, 1  ;;  %vm915_vm4 = vweird.f32 %v982_v8  ;;  %v804_v16 = vadd.f32 %v803_v3, %v802_v60  ;;  %v887_v38 = vrot.slane %v886_v46, 1 }
 0x158   :  { %v906_v9 = vrot.slane %v905_v55, 2  ;;  %v914_v49 = vadd.f32 %v982_v8, %v913_v27  ;;  %v825_v1 = vadd.f32 %v824_v12, %v823_v0  ;;  %v846_v17 = vadd.f32 %v845_v56, %v844_v15 }
 0x159   :  { %v867_v11 = vadd.f32 %v866_v25, %v865_v21  ;;  %v888_v59 = vadd.f32 %v887_v38, %v886_v46 }
 0x15a   :  { %v907_v26 = vadd.f32 %v906_v9, %v905_v55  ;;  %v916_v33 = vsel %vm915_vm4, %v982_v8, %v914_v49 }
 0x15b   :  { %v917_v36 = vmul.f32 %v916_v33, %v2644_v42  ;;  %v918_v63 = vmul.f32 %v916_v33, %v2673_v2  ;;  %v919_v28 = vmul.f32 %v916_v33, %v2686_v13  ;;  %v920_v53 = vmul.f32 %v916_v33, %v657_v40 }
 0x15c   :  { %v908_v6 = vrot.slane %v907_v26, 1  ;;  %v925_v23 = vmul.f32 %v916_v33, %v762_v32  ;;  %v926_v7 = vmul.f32 %v916_v33, %v783_v30  ;;  %v927_v61 = vmul.f32 %v916_v33, %v804_v16 }
 0x15d   :  { %v921_v39 = vmul.f32 %v916_v33, %v678_v19  ;;  %v928_v44 = vmul.f32 %v916_v33, %v825_v1  ;;  %v929_v22 = vmul.f32 %v916_v33, %v846_v17  ;;  %v922_v14 = vmul.f32 %v916_v33, %v699_v43 }
 0x15e   :  { %v909_v57 = vadd.f32 %v908_v6, %v907_v26  ;;  %v930_v35 = vmul.f32 %v916_v33, %v867_v11  ;;  %v950_v42 = vsel %vm949_vm5, %v918_v63, %v917_v36  ;;  %v963_v2 = vsel %vm949_vm5, %v926_v7, %v925_v23 }
 0x15f   :  { %v923_v62 = vmul.f32 %v916_v33, %v720_v41  ;;  %v931_v4 = vmul.f32 %v916_v33, %v888_v59  ;;  %v952_v58 = vsel %vm951_vm6, %v919_v28, %v950_v42  ;;  %v964_v13 = vsel %vm951_vm6, %v927_v61, %v963_v2 }
 0x160   :  { %v924_v37 = vmul.f32 %v916_v33, %v741_v45  ;;  %v932_v24 = vmul.f32 %v916_v33, %v909_v57  ;;  %v954_v40 = vsel %vm953_vm7, %v920_v53, %v952_v58  ;;  %v965_v51 = vsel %vm953_vm7, %v928_v44, %v964_v13 }
 0x161   :  { %v956_v60 = vsel %vm955_vm8, %v921_v39, %v954_v40  ;;  %v966_v20 = vsel %vm955_vm8, %v929_v22, %v965_v51 }
 0x162   :  { %v958_v8 = vsel %vm957_vm9, %v922_v14, %v956_v60  ;;  %v967_v29 = vsel %vm957_vm9, %v930_v35, %v966_v20 }
 0x163   :  { %v960_v18 = vsel %vm959_vm10, %v923_v62, %v958_v8  ;;  %v968_v0 = vsel %vm959_vm10, %v931_v4, %v967_v29 }
 0x164   :  { %v962_v50 = vsel %vm961_vm11, %v924_v37, %v960_v18  ;;  %v969_v47 = vsel %vm961_vm11, %v932_v24, %v968_v0 }
 0x165   :  { %972 = vst.msk [vmem:[%s2895_s5] sm:$0xff] %vm21_vm0, %v962_v50 }
 0x166   :  { %973 = vst.msk [vmem:[%s2895_s5 + $0x8] sm:$0xff] %vm21_vm0, %v969_v47 }

// kernel: fx_cosine_classifier_forward.9
= control target key start
LH: loop header
LB: loop body
LE: loop exit
PB: predicated region body
PF: predicated region fallthrough
CT: control target
= control target key end

     0   :  { %vm21_vm0 = vcmask 261120   ;;  %s198_s0 = inlined_call_operand.vmem [shape: f32[16,32], index: 0, kind: input, shape index: {}]   ;;  %s199_s1 = inlined_call_operand.vmem [shape: bf16[32,128], index: 1, kind: input, shape index: {}]   ;;  %s200_s2 = inlined_call_operand.<no memory space> [shape: f32[1], index: 2, kind: input, shape index: {}]   ;;  %s201_s3 = inlined_call_operand.hbm [shape: f32[16,128], index: 3, kind: output, shape index: {}]  }
   0x1   :  { %v17_v0 = vld [vmem:[%s198_s0] sm:$0xff] }
   0x2   :  { %9 = vsyncpa [#allocation4], 0  ;;  %v19_v1 = vmul.f32 %v17_v0, %v17_v0  ;;  %v18_v2 = vld [vmem:[%s198_s0 + $0x8] sm:$0xff]  ;;  %v119_v7 = vld [vmem:[%s199_s1] sm:$0xff]  ;;  %v87_v29 = vstv %s200_s2  ;;  %s154_s20 = smov [#allocation3]   ;;  %s98_s24 = sshll.u32 %s201_s3, 4  ;;  %s99_s24 = int_to_ptr.hbm [resolvable:$true] %s98_s24 }
   0x3   :  { %v20_v4 = vmul.f32 %v18_v2, %v18_v2  ;;  %v120_v6 = vld [vmem:[%s199_s1 + $0x8] sm:$0xff]  ;;  %s96_s21 = sshll.u32 %s154_s20, 4  ;;  %s155_s25 = smov 128   ;;  %s97_s21 = int_to_ptr.vmem [resolvable:$true] %s96_s21 }
   0x4   :  { %v22_v3 = vsel %vm21_vm0, %v19_v1, 0.0  ;;  %78 = vmatpush.bf16.msra.mxu0 %v120_v6  ;;  %s156_s26 = smov 8  }
   0x5   :  { %23 = vadd.xlane.f32.xlu0 %v22_v3  ;;  %v25_v5 = vsel %vm21_vm0, %v20_v4, 0.0 }
   0x8   :  { %79 = vmatpush.bf16.msra.mxu0 %v119_v7 }
   0xd   :  { %26 = vadd.xlane.f32.xlu0 %v25_v5 }
  0x78   :  { %v24_v8 = vpop.xlane.xlu0 %23 }
  0x79   :  { %v28_v9 = vmax.f32 %v24_v8, 1e-24 }
  0x7b   :  { %124 = vrsqrt.f32 %v28_v9  ;;  %vm36_vm2 = vweird.f32 %v28_v9 }
  0x80   :  { %v27_v10 = vpop.xlane.xlu0 %26 }
  0x81   :  { %v125_v11 = vpop.eup %124  ;;  %v29_v12 = vmax.f32 %v27_v10, 1e-24 }
  0x82   :  { %v31_v13 = vmul.f32 %v125_v11, %v28_v9  ;;  %vm37_vm1 = vweird.f32 %v125_v11 }
  0x83   :  { %126 = vrsqrt.f32 %v29_v12  ;;  %vm38_vm4 = vmor %vm36_vm2, %vm37_vm1  ;;  %vm46_vm5 = vweird.f32 %v29_v12 }
  0x84   :  { %v32_v14 = vmul.f32 %v125_v11, %v31_v13 }
  0x86   :  { %v33_v15 = vmul.f32 0.5, %v32_v14 }
  0x88   :  { %v34_v17 = vsub.f32 1.5, %v33_v15 }
  0x89   :  { %v127_v16 = vpop.eup %126 }
  0x8a   :  { %v41_v18 = vmul.f32 %v127_v16, %v29_v12  ;;  %v35_v20 = vmul.f32 %v125_v11, %v34_v17  ;;  %vm47_vm3 = vweird.f32 %v127_v16 }
  0x8b   :  { %vm48_vm6 = vmor %vm46_vm5, %vm47_vm3 }
  0x8c   :  { %v42_v19 = vmul.f32 %v127_v16, %v41_v18  ;;  %v39_v24 = vsel %vm38_vm4, %v125_v11, %v35_v20 }
  0x8d   :  { %v50_v26 = vmul.f32 %v39_v24, %v17_v0 }
  0x8e   :  { %v43_v21 = vmul.f32 0.5, %v42_v19 }
  0x90   :  { %v44_v22 = vsub.f32 1.5, %v43_v21 }
  0x92   :  { %v45_v23 = vmul.f32 %v127_v16, %v44_v22 }
  0x94   :  { %v49_v25 = vsel %vm48_vm6, %v127_v16, %v45_v23 }
  0x95   :  { %v51_v27 = vmul.f32 %v49_v25, %v18_v2 }
  0x97   :  { %v52_v28 = vpack.c.bf16 %v51_v27, %v50_v26 }
  0x99   :  { %118 = vmatmul.msk.bf16.vlgmr.msra.gmra.mxu0 %vm21_vm0, %v52_v28 }
 0x116   :  { %v81_v30 = vpop.f32.mrf.mxu0 }
 0x117   :  { %v88_v31 = vmul.f32 %v87_v29, %v81_v30 }
 0x119   :  { %90 = vst [vmem:[#allocation3] sm:$0xff] %v88_v31 }
 0x11e   :  { %v83_v32 = vpop.f32.mrf.mxu0 }
 0x11f   :  { %v89_v33 = vmul.f32 %v87_v29, %v83_v32 }
 0x121   :  { %91 = vst [vmem:[#allocation3 + $0x8] sm:$0xff] %v89_v33 }
 0x122   :  { %104 = dma.vmem_to_hbm [thread:$0]  %s97_s21, 256, %s99_s24, [#allocation4], %s155_s25, %s155_s25, %s156_s26  }
 0x123   :  { %152 = dma.done.wait [#allocation4], 256  }
 0x124   :  { %153 = vsyncadd [#allocation4], 4294967040 }
 0x125   :  { %109 = vsyncpa [#allocation4], 1 }

// kernel: fx_cosine_classifier_forward.7
= control target key start
LH: loop header
LB: loop body
LE: loop exit
PB: predicated region body
PF: predicated region fallthrough
CT: control target
= control target key end

     0   :  { %vm1382_vm0 = vcmask 261120   ;;  %s7114_s1 = inlined_call_operand.vmem [shape: bf16[288,32], index: 1, kind: input, shape index: {}]   ;;  %s7115_s0 = inlined_call_operand.vmem [shape: bf16[1024,288], index: 0, kind: input, shape index: {}]   ;;  %s7116_s2 = inlined_call_operand.vmem [shape: f32[1,32], index: 2, kind: input, shape index: {}]   ;;  %s7117_s3 = inlined_call_operand.vmem [shape: f32[1024,32], index: 3, kind: output, shape index: {0}]   ;;  %s7118_s4 = inlined_call_operand.vmem [shape: f32[8,32], index: 4, kind: output, shape index: {1}]   ;;  %s7119_s5 = inlined_call_operand.vmem [shape: f32[8,32], index: 5, kind: output, shape index: {2}]  }
   0x1   :  { %v4459_v0 = vld [vmem:[%s7114_s1 + $0x38] sm:$0xff]  ;;  %v4531_v2 = vld [vmem:[%s7114_s1 + $0x88] sm:$0xff]  ;;  %v4458_v3 = vld [vmem:[%s7114_s1 + $0x30] sm:$0xff] }
   0x2   :  { %v4467_v1 = vld [vmem:[%s7114_s1 + $0x78] sm:$0xff]  ;;  %1575 = vmatpush.bf16.msra.mxu0 %v4459_v0  ;;  %4470 = vmatpush.bf16.msra.mxu3 %v4459_v0  ;;  %v4466_v4 = vld [vmem:[%s7114_s1 + $0x70] sm:$0xff]  ;;  %v4543_v5 = vld [vmem:[%s7114_s1 + $0x80] sm:$0xff] }
   0x3   :  { %1904 = vmatpush.bf16.msra.mxu1 %v4467_v1  ;;  %2239 = vmatpush.bf16.msra.mxu2 %v4531_v2  ;;  %v3366_v6 = vld [vmem:[%s7115_s0 + $0x8] sm:$0xf]  ;;  %v4262_v7 = vld [vmem:[%s7115_s0 + $0x10] sm:$0xf0]  ;;  %v4456_v11 = vld [vmem:[%s7114_s1 + $0x20] sm:$0xff] }
   0x4   :  { %v3367_v8 = vor.u32 %v4262_v7, %v3366_v6  ;;  %v4457_v9 = vld [vmem:[%s7114_s1 + $0x28] sm:$0xff]  ;;  %v4464_v12 = vld [vmem:[%s7114_s1 + $0x60] sm:$0xff]  ;;  %v4455_v13 = vld [vmem:[%s7114_s1 + $0x18] sm:$0xff] }
   0x5   :  { %v4465_v10 = vld [vmem:[%s7114_s1 + $0x68] sm:$0xff]  ;;  %v4463_v14 = vld [vmem:[%s7114_s1 + $0x58] sm:$0xff]  ;;  %v4454_v15 = vld [vmem:[%s7114_s1 + $0x10] sm:$0xff] }
   0x6   :  { %1576 = vmatpush.bf16.msra.mxu0 %v4458_v3  ;;  %4471 = vmatpush.bf16.msra.mxu3 %v4458_v3  ;;  %v4462_v16 = vld [vmem:[%s7114_s1 + $0x50] sm:$0xff]  ;;  %v3378_v17 = vld [vmem:[%s7115_s0 + $0x20] sm:$0xf]  ;;  %v4265_v18 = vld [vmem:[%s7115_s0 + $0x28] sm:$0xf0] }
   0x7   :  { %1905 = vmatpush.bf16.msra.mxu1 %v4466_v4  ;;  %2240 = vmatpush.bf16.msra.mxu2 %v4543_v5  ;;  %v3379_v19 = vor.u32 %v4265_v18, %v3378_v17  ;;  %v4453_v20 = vld [vmem:[%s7114_s1 + $0x8] sm:$0xff]  ;;  %v4452_v22 = vld [vmem:[%s7114_s1] sm:$0xff]  ;;  %v3360_v29 = vld [vmem:[%s7115_s0 + $0xc] sm:$0xf0] }
   0x8   :  { %v4461_v21 = vld [vmem:[%s7114_s1 + $0x48] sm:$0xff]  ;;  %v4460_v23 = vld [vmem:[%s7114_s1 + $0x40] sm:$0xff]  ;;  %v3390_v33 = vld [vmem:[%s7115_s0 + $0x38] sm:$0xf] }
   0x9   :  { %v3358_v24 = vld [vmem:[%s7115_s0] sm:$0xf]  ;;  %v4261_v25 = vld [vmem:[%s7115_s0 + $0x8] sm:$0xf0]  ;;  %v4260_v28 = vld [vmem:[%s7115_s0 + $0x4] sm:$0xf] }
   0xa   :  { %4196 = vmatmul.msk.bf16.vlgmr.msra.gmra.mxu2 %vm1382_vm0, %v3367_v8  ;;  %1577 = vmatpush.bf16.msra.mxu0 %v4457_v9  ;;  %v3934_v26 = vld [vmem:[%s7115_s0 + $0x480] sm:$0xf]  ;;  %v4405_v27 = vld [vmem:[%s7115_s0 + $0x488] sm:$0xf0]  ;;  %v3359_v30 = vor.u32 %v4261_v25, %v3358_v24  ;;  %v3363_v32 = vor.u32 %v4260_v28, %v3360_v29  ;;  %v4268_v34 = vld [vmem:[%s7115_s0 + $0x40] sm:$0xf0] }
   0xb   :  { %4472 = vmatpush.bf16.msra.mxu3 %v4457_v9  ;;  %1906 = vmatpush.bf16.msra.mxu1 %v4465_v10  ;;  %v3935_v31 = vor.u32 %v4405_v27, %v3934_v26  ;;  %v3391_v35 = vor.u32 %v4268_v34, %v3390_v33  ;;  %v3370_v36 = vld [vmem:[%s7115_s0 + $0x18] sm:$0xf]  ;;  %v4264_v37 = vld [vmem:[%s7115_s0 + $0x20] sm:$0xf0]  ;;  %v4263_v40 = vld [vmem:[%s7115_s0 + $0x1c] sm:$0xf] }
   0xc   :  { %v3946_v38 = vld [vmem:[%s7115_s0 + $0x498] sm:$0xf]  ;;  %v4408_v39 = vld [vmem:[%s7115_s0 + $0x4a0] sm:$0xf0]  ;;  %v3372_v41 = vld [vmem:[%s7115_s0 + $0x24] sm:$0xf0]  ;;  %v3371_v42 = vor.u32 %v4264_v37, %v3370_v36 }
   0xd   :  { %v3947_v43 = vor.u32 %v4408_v39, %v3946_v38  ;;  %v3375_v44 = vor.u32 %v4263_v40, %v3372_v41  ;;  %v3402_v45 = vld [vmem:[%s7115_s0 + $0x50] sm:$0xf]  ;;  %v4271_v46 = vld [vmem:[%s7115_s0 + $0x58] sm:$0xf0]  ;;  %v4266_v52 = vld [vmem:[%s7115_s0 + $0x34] sm:$0xf] }
   0xe   :  { %1578 = vmatpush.bf16.msra.mxu0 %v4456_v11  ;;  %v3403_v47 = vor.u32 %v4271_v46, %v3402_v45  ;;  %v3382_v48 = vld [vmem:[%s7115_s0 + $0x30] sm:$0xf]  ;;  %v4267_v49 = vld [vmem:[%s7115_s0 + $0x38] sm:$0xf0]  ;;  %v3384_v53 = vld [vmem:[%s7115_s0 + $0x3c] sm:$0xf0] }
   0xf   :  { %4473 = vmatpush.bf16.msra.mxu3 %v4456_v11  ;;  %1907 = vmatpush.bf16.msra.mxu1 %v4464_v12  ;;  %v3958_v50 = vld [vmem:[%s7115_s0 + $0x4b0] sm:$0xf]  ;;  %v4411_v51 = vld [vmem:[%s7115_s0 + $0x4b8] sm:$0xf0]  ;;  %v3383_v54 = vor.u32 %v4267_v49, %v3382_v48  ;;  %v3387_v56 = vor.u32 %v4266_v52, %v3384_v53  ;;  %v3414_v57 = vld [vmem:[%s7115_s0 + $0x68] sm:$0xf] }
  0x10   :  { %v3959_v55 = vor.u32 %v4411_v51, %v3958_v50  ;;  %v4274_v58 = vld [vmem:[%s7115_s0 + $0x70] sm:$0xf0]  ;;  %v3394_v60 = vld [vmem:[%s7115_s0 + $0x48] sm:$0xf]  ;;  %v4269_v0 = vld [vmem:[%s7115_s0 + $0x4c] sm:$0xf] }
  0x11   :  { %v3415_v59 = vor.u32 %v4274_v58, %v3414_v57  ;;  %v4270_v61 = vld [vmem:[%s7115_s0 + $0x50] sm:$0xf0]  ;;  %v3970_v62 = vld [vmem:[%s7115_s0 + $0x4c8] sm:$0xf]  ;;  %v4277_v6 = vld [vmem:[%s7115_s0 + $0x88] sm:$0xf0] }
  0x12   :  { %1579 = vmatpush.bf16.msra.mxu0 %v4455_v13  ;;  %v4414_v63 = vld [vmem:[%s7115_s0 + $0x4d0] sm:$0xf0]  ;;  %v3406_v8 = vld [vmem:[%s7115_s0 + $0x60] sm:$0xf]  ;;  %v4273_v9 = vld [vmem:[%s7115_s0 + $0x68] sm:$0xf0] }
  0x13   :  { %4474 = vmatpush.bf16.msra.mxu3 %v4455_v13  ;;  %1908 = vmatpush.bf16.msra.mxu1 %v4463_v14  ;;  %v3971_v3 = vor.u32 %v4414_v63, %v3970_v62  ;;  %v4417_v11 = vld [vmem:[%s7115_s0 + $0x4e8] sm:$0xf0]  ;;  %v3408_v13 = vld [vmem:[%s7115_s0 + $0x6c] sm:$0xf0]  ;;  %v3438_v17 = vld [vmem:[%s7115_s0 + $0x98] sm:$0xf] }
  0x14   :  { %v4280_v18 = vld [vmem:[%s7115_s0 + $0xa0] sm:$0xf0]  ;;  %v4275_v24 = vld [vmem:[%s7115_s0 + $0x7c] sm:$0xf]  ;;  %v3420_v25 = vld [vmem:[%s7115_s0 + $0x84] sm:$0xf0] }
  0x15   :  { %v3423_v28 = vor.u32 %v4275_v24, %v3420_v25  ;;  %v3450_v29 = vld [vmem:[%s7115_s0 + $0xb0] sm:$0xf]  ;;  %v4279_v33 = vld [vmem:[%s7115_s0 + $0x98] sm:$0xf0]  ;;  %v4278_v36 = vld [vmem:[%s7115_s0 + $0x94] sm:$0xf] }
  0x16   :  { %1580 = vmatpush.bf16.msra.mxu0 %v4454_v15  ;;  %v4006_v34 = vld [vmem:[%s7115_s0 + $0x510] sm:$0xf]  ;;  %v3432_v37 = vld [vmem:[%s7115_s0 + $0x9c] sm:$0xf0]  ;;  %v3462_v41 = vld [vmem:[%s7115_s0 + $0xc8] sm:$0xf] }
  0x17   :  { %4475 = vmatpush.bf16.msra.mxu3 %v4454_v15  ;;  %1909 = vmatpush.bf16.msra.mxu1 %v4462_v16  ;;  %v3435_v40 = vor.u32 %v4278_v36, %v3432_v37  ;;  %v4282_v45 = vld [vmem:[%s7115_s0 + $0xb0] sm:$0xf0]  ;;  %v4018_v46 = vld [vmem:[%s7115_s0 + $0x528] sm:$0xf]  ;;  %v4281_v48 = vld [vmem:[%s7115_s0 + $0xac] sm:$0xf] }
  0x18   :  { %v3444_v49 = vld [vmem:[%s7115_s0 + $0xb4] sm:$0xf0]  ;;  %v4800_v58 = vld [vmem:[%s7116_s2] ss:$0 sm:$0xff]  ;;  %v4429_v62 = vld [vmem:[%s7115_s0 + $0x548] sm:$0xf0] }
  0x19   :  { %v3447_v53 = vor.u32 %v4281_v48, %v3444_v49  ;;  %v4284_v63 = vld [vmem:[%s7115_s0 + $0xc4] sm:$0xf]  ;;  %v4287_v25 = vld [vmem:[%s7115_s0 + $0xdc] sm:$0xf] }
  0x1a   :  { %4197 = vmatmul.msk.bf16.gmra.mxu2 %vm1382_vm0, %v3379_v19  ;;  %1581 = vmatpush.bf16.msra.mxu0 %v4453_v20  ;;  %v3439_v19 = vor.u32 %v4280_v18, %v3438_v17  ;;  %v4432_v24 = vld [vmem:[%s7115_s0 + $0x560] sm:$0xf0] }
  0x1b   :  { %4476 = vmatpush.bf16.msra.mxu3 %v4453_v20  ;;  %1910 = vmatpush.bf16.msra.mxu1 %v4461_v21  ;;  %v3418_v20 = vld [vmem:[%s7115_s0 + $0x78] sm:$0xf] }
  0x1e   :  { %1582 = vmatpush.bf16.msra.mxu0 %v4452_v22 }
  0x1f   :  { %4477 = vmatpush.bf16.msra.mxu3 %v4452_v22  ;;  %1911 = vmatpush.bf16.msra.mxu1 %v4460_v23  ;;  %v3994_v22 = vld [vmem:[%s7115_s0 + $0x4f8] sm:$0xf] }
  0x21   :  { %1583 = vmatmul.bf16.vlgmr.msra.gmra.mxu0 %v3359_v30  ;;  %v4283_v30 = vld [vmem:[%s7115_s0 + $0xb8] sm:$0xf0] }
  0x22   :  { %1823 = vmatmul.bf16.vlgmr.msra.gmra.mxu3 %v3935_v31  ;;  %1912 = vmatmul.bf16.vlgmr.msra.gmra.mxu1 %v3363_v32  ;;  %v3451_v31 = vor.u32 %v4283_v30, %v3450_v29  ;;  %v3430_v32 = vld [vmem:[%s7115_s0 + $0x90] sm:$0xf] }
  0x23   :  { %4478 = vmatpush.bf16.msrb.mxu3 %v4467_v1  ;;  %v3396_v1 = vld [vmem:[%s7115_s0 + $0x54] sm:$0xf0]  ;;  %v3431_v38 = vor.u32 %v4279_v33, %v3430_v32 }
  0x27   :  { %4479 = vmatpush.bf16.msrb.mxu3 %v4466_v4  ;;  %v3399_v4 = vor.u32 %v4269_v0, %v3396_v1  ;;  %v3456_v0 = vld [vmem:[%s7115_s0 + $0xcc] sm:$0xf0] }
  0x2a   :  { %4198 = vmatmul.msk.bf16.gmra.mxu2 %vm1382_vm0, %v3391_v35  ;;  %v4423_v35 = vld [vmem:[%s7115_s0 + $0x518] sm:$0xf0] }
  0x2b   :  { %4480 = vmatpush.bf16.msrb.mxu3 %v4465_v10  ;;  %v3982_v10 = vld [vmem:[%s7115_s0 + $0x4e0] sm:$0xf]  ;;  %v4007_v39 = vor.u32 %v4423_v35, %v4006_v34 }
  0x2c   :  { %v3983_v15 = vor.u32 %v4417_v11, %v3982_v10  ;;  %v3486_v10 = vld [vmem:[%s7115_s0 + $0xf8] sm:$0xf]  ;;  %v4292_v11 = vld [vmem:[%s7115_s0 + $0x100] sm:$0xf0] }
  0x2f   :  { %4481 = vmatpush.bf16.msrb.mxu3 %v4464_v12  ;;  %v4272_v12 = vld [vmem:[%s7115_s0 + $0x64] sm:$0xf] }
  0x31   :  { %1588 = vmatmul.bf16.gmra.mxu0 %v3371_v42  ;;  %v4286_v42 = vld [vmem:[%s7115_s0 + $0xd0] sm:$0xf0] }
  0x32   :  { %1828 = vmatmul.bf16.gmra.mxu3 %v3947_v43  ;;  %1917 = vmatmul.bf16.gmra.mxu1 %v3375_v44  ;;  %v3463_v43 = vor.u32 %v4286_v42, %v3462_v41  ;;  %v3442_v44 = vld [vmem:[%s7115_s0 + $0xa8] sm:$0xf] }
  0x33   :  { %4482 = vmatpush.bf16.msrb.mxu3 %v4463_v14  ;;  %v3407_v14 = vor.u32 %v4273_v9, %v3406_v8  ;;  %v3443_v51 = vor.u32 %v4282_v45, %v3442_v44  ;;  %v3498_v44 = vld [vmem:[%s7115_s0 + $0x110] sm:$0xf]  ;;  %v4295_v45 = vld [vmem:[%s7115_s0 + $0x118] sm:$0xf0] }
  0x37   :  { %4483 = vmatpush.bf16.msrb.mxu3 %v4462_v16  ;;  %v3411_v16 = vor.u32 %v4272_v12, %v3408_v13 }
  0x3a   :  { %4199 = vmatmul.msk.bf16.gmra.mxu2 %vm1382_vm0, %v3403_v47  ;;  %v4426_v47 = vld [vmem:[%s7115_s0 + $0x530] sm:$0xf0] }
  0x3b   :  { %4484 = vmatpush.bf16.msrb.mxu3 %v4461_v21  ;;  %v4276_v21 = vld [vmem:[%s7115_s0 + $0x80] sm:$0xf0]  ;;  %v4019_v52 = vor.u32 %v4426_v47, %v4018_v46 }
  0x3c   :  { %v3419_v26 = vor.u32 %v4276_v21, %v3418_v20  ;;  %v4288_v20 = vld [vmem:[%s7115_s0 + $0xe0] sm:$0xf0]  ;;  %v4042_v21 = vld [vmem:[%s7115_s0 + $0x558] sm:$0xf] }
  0x3d   :  { %v4043_v35 = vor.u32 %v4432_v24, %v4042_v21 }
  0x3f   :  { %4485 = vmatpush.bf16.msrb.mxu3 %v4460_v23  ;;  %v4420_v23 = vld [vmem:[%s7115_s0 + $0x500] sm:$0xf0] }
  0x40   :  { %v3995_v27 = vor.u32 %v4420_v23, %v3994_v22 }
  0x41   :  { %1593 = vmatmul.bf16.gmra.mxu0 %v3383_v54  ;;  %v3474_v54 = vld [vmem:[%s7115_s0 + $0xe0] sm:$0xf] }
  0x42   :  { %1833 = vmatmul.bf16.gmra.mxu3 %v3959_v55  ;;  %1922 = vmatmul.bf16.gmra.mxu1 %v3387_v56  ;;  %v4289_v55 = vld [vmem:[%s7115_s0 + $0xe8] sm:$0xf0] }
  0x43   :  { %4486 = vmatpush.bf16.msra.mxu3 %v4531_v2  ;;  %v3395_v2 = vor.u32 %v4270_v61, %v3394_v60  ;;  %v3475_v57 = vor.u32 %v4289_v55, %v3474_v54  ;;  %v4285_v60 = vld [vmem:[%s7115_s0 + $0xc8] sm:$0xf0]  ;;  %v4030_v61 = vld [vmem:[%s7115_s0 + $0x540] sm:$0xf] }
  0x47   :  { %4487 = vmatpush.bf16.msra.mxu3 %v4543_v5  ;;  %v3426_v5 = vld [vmem:[%s7115_s0 + $0x80] sm:$0xf] }
  0x48   :  { %v3427_v7 = vor.u32 %v4277_v6, %v3426_v5  ;;  %v3459_v5 = vor.u32 %v4284_v63, %v3456_v0  ;;  %v4435_v63 = vld [vmem:[%s7115_s0 + $0x578] sm:$0xf0]  ;;  %v4290_v0 = vld [vmem:[%s7115_s0 + $0xf4] sm:$0xf] }
  0x4a   :  { %4200 = vmatmul.msk.bf16.gmra.mxu2 %vm1382_vm0, %v3415_v59  ;;  %v3454_v59 = vld [vmem:[%s7115_s0 + $0xc0] sm:$0xf] }
  0x51   :  { %1598 = vmatmul.bf16.gmra.mxu0 %v3395_v2  ;;  %v3455_v2 = vor.u32 %v4285_v60, %v3454_v59  ;;  %v3478_v59 = vld [vmem:[%s7115_s0 + $0xf0] sm:$0xf]  ;;  %v4291_v60 = vld [vmem:[%s7115_s0 + $0xf8] sm:$0xf0] }
  0x52   :  { %1838 = vmatmul.bf16.gmra.mxu3 %v3971_v3  ;;  %1927 = vmatmul.bf16.gmra.mxu1 %v3399_v4  ;;  %v4031_v4 = vor.u32 %v4429_v62, %v4030_v61  ;;  %v4054_v61 = vld [vmem:[%s7115_s0 + $0x570] sm:$0xf] }
  0x5a   :  { %4201 = vmatmul.msk.bf16.gmra.mxu2 %vm1382_vm0, %v3427_v7 }
  0x61   :  { %1603 = vmatmul.bf16.gmra.mxu0 %v3407_v14 }
  0x62   :  { %1843 = vmatmul.bf16.gmra.mxu3 %v3983_v15  ;;  %1932 = vmatmul.bf16.gmra.mxu1 %v3411_v16  ;;  %v3487_v15 = vor.u32 %v4292_v11, %v3486_v10 }
  0x6a   :  { %4202 = vmatmul.msk.bf16.gmra.mxu2 %vm1382_vm0, %v3439_v19  ;;  %v3466_v19 = vld [vmem:[%s7115_s0 + $0xd8] sm:$0xf] }
  0x6b   :  { %v3467_v32 = vor.u32 %v4288_v20, %v3466_v19  ;;  %v4298_v19 = vld [vmem:[%s7115_s0 + $0x130] sm:$0xf0] }
  0x71   :  { %1608 = vmatmul.bf16.gmra.mxu0 %v3419_v26  ;;  %v3468_v26 = vld [vmem:[%s7115_s0 + $0xe4] sm:$0xf0] }
  0x72   :  { %1848 = vmatmul.bf16.gmra.mxu3 %v3995_v27  ;;  %1937 = vmatmul.bf16.gmra.mxu1 %v3423_v28  ;;  %v3471_v36 = vor.u32 %v4287_v25, %v3468_v26 }
  0x7a   :  { %4203 = vmatmul.msk.bf16.gmra.mxu2 %vm1382_vm0, %v3451_v31 }
  0x81   :  { %1613 = vmatmul.bf16.gmra.mxu0 %v3431_v38 }
  0x82   :  { %1853 = vmatmul.bf16.gmra.mxu3 %v4007_v39  ;;  %1942 = vmatmul.bf16.gmra.mxu1 %v3435_v40 }
  0x8a   :  { %4204 = vmatmul.msk.bf16.gmra.mxu2 %vm1382_vm0, %v3463_v43 }
  0x8d   :  { %v2242_v50 = vpop.f32.mrf.mxu2 }
  0x91   :  { %1618 = vmatmul.bf16.gmra.mxu0 %v3443_v51 }
  0x92   :  { %1858 = vmatmul.bf16.gmra.mxu3 %v4019_v52  ;;  %1947 = vmatmul.bf16.gmra.mxu1 %v3447_v53  ;;  %v3499_v52 = vor.u32 %v4295_v45, %v3498_v44 }
  0x95   :  { %v2244_v56 = vpop.f32.mrf.mxu2 }
  0x9a   :  { %4205 = vmatmul.msk.bf16.gmra.mxu2 %vm1382_vm0, %v3475_v57 }
  0x9d   :  { %v2247_v1 = vpop.f32.mrf.mxu2 }
  0x9e   :  { %v1584_v3 = vpop.f32.mrf.mxu0 }
  0x9f   :  { %v1585_v6 = vadd.f32 %v4800_v58, %v1584_v3  ;;  %v1913_v7 = vpop.f32.mrf.mxu1 }
  0xa1   :  { %v1914_v8 = vadd.f32 %v1913_v7, %v1585_v6  ;;  %1623 = vmatmul.bf16.gmra.mxu0 %v3455_v2  ;;  %v3479_v6 = vor.u32 %v4291_v60, %v3478_v59 }
  0xa2   :  { %1863 = vmatmul.bf16.gmra.mxu3 %v4031_v4  ;;  %1952 = vmatmul.bf16.gmra.mxu1 %v3459_v5 }
  0xa3   :  { %v2243_v9 = vadd.f32 %v2242_v50, %v1914_v8 }
  0xa5   :  { %2562 = vst.msk [vmem:[%s7117_s3] sm:$0xff] %vm1382_vm0, %v2243_v9  ;;  %v4832_v12 = vpop.f32.mrf.mxu3  ;;  %v2249_v13 = vpop.f32.mrf.mxu2  ;;  %v2952_v22 = vmul.f32 %v2243_v9, %v2243_v9  ;;  %v2690_v27 = vsel %vm1382_vm0, %v2243_v9, 0.0  ;;  %v4055_v9 = vor.u32 %v4435_v63, %v4054_v61 }
  0xa6   :  { %v1586_v14 = vpop.f32.mrf.mxu0 }
  0xa7   :  { %v1587_v16 = vadd.f32 %v4800_v58, %v1586_v14  ;;  %v1915_v17 = vpop.f32.mrf.mxu1  ;;  %v3080_v37 = vsel %vm1382_vm0, %v2952_v22, 0.0 }
  0xa9   :  { %v1916_v18 = vadd.f32 %v1915_v17, %v1587_v16 }
  0xaa   :  { %4206 = vmatmul.msk.bf16.gmra.mxu2 %vm1382_vm0, %v3487_v15 }
  0xab   :  { %v2245_v23 = vadd.f32 %v2244_v56, %v1916_v18  ;;  %v3510_v18 = vld [vmem:[%s7115_s0 + $0x128] sm:$0xf] }
  0xac   :  { %v3511_v26 = vor.u32 %v4298_v19, %v3510_v18 }
  0xad   :  { %2563 = vst.msk [vmem:[%s7117_s3 + $0x8] sm:$0xff] %vm1382_vm0, %v2245_v23  ;;  %v2691_v28 = vsel %vm1382_vm0, %v2245_v23, 0.0  ;;  %v2953_v29 = vmul.f32 %v2245_v23, %v2245_v23  ;;  %v4860_v30 = vpop.f32.mrf.mxu3  ;;  %v2252_v31 = vpop.f32.mrf.mxu2 }
  0xae   :  { %v2692_v33 = vadd.f32 %v2691_v28, %v2690_v27  ;;  %v1589_v34 = vpop.f32.mrf.mxu0 }
  0xaf   :  { %v3081_v38 = vsel %vm1382_vm0, %v2953_v29, 0.0  ;;  %v1590_v39 = vadd.f32 %v4800_v58, %v1589_v34  ;;  %v1918_v40 = vpop.f32.mrf.mxu1  ;;  %v4294_v34 = vld [vmem:[%s7115_s0 + $0x110] sm:$0xf0] }
  0xb0   :  { %v3082_v41 = vadd.f32 %v3081_v38, %v3080_v37  ;;  %v4438_v37 = vld [vmem:[%s7115_s0 + $0x590] sm:$0xf0]  ;;  %v4293_v38 = vld [vmem:[%s7115_s0 + $0x10c] sm:$0xf] }
  0xb1   :  { %v1919_v42 = vadd.f32 %v1918_v40, %v1590_v39  ;;  %1628 = vmatmul.bf16.gmra.mxu0 %v3467_v32  ;;  %v3492_v39 = vld [vmem:[%s7115_s0 + $0x114] sm:$0xf0] }
  0xb2   :  { %1868 = vmatmul.bf16.gmra.mxu3 %v4043_v35  ;;  %1957 = vmatmul.bf16.gmra.mxu1 %v3471_v36  ;;  %v4066_v35 = vld [vmem:[%s7115_s0 + $0x588] sm:$0xf] }
  0xb3   :  { %v2248_v43 = vadd.f32 %v2247_v1, %v1919_v42  ;;  %v3480_v1 = vld [vmem:[%s7115_s0 + $0xfc] sm:$0xf0] }
  0xb4   :  { %v3483_v10 = vor.u32 %v4290_v0, %v3480_v1 }
  0xb5   :  { %2564 = vst.msk [vmem:[%s7117_s3 + $0x10] sm:$0xff] %vm1382_vm0, %v2248_v43  ;;  %v2693_v46 = vsel %vm1382_vm0, %v2248_v43, 0.0  ;;  %v2954_v47 = vmul.f32 %v2248_v43, %v2248_v43  ;;  %v4876_v48 = vpop.f32.mrf.mxu3  ;;  %v2254_v49 = vpop.f32.mrf.mxu2 }
  0xb6   :  { %v2694_v50 = vadd.f32 %v2693_v46, %v2692_v33  ;;  %v1591_v51 = vpop.f32.mrf.mxu0  ;;  %v3490_v33 = vld [vmem:[%s7115_s0 + $0x108] sm:$0xf] }
  0xb7   :  { %v3083_v53 = vsel %vm1382_vm0, %v2954_v47, 0.0  ;;  %v1592_v54 = vadd.f32 %v4800_v58, %v1591_v51  ;;  %v1920_v55 = vpop.f32.mrf.mxu1  ;;  %v3491_v44 = vor.u32 %v4294_v34, %v3490_v33  ;;  %v4067_v47 = vor.u32 %v4438_v37, %v4066_v35  ;;  %v3534_v33 = vld [vmem:[%s7115_s0 + $0x158] sm:$0xf]  ;;  %v4304_v34 = vld [vmem:[%s7115_s0 + $0x160] sm:$0xf0] }
  0xb8   :  { %v3084_v56 = vadd.f32 %v3083_v53, %v3082_v41 }
  0xb9   :  { %v1921_v57 = vadd.f32 %v1920_v55, %v1592_v54 }
  0xba   :  { %4207 = vmatmul.msk.bf16.gmra.mxu2 %vm1382_vm0, %v3499_v52 }
  0xbb   :  { %v2250_v62 = vadd.f32 %v2249_v13, %v1921_v57  ;;  %v4301_v57 = vld [vmem:[%s7115_s0 + $0x148] sm:$0xf0] }
  0xbd   :  { %2565 = vst.msk [vmem:[%s7117_s3 + $0x18] sm:$0xff] %vm1382_vm0, %v2250_v62  ;;  %v2695_v2 = vsel %vm1382_vm0, %v2250_v62, 0.0  ;;  %v2955_v3 = vmul.f32 %v2250_v62, %v2250_v62  ;;  %v4904_v4 = vpop.f32.mrf.mxu3  ;;  %v2257_v5 = vpop.f32.mrf.mxu2 }
  0xbe   :  { %v2696_v7 = vadd.f32 %v2695_v2, %v2694_v50  ;;  %v1594_v8 = vpop.f32.mrf.mxu0 }
  0xbf   :  { %v3085_v11 = vsel %vm1382_vm0, %v2955_v3, 0.0  ;;  %v1595_v13 = vadd.f32 %v4800_v58, %v1594_v8  ;;  %v1923_v14 = vpop.f32.mrf.mxu1  ;;  %v3502_v8 = vld [vmem:[%s7115_s0 + $0x120] sm:$0xf] }
  0xc0   :  { %v3086_v15 = vadd.f32 %v3085_v11, %v3084_v56  ;;  %v3522_v56 = vld [vmem:[%s7115_s0 + $0x140] sm:$0xf] }
  0xc1   :  { %v1924_v16 = vadd.f32 %v1923_v14, %v1595_v13  ;;  %1633 = vmatmul.bf16.gmra.mxu0 %v3479_v6  ;;  %v3523_v1 = vor.u32 %v4301_v57, %v3522_v56  ;;  %v4441_v13 = vld [vmem:[%s7115_s0 + $0x5a8] sm:$0xf0]  ;;  %v4296_v14 = vld [vmem:[%s7115_s0 + $0x124] sm:$0xf] }
  0xc2   :  { %1873 = vmatmul.bf16.gmra.mxu3 %v4055_v9  ;;  %1962 = vmatmul.bf16.gmra.mxu1 %v3483_v10  ;;  %v4297_v9 = vld [vmem:[%s7115_s0 + $0x128] sm:$0xf0]  ;;  %v4078_v10 = vld [vmem:[%s7115_s0 + $0x5a0] sm:$0xf] }
  0xc3   :  { %v2253_v17 = vadd.f32 %v2252_v31, %v1924_v16 }
  0xc5   :  { %2566 = vst.msk [vmem:[%s7117_s3 + $0x20] sm:$0xff] %vm1382_vm0, %v2253_v17  ;;  %v2697_v20 = vsel %vm1382_vm0, %v2253_v17, 0.0  ;;  %v2956_v21 = vmul.f32 %v2253_v17, %v2253_v17  ;;  %v4919_v22 = vpop.f32.mrf.mxu3  ;;  %v2259_v23 = vpop.f32.mrf.mxu2 }
  0xc6   :  { %v2698_v24 = vadd.f32 %v2697_v20, %v2696_v7  ;;  %v1596_v25 = vpop.f32.mrf.mxu0  ;;  %v3503_v20 = vor.u32 %v4297_v9, %v3502_v8 }
  0xc7   :  { %v3087_v27 = vsel %vm1382_vm0, %v2956_v21, 0.0  ;;  %v1597_v28 = vadd.f32 %v4800_v58, %v1596_v25  ;;  %v1925_v29 = vpop.f32.mrf.mxu1 }
  0xc8   :  { %v3088_v31 = vadd.f32 %v3087_v27, %v3086_v15  ;;  %v3504_v15 = vld [vmem:[%s7115_s0 + $0x12c] sm:$0xf0] }
  0xc9   :  { %v1926_v32 = vadd.f32 %v1925_v29, %v1597_v28  ;;  %v3507_v25 = vor.u32 %v4296_v14, %v3504_v15 }
  0xca   :  { %4208 = vmatmul.msk.bf16.gmra.mxu2 %vm1382_vm0, %v3511_v26 }
  0xcb   :  { %v2255_v36 = vadd.f32 %v2254_v49, %v1926_v32  ;;  %v3495_v49 = vor.u32 %v4293_v38, %v3492_v39 }
  0xcd   :  { %2567 = vst.msk [vmem:[%s7117_s3 + $0x28] sm:$0xff] %vm1382_vm0, %v2255_v36  ;;  %v2699_v40 = vsel %vm1382_vm0, %v2255_v36, 0.0  ;;  %v2957_v41 = vmul.f32 %v2255_v36, %v2255_v36  ;;  %v4947_v42 = vpop.f32.mrf.mxu3  ;;  %v2262_v43 = vpop.f32.mrf.mxu2 }
  0xce   :  { %v2700_v45 = vadd.f32 %v2699_v40, %v2698_v24  ;;  %v1599_v46 = vpop.f32.mrf.mxu0  ;;  %v4079_v24 = vor.u32 %v4441_v13, %v4078_v10  ;;  %v3546_v10 = vld [vmem:[%s7115_s0 + $0x170] sm:$0xf] }
  0xcf   :  { %v3089_v50 = vsel %vm1382_vm0, %v2957_v41, 0.0  ;;  %v1600_v51 = vadd.f32 %v4800_v58, %v1599_v46  ;;  %v1928_v52 = vpop.f32.mrf.mxu1  ;;  %v3535_v41 = vor.u32 %v4304_v34, %v3534_v33  ;;  %v4302_v33 = vld [vmem:[%s7115_s0 + $0x154] sm:$0xf]  ;;  %v3528_v34 = vld [vmem:[%s7115_s0 + $0x15c] sm:$0xf0] }
  0xd0   :  { %v3090_v53 = vadd.f32 %v3089_v50, %v3088_v31  ;;  %v4300_v50 = vld [vmem:[%s7115_s0 + $0x140] sm:$0xf0] }
  0xd1   :  { %v1929_v54 = vadd.f32 %v1928_v52, %v1600_v51  ;;  %1638 = vmatmul.bf16.gmra.mxu0 %v3491_v44  ;;  %v4090_v51 = vld [vmem:[%s7115_s0 + $0x5b8] sm:$0xf] }
  0xd2   :  { %1878 = vmatmul.bf16.gmra.mxu3 %v4067_v47  ;;  %1967 = vmatmul.bf16.gmra.mxu1 %v3495_v49  ;;  %v3514_v49 = vld [vmem:[%s7115_s0 + $0x138] sm:$0xf] }
  0xd3   :  { %v2258_v55 = vadd.f32 %v2257_v5, %v1929_v54  ;;  %v4299_v54 = vld [vmem:[%s7115_s0 + $0x13c] sm:$0xf] }
  0xd5   :  { %2568 = vst.msk [vmem:[%s7117_s3 + $0x30] sm:$0xff] %vm1382_vm0, %v2258_v55  ;;  %v2701_v59 = vsel %vm1382_vm0, %v2258_v55, 0.0  ;;  %v2958_v60 = vmul.f32 %v2258_v55, %v2258_v55  ;;  %v4962_v61 = vpop.f32.mrf.mxu3  ;;  %v2264_v62 = vpop.f32.mrf.mxu2  ;;  %v3516_v55 = vld [vmem:[%s7115_s0 + $0x144] sm:$0xf0] }
  0xd6   :  { %v2702_v63 = vadd.f32 %v2701_v59, %v2700_v45  ;;  %v1601_v0 = vpop.f32.mrf.mxu0 }
  0xd7   :  { %v3091_v2 = vsel %vm1382_vm0, %v2958_v60, 0.0  ;;  %v1602_v3 = vadd.f32 %v4800_v58, %v1601_v0  ;;  %v1930_v5 = vpop.f32.mrf.mxu1 }
  0xd8   :  { %v3092_v6 = vadd.f32 %v3091_v2, %v3090_v53  ;;  %v4444_v53 = vld [vmem:[%s7115_s0 + $0x5c0] sm:$0xf0]  ;;  %v3519_v2 = vor.u32 %v4299_v54, %v3516_v55  ;;  %v4310_v54 = vld [vmem:[%s7115_s0 + $0x190] sm:$0xf0] }
  0xd9   :  { %v1931_v7 = vadd.f32 %v1930_v5, %v1602_v3 }
  0xda   :  { %4209 = vmatmul.msk.bf16.gmra.mxu2 %vm1382_vm0, %v3523_v1  ;;  %v4091_v1 = vor.u32 %v4444_v53, %v4090_v51  ;;  %v3558_v53 = vld [vmem:[%s7115_s0 + $0x188] sm:$0xf] }
  0xdb   :  { %v2260_v11 = vadd.f32 %v2259_v23, %v1931_v7 }
  0xdd   :  { %2569 = vst.msk [vmem:[%s7117_s3 + $0x38] sm:$0xff] %vm1382_vm0, %v2260_v11  ;;  %v2703_v16 = vsel %vm1382_vm0, %v2260_v11, 0.0  ;;  %v2959_v17 = vmul.f32 %v2260_v11, %v2260_v11  ;;  %v4990_v18 = vpop.f32.mrf.mxu3  ;;  %v2267_v19 = vpop.f32.mrf.mxu2  ;;  %v4307_v11 = vld [vmem:[%s7115_s0 + $0x178] sm:$0xf0] }
  0xde   :  { %v2704_v21 = vadd.f32 %v2703_v16, %v2702_v63  ;;  %v1604_v23 = vpop.f32.mrf.mxu0 }
  0xdf   :  { %v3093_v26 = vsel %vm1382_vm0, %v2959_v17, 0.0  ;;  %v1605_v27 = vadd.f32 %v4800_v58, %v1604_v23  ;;  %v1933_v28 = vpop.f32.mrf.mxu1 }
  0xe0   :  { %v3094_v29 = vadd.f32 %v3093_v26, %v3092_v6 }
  0xe1   :  { %v1934_v31 = vadd.f32 %v1933_v28, %v1605_v27  ;;  %1643 = vmatmul.bf16.gmra.mxu0 %v3503_v20  ;;  %v3547_v20 = vor.u32 %v4307_v11, %v3546_v10  ;;  %v3526_v27 = vld [vmem:[%s7115_s0 + $0x150] sm:$0xf]  ;;  %v4303_v28 = vld [vmem:[%s7115_s0 + $0x158] sm:$0xf0]  ;;  %v4450_v11 = vld [vmem:[%s7115_s0 + $0x5f0] sm:$0xf0] }
  0xe2   :  { %1883 = vmatmul.bf16.gmra.mxu3 %v4079_v24  ;;  %1972 = vmatmul.bf16.gmra.mxu1 %v3507_v25 }
  0xe3   :  { %v2263_v32 = vadd.f32 %v2262_v43, %v1934_v31 }
  0xe5   :  { %2570 = vst.msk [vmem:[%s7117_s3 + $0x40] sm:$0xff] %vm1382_vm0, %v2263_v32  ;;  %v2705_v35 = vsel %vm1382_vm0, %v2263_v32, 0.0  ;;  %v2960_v36 = vmul.f32 %v2263_v32, %v2263_v32  ;;  %v5005_v37 = vpop.f32.mrf.mxu3  ;;  %v2269_v38 = vpop.f32.mrf.mxu2  ;;  %v4447_v32 = vld [vmem:[%s7115_s0 + $0x5d8] sm:$0xf0] }
  0xe6   :  { %v2706_v39 = vadd.f32 %v2705_v35, %v2704_v21  ;;  %v1606_v40 = vpop.f32.mrf.mxu0 }
  0xe7   :  { %v3095_v43 = vsel %vm1382_vm0, %v2960_v36, 0.0  ;;  %v1607_v44 = vadd.f32 %v4800_v58, %v1606_v40  ;;  %v1935_v45 = vpop.f32.mrf.mxu1  ;;  %v3527_v40 = vor.u32 %v4303_v28, %v3526_v27 }
  0xe8   :  { %v3096_v46 = vadd.f32 %v3095_v43, %v3094_v29  ;;  %v4102_v29 = vld [vmem:[%s7115_s0 + $0x5d0] sm:$0xf] }
  0xe9   :  { %v1936_v47 = vadd.f32 %v1935_v45, %v1607_v44  ;;  %v4103_v44 = vor.u32 %v4447_v32, %v4102_v29  ;;  %v3531_v45 = vor.u32 %v4302_v33, %v3528_v34  ;;  %v3570_v34 = vld [vmem:[%s7115_s0 + $0x1a0] sm:$0xf] }
  0xea   :  { %4210 = vmatmul.msk.bf16.gmra.mxu2 %vm1382_vm0, %v3535_v41 }
  0xeb   :  { %v2265_v52 = vadd.f32 %v2264_v62, %v1936_v47  ;;  %v3515_v62 = vor.u32 %v4300_v50, %v3514_v49 }
  0xed   :  { %2571 = vst.msk [vmem:[%s7117_s3 + $0x48] sm:$0xff] %vm1382_vm0, %v2265_v52  ;;  %v2707_v56 = vsel %vm1382_vm0, %v2265_v52, 0.0  ;;  %v2961_v57 = vmul.f32 %v2265_v52, %v2265_v52  ;;  %v5033_v59 = vpop.f32.mrf.mxu3  ;;  %v2272_v60 = vpop.f32.mrf.mxu2 }
  0xee   :  { %v2708_v63 = vadd.f32 %v2707_v56, %v2706_v39  ;;  %v1609_v0 = vpop.f32.mrf.mxu0 }
  0xef   :  { %v3097_v3 = vsel %vm1382_vm0, %v2961_v57, 0.0  ;;  %v1610_v5 = vadd.f32 %v4800_v58, %v1609_v0  ;;  %v1938_v6 = vpop.f32.mrf.mxu1  ;;  %v3559_v0 = vor.u32 %v4310_v54, %v3558_v53  ;;  %v4309_v53 = vld [vmem:[%s7115_s0 + $0x188] sm:$0xf0]  ;;  %v4308_v54 = vld [vmem:[%s7115_s0 + $0x184] sm:$0xf] }
  0xf0   :  { %v3098_v7 = vadd.f32 %v3097_v3, %v3096_v46 }
  0xf1   :  { %v1939_v8 = vadd.f32 %v1938_v6, %v1610_v5  ;;  %1648 = vmatmul.bf16.gmra.mxu0 %v3515_v62 }
  0xf2   :  { %1888 = vmatmul.bf16.gmra.mxu3 %v4091_v1  ;;  %1977 = vmatmul.bf16.gmra.mxu1 %v3519_v2 }
  0xf3   :  { %v2268_v9 = vadd.f32 %v2267_v19, %v1939_v8  ;;  %v4306_v8 = vld [vmem:[%s7115_s0 + $0x170] sm:$0xf0] }
  0xf5   :  { %2572 = vst.msk [vmem:[%s7117_s3 + $0x50] sm:$0xff] %vm1382_vm0, %v2268_v9  ;;  %v2709_v13 = vsel %vm1382_vm0, %v2268_v9, 0.0  ;;  %v2962_v14 = vmul.f32 %v2268_v9, %v2268_v9  ;;  %v5048_v15 = vpop.f32.mrf.mxu3  ;;  %v2274_v16 = vpop.f32.mrf.mxu2  ;;  %v4114_v9 = vld [vmem:[%s7115_s0 + $0x5e8] sm:$0xf] }
  0xf6   :  { %v2710_v17 = vadd.f32 %v2709_v13, %v2708_v63  ;;  %v1611_v19 = vpop.f32.mrf.mxu0  ;;  %v4305_v13 = vld [vmem:[%s7115_s0 + $0x16c] sm:$0xf] }
  0xf7   :  { %v3099_v21 = vsel %vm1382_vm0, %v2962_v14, 0.0  ;;  %v1612_v23 = vadd.f32 %v4800_v58, %v1611_v19  ;;  %v1940_v24 = vpop.f32.mrf.mxu1  ;;  %v3540_v14 = vld [vmem:[%s7115_s0 + $0x174] sm:$0xf0] }
  0xf8   :  { %v3100_v25 = vadd.f32 %v3099_v21, %v3098_v7  ;;  %v3538_v7 = vld [vmem:[%s7115_s0 + $0x168] sm:$0xf] }
  0xf9   :  { %v1941_v26 = vadd.f32 %v1940_v24, %v1612_v23  ;;  %v3539_v21 = vor.u32 %v4306_v8, %v3538_v7 }
  0xfa   :  { %4211 = vmatmul.msk.bf16.gmra.mxu2 %vm1382_vm0, %v3547_v20 }
  0xfb   :  { %v2270_v31 = vadd.f32 %v2269_v38, %v1941_v26  ;;  %v3543_v26 = vor.u32 %v4305_v13, %v3540_v14 }
  0xfd   :  { %2573 = vst.msk [vmem:[%s7117_s3 + $0x58] sm:$0xff] %vm1382_vm0, %v2270_v31  ;;  %v2711_v35 = vsel %vm1382_vm0, %v2270_v31, 0.0  ;;  %v2963_v36 = vmul.f32 %v2270_v31, %v2270_v31  ;;  %v5076_v38 = vpop.f32.mrf.mxu3  ;;  %v2277_v39 = vpop.f32.mrf.mxu2 }
  0xfe   :  { %v2712_v41 = vadd.f32 %v2711_v35, %v2710_v17  ;;  %v1614_v43 = vpop.f32.mrf.mxu0  ;;  %v4313_v35 = vld [vmem:[%s7115_s0 + $0x1a8] sm:$0xf0] }
  0xff   :  { %v3101_v46 = vsel %vm1382_vm0, %v2963_v36, 0.0  ;;  %v1615_v47 = vadd.f32 %v4800_v58, %v1614_v43  ;;  %v1943_v49 = vpop.f32.mrf.mxu1 }
 0x100   :  { %v3102_v50 = vadd.f32 %v3101_v46, %v3100_v25  ;;  %v4115_v25 = vor.u32 %v4450_v11, %v4114_v9 }
 0x101   :  { %v1944_v51 = vadd.f32 %v1943_v49, %v1615_v47  ;;  %1653 = vmatmul.bf16.gmra.mxu0 %v3527_v40 }
 0x102   :  { %1893 = vmatmul.bf16.gmra.mxu3 %v4103_v44  ;;  %1982 = vmatmul.bf16.gmra.mxu1 %v3531_v45  ;;  %v3571_v45 = vor.u32 %v4313_v35, %v3570_v34  ;;  %v3562_v35 = vld [vmem:[%s7115_s0 + $0x198] sm:$0xf] }
 0x103   :  { %v2273_v52 = vadd.f32 %v2272_v60, %v1944_v51 }
 0x105   :  { %2574 = vst.msk [vmem:[%s7117_s3 + $0x60] sm:$0xff] %vm1382_vm0, %v2273_v52  ;;  %v2713_v55 = vsel %vm1382_vm0, %v2273_v52, 0.0  ;;  %v2964_v56 = vmul.f32 %v2273_v52, %v2273_v52  ;;  %v5091_v57 = vpop.f32.mrf.mxu3  ;;  %v2279_v62 = vpop.f32.mrf.mxu2  ;;  %v3550_v52 = vld [vmem:[%s7115_s0 + $0x180] sm:$0xf] }
 0x106   :  { %v2714_v60 = vadd.f32 %v2713_v55, %v2712_v41  ;;  %v1616_v63 = vpop.f32.mrf.mxu0 }
 0x107   :  { %v3103_v1 = vsel %vm1382_vm0, %v2964_v56, 0.0  ;;  %v1617_v2 = vadd.f32 %v4800_v58, %v1616_v63  ;;  %v1945_v3 = vpop.f32.mrf.mxu1  ;;  %v3552_v56 = vld [vmem:[%s7115_s0 + $0x18c] sm:$0xf0] }
 0x108   :  { %v3104_v5 = vadd.f32 %v3103_v1, %v3102_v50  ;;  %v3936_v63 = vld [vmem:[%s7115_s0 + $0x48c] sm:$0xf0]  ;;  %v3555_v7 = vor.u32 %v4308_v54, %v3552_v56 }
 0x109   :  { %v1946_v6 = vadd.f32 %v1945_v3, %v1617_v2  ;;  %v3551_v3 = vor.u32 %v4309_v53, %v3550_v52 }
 0x10a   :  { %4212 = vmatmul.msk.bf16.gmra.mxu2 %vm1382_vm0, %v3559_v0 }
 0x10b   :  { %v2275_v10 = vadd.f32 %v2274_v16, %v1946_v6 }
 0x10d   :  { %2575 = vst.msk [vmem:[%s7117_s3 + $0x68] sm:$0xff] %vm1382_vm0, %v2275_v10  ;;  %v2715_v17 = vsel %vm1382_vm0, %v2275_v10, 0.0  ;;  %v2965_v16 = vmul.f32 %v2275_v10, %v2275_v10  ;;  %v5119_v19 = vpop.f32.mrf.mxu3  ;;  %v2282_v20 = vpop.f32.mrf.mxu2 }
 0x10e   :  { %v2716_v23 = vadd.f32 %v2715_v17, %v2714_v60  ;;  %v1619_v24 = vpop.f32.mrf.mxu0  ;;  %v4404_v60 = vld [vmem:[%s7115_s0 + $0x484] sm:$0xf] }
 0x10f   :  { %v3105_v27 = vsel %vm1382_vm0, %v2965_v16, 0.0  ;;  %v1620_v28 = vadd.f32 %v4800_v58, %v1619_v24  ;;  %v1948_v29 = vpop.f32.mrf.mxu1  ;;  %v3939_v8 = vor.u32 %v4404_v60, %v3936_v63  ;;  %v3582_v16 = vld [vmem:[%s7115_s0 + $0x1b8] sm:$0xf] }
 0x110   :  { %v3106_v31 = vadd.f32 %v3105_v27, %v3104_v5 }
 0x111   :  { %v1949_v32 = vadd.f32 %v1948_v29, %v1620_v28  ;;  %1658 = vmatmul.bf16.gmra.mxu0 %v3539_v21  ;;  %v4316_v21 = vld [vmem:[%s7115_s0 + $0x1c0] sm:$0xf0] }
 0x112   :  { %1898 = vmatmul.bf16.gmra.mxu3 %v4115_v25  ;;  %1987 = vmatmul.bf16.gmra.mxu1 %v3543_v26  ;;  %v3583_v28 = vor.u32 %v4316_v21, %v3582_v16 }
 0x113   :  { %v2278_v33 = vadd.f32 %v2277_v39, %v1949_v32 }
 0x115   :  { %2576 = vst.msk [vmem:[%s7117_s3 + $0x70] sm:$0xff] %vm1382_vm0, %v2278_v33  ;;  %v2717_v36 = vsel %vm1382_vm0, %v2278_v33, 0.0  ;;  %v2966_v40 = vmul.f32 %v2278_v33, %v2278_v33  ;;  %v5134_v41 = vpop.f32.mrf.mxu3  ;;  %v2284_v43 = vpop.f32.mrf.mxu2 }
 0x116   :  { %v2718_v39 = vadd.f32 %v2717_v36, %v2716_v23  ;;  %v1621_v44 = vpop.f32.mrf.mxu0  ;;  %v4312_v36 = vld [vmem:[%s7115_s0 + $0x1a0] sm:$0xf0] }
 0x117   :  { %v3107_v46 = vsel %vm1382_vm0, %v2966_v40, 0.0  ;;  %v1622_v47 = vadd.f32 %v4800_v58, %v1621_v44  ;;  %v1950_v49 = vpop.f32.mrf.mxu1  ;;  %v4311_v40 = vld [vmem:[%s7115_s0 + $0x19c] sm:$0xf]  ;;  %v3564_v44 = vld [vmem:[%s7115_s0 + $0x1a4] sm:$0xf0] }
 0x118   :  { %v3108_v50 = vadd.f32 %v3107_v46, %v3106_v31  ;;  %v3948_v46 = vld [vmem:[%s7115_s0 + $0x4a4] sm:$0xf0]  ;;  %v3567_v54 = vor.u32 %v4311_v40, %v3564_v44 }
 0x119   :  { %v1951_v51 = vadd.f32 %v1950_v49, %v1622_v47 }
 0x11a   :  { %4213 = vmatmul.msk.bf16.gmra.mxu2 %vm1382_vm0, %v3571_v45  ;;  %v4407_v45 = vld [vmem:[%s7115_s0 + $0x49c] sm:$0xf] }
 0x11b   :  { %v2280_v55 = vadd.f32 %v2279_v62, %v1951_v51  ;;  %v3563_v51 = vor.u32 %v4312_v36, %v3562_v35 }
 0x11d   :  { %2577 = vst.msk [vmem:[%s7117_s3 + $0x78] sm:$0xff] %vm1382_vm0, %v2280_v55  ;;  %v2719_v0 = vsel %vm1382_vm0, %v2280_v55, 0.0  ;;  %v2967_v62 = vmul.f32 %v2280_v55, %v2280_v55  ;;  %v5162_v1 = vpop.f32.mrf.mxu3  ;;  %v2287_v2 = vpop.f32.mrf.mxu2  ;;  %v3951_v55 = vor.u32 %v4407_v45, %v3948_v46 }
 0x11e   :  { %v2720_v5 = vadd.f32 %v2719_v0, %v2718_v39  ;;  %v1624_v6 = vpop.f32.mrf.mxu0 }
 0x11f   :  { %v3109_v9 = vsel %vm1382_vm0, %v2967_v62, 0.0  ;;  %v1625_v10 = vadd.f32 %v4800_v58, %v1624_v6  ;;  %v1953_v11 = vpop.f32.mrf.mxu1  ;;  %v4319_v6 = vld [vmem:[%s7115_s0 + $0x1d8] sm:$0xf0] }
 0x120   :  { %v3110_v13 = vadd.f32 %v3109_v9, %v3108_v50 }
 0x121   :  { %v1954_v14 = vadd.f32 %v1953_v11, %v1625_v10  ;;  %1663 = vmatmul.bf16.gmra.mxu0 %v3551_v3 }
 0x122   :  { %1992 = vmatmul.bf16.gmra.mxu1 %v3555_v7  ;;  %2152 = vmatmul.bf16.vlgmr.msrb.gmra.mxu3 %v3939_v8 }
 0x123   :  { %v2283_v17 = vadd.f32 %v2282_v20, %v1954_v14 }
 0x125   :  { %2578 = vst.msk [vmem:[%s7117_s3 + $0x80] sm:$0xff] %vm1382_vm0, %v2283_v17  ;;  %v2721_v23 = vsel %vm1382_vm0, %v2283_v17, 0.0  ;;  %v2968_v24 = vmul.f32 %v2283_v17, %v2283_v17  ;;  %v5177_v25 = vpop.f32.mrf.mxu3  ;;  %v2289_v26 = vpop.f32.mrf.mxu2 }
 0x126   :  { %v2722_v20 = vadd.f32 %v2721_v23, %v2720_v5  ;;  %v1626_v27 = vpop.f32.mrf.mxu0  ;;  %v3594_v5 = vld [vmem:[%s7115_s0 + $0x1d0] sm:$0xf] }
 0x127   :  { %v3111_v29 = vsel %vm1382_vm0, %v2968_v24, 0.0  ;;  %v1627_v31 = vadd.f32 %v4800_v58, %v1626_v27  ;;  %v1955_v32 = vpop.f32.mrf.mxu1  ;;  %v3574_v24 = vld [vmem:[%s7115_s0 + $0x1b0] sm:$0xf]  ;;  %v4314_v27 = vld [vmem:[%s7115_s0 + $0x1b4] sm:$0xf] }
 0x128   :  { %v3112_v33 = vadd.f32 %v3111_v29, %v3110_v13  ;;  %v3595_v13 = vor.u32 %v4319_v6, %v3594_v5  ;;  %v3576_v29 = vld [vmem:[%s7115_s0 + $0x1bc] sm:$0xf0] }
 0x129   :  { %v1956_v34 = vadd.f32 %v1955_v32, %v1627_v31  ;;  %v4410_v31 = vld [vmem:[%s7115_s0 + $0x4b4] sm:$0xf]  ;;  %v3960_v32 = vld [vmem:[%s7115_s0 + $0x4bc] sm:$0xf0]  ;;  %v3579_v44 = vor.u32 %v4314_v27, %v3576_v29 }
 0x12a   :  { %4214 = vmatmul.msk.bf16.gmra.mxu2 %vm1382_vm0, %v3583_v28  ;;  %v3963_v45 = vor.u32 %v4410_v31, %v3960_v32 }
 0x12b   :  { %v2285_v39 = vadd.f32 %v2284_v43, %v1956_v34 }
 0x12d   :  { %2579 = vst.msk [vmem:[%s7117_s3 + $0x88] sm:$0xff] %vm1382_vm0, %v2285_v39  ;;  %v2723_v47 = vsel %vm1382_vm0, %v2285_v39, 0.0  ;;  %v2969_v43 = vmul.f32 %v2285_v39, %v2285_v39  ;;  %v5205_v49 = vpop.f32.mrf.mxu3  ;;  %v2292_v50 = vpop.f32.mrf.mxu2 }
 0x12e   :  { %v2724_v52 = vadd.f32 %v2723_v47, %v2722_v20  ;;  %v1629_v53 = vpop.f32.mrf.mxu0  ;;  %v4315_v20 = vld [vmem:[%s7115_s0 + $0x1b8] sm:$0xf0] }
 0x12f   :  { %v3113_v56 = vsel %vm1382_vm0, %v2969_v43, 0.0  ;;  %v1630_v60 = vadd.f32 %v4800_v58, %v1629_v53  ;;  %v1958_v63 = vpop.f32.mrf.mxu1  ;;  %v3575_v36 = vor.u32 %v4315_v20, %v3574_v24 }
 0x130   :  { %v3114_v0 = vadd.f32 %v3113_v56, %v3112_v33 }
 0x131   :  { %v1959_v62 = vadd.f32 %v1958_v63, %v1630_v60  ;;  %1668 = vmatmul.bf16.gmra.mxu0 %v3563_v51 }
 0x132   :  { %1997 = vmatmul.bf16.gmra.mxu1 %v3567_v54  ;;  %2157 = vmatmul.bf16.gmra.mxu3 %v3951_v55  ;;  %v3606_v54 = vld [vmem:[%s7115_s0 + $0x1e8] sm:$0xf]  ;;  %v4322_v55 = vld [vmem:[%s7115_s0 + $0x1f0] sm:$0xf0] }
 0x133   :  { %v2288_v3 = vadd.f32 %v2287_v2, %v1959_v62 }
 0x135   :  { %2580 = vst.msk [vmem:[%s7117_s3 + $0x90] sm:$0xff] %vm1382_vm0, %v2288_v3  ;;  %v2725_v7 = vsel %vm1382_vm0, %v2288_v3, 0.0  ;;  %v2970_v8 = vmul.f32 %v2288_v3, %v2288_v3  ;;  %v5220_v9 = vpop.f32.mrf.mxu3  ;;  %v2294_v10 = vpop.f32.mrf.mxu2  ;;  %v3607_v3 = vor.u32 %v4322_v55, %v3606_v54 }
 0x136   :  { %v2726_v2 = vadd.f32 %v2725_v7, %v2724_v52  ;;  %v1631_v11 = vpop.f32.mrf.mxu0 }
 0x137   :  { %v3115_v14 = vsel %vm1382_vm0, %v2970_v8, 0.0  ;;  %v1632_v17 = vadd.f32 %v4800_v58, %v1631_v11  ;;  %v1960_v16 = vpop.f32.mrf.mxu1  ;;  %v3586_v11 = vld [vmem:[%s7115_s0 + $0x1c8] sm:$0xf] }
 0x138   :  { %v3116_v21 = vadd.f32 %v3115_v14, %v3114_v0  ;;  %v4317_v14 = vld [vmem:[%s7115_s0 + $0x1cc] sm:$0xf] }
 0x139   :  { %v1961_v23 = vadd.f32 %v1960_v16, %v1632_v17  ;;  %v3588_v16 = vld [vmem:[%s7115_s0 + $0x1d4] sm:$0xf0] }
 0x13a   :  { %4215 = vmatmul.msk.bf16.gmra.mxu2 %vm1382_vm0, %v3595_v13  ;;  %v4318_v13 = vld [vmem:[%s7115_s0 + $0x1d0] sm:$0xf0]  ;;  %v3591_v32 = vor.u32 %v4317_v14, %v3588_v16 }
 0x13b   :  { %v2290_v28 = vadd.f32 %v2289_v26, %v1961_v23  ;;  %v3972_v23 = vld [vmem:[%s7115_s0 + $0x4d4] sm:$0xf0] }
 0x13d   :  { %2581 = vst.msk [vmem:[%s7117_s3 + $0x98] sm:$0xff] %vm1382_vm0, %v2290_v28  ;;  %v2727_v33 = vsel %vm1382_vm0, %v2290_v28, 0.0  ;;  %v2971_v26 = vmul.f32 %v2290_v28, %v2290_v28  ;;  %v5248_v34 = vpop.f32.mrf.mxu3  ;;  %v2297_v35 = vpop.f32.mrf.mxu2  ;;  %v3587_v28 = vor.u32 %v4318_v13, %v3586_v11  ;;  %v3984_v11 = vld [vmem:[%s7115_s0 + $0x4ec] sm:$0xf0] }
 0x13e   :  { %v2728_v40 = vadd.f32 %v2727_v33, %v2726_v2  ;;  %v1634_v39 = vpop.f32.mrf.mxu0 }
 0x13f   :  { %v3117_v46 = vsel %vm1382_vm0, %v2971_v26, 0.0  ;;  %v1635_v47 = vadd.f32 %v4800_v58, %v1634_v39  ;;  %v1963_v43 = vpop.f32.mrf.mxu1 }
 0x140   :  { %v3118_v51 = vadd.f32 %v3117_v46, %v3116_v21  ;;  %v4413_v21 = vld [vmem:[%s7115_s0 + $0x4cc] sm:$0xf]  ;;  %v3618_v46 = vld [vmem:[%s7115_s0 + $0x200] sm:$0xf] }
 0x141   :  { %v1964_v52 = vadd.f32 %v1963_v43, %v1635_v47  ;;  %1673 = vmatmul.bf16.gmra.mxu0 %v3575_v36  ;;  %v3975_v33 = vor.u32 %v4413_v21, %v3972_v23  ;;  %v4325_v47 = vld [vmem:[%s7115_s0 + $0x208] sm:$0xf0] }
 0x142   :  { %2002 = vmatmul.bf16.gmra.mxu1 %v3579_v44  ;;  %2162 = vmatmul.bf16.gmra.mxu3 %v3963_v45  ;;  %v3619_v55 = vor.u32 %v4325_v47, %v3618_v46 }
 0x143   :  { %v2293_v53 = vadd.f32 %v2292_v50, %v1964_v52 }
 0x145   :  { %2582 = vst.msk [vmem:[%s7117_s3 + $0xa0] sm:$0xff] %vm1382_vm0, %v2293_v53  ;;  %v2729_v56 = vsel %vm1382_vm0, %v2293_v53, 0.0  ;;  %v2972_v60 = vmul.f32 %v2293_v53, %v2293_v53  ;;  %v5263_v63 = vpop.f32.mrf.mxu3  ;;  %v2299_v0 = vpop.f32.mrf.mxu2 }
 0x146   :  { %v2730_v50 = vadd.f32 %v2729_v56, %v2728_v40  ;;  %v1636_v62 = vpop.f32.mrf.mxu0 }
 0x147   :  { %v3119_v5 = vsel %vm1382_vm0, %v2972_v60, 0.0  ;;  %v1637_v6 = vadd.f32 %v4800_v58, %v1636_v62  ;;  %v1965_v7 = vpop.f32.mrf.mxu1 }
 0x148   :  { %v3120_v8 = vadd.f32 %v3119_v5, %v3118_v51  ;;  %v3598_v5 = vld [vmem:[%s7115_s0 + $0x1e0] sm:$0xf] }
 0x149   :  { %v1966_v2 = vadd.f32 %v1965_v7, %v1637_v6  ;;  %v4321_v6 = vld [vmem:[%s7115_s0 + $0x1e8] sm:$0xf0]  ;;  %v4320_v7 = vld [vmem:[%s7115_s0 + $0x1e4] sm:$0xf] }
 0x14a   :  { %4216 = vmatmul.msk.bf16.gmra.mxu2 %vm1382_vm0, %v3607_v3  ;;  %v3599_v16 = vor.u32 %v4321_v6, %v3598_v5  ;;  %v3612_v6 = vld [vmem:[%s7115_s0 + $0x204] sm:$0xf0] }
 0x14b   :  { %v2295_v17 = vadd.f32 %v2294_v10, %v1966_v2  ;;  %v4416_v2 = vld [vmem:[%s7115_s0 + $0x4e4] sm:$0xf] }
 0x14d   :  { %2583 = vst.msk [vmem:[%s7117_s3 + $0xa8] sm:$0xff] %vm1382_vm0, %v2295_v17  ;;  %v2731_v24 = vsel %vm1382_vm0, %v2295_v17, 0.0  ;;  %v2973_v10 = vmul.f32 %v2295_v17, %v2295_v17  ;;  %v5291_v20 = vpop.f32.mrf.mxu3  ;;  %v2302_v27 = vpop.f32.mrf.mxu2 }
 0x14e   :  { %v2732_v29 = vadd.f32 %v2731_v24, %v2730_v50  ;;  %v1639_v31 = vpop.f32.mrf.mxu0 }
 0x14f   :  { %v3121_v26 = vsel %vm1382_vm0, %v2973_v10, 0.0  ;;  %v1640_v36 = vadd.f32 %v4800_v58, %v1639_v31  ;;  %v1968_v40 = vpop.f32.mrf.mxu1  ;;  %v3987_v10 = vor.u32 %v4416_v2, %v3984_v11 }
 0x150   :  { %v3122_v39 = vadd.f32 %v3121_v26, %v3120_v8 }
 0x151   :  { %v1969_v44 = vadd.f32 %v1968_v40, %v1640_v36  ;;  %1678 = vmatmul.bf16.gmra.mxu0 %v3587_v28  ;;  %v3630_v40 = vld [vmem:[%s7115_s0 + $0x218] sm:$0xf] }
 0x152   :  { %2007 = vmatmul.bf16.gmra.mxu1 %v3591_v32  ;;  %2167 = vmatmul.bf16.gmra.mxu3 %v3975_v33 }
 0x153   :  { %v2298_v45 = vadd.f32 %v2297_v35, %v1969_v44 }
 0x155   :  { %2584 = vst.msk [vmem:[%s7117_s3 + $0xb0] sm:$0xff] %vm1382_vm0, %v2298_v45  ;;  %v2733_v43 = vsel %vm1382_vm0, %v2298_v45, 0.0  ;;  %v2974_v51 = vmul.f32 %v2298_v45, %v2298_v45  ;;  %v5306_v52 = vpop.f32.mrf.mxu3  ;;  %v2304_v53 = vpop.f32.mrf.mxu2 }
 0x156   :  { %v2734_v35 = vadd.f32 %v2733_v43, %v2732_v29  ;;  %v1641_v54 = vpop.f32.mrf.mxu0  ;;  %v5340_v29 = vld [vmem:[%s7116_s2] ss:$0 sm:$0xff] }
 0x157   :  { %v3123_v56 = vsel %vm1382_vm0, %v2974_v51, 0.0  ;;  %v1642_v60 = vadd.f32 %v4800_v58, %v1641_v54  ;;  %v1970_v50 = vpop.f32.mrf.mxu1  ;;  %v3600_v58 = vld [vmem:[%s7115_s0 + $0x1ec] sm:$0xf0] }
 0x158   :  { %v3124_v62 = vadd.f32 %v3123_v56, %v3122_v39  ;;  %v3603_v24 = vor.u32 %v4320_v7, %v3600_v58  ;;  %v4328_v39 = vld [vmem:[%s7115_s0 + $0x220] sm:$0xf0]  ;;  %v4419_v7 = vld [vmem:[%s7115_s0 + $0x4fc] sm:$0xf] }
 0x159   :  { %v1971_v3 = vadd.f32 %v1970_v50, %v1642_v60  ;;  %v3631_v51 = vor.u32 %v4328_v39, %v3630_v40  ;;  %v3610_v50 = vld [vmem:[%s7115_s0 + $0x1f8] sm:$0xf] }
 0x15a   :  { %4217 = vmatmul.msk.bf16.gmra.mxu2 %vm1382_vm0, %v3619_v55 }
 0x15b   :  { %v2300_v8 = vadd.f32 %v2299_v0, %v1971_v3  ;;  %v4323_v3 = vld [vmem:[%s7115_s0 + $0x1fc] sm:$0xf] }
 0x15d   :  { %2585 = vst.msk [vmem:[%s7117_s3 + $0xb8] sm:$0xff] %vm1382_vm0, %v2300_v8  ;;  %v2735_v13 = vsel %vm1382_vm0, %v2300_v8, 0.0  ;;  %v2975_v0 = vmul.f32 %v2300_v8, %v2300_v8  ;;  %v5334_v14 = vpop.f32.mrf.mxu3  ;;  %v2307_v17 = vpop.f32.mrf.mxu2  ;;  %v3996_v8 = vld [vmem:[%s7115_s0 + $0x504] sm:$0xf0] }
 0x15e   :  { %v2736_v21 = vadd.f32 %v2735_v13, %v2734_v35  ;;  %v1644_v23 = vpop.f32.mrf.mxu0 }
 0x15f   :  { %v3125_v28 = vsel %vm1382_vm0, %v2975_v0, 0.0  ;;  %v1645_v31 = vadd.f32 %v5340_v29, %v1644_v23  ;;  %v1973_v32 = vpop.f32.mrf.mxu1  ;;  %v3999_v23 = vor.u32 %v4419_v7, %v3996_v8  ;;  %v4008_v7 = vld [vmem:[%s7115_s0 + $0x51c] sm:$0xf0] }
 0x160   :  { %v3126_v33 = vadd.f32 %v3125_v28, %v3124_v62  ;;  %v4324_v62 = vld [vmem:[%s7115_s0 + $0x200] sm:$0xf0] }
 0x161   :  { %v1974_v26 = vadd.f32 %v1973_v32, %v1645_v31  ;;  %1683 = vmatmul.bf16.gmra.mxu0 %v3599_v16  ;;  %v3611_v13 = vor.u32 %v4324_v62, %v3610_v50  ;;  %v4327_v50 = vld [vmem:[%s7115_s0 + $0x218] sm:$0xf0]  ;;  %v4326_v62 = vld [vmem:[%s7115_s0 + $0x214] sm:$0xf] }
 0x162   :  { %2012 = vmatmul.bf16.gmra.mxu1 %v3603_v24  ;;  %2172 = vmatmul.bf16.gmra.mxu3 %v3987_v10 }
 0x163   :  { %v2303_v36 = vadd.f32 %v2302_v27, %v1974_v26  ;;  %v3642_v26 = vld [vmem:[%s7115_s0 + $0x230] sm:$0xf] }
 0x165   :  { %2586 = vst.msk [vmem:[%s7117_s3 + $0xc0] sm:$0xff] %vm1382_vm0, %v2303_v36  ;;  %v2737_v44 = vsel %vm1382_vm0, %v2303_v36, 0.0  ;;  %v2976_v45 = vmul.f32 %v2303_v36, %v2303_v36  ;;  %v5354_v46 = vpop.f32.mrf.mxu3  ;;  %v2309_v47 = vpop.f32.mrf.mxu2  ;;  %v4331_v36 = vld [vmem:[%s7115_s0 + $0x238] sm:$0xf0] }
 0x166   :  { %v2738_v27 = vadd.f32 %v2737_v44, %v2736_v21  ;;  %v1646_v43 = vpop.f32.mrf.mxu0  ;;  %v3615_v21 = vor.u32 %v4323_v3, %v3612_v6  ;;  %v4422_v6 = vld [vmem:[%s7115_s0 + $0x514] sm:$0xf] }
 0x167   :  { %v3127_v35 = vsel %vm1382_vm0, %v2976_v45, 0.0  ;;  %v1647_v54 = vadd.f32 %v5340_v29, %v1646_v43  ;;  %v1975_v55 = vpop.f32.mrf.mxu1  ;;  %v3643_v43 = vor.u32 %v4331_v36, %v3642_v26  ;;  %v3654_v26 = vld [vmem:[%s7115_s0 + $0x248] sm:$0xf]  ;;  %v4334_v36 = vld [vmem:[%s7115_s0 + $0x250] sm:$0xf0] }
 0x168   :  { %v3128_v56 = vadd.f32 %v3127_v35, %v3126_v33 }
 0x169   :  { %v1976_v60 = vadd.f32 %v1975_v55, %v1647_v54 }
 0x16a   :  { %4218 = vmatmul.msk.bf16.gmra.mxu2 %vm1382_vm0, %v3631_v51 }
 0x16b   :  { %v2305_v5 = vadd.f32 %v2304_v53, %v1976_v60  ;;  %v3622_v60 = vld [vmem:[%s7115_s0 + $0x210] sm:$0xf] }
 0x16d   :  { %2587 = vst.msk [vmem:[%s7117_s3 + $0xc8] sm:$0xff] %vm1382_vm0, %v2305_v5  ;;  %v2739_v58 = vsel %vm1382_vm0, %v2305_v5, 0.0  ;;  %v2977_v53 = vmul.f32 %v2305_v5, %v2305_v5  ;;  %v5382_v2 = vpop.f32.mrf.mxu3  ;;  %v2312_v11 = vpop.f32.mrf.mxu2  ;;  %v3624_v5 = vld [vmem:[%s7115_s0 + $0x21c] sm:$0xf0] }
 0x16e   :  { %v2740_v0 = vadd.f32 %v2739_v58, %v2738_v27  ;;  %v1649_v16 = vpop.f32.mrf.mxu0 }
 0x16f   :  { %v3129_v24 = vsel %vm1382_vm0, %v2977_v53, 0.0  ;;  %v1650_v10 = vadd.f32 %v5340_v29, %v1649_v16  ;;  %v1978_v28 = vpop.f32.mrf.mxu1 }
 0x170   :  { %v3130_v31 = vadd.f32 %v3129_v24, %v3128_v56 }
 0x171   :  { %v1979_v32 = vadd.f32 %v1978_v28, %v1650_v10  ;;  %1688 = vmatmul.bf16.gmra.mxu0 %v3611_v13  ;;  %v3623_v13 = vor.u32 %v4327_v50, %v3622_v60  ;;  %v3634_v50 = vld [vmem:[%s7115_s0 + $0x228] sm:$0xf] }
 0x172   :  { %2017 = vmatmul.bf16.gmra.mxu1 %v3615_v21  ;;  %2177 = vmatmul.bf16.gmra.mxu3 %v3999_v23  ;;  %v3627_v21 = vor.u32 %v4326_v62, %v3624_v5  ;;  %v4011_v23 = vor.u32 %v4422_v6, %v4008_v7  ;;  %v4330_v62 = vld [vmem:[%s7115_s0 + $0x230] sm:$0xf0]  ;;  %v3636_v6 = vld [vmem:[%s7115_s0 + $0x234] sm:$0xf0]  ;;  %v4425_v7 = vld [vmem:[%s7115_s0 + $0x52c] sm:$0xf] }
 0x173   :  { %v2308_v33 = vadd.f32 %v2307_v17, %v1979_v32 }
 0x175   :  { %2588 = vst.msk [vmem:[%s7117_s3 + $0xd0] sm:$0xff] %vm1382_vm0, %v2308_v33  ;;  %v2741_v40 = vsel %vm1382_vm0, %v2308_v33, 0.0  ;;  %v2978_v39 = vmul.f32 %v2308_v33, %v2308_v33  ;;  %v5397_v44 = vpop.f32.mrf.mxu3  ;;  %v2314_v45 = vpop.f32.mrf.mxu2 }
 0x176   :  { %v2742_v17 = vadd.f32 %v2741_v40, %v2740_v0  ;;  %v1651_v27 = vpop.f32.mrf.mxu0 }
 0x177   :  { %v3131_v51 = vsel %vm1382_vm0, %v2978_v39, 0.0  ;;  %v1652_v35 = vadd.f32 %v5340_v29, %v1651_v27  ;;  %v1980_v54 = vpop.f32.mrf.mxu1 }
 0x178   :  { %v3132_v55 = vadd.f32 %v3131_v51, %v3130_v31  ;;  %v3655_v51 = vor.u32 %v4334_v36, %v3654_v26 }
 0x179   :  { %v1981_v56 = vadd.f32 %v1980_v54, %v1652_v35 }
 0x17a   :  { %4219 = vmatmul.msk.bf16.gmra.mxu2 %vm1382_vm0, %v3643_v43 }
 0x17b   :  { %v2310_v3 = vadd.f32 %v2309_v47, %v1981_v56 }
 0x17d   :  { %2589 = vst.msk [vmem:[%s7117_s3 + $0xd8] sm:$0xff] %vm1382_vm0, %v2310_v3  ;;  %v2743_v8 = vsel %vm1382_vm0, %v2310_v3, 0.0  ;;  %v2979_v47 = vmul.f32 %v2310_v3, %v2310_v3  ;;  %v5425_v58 = vpop.f32.mrf.mxu3  ;;  %v2317_v53 = vpop.f32.mrf.mxu2  ;;  %v4329_v3 = vld [vmem:[%s7115_s0 + $0x22c] sm:$0xf] }
 0x17e   :  { %v2744_v0 = vadd.f32 %v2743_v8, %v2742_v17  ;;  %v1654_v16 = vpop.f32.mrf.mxu0  ;;  %v4020_v8 = vld [vmem:[%s7115_s0 + $0x534] sm:$0xf0] }
 0x17f   :  { %v3133_v24 = vsel %vm1382_vm0, %v2979_v47, 0.0  ;;  %v1655_v10 = vadd.f32 %v5340_v29, %v1654_v16  ;;  %v1983_v28 = vpop.f32.mrf.mxu1  ;;  %v3635_v16 = vor.u32 %v4330_v62, %v3634_v50 }
 0x180   :  { %v3134_v31 = vadd.f32 %v3133_v24, %v3132_v55  ;;  %v3639_v24 = vor.u32 %v4329_v3, %v3636_v6  ;;  %v4333_v6 = vld [vmem:[%s7115_s0 + $0x248] sm:$0xf0] }
 0x181   :  { %v1984_v32 = vadd.f32 %v1983_v28, %v1655_v10  ;;  %1693 = vmatmul.bf16.gmra.mxu0 %v3623_v13  ;;  %v4023_v10 = vor.u32 %v4425_v7, %v4020_v8  ;;  %v4332_v7 = vld [vmem:[%s7115_s0 + $0x244] sm:$0xf] }
 0x182   :  { %2022 = vmatmul.bf16.gmra.mxu1 %v3627_v21  ;;  %2182 = vmatmul.bf16.gmra.mxu3 %v4011_v23 }
 0x183   :  { %v2313_v33 = vadd.f32 %v2312_v11, %v1984_v32 }
 0x185   :  { %2590 = vst.msk [vmem:[%s7117_s3 + $0xe0] sm:$0xff] %vm1382_vm0, %v2313_v33  ;;  %v2745_v40 = vsel %vm1382_vm0, %v2313_v33, 0.0  ;;  %v2980_v39 = vmul.f32 %v2313_v33, %v2313_v33  ;;  %v5440_v17 = vpop.f32.mrf.mxu3  ;;  %v2319_v27 = vpop.f32.mrf.mxu2 }
 0x186   :  { %v2746_v11 = vadd.f32 %v2745_v40, %v2744_v0  ;;  %v1656_v43 = vpop.f32.mrf.mxu0  ;;  %v3666_v40 = vld [vmem:[%s7115_s0 + $0x260] sm:$0xf] }
 0x187   :  { %v3135_v35 = vsel %vm1382_vm0, %v2980_v39, 0.0  ;;  %v1657_v54 = vadd.f32 %v5340_v29, %v1656_v43  ;;  %v1985_v55 = vpop.f32.mrf.mxu1  ;;  %v4337_v39 = vld [vmem:[%s7115_s0 + $0x268] sm:$0xf0] }
 0x188   :  { %v3136_v56 = vadd.f32 %v3135_v35, %v3134_v31 }
 0x189   :  { %v1986_v60 = vadd.f32 %v1985_v55, %v1657_v54  ;;  %v3667_v55 = vor.u32 %v4337_v39, %v3666_v40 }
 0x18a   :  { %4220 = vmatmul.msk.bf16.gmra.mxu2 %vm1382_vm0, %v3655_v51 }
 0x18b   :  { %v2315_v5 = vadd.f32 %v2314_v45, %v1986_v60 }
 0x18d   :  { %2591 = vst.msk [vmem:[%s7117_s3 + $0xe8] sm:$0xff] %vm1382_vm0, %v2315_v5  ;;  %v2747_v47 = vsel %vm1382_vm0, %v2315_v5, 0.0  ;;  %v2981_v45 = vmul.f32 %v2315_v5, %v2315_v5  ;;  %v5468_v13 = vpop.f32.mrf.mxu3  ;;  %v2322_v0 = vpop.f32.mrf.mxu2  ;;  %v3646_v5 = vld [vmem:[%s7115_s0 + $0x240] sm:$0xf] }
 0x18e   :  { %v2748_v21 = vadd.f32 %v2747_v47, %v2746_v11  ;;  %v1659_v23 = vpop.f32.mrf.mxu0  ;;  %v3648_v47 = vld [vmem:[%s7115_s0 + $0x24c] sm:$0xf0] }
 0x18f   :  { %v3137_v28 = vsel %vm1382_vm0, %v2981_v45, 0.0  ;;  %v1660_v31 = vadd.f32 %v5340_v29, %v1659_v23  ;;  %v1988_v32 = vpop.f32.mrf.mxu1  ;;  %v4428_v45 = vld [vmem:[%s7115_s0 + $0x544] sm:$0xf] }
 0x190   :  { %v3138_v33 = vadd.f32 %v3137_v28, %v3136_v56 }
 0x191   :  { %v1989_v26 = vadd.f32 %v1988_v32, %v1660_v31  ;;  %1698 = vmatmul.bf16.gmra.mxu0 %v3635_v16  ;;  %v4032_v16 = vld [vmem:[%s7115_s0 + $0x54c] sm:$0xf0]  ;;  %v3651_v32 = vor.u32 %v4332_v7, %v3648_v47 }
 0x192   :  { %2027 = vmatmul.bf16.gmra.mxu1 %v3639_v24  ;;  %2187 = vmatmul.bf16.gmra.mxu3 %v4023_v10  ;;  %v3647_v10 = vor.u32 %v4333_v6, %v3646_v5 }
 0x193   :  { %v2318_v36 = vadd.f32 %v2317_v53, %v1989_v26 }
 0x195   :  { %2592 = vst.msk [vmem:[%s7117_s3 + $0xf0] sm:$0xff] %vm1382_vm0, %v2318_v36  ;;  %v2749_v11 = vsel %vm1382_vm0, %v2318_v36, 0.0  ;;  %v2982_v43 = vmul.f32 %v2318_v36, %v2318_v36  ;;  %v5483_v51 = vpop.f32.mrf.mxu3  ;;  %v2324_v35 = vpop.f32.mrf.mxu2 }
 0x196   :  { %v2750_v53 = vadd.f32 %v2749_v11, %v2748_v21  ;;  %v1661_v54 = vpop.f32.mrf.mxu0 }
 0x197   :  { %v3139_v56 = vsel %vm1382_vm0, %v2982_v43, 0.0  ;;  %v1662_v60 = vadd.f32 %v5340_v29, %v1661_v54  ;;  %v1990_v50 = vpop.f32.mrf.mxu1  ;;  %v3678_v54 = vld [vmem:[%s7115_s0 + $0x278] sm:$0xf] }
 0x198   :  { %v3140_v62 = vadd.f32 %v3139_v56, %v3138_v33  ;;  %v4035_v33 = vor.u32 %v4428_v45, %v4032_v16  ;;  %v3658_v16 = vld [vmem:[%s7115_s0 + $0x258] sm:$0xf] }
 0x199   :  { %v1991_v3 = vadd.f32 %v1990_v50, %v1662_v60 }
 0x19a   :  { %4221 = vmatmul.msk.bf16.gmra.mxu2 %vm1382_vm0, %v3667_v55  ;;  %v1825_v55 = vadd.f32 %v5340_v29, %v4832_v12 }
 0x19b   :  { %v2320_v8 = vadd.f32 %v2319_v27, %v1991_v3 }
 0x19d   :  { %2593 = vst.msk [vmem:[%s7117_s3 + $0xf8] sm:$0xff] %vm1382_vm0, %v2320_v8  ;;  %v2751_v21 = vsel %vm1382_vm0, %v2320_v8, 0.0  ;;  %v2983_v27 = vmul.f32 %v2320_v8, %v2320_v8  ;;  %v5511_v23 = vpop.f32.mrf.mxu3  ;;  %v2327_v24 = vpop.f32.mrf.mxu2 }
 0x19e   :  { %v2752_v28 = vadd.f32 %v2751_v21, %v2750_v53  ;;  %v1664_v31 = vpop.f32.mrf.mxu0  ;;  %v4340_v53 = vld [vmem:[%s7115_s0 + $0x280] sm:$0xf0] }
 0x19f   :  { %v3141_v26 = vsel %vm1382_vm0, %v2983_v27, 0.0  ;;  %v1665_v36 = vadd.f32 %v5340_v29, %v1664_v31  ;;  %v1993_v40 = vpop.f32.mrf.mxu1  ;;  %v3679_v6 = vor.u32 %v4340_v53, %v3678_v54  ;;  %v4336_v21 = vld [vmem:[%s7115_s0 + $0x260] sm:$0xf0]  ;;  %v4335_v27 = vld [vmem:[%s7115_s0 + $0x25c] sm:$0xf] }
 0x1a0   :  { %v3142_v39 = vadd.f32 %v3141_v26, %v3140_v62  ;;  %v4431_v31 = vld [vmem:[%s7115_s0 + $0x55c] sm:$0xf] }
 0x1a1   :  { %v1994_v11 = vadd.f32 %v1993_v40, %v1665_v36  ;;  %1703 = vmatmul.bf16.gmra.mxu0 %v3647_v10 }
 0x1a2   :  { %2032 = vmatmul.bf16.gmra.mxu1 %v3651_v32  ;;  %2192 = vmatmul.bf16.gmra.mxu3 %v4035_v33  ;;  %v4044_v32 = vld [vmem:[%s7115_s0 + $0x564] sm:$0xf0]  ;;  %v1827_v33 = vadd.f32 %v5340_v29, %v4860_v30 }
 0x1a3   :  { %v2323_v43 = vadd.f32 %v2322_v0, %v1994_v11 }
 0x1a5   :  { %2594 = vst.msk [vmem:[%s7117_s3 + $0x100] sm:$0xff] %vm1382_vm0, %v2323_v43  ;;  %v2753_v56 = vsel %vm1382_vm0, %v2323_v43, 0.0  ;;  %v2984_v60 = vmul.f32 %v2323_v43, %v2323_v43  ;;  %v2153_v0 = vpop.f32.mrf.mxu3  ;;  %v2329_v50 = vpop.f32.mrf.mxu2 }
 0x1a6   :  { %v2754_v62 = vadd.f32 %v2753_v56, %v2752_v28  ;;  %v5528_v3 = vadd.f32 %v2153_v0, %v1825_v55  ;;  %v1666_v5 = vpop.f32.mrf.mxu0  ;;  %v3660_v28 = vld [vmem:[%s7115_s0 + $0x264] sm:$0xf0]  ;;  %v4047_v55 = vor.u32 %v4431_v31, %v4044_v32 }
 0x1a7   :  { %v3143_v7 = vsel %vm1382_vm0, %v2984_v60, 0.0  ;;  %v1667_v8 = vadd.f32 %v5340_v29, %v1666_v5  ;;  %v1995_v12 = vpop.f32.mrf.mxu1  ;;  %v3663_v53 = vor.u32 %v4335_v27, %v3660_v28 }
 0x1a8   :  { %v3144_v47 = vadd.f32 %v3143_v7, %v3142_v39  ;;  %v3659_v39 = vor.u32 %v4336_v21, %v3658_v16  ;;  %v4343_v7 = vld [vmem:[%s7115_s0 + $0x298] sm:$0xf0] }
 0x1a9   :  { %v1996_v45 = vadd.f32 %v1995_v12, %v1667_v8  ;;  %v1830_v8 = vadd.f32 %v5340_v29, %v4876_v48 }
 0x1aa   :  { %4222 = vmatmul.msk.bf16.gmra.mxu2 %vm1382_vm0, %v3679_v6 }
 0x1ab   :  { %v2325_v10 = vadd.f32 %v2324_v35, %v1996_v45 }
 0x1ad   :  { %2595 = vst.msk [vmem:[%s7117_s3 + $0x108] sm:$0xff] %vm1382_vm0, %v2325_v10  ;;  %v2755_v35 = vsel %vm1382_vm0, %v2325_v10, 0.0  ;;  %v2985_v26 = vmul.f32 %v2325_v10, %v2325_v10  ;;  %v2155_v36 = vpop.f32.mrf.mxu3  ;;  %v2332_v40 = vpop.f32.mrf.mxu2 }
 0x1ae   :  { %v2756_v11 = vadd.f32 %v2755_v35, %v2754_v62  ;;  %v5558_v43 = vadd.f32 %v2155_v36, %v1827_v33  ;;  %v1669_v54 = vpop.f32.mrf.mxu0  ;;  %v3690_v62 = vld [vmem:[%s7115_s0 + $0x290] sm:$0xf]  ;;  %v4338_v36 = vld [vmem:[%s7115_s0 + $0x274] sm:$0xf] }
 0x1af   :  { %v3145_v56 = vsel %vm1382_vm0, %v2985_v26, 0.0  ;;  %v1670_v30 = vadd.f32 %v5340_v29, %v1669_v54  ;;  %v1998_v60 = vpop.f32.mrf.mxu1  ;;  %v3691_v10 = vor.u32 %v4343_v7, %v3690_v62  ;;  %v3670_v35 = vld [vmem:[%s7115_s0 + $0x270] sm:$0xf]  ;;  %v4339_v26 = vld [vmem:[%s7115_s0 + $0x278] sm:$0xf0] }
 0x1b0   :  { %v3146_v0 = vadd.f32 %v3145_v56, %v3144_v47  ;;  %v4434_v54 = vld [vmem:[%s7115_s0 + $0x574] sm:$0xf] }
 0x1b1   :  { %v1999_v5 = vadd.f32 %v1998_v60, %v1670_v30  ;;  %1708 = vmatmul.bf16.gmra.mxu0 %v3659_v39 }
 0x1b2   :  { %2037 = vmatmul.bf16.gmra.mxu1 %v3663_v53  ;;  %2197 = vmatmul.bf16.gmra.mxu3 %v4047_v55  ;;  %v4056_v53 = vld [vmem:[%s7115_s0 + $0x57c] sm:$0xf0]  ;;  %v1832_v55 = vadd.f32 %v5340_v29, %v4904_v4 }
 0x1b3   :  { %v2328_v6 = vadd.f32 %v2327_v24, %v1999_v5 }
 0x1b5   :  { %2596 = vst.msk [vmem:[%s7117_s3 + $0x110] sm:$0xff] %vm1382_vm0, %v2328_v6  ;;  %v2757_v12 = vsel %vm1382_vm0, %v2328_v6, 0.0  ;;  %v2986_v47 = vmul.f32 %v2328_v6, %v2328_v6  ;;  %v2158_v24 = vpop.f32.mrf.mxu3  ;;  %v2334_v45 = vpop.f32.mrf.mxu2 }
 0x1b6   :  { %v2758_v16 = vadd.f32 %v2757_v12, %v2756_v11  ;;  %v5575_v21 = vadd.f32 %v2158_v24, %v1830_v8  ;;  %v1671_v27 = vpop.f32.mrf.mxu0  ;;  %v3672_v11 = vld [vmem:[%s7115_s0 + $0x27c] sm:$0xf0]  ;;  %v4059_v8 = vor.u32 %v4434_v54, %v4056_v53 }
 0x1b7   :  { %v3147_v28 = vsel %vm1382_vm0, %v2986_v47, 0.0  ;;  %v1672_v31 = vadd.f32 %v5340_v29, %v1671_v27  ;;  %v2000_v48 = vpop.f32.mrf.mxu1  ;;  %v3675_v7 = vor.u32 %v4338_v36, %v3672_v11 }
 0x1b8   :  { %v3148_v32 = vadd.f32 %v3147_v28, %v3146_v0  ;;  %v3671_v0 = vor.u32 %v4339_v26, %v3670_v35  ;;  %v4346_v28 = vld [vmem:[%s7115_s0 + $0x2b0] sm:$0xf0] }
 0x1b9   :  { %v2001_v33 = vadd.f32 %v2000_v48, %v1672_v31  ;;  %v1835_v31 = vadd.f32 %v5340_v29, %v4919_v22 }
 0x1ba   :  { %4223 = vmatmul.msk.bf16.gmra.mxu2 %vm1382_vm0, %v3691_v10 }
 0x1bb   :  { %v2330_v39 = vadd.f32 %v2329_v50, %v2001_v33 }
 0x1bd   :  { %2597 = vst.msk [vmem:[%s7117_s3 + $0x118] sm:$0xff] %vm1382_vm0, %v2330_v39  ;;  %v2759_v50 = vsel %vm1382_vm0, %v2330_v39, 0.0  ;;  %v2987_v56 = vmul.f32 %v2330_v39, %v2330_v39  ;;  %v2160_v30 = vpop.f32.mrf.mxu3  ;;  %v2337_v60 = vpop.f32.mrf.mxu2 }
 0x1be   :  { %v2760_v5 = vadd.f32 %v2759_v50, %v2758_v16  ;;  %v5605_v6 = vadd.f32 %v2160_v30, %v1832_v55  ;;  %v1674_v62 = vpop.f32.mrf.mxu0  ;;  %v3702_v16 = vld [vmem:[%s7115_s0 + $0x2a8] sm:$0xf]  ;;  %v4341_v30 = vld [vmem:[%s7115_s0 + $0x28c] sm:$0xf] }
 0x1bf   :  { %v3149_v12 = vsel %vm1382_vm0, %v2987_v56, 0.0  ;;  %v1675_v4 = vadd.f32 %v5340_v29, %v1674_v62  ;;  %v2003_v47 = vpop.f32.mrf.mxu1  ;;  %v3703_v39 = vor.u32 %v4346_v28, %v3702_v16  ;;  %v3682_v50 = vld [vmem:[%s7115_s0 + $0x288] sm:$0xf]  ;;  %v4342_v56 = vld [vmem:[%s7115_s0 + $0x290] sm:$0xf0] }
 0x1c0   :  { %v3150_v24 = vadd.f32 %v3149_v12, %v3148_v32  ;;  %v4437_v62 = vld [vmem:[%s7115_s0 + $0x58c] sm:$0xf] }
 0x1c1   :  { %v2004_v27 = vadd.f32 %v2003_v47, %v1675_v4  ;;  %1713 = vmatmul.bf16.gmra.mxu0 %v3671_v0 }
 0x1c2   :  { %2042 = vmatmul.bf16.gmra.mxu1 %v3675_v7  ;;  %2202 = vmatmul.bf16.gmra.mxu3 %v4059_v8  ;;  %v4068_v7 = vld [vmem:[%s7115_s0 + $0x594] sm:$0xf0]  ;;  %v1837_v8 = vadd.f32 %v5340_v29, %v4947_v42 }
 0x1c3   :  { %v2333_v10 = vadd.f32 %v2332_v40, %v2004_v27 }
 0x1c5   :  { %2598 = vst.msk [vmem:[%s7117_s3 + $0x120] sm:$0xff] %vm1382_vm0, %v2333_v10  ;;  %v2761_v48 = vsel %vm1382_vm0, %v2333_v10, 0.0  ;;  %v2988_v32 = vmul.f32 %v2333_v10, %v2333_v10  ;;  %v2163_v40 = vpop.f32.mrf.mxu3  ;;  %v2339_v33 = vpop.f32.mrf.mxu2 }
 0x1c6   :  { %v2762_v35 = vadd.f32 %v2761_v48, %v2760_v5  ;;  %v5622_v26 = vadd.f32 %v2163_v40, %v1835_v31  ;;  %v1676_v36 = vpop.f32.mrf.mxu0  ;;  %v3684_v5 = vld [vmem:[%s7115_s0 + $0x294] sm:$0xf0]  ;;  %v4071_v31 = vor.u32 %v4437_v62, %v4068_v7 }
 0x1c7   :  { %v3151_v11 = vsel %vm1382_vm0, %v2988_v32, 0.0  ;;  %v1677_v54 = vadd.f32 %v5340_v29, %v1676_v36  ;;  %v2005_v22 = vpop.f32.mrf.mxu1  ;;  %v3687_v28 = vor.u32 %v4341_v30, %v3684_v5 }
 0x1c8   :  { %v3152_v53 = vadd.f32 %v3151_v11, %v3150_v24  ;;  %v3683_v24 = vor.u32 %v4342_v56, %v3682_v50  ;;  %v4349_v11 = vld [vmem:[%s7115_s0 + $0x2c8] sm:$0xf0] }
 0x1c9   :  { %v2006_v55 = vadd.f32 %v2005_v22, %v1677_v54  ;;  %v1840_v54 = vadd.f32 %v5340_v29, %v4962_v61 }
 0x1ca   :  { %4224 = vmatmul.msk.bf16.gmra.mxu2 %vm1382_vm0, %v3703_v39 }
 0x1cb   :  { %v2335_v0 = vadd.f32 %v2334_v45, %v2006_v55 }
 0x1cd   :  { %2599 = vst.msk [vmem:[%s7117_s3 + $0x128] sm:$0xff] %vm1382_vm0, %v2335_v0  ;;  %v2763_v45 = vsel %vm1382_vm0, %v2335_v0, 0.0  ;;  %v2989_v12 = vmul.f32 %v2335_v0, %v2335_v0  ;;  %v2165_v4 = vpop.f32.mrf.mxu3  ;;  %v2342_v47 = vpop.f32.mrf.mxu2 }
 0x1ce   :  { %v2764_v27 = vadd.f32 %v2763_v45, %v2762_v35  ;;  %v5652_v10 = vadd.f32 %v2165_v4, %v1837_v8  ;;  %v1679_v16 = vpop.f32.mrf.mxu0  ;;  %v3714_v35 = vld [vmem:[%s7115_s0 + $0x2c0] sm:$0xf]  ;;  %v4344_v4 = vld [vmem:[%s7115_s0 + $0x2a4] sm:$0xf] }
 0x1cf   :  { %v3153_v48 = vsel %vm1382_vm0, %v2989_v12, 0.0  ;;  %v1680_v42 = vadd.f32 %v5340_v29, %v1679_v16  ;;  %v2008_v32 = vpop.f32.mrf.mxu1  ;;  %v3715_v0 = vor.u32 %v4349_v11, %v3714_v35  ;;  %v3694_v45 = vld [vmem:[%s7115_s0 + $0x2a0] sm:$0xf]  ;;  %v4345_v12 = vld [vmem:[%s7115_s0 + $0x2a8] sm:$0xf0] }
 0x1d0   :  { %v3154_v40 = vadd.f32 %v3153_v48, %v3152_v53  ;;  %v4440_v16 = vld [vmem:[%s7115_s0 + $0x5a4] sm:$0xf] }
 0x1d1   :  { %v2009_v36 = vadd.f32 %v2008_v32, %v1680_v42  ;;  %1718 = vmatmul.bf16.gmra.mxu0 %v3683_v24 }
 0x1d2   :  { %2047 = vmatmul.bf16.gmra.mxu1 %v3687_v28  ;;  %2207 = vmatmul.bf16.gmra.mxu3 %v4071_v31  ;;  %v4080_v28 = vld [vmem:[%s7115_s0 + $0x5ac] sm:$0xf0]  ;;  %v1842_v31 = vadd.f32 %v5340_v29, %v4990_v18 }
 0x1d3   :  { %v2338_v39 = vadd.f32 %v2337_v60, %v2009_v36 }
 0x1d5   :  { %2600 = vst.msk [vmem:[%s7117_s3 + $0x130] sm:$0xff] %vm1382_vm0, %v2338_v39  ;;  %v2765_v22 = vsel %vm1382_vm0, %v2338_v39, 0.0  ;;  %v2990_v53 = vmul.f32 %v2338_v39, %v2338_v39  ;;  %v2168_v60 = vpop.f32.mrf.mxu3  ;;  %v2344_v55 = vpop.f32.mrf.mxu2 }
 0x1d6   :  { %v2766_v50 = vadd.f32 %v2765_v22, %v2764_v27  ;;  %v5669_v56 = vadd.f32 %v2168_v60, %v1840_v54  ;;  %v1681_v30 = vpop.f32.mrf.mxu0  ;;  %v3696_v27 = vld [vmem:[%s7115_s0 + $0x2ac] sm:$0xf0]  ;;  %v4083_v54 = vor.u32 %v4440_v16, %v4080_v28 }
 0x1d7   :  { %v3155_v5 = vsel %vm1382_vm0, %v2990_v53, 0.0  ;;  %v1682_v62 = vadd.f32 %v5340_v29, %v1681_v30  ;;  %v2010_v61 = vpop.f32.mrf.mxu1  ;;  %v3699_v11 = vor.u32 %v4344_v4, %v3696_v27 }
 0x1d8   :  { %v3156_v7 = vadd.f32 %v3155_v5, %v3154_v40  ;;  %v3695_v40 = vor.u32 %v4345_v12, %v3694_v45  ;;  %v4352_v5 = vld [vmem:[%s7115_s0 + $0x2e0] sm:$0xf0] }
 0x1d9   :  { %v2011_v8 = vadd.f32 %v2010_v61, %v1682_v62  ;;  %v1845_v62 = vadd.f32 %v5340_v29, %v5005_v37 }
 0x1da   :  { %4225 = vmatmul.msk.bf16.gmra.mxu2 %vm1382_vm0, %v3715_v0 }
 0x1db   :  { %v2340_v24 = vadd.f32 %v2339_v33, %v2011_v8 }
 0x1dd   :  { %2601 = vst.msk [vmem:[%s7117_s3 + $0x138] sm:$0xff] %vm1382_vm0, %v2340_v24  ;;  %v2767_v33 = vsel %vm1382_vm0, %v2340_v24, 0.0  ;;  %v2991_v48 = vmul.f32 %v2340_v24, %v2340_v24  ;;  %v2170_v42 = vpop.f32.mrf.mxu3  ;;  %v2347_v32 = vpop.f32.mrf.mxu2 }
 0x1de   :  { %v2768_v36 = vadd.f32 %v2767_v33, %v2766_v50  ;;  %v5699_v39 = vadd.f32 %v2170_v42, %v1842_v31  ;;  %v1684_v35 = vpop.f32.mrf.mxu0  ;;  %v3726_v50 = vld [vmem:[%s7115_s0 + $0x2d8] sm:$0xf]  ;;  %v4347_v42 = vld [vmem:[%s7115_s0 + $0x2bc] sm:$0xf] }
 0x1df   :  { %v3157_v22 = vsel %vm1382_vm0, %v2991_v48, 0.0  ;;  %v1685_v18 = vadd.f32 %v5340_v29, %v1684_v35  ;;  %v2013_v53 = vpop.f32.mrf.mxu1  ;;  %v3727_v24 = vor.u32 %v4352_v5, %v3726_v50  ;;  %v3706_v33 = vld [vmem:[%s7115_s0 + $0x2b8] sm:$0xf]  ;;  %v4348_v48 = vld [vmem:[%s7115_s0 + $0x2c0] sm:$0xf0] }
 0x1e0   :  { %v3158_v60 = vadd.f32 %v3157_v22, %v3156_v7  ;;  %v4443_v35 = vld [vmem:[%s7115_s0 + $0x5bc] sm:$0xf] }
 0x1e1   :  { %v2014_v30 = vadd.f32 %v2013_v53, %v1685_v18  ;;  %1723 = vmatmul.bf16.gmra.mxu0 %v3695_v40 }
 0x1e2   :  { %2052 = vmatmul.bf16.gmra.mxu1 %v3699_v11  ;;  %2212 = vmatmul.bf16.gmra.mxu3 %v4083_v54  ;;  %v4092_v11 = vld [vmem:[%s7115_s0 + $0x5c4] sm:$0xf0]  ;;  %v1847_v54 = vadd.f32 %v5340_v29, %v5033_v59 }
 0x1e3   :  { %v2343_v0 = vadd.f32 %v2342_v47, %v2014_v30 }
 0x1e5   :  { %2602 = vst.msk [vmem:[%s7117_s3 + $0x140] sm:$0xff] %vm1382_vm0, %v2343_v0  ;;  %v2769_v61 = vsel %vm1382_vm0, %v2343_v0, 0.0  ;;  %v2992_v7 = vmul.f32 %v2343_v0, %v2343_v0  ;;  %v2173_v47 = vpop.f32.mrf.mxu3  ;;  %v2349_v8 = vpop.f32.mrf.mxu2 }
 0x1e6   :  { %v2770_v45 = vadd.f32 %v2769_v61, %v2768_v36  ;;  %v5716_v12 = vadd.f32 %v2173_v47, %v1845_v62  ;;  %v1686_v4 = vpop.f32.mrf.mxu0  ;;  %v3708_v36 = vld [vmem:[%s7115_s0 + $0x2c4] sm:$0xf0]  ;;  %v4095_v62 = vor.u32 %v4443_v35, %v4092_v11 }
 0x1e7   :  { %v3159_v27 = vsel %vm1382_vm0, %v2992_v7, 0.0  ;;  %v1687_v16 = vadd.f32 %v5340_v29, %v1686_v4  ;;  %v2015_v37 = vpop.f32.mrf.mxu1  ;;  %v3711_v5 = vor.u32 %v4347_v42, %v3708_v36 }
 0x1e8   :  { %v3160_v28 = vadd.f32 %v3159_v27, %v3158_v60  ;;  %v3707_v60 = vor.u32 %v4348_v48, %v3706_v33  ;;  %v4355_v27 = vld [vmem:[%s7115_s0 + $0x2f8] sm:$0xf0] }
 0x1e9   :  { %v2016_v31 = vadd.f32 %v2015_v37, %v1687_v16  ;;  %v1850_v16 = vadd.f32 %v5340_v29, %v5048_v15 }
 0x1ea   :  { %4226 = vmatmul.msk.bf16.gmra.mxu2 %vm1382_vm0, %v3727_v24 }
 0x1eb   :  { %v2345_v40 = vadd.f32 %v2344_v55, %v2016_v31 }
 0x1ed   :  { %2603 = vst.msk [vmem:[%s7117_s3 + $0x148] sm:$0xff] %vm1382_vm0, %v2345_v40  ;;  %v2771_v55 = vsel %vm1382_vm0, %v2345_v40, 0.0  ;;  %v2993_v22 = vmul.f32 %v2345_v40, %v2345_v40  ;;  %v2175_v18 = vpop.f32.mrf.mxu3  ;;  %v2352_v53 = vpop.f32.mrf.mxu2 }
 0x1ee   :  { %v2772_v30 = vadd.f32 %v2771_v55, %v2770_v45  ;;  %v5746_v0 = vadd.f32 %v2175_v18, %v1847_v54  ;;  %v1689_v50 = vpop.f32.mrf.mxu0  ;;  %v3738_v45 = vld [vmem:[%s7115_s0 + $0x2f0] sm:$0xf]  ;;  %v4350_v18 = vld [vmem:[%s7115_s0 + $0x2d4] sm:$0xf] }
 0x1ef   :  { %v3161_v61 = vsel %vm1382_vm0, %v2993_v22, 0.0  ;;  %v1690_v59 = vadd.f32 %v5340_v29, %v1689_v50  ;;  %v2018_v7 = vpop.f32.mrf.mxu1  ;;  %v3739_v40 = vor.u32 %v4355_v27, %v3738_v45  ;;  %v3718_v55 = vld [vmem:[%s7115_s0 + $0x2d0] sm:$0xf]  ;;  %v4351_v22 = vld [vmem:[%s7115_s0 + $0x2d8] sm:$0xf0] }
 0x1f0   :  { %v3162_v47 = vadd.f32 %v3161_v61, %v3160_v28  ;;  %v4446_v50 = vld [vmem:[%s7115_s0 + $0x5d4] sm:$0xf] }
 0x1f1   :  { %v2019_v4 = vadd.f32 %v2018_v7, %v1690_v59  ;;  %1728 = vmatmul.bf16.gmra.mxu0 %v3707_v60 }
 0x1f2   :  { %2057 = vmatmul.bf16.gmra.mxu1 %v3711_v5  ;;  %2217 = vmatmul.bf16.gmra.mxu3 %v4095_v62  ;;  %v4104_v5 = vld [vmem:[%s7115_s0 + $0x5dc] sm:$0xf0]  ;;  %v1852_v62 = vadd.f32 %v5340_v29, %v5076_v38 }
 0x1f3   :  { %v2348_v24 = vadd.f32 %v2347_v32, %v2019_v4 }
 0x1f5   :  { %2604 = vst.msk [vmem:[%s7117_s3 + $0x150] sm:$0xff] %vm1382_vm0, %v2348_v24  ;;  %v2773_v37 = vsel %vm1382_vm0, %v2348_v24, 0.0  ;;  %v2994_v28 = vmul.f32 %v2348_v24, %v2348_v24  ;;  %v2178_v32 = vpop.f32.mrf.mxu3  ;;  %v2354_v31 = vpop.f32.mrf.mxu2 }
 0x1f6   :  { %v2774_v33 = vadd.f32 %v2773_v37, %v2772_v30  ;;  %v5763_v48 = vadd.f32 %v2178_v32, %v1850_v16  ;;  %v1691_v42 = vpop.f32.mrf.mxu0  ;;  %v3720_v30 = vld [vmem:[%s7115_s0 + $0x2dc] sm:$0xf0]  ;;  %v4107_v16 = vor.u32 %v4446_v50, %v4104_v5 }
 0x1f7   :  { %v3163_v36 = vsel %vm1382_vm0, %v2994_v28, 0.0  ;;  %v1692_v35 = vadd.f32 %v5340_v29, %v1691_v42  ;;  %v2020_v15 = vpop.f32.mrf.mxu1  ;;  %v3723_v27 = vor.u32 %v4350_v18, %v3720_v30 }
 0x1f8   :  { %v3164_v11 = vadd.f32 %v3163_v36, %v3162_v47  ;;  %v3719_v47 = vor.u32 %v4351_v22, %v3718_v55  ;;  %v4358_v36 = vld [vmem:[%s7115_s0 + $0x310] sm:$0xf0] }
 0x1f9   :  { %v2021_v54 = vadd.f32 %v2020_v15, %v1692_v35  ;;  %v1855_v35 = vadd.f32 %v5340_v29, %v5091_v57 }
 0x1fa   :  { %4227 = vmatmul.msk.bf16.gmra.mxu2 %vm1382_vm0, %v3739_v40 }
 0x1fb   :  { %v2350_v60 = vadd.f32 %v2349_v8, %v2021_v54 }
 0x1fd   :  { %2605 = vst.msk [vmem:[%s7117_s3 + $0x158] sm:$0xff] %vm1382_vm0, %v2350_v60  ;;  %v2775_v8 = vsel %vm1382_vm0, %v2350_v60, 0.0  ;;  %v2995_v61 = vmul.f32 %v2350_v60, %v2350_v60  ;;  %v2180_v59 = vpop.f32.mrf.mxu3  ;;  %v2357_v7 = vpop.f32.mrf.mxu2 }
 0x1fe   :  { %v2776_v4 = vadd.f32 %v2775_v8, %v2774_v33  ;;  %v5793_v24 = vadd.f32 %v2180_v59, %v1852_v62  ;;  %v1694_v45 = vpop.f32.mrf.mxu0  ;;  %v3750_v33 = vld [vmem:[%s7115_s0 + $0x308] sm:$0xf]  ;;  %v4353_v59 = vld [vmem:[%s7115_s0 + $0x2ec] sm:$0xf] }
 0x1ff   :  { %v3165_v37 = vsel %vm1382_vm0, %v2995_v61, 0.0  ;;  %v1695_v38 = vadd.f32 %v5340_v29, %v1694_v45  ;;  %v2023_v28 = vpop.f32.mrf.mxu1  ;;  %v3751_v60 = vor.u32 %v4358_v36, %v3750_v33  ;;  %v3730_v8 = vld [vmem:[%s7115_s0 + $0x2e8] sm:$0xf]  ;;  %v4354_v61 = vld [vmem:[%s7115_s0 + $0x2f0] sm:$0xf0] }
 0x200   :  { %v3166_v32 = vadd.f32 %v3165_v37, %v3164_v11  ;;  %v4449_v45 = vld [vmem:[%s7115_s0 + $0x5ec] sm:$0xf] }
 0x201   :  { %v2024_v42 = vadd.f32 %v2023_v28, %v1695_v38  ;;  %1733 = vmatmul.bf16.gmra.mxu0 %v3719_v47 }
 0x202   :  { %2062 = vmatmul.bf16.gmra.mxu1 %v3723_v27  ;;  %2222 = vmatmul.bf16.gmra.mxu3 %v4107_v16  ;;  %v4116_v27 = vld [vmem:[%s7115_s0 + $0x5f4] sm:$0xf0]  ;;  %v1857_v16 = vadd.f32 %v5340_v29, %v5119_v19 }
 0x203   :  { %v2353_v40 = vadd.f32 %v2352_v53, %v2024_v42 }
 0x205   :  { %2606 = vst.msk [vmem:[%s7117_s3 + $0x160] sm:$0xff] %vm1382_vm0, %v2353_v40  ;;  %v2777_v15 = vsel %vm1382_vm0, %v2353_v40, 0.0  ;;  %v2996_v11 = vmul.f32 %v2353_v40, %v2353_v40  ;;  %v2183_v53 = vpop.f32.mrf.mxu3  ;;  %v2359_v54 = vpop.f32.mrf.mxu2 }
 0x206   :  { %v2778_v55 = vadd.f32 %v2777_v15, %v2776_v4  ;;  %v5810_v22 = vadd.f32 %v2183_v53, %v1855_v35  ;;  %v1696_v18 = vpop.f32.mrf.mxu0  ;;  %v3732_v4 = vld [vmem:[%s7115_s0 + $0x2f4] sm:$0xf0]  ;;  %v4119_v35 = vor.u32 %v4449_v45, %v4116_v27 }
 0x207   :  { %v3167_v30 = vsel %vm1382_vm0, %v2996_v11, 0.0  ;;  %v1697_v50 = vadd.f32 %v5340_v29, %v1696_v18  ;;  %v2025_v57 = vpop.f32.mrf.mxu1  ;;  %v3735_v36 = vor.u32 %v4353_v59, %v3732_v4 }
 0x208   :  { %v3168_v5 = vadd.f32 %v3167_v30, %v3166_v32  ;;  %v3731_v32 = vor.u32 %v4354_v61, %v3730_v8  ;;  %v4361_v30 = vld [vmem:[%s7115_s0 + $0x328] sm:$0xf0] }
 0x209   :  { %v2026_v62 = vadd.f32 %v2025_v57, %v1697_v50  ;;  %v1860_v50 = vadd.f32 %v5340_v29, %v5134_v41 }
 0x20a   :  { %4228 = vmatmul.msk.bf16.gmra.mxu2 %vm1382_vm0, %v3751_v60 }
 0x20b   :  { %v2355_v47 = vadd.f32 %v2354_v31, %v2026_v62 }
 0x20d   :  { %2607 = vst.msk [vmem:[%s7117_s3 + $0x168] sm:$0xff] %vm1382_vm0, %v2355_v47  ;;  %v2779_v31 = vsel %vm1382_vm0, %v2355_v47, 0.0  ;;  %v2997_v37 = vmul.f32 %v2355_v47, %v2355_v47  ;;  %v2185_v38 = vpop.f32.mrf.mxu3  ;;  %v2362_v28 = vpop.f32.mrf.mxu2 }
 0x20e   :  { %v2780_v42 = vadd.f32 %v2779_v31, %v2778_v55  ;;  %v5840_v40 = vadd.f32 %v2185_v38, %v1857_v16  ;;  %v1699_v33 = vpop.f32.mrf.mxu0  ;;  %v3762_v55 = vld [vmem:[%s7115_s0 + $0x320] sm:$0xf]  ;;  %v4356_v38 = vld [vmem:[%s7115_s0 + $0x304] sm:$0xf] }
 0x20f   :  { %v3169_v15 = vsel %vm1382_vm0, %v2997_v37, 0.0  ;;  %v1700_v19 = vadd.f32 %v5340_v29, %v1699_v33  ;;  %v2028_v11 = vpop.f32.mrf.mxu1  ;;  %v3763_v47 = vor.u32 %v4361_v30, %v3762_v55  ;;  %v3742_v31 = vld [vmem:[%s7115_s0 + $0x300] sm:$0xf]  ;;  %v4357_v37 = vld [vmem:[%s7115_s0 + $0x308] sm:$0xf0] }
 0x210   :  { %v3170_v53 = vadd.f32 %v3169_v15, %v3168_v5  ;;  %v4412_v33 = vld [vmem:[%s7115_s0 + $0x4c0] sm:$0xf0] }
 0x211   :  { %v2029_v18 = vadd.f32 %v2028_v11, %v1700_v19  ;;  %1738 = vmatmul.bf16.gmra.mxu0 %v3731_v32 }
 0x212   :  { %2067 = vmatmul.bf16.gmra.mxu1 %v3735_v36  ;;  %2227 = vmatmul.bf16.gmra.mxu3 %v4119_v35  ;;  %v5883_v36 = vld [vmem:[%s7116_s2] ss:$0 sm:$0xff] }
 0x213   :  { %v2358_v60 = vadd.f32 %v2357_v7, %v2029_v18 }
 0x215   :  { %2608 = vst.msk [vmem:[%s7117_s3 + $0x170] sm:$0xff] %vm1382_vm0, %v2358_v60  ;;  %v2781_v57 = vsel %vm1382_vm0, %v2358_v60, 0.0  ;;  %v2998_v5 = vmul.f32 %v2358_v60, %v2358_v60  ;;  %v2188_v7 = vpop.f32.mrf.mxu3  ;;  %v2364_v62 = vpop.f32.mrf.mxu2 }
 0x216   :  { %v2782_v8 = vadd.f32 %v2781_v57, %v2780_v42  ;;  %v5857_v61 = vadd.f32 %v2188_v7, %v1860_v50  ;;  %v1701_v59 = vpop.f32.mrf.mxu0  ;;  %v3966_v42 = vld [vmem:[%s7115_s0 + $0x4b8] sm:$0xf] }
 0x217   :  { %v3171_v4 = vsel %vm1382_vm0, %v2998_v5, 0.0  ;;  %v1702_v45 = vadd.f32 %v5340_v29, %v1701_v59  ;;  %v2030_v41 = vpop.f32.mrf.mxu1  ;;  %v3744_v29 = vld [vmem:[%s7115_s0 + $0x30c] sm:$0xf0]  ;;  %v3967_v50 = vor.u32 %v4412_v33, %v3966_v42 }
 0x218   :  { %v3172_v27 = vadd.f32 %v3171_v4, %v3170_v53  ;;  %v3743_v53 = vor.u32 %v4357_v37, %v3742_v31  ;;  %v3747_v30 = vor.u32 %v4356_v38, %v3744_v29  ;;  %v4364_v4 = vld [vmem:[%s7115_s0 + $0x340] sm:$0xf0] }
 0x219   :  { %v2031_v16 = vadd.f32 %v2030_v41, %v1702_v45  ;;  %v1865_v45 = vadd.f32 %v5883_v36, %v5177_v25 }
 0x21a   :  { %4229 = vmatmul.msk.bf16.gmra.mxu2 %vm1382_vm0, %v3763_v47 }
 0x21b   :  { %v2360_v32 = vadd.f32 %v2359_v54, %v2031_v16  ;;  %v1862_v54 = vadd.f32 %v5883_v36, %v5162_v1 }
 0x21d   :  { %2609 = vst.msk [vmem:[%s7117_s3 + $0x178] sm:$0xff] %vm1382_vm0, %v2360_v32  ;;  %v2783_v35 = vsel %vm1382_vm0, %v2360_v32, 0.0  ;;  %v2999_v15 = vmul.f32 %v2360_v32, %v2360_v32  ;;  %v2190_v19 = vpop.f32.mrf.mxu3  ;;  %v2367_v11 = vpop.f32.mrf.mxu2 }
 0x21e   :  { %v2784_v18 = vadd.f32 %v2783_v35, %v2782_v8  ;;  %v5892_v60 = vadd.f32 %v2190_v19, %v1862_v54  ;;  %v1704_v55 = vpop.f32.mrf.mxu0  ;;  %v3774_v8 = vld [vmem:[%s7115_s0 + $0x338] sm:$0xf]  ;;  %v4359_v19 = vld [vmem:[%s7115_s0 + $0x31c] sm:$0xf] }
 0x21f   :  { %v3173_v57 = vsel %vm1382_vm0, %v2999_v15, 0.0  ;;  %v1705_v1 = vadd.f32 %v5883_v36, %v1704_v55  ;;  %v2033_v5 = vpop.f32.mrf.mxu1  ;;  %v3775_v32 = vor.u32 %v4364_v4, %v3774_v8  ;;  %v3754_v35 = vld [vmem:[%s7115_s0 + $0x318] sm:$0xf]  ;;  %v4360_v15 = vld [vmem:[%s7115_s0 + $0x320] sm:$0xf0] }
 0x220   :  { %v3174_v7 = vadd.f32 %v3173_v57, %v3172_v27  ;;  %v3978_v55 = vld [vmem:[%s7115_s0 + $0x4d0] sm:$0xf] }
 0x221   :  { %v2034_v59 = vadd.f32 %v2033_v5, %v1705_v1  ;;  %1743 = vmatmul.bf16.gmra.mxu0 %v3743_v53 }
 0x222   :  { %2072 = vmatmul.bf16.gmra.mxu1 %v3747_v30  ;;  %4246 = vmatmul.msk.bf16.vlgmr.msra.gmra.mxu3 %vm1382_vm0, %v3967_v50  ;;  %v4415_v30 = vld [vmem:[%s7115_s0 + $0x4d8] sm:$0xf0]  ;;  %v1867_v50 = vadd.f32 %v5883_v36, %v5205_v49 }
 0x223   :  { %v2363_v47 = vadd.f32 %v2362_v28, %v2034_v59 }
 0x225   :  { %2610 = vst.msk [vmem:[%s7117_s3 + $0x180] sm:$0xff] %vm1382_vm0, %v2363_v47  ;;  %v2785_v41 = vsel %vm1382_vm0, %v2363_v47, 0.0  ;;  %v3000_v27 = vmul.f32 %v2363_v47, %v2363_v47  ;;  %v2193_v28 = vpop.f32.mrf.mxu3  ;;  %v2369_v16 = vpop.f32.mrf.mxu2 }
 0x226   :  { %v2786_v31 = vadd.f32 %v2785_v41, %v2784_v18  ;;  %v5910_v37 = vadd.f32 %v2193_v28, %v1865_v45  ;;  %v1706_v38 = vpop.f32.mrf.mxu0  ;;  %v3756_v18 = vld [vmem:[%s7115_s0 + $0x324] sm:$0xf0]  ;;  %v3979_v45 = vor.u32 %v4415_v30, %v3978_v55 }
 0x227   :  { %v3175_v29 = vsel %vm1382_vm0, %v3000_v27, 0.0  ;;  %v1707_v42 = vadd.f32 %v5883_v36, %v1706_v38  ;;  %v2035_v25 = vpop.f32.mrf.mxu1  ;;  %v3759_v4 = vor.u32 %v4359_v19, %v3756_v18 }
 0x228   :  { %v3176_v33 = vadd.f32 %v3175_v29, %v3174_v7  ;;  %v3755_v7 = vor.u32 %v4360_v15, %v3754_v35  ;;  %v4367_v29 = vld [vmem:[%s7115_s0 + $0x358] sm:$0xf0] }
 0x229   :  { %v2036_v54 = vadd.f32 %v2035_v25, %v1707_v42  ;;  %v1870_v42 = vadd.f32 %v5883_v36, %v5220_v9 }
 0x22a   :  { %4230 = vmatmul.msk.bf16.gmra.mxu2 %vm1382_vm0, %v3775_v32 }
 0x22b   :  { %v2365_v53 = vadd.f32 %v2364_v62, %v2036_v54 }
 0x22d   :  { %2611 = vst.msk [vmem:[%s7117_s3 + $0x188] sm:$0xff] %vm1382_vm0, %v2365_v53  ;;  %v2787_v62 = vsel %vm1382_vm0, %v2365_v53, 0.0  ;;  %v3001_v57 = vmul.f32 %v2365_v53, %v2365_v53  ;;  %v2195_v1 = vpop.f32.mrf.mxu3  ;;  %v2372_v5 = vpop.f32.mrf.mxu2 }
 0x22e   :  { %v2788_v59 = vadd.f32 %v2787_v62, %v2786_v31  ;;  %v5940_v47 = vadd.f32 %v2195_v1, %v1867_v50  ;;  %v1709_v8 = vpop.f32.mrf.mxu0  ;;  %v3786_v31 = vld [vmem:[%s7115_s0 + $0x350] sm:$0xf]  ;;  %v4362_v1 = vld [vmem:[%s7115_s0 + $0x334] sm:$0xf] }
 0x22f   :  { %v3177_v41 = vsel %vm1382_vm0, %v3001_v57, 0.0  ;;  %v1710_v49 = vadd.f32 %v5883_v36, %v1709_v8  ;;  %v2038_v27 = vpop.f32.mrf.mxu1  ;;  %v3787_v53 = vor.u32 %v4367_v29, %v3786_v31  ;;  %v3766_v62 = vld [vmem:[%s7115_s0 + $0x330] sm:$0xf]  ;;  %v4363_v57 = vld [vmem:[%s7115_s0 + $0x338] sm:$0xf0] }
 0x230   :  { %v3178_v28 = vadd.f32 %v3177_v41, %v3176_v33  ;;  %v3990_v8 = vld [vmem:[%s7115_s0 + $0x4e8] sm:$0xf] }
 0x231   :  { %v2039_v38 = vadd.f32 %v2038_v27, %v1710_v49  ;;  %1748 = vmatmul.bf16.gmra.mxu0 %v3755_v7 }
 0x232   :  { %2077 = vmatmul.bf16.gmra.mxu1 %v3759_v4  ;;  %4247 = vmatmul.msk.bf16.gmra.mxu3 %vm1382_vm0, %v3979_v45  ;;  %v4418_v4 = vld [vmem:[%s7115_s0 + $0x4f0] sm:$0xf0]  ;;  %v1872_v45 = vadd.f32 %v5883_v36, %v5248_v34 }
 0x233   :  { %v2368_v32 = vadd.f32 %v2367_v11, %v2039_v38 }
 0x235   :  { %2612 = vst.msk [vmem:[%s7117_s3 + $0x190] sm:$0xff] %vm1382_vm0, %v2368_v32  ;;  %v2789_v25 = vsel %vm1382_vm0, %v2368_v32, 0.0  ;;  %v3002_v33 = vmul.f32 %v2368_v32, %v2368_v32  ;;  %v2198_v11 = vpop.f32.mrf.mxu3  ;;  %v2374_v54 = vpop.f32.mrf.mxu2 }
 0x236   :  { %v2790_v35 = vadd.f32 %v2789_v25, %v2788_v59  ;;  %v5958_v15 = vadd.f32 %v2198_v11, %v1870_v42  ;;  %v1711_v19 = vpop.f32.mrf.mxu0  ;;  %v3768_v59 = vld [vmem:[%s7115_s0 + $0x33c] sm:$0xf0]  ;;  %v3991_v42 = vor.u32 %v4418_v4, %v3990_v8 }
 0x237   :  { %v3179_v18 = vsel %vm1382_vm0, %v3002_v33, 0.0  ;;  %v1712_v55 = vadd.f32 %v5883_v36, %v1711_v19  ;;  %v2040_v9 = vpop.f32.mrf.mxu1  ;;  %v3771_v29 = vor.u32 %v4362_v1, %v3768_v59 }
 0x238   :  { %v3180_v30 = vadd.f32 %v3179_v18, %v3178_v28  ;;  %v3767_v28 = vor.u32 %v4363_v57, %v3766_v62  ;;  %v4370_v18 = vld [vmem:[%s7115_s0 + $0x370] sm:$0xf0] }
 0x239   :  { %v2041_v50 = vadd.f32 %v2040_v9, %v1712_v55  ;;  %v1875_v55 = vadd.f32 %v5883_v36, %v5263_v63 }
 0x23a   :  { %4231 = vmatmul.msk.bf16.gmra.mxu2 %vm1382_vm0, %v3787_v53 }
 0x23b   :  { %v2370_v7 = vadd.f32 %v2369_v16, %v2041_v50 }
 0x23d   :  { %2613 = vst.msk [vmem:[%s7117_s3 + $0x198] sm:$0xff] %vm1382_vm0, %v2370_v7  ;;  %v2791_v16 = vsel %vm1382_vm0, %v2370_v7, 0.0  ;;  %v3003_v41 = vmul.f32 %v2370_v7, %v2370_v7  ;;  %v2200_v49 = vpop.f32.mrf.mxu3  ;;  %v2377_v27 = vpop.f32.mrf.mxu2 }
 0x23e   :  { %v2792_v38 = vadd.f32 %v2791_v16, %v2790_v35  ;;  %v5988_v32 = vadd.f32 %v2200_v49, %v1872_v45  ;;  %v1714_v31 = vpop.f32.mrf.mxu0  ;;  %v3798_v35 = vld [vmem:[%s7115_s0 + $0x368] sm:$0xf]  ;;  %v4365_v49 = vld [vmem:[%s7115_s0 + $0x34c] sm:$0xf] }
 0x23f   :  { %v3181_v25 = vsel %vm1382_vm0, %v3003_v41, 0.0  ;;  %v1715_v34 = vadd.f32 %v5883_v36, %v1714_v31  ;;  %v2043_v33 = vpop.f32.mrf.mxu1  ;;  %v3799_v7 = vor.u32 %v4370_v18, %v3798_v35  ;;  %v3778_v16 = vld [vmem:[%s7115_s0 + $0x348] sm:$0xf]  ;;  %v4366_v41 = vld [vmem:[%s7115_s0 + $0x350] sm:$0xf0] }
 0x240   :  { %v3182_v11 = vadd.f32 %v3181_v25, %v3180_v30  ;;  %v4002_v31 = vld [vmem:[%s7115_s0 + $0x500] sm:$0xf] }
 0x241   :  { %v2044_v19 = vadd.f32 %v2043_v33, %v1715_v34  ;;  %1753 = vmatmul.bf16.gmra.mxu0 %v3767_v28 }
 0x242   :  { %2082 = vmatmul.bf16.gmra.mxu1 %v3771_v29  ;;  %4248 = vmatmul.msk.bf16.gmra.mxu3 %vm1382_vm0, %v3991_v42  ;;  %v4421_v29 = vld [vmem:[%s7115_s0 + $0x508] sm:$0xf0]  ;;  %v1877_v42 = vadd.f32 %v5883_v36, %v5291_v20 }
 0x243   :  { %v2373_v53 = vadd.f32 %v2372_v5, %v2044_v19 }
 0x245   :  { %2614 = vst.msk [vmem:[%s7117_s3 + $0x1a0] sm:$0xff] %vm1382_vm0, %v2373_v53  ;;  %v2793_v9 = vsel %vm1382_vm0, %v2373_v53, 0.0  ;;  %v3004_v30 = vmul.f32 %v2373_v53, %v2373_v53  ;;  %v2203_v5 = vpop.f32.mrf.mxu3  ;;  %v2379_v50 = vpop.f32.mrf.mxu2 }
 0x246   :  { %v2794_v62 = vadd.f32 %v2793_v9, %v2792_v38  ;;  %v6006_v57 = vadd.f32 %v2203_v5, %v1875_v55  ;;  %v1716_v1 = vpop.f32.mrf.mxu0  ;;  %v3780_v38 = vld [vmem:[%s7115_s0 + $0x354] sm:$0xf0]  ;;  %v4003_v55 = vor.u32 %v4421_v29, %v4002_v31 }
 0x247   :  { %v3183_v59 = vsel %vm1382_vm0, %v3004_v30, 0.0  ;;  %v1717_v8 = vadd.f32 %v5883_v36, %v1716_v1  ;;  %v2045_v63 = vpop.f32.mrf.mxu1  ;;  %v3783_v18 = vor.u32 %v4365_v49, %v3780_v38 }
 0x248   :  { %v3184_v4 = vadd.f32 %v3183_v59, %v3182_v11  ;;  %v3779_v11 = vor.u32 %v4366_v41, %v3778_v16  ;;  %v4373_v59 = vld [vmem:[%s7115_s0 + $0x388] sm:$0xf0] }
 0x249   :  { %v2046_v45 = vadd.f32 %v2045_v63, %v1717_v8  ;;  %v1880_v8 = vadd.f32 %v5883_v36, %v5306_v52 }
 0x24a   :  { %4232 = vmatmul.msk.bf16.gmra.mxu2 %vm1382_vm0, %v3799_v7 }
 0x24b   :  { %v2375_v28 = vadd.f32 %v2374_v54, %v2046_v45 }
 0x24d   :  { %2615 = vst.msk [vmem:[%s7117_s3 + $0x1a8] sm:$0xff] %vm1382_vm0, %v2375_v28  ;;  %v2795_v54 = vsel %vm1382_vm0, %v2375_v28, 0.0  ;;  %v3005_v25 = vmul.f32 %v2375_v28, %v2375_v28  ;;  %v2205_v34 = vpop.f32.mrf.mxu3  ;;  %v2382_v33 = vpop.f32.mrf.mxu2 }
 0x24e   :  { %v2796_v19 = vadd.f32 %v2795_v54, %v2794_v62  ;;  %v6036_v53 = vadd.f32 %v2205_v34, %v1877_v42  ;;  %v1719_v35 = vpop.f32.mrf.mxu0  ;;  %v3810_v62 = vld [vmem:[%s7115_s0 + $0x380] sm:$0xf]  ;;  %v4368_v34 = vld [vmem:[%s7115_s0 + $0x364] sm:$0xf] }
 0x24f   :  { %v3185_v9 = vsel %vm1382_vm0, %v3005_v25, 0.0  ;;  %v1720_v20 = vadd.f32 %v5883_v36, %v1719_v35  ;;  %v2048_v30 = vpop.f32.mrf.mxu1  ;;  %v3811_v28 = vor.u32 %v4373_v59, %v3810_v62  ;;  %v3790_v54 = vld [vmem:[%s7115_s0 + $0x360] sm:$0xf]  ;;  %v4369_v25 = vld [vmem:[%s7115_s0 + $0x368] sm:$0xf0] }
 0x250   :  { %v3186_v5 = vadd.f32 %v3185_v9, %v3184_v4  ;;  %v4014_v35 = vld [vmem:[%s7115_s0 + $0x518] sm:$0xf] }
 0x251   :  { %v2049_v1 = vadd.f32 %v2048_v30, %v1720_v20  ;;  %1758 = vmatmul.bf16.gmra.mxu0 %v3779_v11 }
 0x252   :  { %2087 = vmatmul.bf16.gmra.mxu1 %v3783_v18  ;;  %4249 = vmatmul.msk.bf16.gmra.mxu3 %vm1382_vm0, %v4003_v55  ;;  %v4424_v18 = vld [vmem:[%s7115_s0 + $0x520] sm:$0xf0]  ;;  %v1882_v55 = vadd.f32 %v5883_v36, %v5334_v14 }
 0x253   :  { %v2378_v7 = vadd.f32 %v2377_v27, %v2049_v1 }
 0x255   :  { %2616 = vst.msk [vmem:[%s7117_s3 + $0x1b0] sm:$0xff] %vm1382_vm0, %v2378_v7  ;;  %v2797_v63 = vsel %vm1382_vm0, %v2378_v7, 0.0  ;;  %v3006_v4 = vmul.f32 %v2378_v7, %v2378_v7  ;;  %v2208_v27 = vpop.f32.mrf.mxu3  ;;  %v2384_v45 = vpop.f32.mrf.mxu2 }
 0x256   :  { %v2798_v16 = vadd.f32 %v2797_v63, %v2796_v19  ;;  %v6054_v41 = vadd.f32 %v2208_v27, %v1880_v8  ;;  %v1721_v49 = vpop.f32.mrf.mxu0  ;;  %v3792_v19 = vld [vmem:[%s7115_s0 + $0x36c] sm:$0xf0]  ;;  %v4015_v8 = vor.u32 %v4424_v18, %v4014_v35 }
 0x257   :  { %v3187_v38 = vsel %vm1382_vm0, %v3006_v4, 0.0  ;;  %v1722_v31 = vadd.f32 %v5883_v36, %v1721_v49  ;;  %v2050_v52 = vpop.f32.mrf.mxu1  ;;  %v3795_v59 = vor.u32 %v4368_v34, %v3792_v19 }
 0x258   :  { %v3188_v29 = vadd.f32 %v3187_v38, %v3186_v5  ;;  %v3791_v5 = vor.u32 %v4369_v25, %v3790_v54  ;;  %v4376_v38 = vld [vmem:[%s7115_s0 + $0x3a0] sm:$0xf0] }
 0x259   :  { %v2051_v42 = vadd.f32 %v2050_v52, %v1722_v31  ;;  %v1885_v31 = vadd.f32 %v5883_v36, %v5354_v46 }
 0x25a   :  { %4233 = vmatmul.msk.bf16.gmra.mxu2 %vm1382_vm0, %v3811_v28 }
 0x25b   :  { %v2380_v11 = vadd.f32 %v2379_v50, %v2051_v42 }
 0x25d   :  { %2617 = vst.msk [vmem:[%s7117_s3 + $0x1b8] sm:$0xff] %vm1382_vm0, %v2380_v11  ;;  %v2799_v50 = vsel %vm1382_vm0, %v2380_v11, 0.0  ;;  %v3007_v9 = vmul.f32 %v2380_v11, %v2380_v11  ;;  %v2210_v20 = vpop.f32.mrf.mxu3  ;;  %v2387_v30 = vpop.f32.mrf.mxu2 }
 0x25e   :  { %v2800_v1 = vadd.f32 %v2799_v50, %v2798_v16  ;;  %v6084_v7 = vadd.f32 %v2210_v20, %v1882_v55  ;;  %v1724_v62 = vpop.f32.mrf.mxu0  ;;  %v3822_v16 = vld [vmem:[%s7115_s0 + $0x398] sm:$0xf]  ;;  %v4371_v20 = vld [vmem:[%s7115_s0 + $0x37c] sm:$0xf] }
 0x25f   :  { %v3189_v63 = vsel %vm1382_vm0, %v3007_v9, 0.0  ;;  %v1725_v14 = vadd.f32 %v5883_v36, %v1724_v62  ;;  %v2053_v4 = vpop.f32.mrf.mxu1  ;;  %v3823_v11 = vor.u32 %v4376_v38, %v3822_v16  ;;  %v3802_v50 = vld [vmem:[%s7115_s0 + $0x378] sm:$0xf]  ;;  %v4372_v9 = vld [vmem:[%s7115_s0 + $0x380] sm:$0xf0] }
 0x260   :  { %v3190_v27 = vadd.f32 %v3189_v63, %v3188_v29  ;;  %v4026_v62 = vld [vmem:[%s7115_s0 + $0x530] sm:$0xf] }
 0x261   :  { %v2054_v49 = vadd.f32 %v2053_v4, %v1725_v14  ;;  %1763 = vmatmul.bf16.gmra.mxu0 %v3791_v5 }
 0x262   :  { %2092 = vmatmul.bf16.gmra.mxu1 %v3795_v59  ;;  %4250 = vmatmul.msk.bf16.gmra.mxu3 %vm1382_vm0, %v4015_v8  ;;  %v4427_v59 = vld [vmem:[%s7115_s0 + $0x538] sm:$0xf0]  ;;  %v1887_v8 = vadd.f32 %v5883_v36, %v5382_v2 }
 0x263   :  { %v2383_v28 = vadd.f32 %v2382_v33, %v2054_v49 }
 0x265   :  { %2618 = vst.msk [vmem:[%s7117_s3 + $0x1c0] sm:$0xff] %vm1382_vm0, %v2383_v28  ;;  %v2801_v52 = vsel %vm1382_vm0, %v2383_v28, 0.0  ;;  %v3008_v29 = vmul.f32 %v2383_v28, %v2383_v28  ;;  %v2213_v33 = vpop.f32.mrf.mxu3  ;;  %v2389_v42 = vpop.f32.mrf.mxu2 }
 0x266   :  { %v2802_v54 = vadd.f32 %v2801_v52, %v2800_v1  ;;  %v6102_v25 = vadd.f32 %v2213_v33, %v1885_v31  ;;  %v1726_v34 = vpop.f32.mrf.mxu0  ;;  %v3804_v1 = vld [vmem:[%s7115_s0 + $0x384] sm:$0xf0]  ;;  %v4027_v31 = vor.u32 %v4427_v59, %v4026_v62 }
 0x267   :  { %v3191_v19 = vsel %vm1382_vm0, %v3008_v29, 0.0  ;;  %v1727_v35 = vadd.f32 %v5883_v36, %v1726_v34  ;;  %v2055_v46 = vpop.f32.mrf.mxu1  ;;  %v3807_v38 = vor.u32 %v4371_v20, %v3804_v1 }
 0x268   :  { %v3192_v18 = vadd.f32 %v3191_v19, %v3190_v27  ;;  %v3803_v27 = vor.u32 %v4372_v9, %v3802_v50  ;;  %v4379_v19 = vld [vmem:[%s7115_s0 + $0x3b8] sm:$0xf0] }
 0x269   :  { %v2056_v55 = vadd.f32 %v2055_v46, %v1727_v35  ;;  %v1890_v35 = vadd.f32 %v5883_v36, %v5397_v44 }
 0x26a   :  { %4234 = vmatmul.msk.bf16.gmra.mxu2 %vm1382_vm0, %v3823_v11 }
 0x26b   :  { %v2385_v5 = vadd.f32 %v2384_v45, %v2056_v55 }
 0x26d   :  { %2619 = vst.msk [vmem:[%s7117_s3 + $0x1c8] sm:$0xff] %vm1382_vm0, %v2385_v5  ;;  %v2803_v45 = vsel %vm1382_vm0, %v2385_v5, 0.0  ;;  %v3009_v63 = vmul.f32 %v2385_v5, %v2385_v5  ;;  %v2215_v14 = vpop.f32.mrf.mxu3  ;;  %v2392_v4 = vpop.f32.mrf.mxu2 }
 0x26e   :  { %v2804_v49 = vadd.f32 %v2803_v45, %v2802_v54  ;;  %v6132_v28 = vadd.f32 %v2215_v14, %v1887_v8  ;;  %v1729_v16 = vpop.f32.mrf.mxu0  ;;  %v3834_v54 = vld [vmem:[%s7115_s0 + $0x3b0] sm:$0xf]  ;;  %v4374_v14 = vld [vmem:[%s7115_s0 + $0x394] sm:$0xf] }
 0x26f   :  { %v3193_v52 = vsel %vm1382_vm0, %v3009_v63, 0.0  ;;  %v1730_v2 = vadd.f32 %v5883_v36, %v1729_v16  ;;  %v2058_v29 = vpop.f32.mrf.mxu1  ;;  %v3835_v5 = vor.u32 %v4379_v19, %v3834_v54  ;;  %v3814_v45 = vld [vmem:[%s7115_s0 + $0x390] sm:$0xf]  ;;  %v4375_v63 = vld [vmem:[%s7115_s0 + $0x398] sm:$0xf0] }
 0x270   :  { %v3194_v33 = vadd.f32 %v3193_v52, %v3192_v18  ;;  %v4038_v16 = vld [vmem:[%s7115_s0 + $0x548] sm:$0xf] }
 0x271   :  { %v2059_v34 = vadd.f32 %v2058_v29, %v1730_v2  ;;  %1768 = vmatmul.bf16.gmra.mxu0 %v3803_v27 }
 0x272   :  { %2097 = vmatmul.bf16.gmra.mxu1 %v3807_v38  ;;  %4251 = vmatmul.msk.bf16.gmra.mxu3 %vm1382_vm0, %v4027_v31  ;;  %v4430_v38 = vld [vmem:[%s7115_s0 + $0x550] sm:$0xf0]  ;;  %v1892_v31 = vadd.f32 %v5883_v36, %v5425_v58 }
 0x273   :  { %v2388_v11 = vadd.f32 %v2387_v30, %v2059_v34 }
 0x275   :  { %2620 = vst.msk [vmem:[%s7117_s3 + $0x1d0] sm:$0xff] %vm1382_vm0, %v2388_v11  ;;  %v2805_v46 = vsel %vm1382_vm0, %v2388_v11, 0.0  ;;  %v3010_v18 = vmul.f32 %v2388_v11, %v2388_v11  ;;  %v2218_v30 = vpop.f32.mrf.mxu3  ;;  %v2394_v55 = vpop.f32.mrf.mxu2 }
 0x276   :  { %v2806_v50 = vadd.f32 %v2805_v46, %v2804_v49  ;;  %v6150_v9 = vadd.f32 %v2218_v30, %v1890_v35  ;;  %v1731_v20 = vpop.f32.mrf.mxu0  ;;  %v3816_v49 = vld [vmem:[%s7115_s0 + $0x39c] sm:$0xf0]  ;;  %v4039_v35 = vor.u32 %v4430_v38, %v4038_v16 }
 0x277   :  { %v3195_v1 = vsel %vm1382_vm0, %v3010_v18, 0.0  ;;  %v1732_v62 = vadd.f32 %v5883_v36, %v1731_v20  ;;  %v2060_v44 = vpop.f32.mrf.mxu1  ;;  %v3819_v19 = vor.u32 %v4374_v14, %v3816_v49 }
 0x278   :  { %v3196_v59 = vadd.f32 %v3195_v1, %v3194_v33  ;;  %v3815_v33 = vor.u32 %v4375_v63, %v3814_v45  ;;  %v4382_v1 = vld [vmem:[%s7115_s0 + $0x3d0] sm:$0xf0] }
 0x279   :  { %v2061_v8 = vadd.f32 %v2060_v44, %v1732_v62  ;;  %v1895_v62 = vadd.f32 %v5883_v36, %v5440_v17 }
 0x27a   :  { %4235 = vmatmul.msk.bf16.gmra.mxu2 %vm1382_vm0, %v3835_v5 }
 0x27b   :  { %v2390_v27 = vadd.f32 %v2389_v42, %v2061_v8 }
 0x27d   :  { %2621 = vst.msk [vmem:[%s7117_s3 + $0x1d8] sm:$0xff] %vm1382_vm0, %v2390_v27  ;;  %v2807_v42 = vsel %vm1382_vm0, %v2390_v27, 0.0  ;;  %v3011_v52 = vmul.f32 %v2390_v27, %v2390_v27  ;;  %v2220_v2 = vpop.f32.mrf.mxu3  ;;  %v2397_v29 = vpop.f32.mrf.mxu2 }
 0x27e   :  { %v2808_v34 = vadd.f32 %v2807_v42, %v2806_v50  ;;  %v6180_v11 = vadd.f32 %v2220_v2, %v1892_v31  ;;  %v1734_v54 = vpop.f32.mrf.mxu0  ;;  %v3846_v50 = vld [vmem:[%s7115_s0 + $0x3c8] sm:$0xf]  ;;  %v4377_v2 = vld [vmem:[%s7115_s0 + $0x3ac] sm:$0xf] }
 0x27f   :  { %v3197_v46 = vsel %vm1382_vm0, %v3011_v52, 0.0  ;;  %v1735_v58 = vadd.f32 %v5883_v36, %v1734_v54  ;;  %v2063_v18 = vpop.f32.mrf.mxu1  ;;  %v3847_v27 = vor.u32 %v4382_v1, %v3846_v50  ;;  %v3826_v42 = vld [vmem:[%s7115_s0 + $0x3a8] sm:$0xf]  ;;  %v4378_v52 = vld [vmem:[%s7115_s0 + $0x3b0] sm:$0xf0] }
 0x280   :  { %v3198_v30 = vadd.f32 %v3197_v46, %v3196_v59  ;;  %v4050_v54 = vld [vmem:[%s7115_s0 + $0x560] sm:$0xf] }
 0x281   :  { %v2064_v20 = vadd.f32 %v2063_v18, %v1735_v58  ;;  %1773 = vmatmul.bf16.gmra.mxu0 %v3815_v33 }
 0x282   :  { %2102 = vmatmul.bf16.gmra.mxu1 %v3819_v19  ;;  %4252 = vmatmul.msk.bf16.gmra.mxu3 %vm1382_vm0, %v4039_v35  ;;  %v4433_v19 = vld [vmem:[%s7115_s0 + $0x568] sm:$0xf0]  ;;  %v1897_v35 = vadd.f32 %v5883_v36, %v5468_v13 }
 0x283   :  { %v2393_v5 = vadd.f32 %v2392_v4, %v2064_v20 }
 0x285   :  { %2622 = vst.msk [vmem:[%s7117_s3 + $0x1e0] sm:$0xff] %vm1382_vm0, %v2393_v5  ;;  %v2809_v44 = vsel %vm1382_vm0, %v2393_v5, 0.0  ;;  %v3012_v59 = vmul.f32 %v2393_v5, %v2393_v5  ;;  %v2223_v4 = vpop.f32.mrf.mxu3  ;;  %v2399_v8 = vpop.f32.mrf.mxu2 }
 0x286   :  { %v2810_v45 = vadd.f32 %v2809_v44, %v2808_v34  ;;  %v6198_v63 = vadd.f32 %v2223_v4, %v1895_v62  ;;  %v1736_v14 = vpop.f32.mrf.mxu0  ;;  %v3828_v34 = vld [vmem:[%s7115_s0 + $0x3b4] sm:$0xf0]  ;;  %v4051_v62 = vor.u32 %v4433_v19, %v4050_v54 }
 0x287   :  { %v3199_v49 = vsel %vm1382_vm0, %v3012_v59, 0.0  ;;  %v1737_v16 = vadd.f32 %v5883_v36, %v1736_v14  ;;  %v2065_v17 = vpop.f32.mrf.mxu1  ;;  %v3831_v1 = vor.u32 %v4377_v2, %v3828_v34 }
 0x288   :  { %v3200_v38 = vadd.f32 %v3199_v49, %v3198_v30  ;;  %v3827_v30 = vor.u32 %v4378_v52, %v3826_v42  ;;  %v4385_v49 = vld [vmem:[%s7115_s0 + $0x3e8] sm:$0xf0] }
 0x289   :  { %v2066_v31 = vadd.f32 %v2065_v17, %v1737_v16  ;;  %v1900_v16 = vadd.f32 %v5883_v36, %v5483_v51 }
 0x28a   :  { %4236 = vmatmul.msk.bf16.gmra.mxu2 %vm1382_vm0, %v3847_v27 }
 0x28b   :  { %v2395_v33 = vadd.f32 %v2394_v55, %v2066_v31 }
 0x28d   :  { %2623 = vst.msk [vmem:[%s7117_s3 + $0x1e8] sm:$0xff] %vm1382_vm0, %v2395_v33  ;;  %v2811_v55 = vsel %vm1382_vm0, %v2395_v33, 0.0  ;;  %v3013_v46 = vmul.f32 %v2395_v33, %v2395_v33  ;;  %v2225_v58 = vpop.f32.mrf.mxu3  ;;  %v2402_v18 = vpop.f32.mrf.mxu2 }
 0x28e   :  { %v2812_v20 = vadd.f32 %v2811_v55, %v2810_v45  ;;  %v6228_v5 = vadd.f32 %v2225_v58, %v1897_v35  ;;  %v1739_v50 = vpop.f32.mrf.mxu0  ;;  %v3858_v45 = vld [vmem:[%s7115_s0 + $0x3e0] sm:$0xf]  ;;  %v4380_v58 = vld [vmem:[%s7115_s0 + $0x3c4] sm:$0xf] }
 0x28f   :  { %v3201_v44 = vsel %vm1382_vm0, %v3013_v46, 0.0  ;;  %v1740_v13 = vadd.f32 %v5883_v36, %v1739_v50  ;;  %v2068_v59 = vpop.f32.mrf.mxu1  ;;  %v3859_v33 = vor.u32 %v4385_v49, %v3858_v45  ;;  %v3838_v55 = vld [vmem:[%s7115_s0 + $0x3c0] sm:$0xf]  ;;  %v4381_v46 = vld [vmem:[%s7115_s0 + $0x3c8] sm:$0xf0] }
 0x290   :  { %v3202_v4 = vadd.f32 %v3201_v44, %v3200_v38  ;;  %v4062_v50 = vld [vmem:[%s7115_s0 + $0x578] sm:$0xf] }
 0x291   :  { %v2069_v14 = vadd.f32 %v2068_v59, %v1740_v13  ;;  %1778 = vmatmul.bf16.gmra.mxu0 %v3827_v30 }
 0x292   :  { %2107 = vmatmul.bf16.gmra.mxu1 %v3831_v1  ;;  %4253 = vmatmul.msk.bf16.gmra.mxu3 %vm1382_vm0, %v4051_v62  ;;  %v4436_v1 = vld [vmem:[%s7115_s0 + $0x580] sm:$0xf0]  ;;  %v1902_v62 = vadd.f32 %v5883_v36, %v5511_v23 }
 0x293   :  { %v2398_v27 = vadd.f32 %v2397_v29, %v2069_v14 }
 0x295   :  { %2624 = vst.msk [vmem:[%s7117_s3 + $0x1f0] sm:$0xff] %vm1382_vm0, %v2398_v27  ;;  %v2813_v17 = vsel %vm1382_vm0, %v2398_v27, 0.0  ;;  %v3014_v38 = vmul.f32 %v2398_v27, %v2398_v27  ;;  %v2228_v29 = vpop.f32.mrf.mxu3  ;;  %v2404_v31 = vpop.f32.mrf.mxu2 }
 0x296   :  { %v2814_v42 = vadd.f32 %v2813_v17, %v2812_v20  ;;  %v6246_v52 = vadd.f32 %v2228_v29, %v1900_v16  ;;  %v1741_v2 = vpop.f32.mrf.mxu0  ;;  %v3840_v20 = vld [vmem:[%s7115_s0 + $0x3cc] sm:$0xf0]  ;;  %v4063_v16 = vor.u32 %v4436_v1, %v4062_v50 }
 0x297   :  { %v3203_v34 = vsel %vm1382_vm0, %v3014_v38, 0.0  ;;  %v1742_v54 = vadd.f32 %v5883_v36, %v1741_v2  ;;  %v2070_v51 = vpop.f32.mrf.mxu1  ;;  %v3843_v49 = vor.u32 %v4380_v58, %v3840_v20 }
 0x298   :  { %v3204_v19 = vadd.f32 %v3203_v34, %v3202_v4  ;;  %v3839_v4 = vor.u32 %v4381_v46, %v3838_v55  ;;  %v4388_v34 = vld [vmem:[%s7115_s0 + $0x400] sm:$0xf0] }
 0x299   :  { %v2071_v35 = vadd.f32 %v2070_v51, %v1742_v54 }
 0x29a   :  { %4237 = vmatmul.msk.bf16.gmra.mxu2 %vm1382_vm0, %v3859_v33 }
 0x29b   :  { %v2400_v30 = vadd.f32 %v2399_v8, %v2071_v35 }
 0x29d   :  { %2625 = vst.msk [vmem:[%s7117_s3 + $0x1f8] sm:$0xff] %vm1382_vm0, %v2400_v30  ;;  %v2815_v8 = vsel %vm1382_vm0, %v2400_v30, 0.0  ;;  %v3015_v44 = vmul.f32 %v2400_v30, %v2400_v30  ;;  %v2230_v13 = vpop.f32.mrf.mxu3  ;;  %v2407_v59 = vpop.f32.mrf.mxu2 }
 0x29e   :  { %v2816_v14 = vadd.f32 %v2815_v8, %v2814_v42  ;;  %v6276_v27 = vadd.f32 %v2230_v13, %v1902_v62  ;;  %v1744_v45 = vpop.f32.mrf.mxu0  ;;  %v3870_v42 = vld [vmem:[%s7115_s0 + $0x3f8] sm:$0xf]  ;;  %v4384_v8 = vld [vmem:[%s7115_s0 + $0x3e0] sm:$0xf0] }
 0x29f   :  { %v3205_v17 = vsel %vm1382_vm0, %v3015_v44, 0.0  ;;  %v1745_v23 = vadd.f32 %v5883_v36, %v1744_v45  ;;  %v2073_v38 = vpop.f32.mrf.mxu1  ;;  %v3871_v58 = vor.u32 %v4388_v34, %v3870_v42  ;;  %v4383_v44 = vld [vmem:[%s7115_s0 + $0x3dc] sm:$0xf] }
 0x2a0   :  { %v3206_v29 = vadd.f32 %v3205_v17, %v3204_v19  ;;  %v4439_v45 = vld [vmem:[%s7115_s0 + $0x598] sm:$0xf0] }
 0x2a1   :  { %v2074_v2 = vadd.f32 %v2073_v38, %v1745_v23  ;;  %1783 = vmatmul.bf16.gmra.mxu0 %v3839_v4  ;;  %v3852_v4 = vld [vmem:[%s7115_s0 + $0x3e4] sm:$0xf0] }
 0x2a2   :  { %2112 = vmatmul.bf16.gmra.mxu1 %v3843_v49  ;;  %4254 = vmatmul.msk.bf16.gmra.mxu3 %vm1382_vm0, %v4063_v16 }
 0x2a3   :  { %v2403_v33 = vadd.f32 %v2402_v18, %v2074_v2 }
 0x2a5   :  { %2626 = vst.msk [vmem:[%s7117_s3 + $0x200] sm:$0xff] %vm1382_vm0, %v2403_v33  ;;  %v2817_v54 = vsel %vm1382_vm0, %v2403_v33, 0.0  ;;  %v3016_v51 = vmul.f32 %v2403_v33, %v2403_v33  ;;  %v2409_v19 = vpop.f32.mrf.mxu2  ;;  %v2492_v35 = vpop.f32.mrf.mxu3  ;;  %v3855_v33 = vor.u32 %v4383_v44, %v3852_v4 }
 0x2a6   :  { %v2818_v55 = vadd.f32 %v2817_v54, %v2816_v14  ;;  %v6293_v18 = vadd.f32 %v2492_v35, %v5622_v26  ;;  %v1746_v46 = vpop.f32.mrf.mxu0  ;;  %v3850_v26 = vld [vmem:[%s7115_s0 + $0x3d8] sm:$0xf]  ;;  %v4074_v14 = vld [vmem:[%s7115_s0 + $0x590] sm:$0xf] }
 0x2a7   :  { %v3207_v30 = vsel %vm1382_vm0, %v3016_v51, 0.0  ;;  %v1747_v20 = vadd.f32 %v5883_v36, %v1746_v46  ;;  %v2075_v50 = vpop.f32.mrf.mxu1  ;;  %v3851_v23 = vor.u32 %v4384_v8, %v3850_v26  ;;  %v4075_v42 = vor.u32 %v4439_v45, %v4074_v14 }
 0x2a8   :  { %v3208_v1 = vadd.f32 %v3207_v30, %v3206_v29  ;;  %2662 = vst.msk [vmem:[%s7117_s3 + $0x320] sm:$0xff] %vm1382_vm0, %v6293_v18 }
 0x2a9   :  { %v2076_v62 = vadd.f32 %v2075_v50, %v1747_v20 }
 0x2aa   :  { %4238 = vmatmul.msk.bf16.gmra.mxu2 %vm1382_vm0, %v3871_v58  ;;  %v4391_v58 = vld [vmem:[%s7115_s0 + $0x418] sm:$0xf0] }
 0x2ab   :  { %v2405_v13 = vadd.f32 %v2404_v31, %v2076_v62 }
 0x2ad   :  { %2627 = vst.msk [vmem:[%s7117_s3 + $0x208] sm:$0xff] %vm1382_vm0, %v2405_v13  ;;  %v2819_v49 = vsel %vm1382_vm0, %v2405_v13, 0.0  ;;  %v3017_v31 = vmul.f32 %v2405_v13, %v2405_v13  ;;  %v6326_v16 = vpop.f32.mrf.mxu2  ;;  %v2494_v17 = vpop.f32.mrf.mxu3 }
 0x2ae   :  { %v2820_v38 = vadd.f32 %v2819_v49, %v2818_v55  ;;  %v6329_v29 = vadd.f32 %v2494_v17, %v5652_v10  ;;  %v1749_v2 = vpop.f32.mrf.mxu0  ;;  %v3882_v55 = vld [vmem:[%s7115_s0 + $0x410] sm:$0xf]  ;;  %v4387_v49 = vld [vmem:[%s7115_s0 + $0x3f8] sm:$0xf0] }
 0x2af   :  { %v3209_v34 = vsel %vm1382_vm0, %v3017_v31, 0.0  ;;  %v1750_v54 = vadd.f32 %v5883_v36, %v1749_v2  ;;  %v2078_v51 = vpop.f32.mrf.mxu1  ;;  %v3883_v8 = vor.u32 %v4391_v58, %v3882_v55  ;;  %v4386_v31 = vld [vmem:[%s7115_s0 + $0x3f4] sm:$0xf] }
 0x2b0   :  { %v3210_v35 = vadd.f32 %v3209_v34, %v3208_v1  ;;  %2663 = vst.msk [vmem:[%s7117_s3 + $0x328] sm:$0xff] %vm1382_vm0, %v6329_v29  ;;  %v4442_v2 = vld [vmem:[%s7115_s0 + $0x5b0] sm:$0xf0] }
 0x2b1   :  { %v2079_v46 = vadd.f32 %v2078_v51, %v1750_v54  ;;  %1788 = vmatmul.bf16.gmra.mxu0 %v3851_v23  ;;  %v3864_v23 = vld [vmem:[%s7115_s0 + $0x3fc] sm:$0xf0] }
 0x2b2   :  { %2117 = vmatmul.bf16.gmra.mxu1 %v3855_v33  ;;  %4255 = vmatmul.msk.bf16.gmra.mxu3 %vm1382_vm0, %v4075_v42 }
 0x2b3   :  { %v2408_v10 = vadd.f32 %v2407_v59, %v2079_v46 }
 0x2b5   :  { %2628 = vst.msk [vmem:[%s7117_s3 + $0x210] sm:$0xff] %vm1382_vm0, %v2408_v10  ;;  %v2821_v30 = vsel %vm1382_vm0, %v2408_v10, 0.0  ;;  %v3018_v20 = vmul.f32 %v2408_v10, %v2408_v10  ;;  %v2414_v50 = vpop.f32.mrf.mxu2  ;;  %v2497_v1 = vpop.f32.mrf.mxu3  ;;  %v3867_v10 = vor.u32 %v4386_v31, %v3864_v23 }
 0x2b6   :  { %v2822_v62 = vadd.f32 %v2821_v30, %v2820_v38  ;;  %v6351_v59 = vadd.f32 %v2497_v1, %v5669_v56  ;;  %v1751_v26 = vpop.f32.mrf.mxu0  ;;  %v3862_v56 = vld [vmem:[%s7115_s0 + $0x3f0] sm:$0xf]  ;;  %v4086_v38 = vld [vmem:[%s7115_s0 + $0x5a8] sm:$0xf] }
 0x2b7   :  { %v3211_v44 = vsel %vm1382_vm0, %v3018_v20, 0.0  ;;  %v1752_v13 = vadd.f32 %v5883_v36, %v1751_v26  ;;  %v2080_v4 = vpop.f32.mrf.mxu1  ;;  %v3863_v54 = vor.u32 %v4387_v49, %v3862_v56  ;;  %v4087_v55 = vor.u32 %v4442_v2, %v4086_v38 }
 0x2b8   :  { %v3212_v14 = vadd.f32 %v3211_v44, %v3210_v35  ;;  %2664 = vst.msk [vmem:[%s7117_s3 + $0x330] sm:$0xff] %vm1382_vm0, %v6351_v59 }
 0x2b9   :  { %v2081_v45 = vadd.f32 %v2080_v4, %v1752_v13 }
 0x2ba   :  { %4239 = vmatmul.msk.bf16.gmra.mxu2 %vm1382_vm0, %v3883_v8  ;;  %v4394_v8 = vld [vmem:[%s7115_s0 + $0x430] sm:$0xf0] }
 0x2bb   :  { %v2410_v17 = vadd.f32 %v2409_v19, %v2081_v45 }
 0x2bd   :  { %2629 = vst.msk [vmem:[%s7117_s3 + $0x218] sm:$0xff] %vm1382_vm0, %v2410_v17  ;;  %v2823_v33 = vsel %vm1382_vm0, %v2410_v17, 0.0  ;;  %v3019_v19 = vmul.f32 %v2410_v17, %v2410_v17  ;;  %v6384_v42 = vpop.f32.mrf.mxu2  ;;  %v2499_v34 = vpop.f32.mrf.mxu3 }
 0x2be   :  { %v2824_v51 = vadd.f32 %v2823_v33, %v2822_v62  ;;  %v6387_v35 = vadd.f32 %v2499_v34, %v5699_v39  ;;  %v1754_v46 = vpop.f32.mrf.mxu0  ;;  %v3894_v62 = vld [vmem:[%s7115_s0 + $0x428] sm:$0xf]  ;;  %v4390_v33 = vld [vmem:[%s7115_s0 + $0x410] sm:$0xf0]  ;;  %v3876_v34 = vld [vmem:[%s7115_s0 + $0x414] sm:$0xf0] }
 0x2bf   :  { %v3213_v58 = vsel %vm1382_vm0, %v3019_v19, 0.0  ;;  %v1755_v30 = vadd.f32 %v5883_v36, %v1754_v46  ;;  %v2083_v20 = vpop.f32.mrf.mxu1  ;;  %v3895_v49 = vor.u32 %v4394_v8, %v3894_v62  ;;  %v6454_v8 = vld [vmem:[%s7116_s2] ss:$0 sm:$0xff] }
 0x2c0   :  { %v3214_v1 = vadd.f32 %v3213_v58, %v3212_v14  ;;  %2665 = vst.msk [vmem:[%s7117_s3 + $0x338] sm:$0xff] %vm1382_vm0, %v6387_v35 }
 0x2c1   :  { %v2084_v26 = vadd.f32 %v2083_v20, %v1755_v30  ;;  %1793 = vmatmul.bf16.gmra.mxu0 %v3863_v54  ;;  %v4098_v54 = vld [vmem:[%s7115_s0 + $0x5c0] sm:$0xf] }
 0x2c2   :  { %2122 = vmatmul.bf16.gmra.mxu1 %v3867_v10  ;;  %4256 = vmatmul.msk.bf16.gmra.mxu3 %vm1382_vm0, %v4087_v55 }
 0x2c3   :  { %v2413_v39 = vadd.f32 %v6326_v16, %v2084_v26 }
 0x2c5   :  { %2630 = vst.msk [vmem:[%s7117_s3 + $0x220] sm:$0xff] %vm1382_vm0, %v2413_v39  ;;  %v2825_v44 = vsel %vm1382_vm0, %v2413_v39, 0.0  ;;  %v3020_v13 = vmul.f32 %v2413_v39, %v2413_v39  ;;  %v6409_v4 = vpop.f32.mrf.mxu2  ;;  %v2502_v14 = vpop.f32.mrf.mxu3 }
 0x2c6   :  { %v2826_v16 = vadd.f32 %v2825_v44, %v2824_v51  ;;  %v6412_v45 = vadd.f32 %v2502_v14, %v5716_v12  ;;  %v1756_v56 = vpop.f32.mrf.mxu0  ;;  %v3874_v12 = vld [vmem:[%s7115_s0 + $0x408] sm:$0xf]  ;;  %v4445_v51 = vld [vmem:[%s7115_s0 + $0x5c8] sm:$0xf0] }
 0x2c7   :  { %v3215_v31 = vsel %vm1382_vm0, %v3020_v13, 0.0  ;;  %v1757_v17 = vadd.f32 %v5883_v36, %v1756_v56  ;;  %v2085_v23 = vpop.f32.mrf.mxu1  ;;  %v4389_v36 = vld [vmem:[%s7115_s0 + $0x40c] sm:$0xf]  ;;  %v3875_v58 = vor.u32 %v4390_v33, %v3874_v12  ;;  %v4099_v39 = vor.u32 %v4445_v51, %v4098_v54  ;;  %v3906_v56 = vld [vmem:[%s7115_s0 + $0x440] sm:$0xf] }
 0x2c8   :  { %v3216_v38 = vadd.f32 %v3215_v31, %v3214_v1  ;;  %2666 = vst.msk [vmem:[%s7117_s3 + $0x340] sm:$0xff] %vm1382_vm0, %v6412_v45  ;;  %v3879_v26 = vor.u32 %v4389_v36, %v3876_v34 }
 0x2c9   :  { %v2086_v2 = vadd.f32 %v2085_v23, %v1757_v17 }
 0x2ca   :  { %4240 = vmatmul.msk.bf16.gmra.mxu2 %vm1382_vm0, %v3895_v49  ;;  %v4397_v49 = vld [vmem:[%s7115_s0 + $0x448] sm:$0xf0] }
 0x2cb   :  { %v2415_v19 = vadd.f32 %v2414_v50, %v2086_v2  ;;  %v3907_v33 = vor.u32 %v4397_v49, %v3906_v56 }
 0x2cd   :  { %2631 = vst.msk [vmem:[%s7117_s3 + $0x228] sm:$0xff] %vm1382_vm0, %v2415_v19  ;;  %v2827_v46 = vsel %vm1382_vm0, %v2415_v19, 0.0  ;;  %v3021_v50 = vmul.f32 %v2415_v19, %v2415_v19  ;;  %v6445_v10 = vpop.f32.mrf.mxu2  ;;  %v2504_v55 = vpop.f32.mrf.mxu3 }
 0x2ce   :  { %v2828_v30 = vadd.f32 %v2827_v46, %v2826_v16  ;;  %v6448_v20 = vadd.f32 %v2504_v55, %v5746_v0  ;;  %v1759_v1 = vpop.f32.mrf.mxu0  ;;  %v4393_v46 = vld [vmem:[%s7115_s0 + $0x428] sm:$0xf0] }
 0x2cf   :  { %v3217_v62 = vsel %vm1382_vm0, %v3021_v50, 0.0  ;;  %v1760_v44 = vadd.f32 %v6454_v8, %v1759_v1  ;;  %v2088_v13 = vpop.f32.mrf.mxu1  ;;  %v4392_v50 = vld [vmem:[%s7115_s0 + $0x424] sm:$0xf] }
 0x2d0   :  { %v3218_v14 = vadd.f32 %v3217_v62, %v3216_v38  ;;  %2667 = vst.msk [vmem:[%s7117_s3 + $0x348] sm:$0xff] %vm1382_vm0, %v6448_v20  ;;  %v4448_v1 = vld [vmem:[%s7115_s0 + $0x5e0] sm:$0xf0] }
 0x2d1   :  { %v2089_v0 = vadd.f32 %v2088_v13, %v1760_v44  ;;  %1798 = vmatmul.bf16.gmra.mxu0 %v3875_v58  ;;  %v3888_v58 = vld [vmem:[%s7115_s0 + $0x42c] sm:$0xf0] }
 0x2d2   :  { %2127 = vmatmul.bf16.gmra.mxu1 %v3879_v26  ;;  %4257 = vmatmul.msk.bf16.gmra.mxu3 %vm1382_vm0, %v4099_v39 }
 0x2d3   :  { %v2418_v16 = vadd.f32 %v6384_v42, %v2089_v0 }
 0x2d5   :  { %2632 = vst.msk [vmem:[%s7117_s3 + $0x230] sm:$0xff] %vm1382_vm0, %v2418_v16  ;;  %v2829_v31 = vsel %vm1382_vm0, %v2418_v16, 0.0  ;;  %v3022_v17 = vmul.f32 %v2418_v16, %v2418_v16  ;;  %v2424_v23 = vpop.f32.mrf.mxu2  ;;  %v2507_v38 = vpop.f32.mrf.mxu3  ;;  %v3891_v16 = vor.u32 %v4392_v50, %v3888_v58 }
 0x2d6   :  { %v2830_v2 = vadd.f32 %v2829_v31, %v2828_v30  ;;  %v6476_v42 = vadd.f32 %v2507_v38, %v5763_v48  ;;  %v1761_v12 = vpop.f32.mrf.mxu0  ;;  %v3886_v48 = vld [vmem:[%s7115_s0 + $0x420] sm:$0xf]  ;;  %v4110_v30 = vld [vmem:[%s7115_s0 + $0x5d8] sm:$0xf] }
 0x2d7   :  { %v3219_v36 = vsel %vm1382_vm0, %v3022_v17, 0.0  ;;  %v1762_v19 = vadd.f32 %v6454_v8, %v1761_v12  ;;  %v2090_v34 = vpop.f32.mrf.mxu1  ;;  %v3887_v44 = vor.u32 %v4393_v46, %v3886_v48  ;;  %v4111_v56 = vor.u32 %v4448_v1, %v4110_v30 }
 0x2d8   :  { %v3220_v54 = vadd.f32 %v3219_v36, %v3218_v14  ;;  %2668 = vst.msk [vmem:[%s7117_s3 + $0x350] sm:$0xff] %vm1382_vm0, %v6476_v42 }
 0x2d9   :  { %v2091_v51 = vadd.f32 %v2090_v34, %v1762_v19 }
 0x2da   :  { %4241 = vmatmul.msk.bf16.gmra.mxu2 %vm1382_vm0, %v3907_v33  ;;  %v4400_v33 = vld [vmem:[%s7115_s0 + $0x460] sm:$0xf0] }
 0x2db   :  { %v2420_v55 = vadd.f32 %v6409_v4, %v2091_v51 }
 0x2dd   :  { %2633 = vst.msk [vmem:[%s7117_s3 + $0x238] sm:$0xff] %vm1382_vm0, %v2420_v55  ;;  %v2831_v26 = vsel %vm1382_vm0, %v2420_v55, 0.0  ;;  %v3023_v4 = vmul.f32 %v2420_v55, %v2420_v55  ;;  %v6510_v39 = vpop.f32.mrf.mxu2  ;;  %v2509_v62 = vpop.f32.mrf.mxu3 }
 0x2de   :  { %v2832_v13 = vadd.f32 %v2831_v26, %v2830_v2  ;;  %v6513_v14 = vadd.f32 %v2509_v62, %v5793_v24  ;;  %v1764_v0 = vpop.f32.mrf.mxu0  ;;  %v3918_v2 = vld [vmem:[%s7115_s0 + $0x458] sm:$0xf]  ;;  %v4396_v26 = vld [vmem:[%s7115_s0 + $0x440] sm:$0xf0] }
 0x2df   :  { %v3221_v49 = vsel %vm1382_vm0, %v3023_v4, 0.0  ;;  %v1765_v31 = vadd.f32 %v6454_v8, %v1764_v0  ;;  %v2093_v17 = vpop.f32.mrf.mxu1  ;;  %v3919_v46 = vor.u32 %v4400_v33, %v3918_v2  ;;  %v4395_v4 = vld [vmem:[%s7115_s0 + $0x43c] sm:$0xf] }
 0x2e0   :  { %v3222_v38 = vadd.f32 %v3221_v49, %v3220_v54  ;;  %2669 = vst.msk [vmem:[%s7117_s3 + $0x358] sm:$0xff] %vm1382_vm0, %v6513_v14  ;;  %v4451_v0 = vld [vmem:[%s7115_s0 + $0x5f8] sm:$0xf0] }
 0x2e1   :  { %v2094_v12 = vadd.f32 %v2093_v17, %v1765_v31  ;;  %1803 = vmatmul.bf16.gmra.mxu0 %v3887_v44  ;;  %v3900_v44 = vld [vmem:[%s7115_s0 + $0x444] sm:$0xf0] }
 0x2e2   :  { %2132 = vmatmul.bf16.gmra.mxu1 %v3891_v16  ;;  %4258 = vmatmul.msk.bf16.gmra.mxu3 %vm1382_vm0, %v4111_v56 }
 0x2e3   :  { %v2423_v24 = vadd.f32 %v6445_v10, %v2094_v12 }
 0x2e5   :  { %2634 = vst.msk [vmem:[%s7117_s3 + $0x240] sm:$0xff] %vm1382_vm0, %v2423_v24  ;;  %v2833_v36 = vsel %vm1382_vm0, %v2423_v24, 0.0  ;;  %v3024_v19 = vmul.f32 %v2423_v24, %v2423_v24  ;;  %v2429_v34 = vpop.f32.mrf.mxu2  ;;  %v2512_v54 = vpop.f32.mrf.mxu3  ;;  %v3903_v24 = vor.u32 %v4395_v4, %v3900_v44 }
 0x2e6   :  { %v2834_v51 = vadd.f32 %v2833_v36, %v2832_v13  ;;  %v6536_v10 = vadd.f32 %v2512_v54, %v5810_v22  ;;  %v1766_v48 = vpop.f32.mrf.mxu0  ;;  %v3898_v22 = vld [vmem:[%s7115_s0 + $0x438] sm:$0xf]  ;;  %v4122_v13 = vld [vmem:[%s7115_s0 + $0x5f0] sm:$0xf] }
 0x2e7   :  { %v3223_v50 = vsel %vm1382_vm0, %v3024_v19, 0.0  ;;  %v1767_v55 = vadd.f32 %v6454_v8, %v1766_v48  ;;  %v2095_v58 = vpop.f32.mrf.mxu1  ;;  %v3899_v31 = vor.u32 %v4396_v26, %v3898_v22  ;;  %v4123_v2 = vor.u32 %v4451_v0, %v4122_v13 }
 0x2e8   :  { %v3224_v30 = vadd.f32 %v3223_v50, %v3222_v38  ;;  %2670 = vst.msk [vmem:[%s7117_s3 + $0x360] sm:$0xff] %vm1382_vm0, %v6536_v10 }
 0x2e9   :  { %v2096_v1 = vadd.f32 %v2095_v58, %v1767_v55 }
 0x2ea   :  { %4242 = vmatmul.msk.bf16.gmra.mxu2 %vm1382_vm0, %v3919_v46  ;;  %v4403_v46 = vld [vmem:[%s7115_s0 + $0x478] sm:$0xf0] }
 0x2eb   :  { %v2425_v62 = vadd.f32 %v2424_v23, %v2096_v1 }
 0x2ed   :  { %2635 = vst.msk [vmem:[%s7117_s3 + $0x248] sm:$0xff] %vm1382_vm0, %v2425_v62  ;;  %v2835_v16 = vsel %vm1382_vm0, %v2425_v62, 0.0  ;;  %v3025_v23 = vmul.f32 %v2425_v62, %v2425_v62  ;;  %v2432_v56 = vpop.f32.mrf.mxu2  ;;  %v2514_v49 = vpop.f32.mrf.mxu3 }
 0x2ee   :  { %v2836_v17 = vadd.f32 %v2835_v16, %v2834_v51  ;;  %v6570_v38 = vadd.f32 %v2514_v49, %v5840_v40  ;;  %v1769_v12 = vpop.f32.mrf.mxu0  ;;  %v3930_v51 = vld [vmem:[%s7115_s0 + $0x470] sm:$0xf]  ;;  %v4399_v16 = vld [vmem:[%s7115_s0 + $0x458] sm:$0xf0]  ;;  %v4398_v49 = vld [vmem:[%s7115_s0 + $0x454] sm:$0xf] }
 0x2ef   :  { %v3225_v33 = vsel %vm1382_vm0, %v3025_v23, 0.0  ;;  %v1770_v36 = vadd.f32 %v6454_v8, %v1769_v12  ;;  %v2098_v19 = vpop.f32.mrf.mxu1  ;;  %v3931_v26 = vor.u32 %v4403_v46, %v3930_v51 }
 0x2f0   :  { %v3226_v54 = vadd.f32 %v3225_v33, %v3224_v30  ;;  %2671 = vst.msk [vmem:[%s7117_s3 + $0x368] sm:$0xff] %vm1382_vm0, %v6570_v38 }
 0x2f1   :  { %v2099_v48 = vadd.f32 %v2098_v19, %v1770_v36  ;;  %1808 = vmatmul.bf16.gmra.mxu0 %v3899_v31  ;;  %v3912_v31 = vld [vmem:[%s7115_s0 + $0x45c] sm:$0xf0] }
 0x2f2   :  { %2137 = vmatmul.bf16.gmra.mxu1 %v3903_v24  ;;  %4259 = vmatmul.msk.bf16.gmra.mxu3 %vm1382_vm0, %v4123_v2 }
 0x2f3   :  { %v2428_v40 = vadd.f32 %v6510_v39, %v2099_v48 }
 0x2f5   :  { %2636 = vst.msk [vmem:[%s7117_s3 + $0x250] sm:$0xff] %vm1382_vm0, %v2428_v40  ;;  %v2837_v50 = vsel %vm1382_vm0, %v2428_v40, 0.0  ;;  %v3026_v55 = vmul.f32 %v2428_v40, %v2428_v40  ;;  %v2434_v58 = vpop.f32.mrf.mxu2  ;;  %v2517_v30 = vpop.f32.mrf.mxu3 }
 0x2f6   :  { %v2838_v1 = vadd.f32 %v2837_v50, %v2836_v17  ;;  %v6593_v39 = vadd.f32 %v2517_v30, %v5857_v61  ;;  %v1771_v22 = vpop.f32.mrf.mxu0  ;;  %v3910_v61 = vld [vmem:[%s7115_s0 + $0x450] sm:$0xf]  ;;  %v4406_v30 = vld [vmem:[%s7115_s0 + $0x490] sm:$0xf0] }
 0x2f7   :  { %v3227_v4 = vsel %vm1382_vm0, %v3026_v55, 0.0  ;;  %v1772_v62 = vadd.f32 %v6454_v8, %v1771_v22  ;;  %v2100_v44 = vpop.f32.mrf.mxu1  ;;  %v3911_v33 = vor.u32 %v4399_v16, %v3910_v61 }
 0x2f8   :  { %v3228_v13 = vadd.f32 %v3227_v4, %v3226_v54  ;;  %2672 = vst.msk [vmem:[%s7117_s3 + $0x370] sm:$0xff] %vm1382_vm0, %v6593_v39  ;;  %v3915_v54 = vor.u32 %v4398_v49, %v3912_v31  ;;  %v4402_v31 = vld [vmem:[%s7115_s0 + $0x470] sm:$0xf0] }
 0x2f9   :  { %v2101_v0 = vadd.f32 %v2100_v44, %v1772_v62 }
 0x2fa   :  { %4243 = vmatmul.msk.bf16.gmra.mxu2 %vm1382_vm0, %v3931_v26 }
 0x2fb   :  { %v2430_v23 = vadd.f32 %v2429_v34, %v2101_v0 }
 0x2fd   :  { %2637 = vst.msk [vmem:[%s7117_s3 + $0x258] sm:$0xff] %vm1382_vm0, %v2430_v23  ;;  %v2839_v17 = vsel %vm1382_vm0, %v2430_v23, 0.0  ;;  %v3027_v12 = vmul.f32 %v2430_v23, %v2430_v23  ;;  %v2437_v24 = vpop.f32.mrf.mxu2  ;;  %v2519_v2 = vpop.f32.mrf.mxu3 }
 0x2fe   :  { %v2840_v34 = vadd.f32 %v2839_v17, %v2838_v1  ;;  %v6621_v36 = vadd.f32 %v2519_v2, %v5892_v60  ;;  %v1774_v19 = vpop.f32.mrf.mxu0  ;;  %v3942_v60 = vld [vmem:[%s7115_s0 + $0x488] sm:$0xf]  ;;  %v3924_v2 = vld [vmem:[%s7115_s0 + $0x474] sm:$0xf0] }
 0x2ff   :  { %v3229_v48 = vsel %vm1382_vm0, %v3027_v12, 0.0  ;;  %v1775_v40 = vadd.f32 %v6454_v8, %v1774_v19  ;;  %v2103_v51 = vpop.f32.mrf.mxu1  ;;  %v4401_v12 = vld [vmem:[%s7115_s0 + $0x46c] sm:$0xf] }
 0x300   :  { %v3230_v46 = vadd.f32 %v3229_v48, %v3228_v13  ;;  %2673 = vst.msk [vmem:[%s7117_s3 + $0x378] sm:$0xff] %vm1382_vm0, %v6621_v36  ;;  %v3943_v13 = vor.u32 %v4406_v30, %v3942_v60 }
 0x301   :  { %v2104_v50 = vadd.f32 %v2103_v51, %v1775_v40  ;;  %1813 = vmatmul.bf16.gmra.mxu0 %v3911_v33 }
 0x302   :  { %2142 = vmatmul.bf16.gmra.mxu1 %v3915_v54 }
 0x303   :  { %v2433_v55 = vadd.f32 %v2432_v56, %v2104_v50 }
 0x305   :  { %2638 = vst.msk [vmem:[%s7117_s3 + $0x260] sm:$0xff] %vm1382_vm0, %v2433_v55  ;;  %v2841_v1 = vsel %vm1382_vm0, %v2433_v55, 0.0  ;;  %v3028_v22 = vmul.f32 %v2433_v55, %v2433_v55  ;;  %v2439_v26 = vpop.f32.mrf.mxu2  ;;  %v2522_v4 = vpop.f32.mrf.mxu3 }
 0x306   :  { %v2842_v62 = vadd.f32 %v2841_v1, %v2840_v34  ;;  %v6642_v56 = vadd.f32 %v2522_v4, %v5910_v37  ;;  %v1776_v44 = vpop.f32.mrf.mxu0  ;;  %v3922_v37 = vld [vmem:[%s7115_s0 + $0x468] sm:$0xf]  ;;  %v4409_v4 = vld [vmem:[%s7115_s0 + $0x4a8] sm:$0xf0] }
 0x307   :  { %v3231_v0 = vsel %vm1382_vm0, %v3028_v22, 0.0  ;;  %v1777_v61 = vadd.f32 %v6454_v8, %v1776_v44  ;;  %v2105_v16 = vpop.f32.mrf.mxu1  ;;  %v3923_v48 = vor.u32 %v4402_v31, %v3922_v37 }
 0x308   :  { %v3232_v23 = vadd.f32 %v3231_v0, %v3230_v46  ;;  %2674 = vst.msk [vmem:[%s7117_s3 + $0x380] sm:$0xff] %vm1382_vm0, %v6642_v56  ;;  %v3927_v46 = vor.u32 %v4401_v12, %v3924_v2 }
 0x309   :  { %v2106_v49 = vadd.f32 %v2105_v16, %v1777_v61 }
 0x30a   :  { %4244 = vmatmul.msk.bf16.gmra.mxu2 %vm1382_vm0, %v3943_v13 }
 0x30b   :  { %v2435_v17 = vadd.f32 %v2434_v58, %v2106_v49 }
 0x30d   :  { %2639 = vst.msk [vmem:[%s7117_s3 + $0x268] sm:$0xff] %vm1382_vm0, %v2435_v17  ;;  %v2843_v33 = vsel %vm1382_vm0, %v2435_v17, 0.0  ;;  %v3029_v34 = vmul.f32 %v2435_v17, %v2435_v17  ;;  %v2442_v19 = vpop.f32.mrf.mxu2  ;;  %v2524_v54 = vpop.f32.mrf.mxu3 }
 0x30e   :  { %v2844_v58 = vadd.f32 %v2843_v33, %v2842_v62  ;;  %v6670_v40 = vadd.f32 %v2524_v54, %v5940_v47  ;;  %v1779_v51 = vpop.f32.mrf.mxu0  ;;  %v3954_v47 = vld [vmem:[%s7115_s0 + $0x4a0] sm:$0xf] }
 0x30f   :  { %v3233_v50 = vsel %vm1382_vm0, %v3029_v34, 0.0  ;;  %v1780_v55 = vadd.f32 %v6454_v8, %v1779_v51  ;;  %v2108_v60 = vpop.f32.mrf.mxu1 }
 0x310   :  { %v3234_v30 = vadd.f32 %v3233_v50, %v3232_v23  ;;  %2675 = vst.msk [vmem:[%s7117_s3 + $0x388] sm:$0xff] %vm1382_vm0, %v6670_v40  ;;  %v3955_v23 = vor.u32 %v4409_v4, %v3954_v47 }
 0x311   :  { %v2109_v1 = vadd.f32 %v2108_v60, %v1780_v55  ;;  %1818 = vmatmul.bf16.gmra.mxu0 %v3923_v48 }
 0x312   :  { %2147 = vmatmul.bf16.gmra.mxu1 %v3927_v46 }
 0x313   :  { %v2438_v22 = vadd.f32 %v2437_v24, %v2109_v1 }
 0x315   :  { %2640 = vst.msk [vmem:[%s7117_s3 + $0x270] sm:$0xff] %vm1382_vm0, %v2438_v22  ;;  %v2845_v62 = vsel %vm1382_vm0, %v2438_v22, 0.0  ;;  %v3030_v44 = vmul.f32 %v2438_v22, %v2438_v22  ;;  %v2444_v13 = vpop.f32.mrf.mxu2  ;;  %v2527_v0 = vpop.f32.mrf.mxu3 }
 0x316   :  { %v2846_v61 = vadd.f32 %v2845_v62, %v2844_v58  ;;  %v6691_v24 = vadd.f32 %v2527_v0, %v5958_v15  ;;  %v1781_v16 = vpop.f32.mrf.mxu0 }
 0x317   :  { %v3235_v49 = vsel %vm1382_vm0, %v3030_v44, 0.0  ;;  %v1782_v37 = vadd.f32 %v6454_v8, %v1781_v16  ;;  %v2110_v31 = vpop.f32.mrf.mxu1 }
 0x318   :  { %v3236_v17 = vadd.f32 %v3235_v49, %v3234_v30  ;;  %2676 = vst.msk [vmem:[%s7117_s3 + $0x390] sm:$0xff] %vm1382_vm0, %v6691_v24 }
 0x319   :  { %v2111_v12 = vadd.f32 %v2110_v31, %v1782_v37 }
 0x31a   :  { %4245 = vmatmul.msk.bf16.gmra.mxu2 %vm1382_vm0, %v3955_v23 }
 0x31b   :  { %v2440_v2 = vadd.f32 %v2439_v26, %v2111_v12 }
 0x31d   :  { %2641 = vst.msk [vmem:[%s7117_s3 + $0x278] sm:$0xff] %vm1382_vm0, %v2440_v2  ;;  %v2847_v15 = vsel %vm1382_vm0, %v2440_v2, 0.0  ;;  %v3031_v33 = vmul.f32 %v2440_v2, %v2440_v2  ;;  %v2447_v34 = vpop.f32.mrf.mxu2  ;;  %v2529_v54 = vpop.f32.mrf.mxu3 }
 0x31e   :  { %v2848_v48 = vadd.f32 %v2847_v15, %v2846_v61  ;;  %v6707_v58 = vadd.f32 %v2529_v54, %v5988_v32  ;;  %v1784_v51 = vpop.f32.mrf.mxu0 }
 0x31f   :  { %v3237_v46 = vsel %vm1382_vm0, %v3031_v33, 0.0  ;;  %v1785_v50 = vadd.f32 %v6454_v8, %v1784_v51  ;;  %v2113_v26 = vpop.f32.mrf.mxu1 }
 0x320   :  { %v3238_v55 = vadd.f32 %v3237_v46, %v3236_v17  ;;  %2677 = vst.msk [vmem:[%s7117_s3 + $0x398] sm:$0xff] %vm1382_vm0, %v6707_v58 }
 0x321   :  { %v2114_v60 = vadd.f32 %v2113_v26, %v1785_v50 }
 0x323   :  { %v2443_v30 = vadd.f32 %v2442_v19, %v2114_v60 }
 0x325   :  { %2642 = vst.msk [vmem:[%s7117_s3 + $0x280] sm:$0xff] %vm1382_vm0, %v2443_v30  ;;  %v2849_v32 = vsel %vm1382_vm0, %v2443_v30, 0.0  ;;  %v3032_v1 = vmul.f32 %v2443_v30, %v2443_v30  ;;  %v2449_v22 = vpop.f32.mrf.mxu2  ;;  %v2532_v47 = vpop.f32.mrf.mxu3 }
 0x326   :  { %v2850_v4 = vadd.f32 %v2849_v32, %v2848_v48  ;;  %v6722_v62 = vadd.f32 %v2532_v47, %v6006_v57  ;;  %v1786_v44 = vpop.f32.mrf.mxu0 }
 0x327   :  { %v3239_v0 = vsel %vm1382_vm0, %v3032_v1, 0.0  ;;  %v1787_v61 = vadd.f32 %v6454_v8, %v1786_v44  ;;  %v2115_v19 = vpop.f32.mrf.mxu1 }
 0x328   :  { %v3240_v16 = vadd.f32 %v3239_v0, %v3238_v55  ;;  %2678 = vst.msk [vmem:[%s7117_s3 + $0x3a0] sm:$0xff] %vm1382_vm0, %v6722_v62 }
 0x329   :  { %v2116_v23 = vadd.f32 %v2115_v19, %v1787_v61 }
 0x32b   :  { %v2445_v49 = vadd.f32 %v2444_v13, %v2116_v23 }
 0x32d   :  { %2643 = vst.msk [vmem:[%s7117_s3 + $0x288] sm:$0xff] %vm1382_vm0, %v2445_v49  ;;  %v2851_v57 = vsel %vm1382_vm0, %v2445_v49, 0.0  ;;  %v3033_v37 = vmul.f32 %v2445_v49, %v2445_v49  ;;  %v2452_v31 = vpop.f32.mrf.mxu2  ;;  %v2534_v17 = vpop.f32.mrf.mxu3 }
 0x32e   :  { %v2852_v12 = vadd.f32 %v2851_v57, %v2850_v4  ;;  %v6737_v2 = vadd.f32 %v2534_v17, %v6036_v53  ;;  %v1789_v15 = vpop.f32.mrf.mxu0 }
 0x32f   :  { %v3241_v33 = vsel %vm1382_vm0, %v3033_v37, 0.0  ;;  %v1790_v54 = vadd.f32 %v6454_v8, %v1789_v15  ;;  %v2118_v13 = vpop.f32.mrf.mxu1 }
 0x330   :  { %v3242_v48 = vadd.f32 %v3241_v33, %v3240_v16  ;;  %2679 = vst.msk [vmem:[%s7117_s3 + $0x3a8] sm:$0xff] %vm1382_vm0, %v6737_v2 }
 0x331   :  { %v2119_v51 = vadd.f32 %v2118_v13, %v1790_v54 }
 0x333   :  { %v2448_v46 = vadd.f32 %v2447_v34, %v2119_v51 }
 0x335   :  { %2644 = vst.msk [vmem:[%s7117_s3 + $0x290] sm:$0xff] %vm1382_vm0, %v2448_v46  ;;  %v2853_v53 = vsel %vm1382_vm0, %v2448_v46, 0.0  ;;  %v3034_v50 = vmul.f32 %v2448_v46, %v2448_v46  ;;  %v2454_v26 = vpop.f32.mrf.mxu2  ;;  %v2537_v55 = vpop.f32.mrf.mxu3 }
 0x336   :  { %v2854_v60 = vadd.f32 %v2853_v53, %v2852_v12  ;;  %v6752_v30 = vadd.f32 %v2537_v55, %v6054_v41  ;;  %v1791_v32 = vpop.f32.mrf.mxu0 }
 0x337   :  { %v3243_v1 = vsel %vm1382_vm0, %v3034_v50, 0.0  ;;  %v1792_v47 = vadd.f32 %v6454_v8, %v1791_v32  ;;  %v2120_v34 = vpop.f32.mrf.mxu1 }
 0x338   :  { %v3244_v4 = vadd.f32 %v3243_v1, %v3242_v48  ;;  %2680 = vst.msk [vmem:[%s7117_s3 + $0x3b0] sm:$0xff] %vm1382_vm0, %v6752_v30 }
 0x339   :  { %v2121_v44 = vadd.f32 %v2120_v34, %v1792_v47 }
 0x33b   :  { %v2450_v0 = vadd.f32 %v2449_v22, %v2121_v44 }
 0x33d   :  { %2645 = vst.msk [vmem:[%s7117_s3 + $0x298] sm:$0xff] %vm1382_vm0, %v2450_v0  ;;  %v2855_v41 = vsel %vm1382_vm0, %v2450_v0, 0.0  ;;  %v3035_v61 = vmul.f32 %v2450_v0, %v2450_v0  ;;  %v2457_v19 = vpop.f32.mrf.mxu2  ;;  %v2539_v16 = vpop.f32.mrf.mxu3 }
 0x33e   :  { %v2856_v23 = vadd.f32 %v2855_v41, %v2854_v60  ;;  %v6767_v49 = vadd.f32 %v2539_v16, %v6084_v7  ;;  %v1794_v57 = vpop.f32.mrf.mxu0 }
 0x33f   :  { %v3245_v37 = vsel %vm1382_vm0, %v3035_v61, 0.0  ;;  %v1795_v17 = vadd.f32 %v6454_v8, %v1794_v57  ;;  %v2123_v22 = vpop.f32.mrf.mxu1 }
 0x340   :  { %v3246_v12 = vadd.f32 %v3245_v37, %v3244_v4  ;;  %2681 = vst.msk [vmem:[%s7117_s3 + $0x3b8] sm:$0xff] %vm1382_vm0, %v6767_v49 }
 0x341   :  { %v2124_v15 = vadd.f32 %v2123_v22, %v1795_v17 }
 0x343   :  { %v2453_v33 = vadd.f32 %v2452_v31, %v2124_v15 }
 0x345   :  { %2646 = vst.msk [vmem:[%s7117_s3 + $0x2a0] sm:$0xff] %vm1382_vm0, %v2453_v33  ;;  %v2857_v7 = vsel %vm1382_vm0, %v2453_v33, 0.0  ;;  %v3036_v54 = vmul.f32 %v2453_v33, %v2453_v33  ;;  %v2459_v13 = vpop.f32.mrf.mxu2  ;;  %v2542_v48 = vpop.f32.mrf.mxu3 }
 0x346   :  { %v2858_v51 = vadd.f32 %v2857_v7, %v2856_v23  ;;  %v6782_v46 = vadd.f32 %v2542_v48, %v6102_v25  ;;  %v1796_v53 = vpop.f32.mrf.mxu0 }
 0x347   :  { %v3247_v50 = vsel %vm1382_vm0, %v3036_v54, 0.0  ;;  %v1797_v55 = vadd.f32 %v6454_v8, %v1796_v53  ;;  %v2125_v31 = vpop.f32.mrf.mxu1 }
 0x348   :  { %v3248_v60 = vadd.f32 %v3247_v50, %v3246_v12  ;;  %2682 = vst.msk [vmem:[%s7117_s3 + $0x3c0] sm:$0xff] %vm1382_vm0, %v6782_v46 }
 0x349   :  { %v2126_v32 = vadd.f32 %v2125_v31, %v1797_v55 }
 0x34b   :  { %v2455_v1 = vadd.f32 %v2454_v26, %v2126_v32 }
 0x34d   :  { %2647 = vst.msk [vmem:[%s7117_s3 + $0x2a8] sm:$0xff] %vm1382_vm0, %v2455_v1  ;;  %v2859_v25 = vsel %vm1382_vm0, %v2455_v1, 0.0  ;;  %v3037_v47 = vmul.f32 %v2455_v1, %v2455_v1  ;;  %v2462_v34 = vpop.f32.mrf.mxu2  ;;  %v2544_v4 = vpop.f32.mrf.mxu3 }
 0x34e   :  { %v6796_v44 = vadd.f32 %v2859_v25, %v2858_v51  ;;  %v6799_v0 = vadd.f32 %v2544_v4, %v6132_v28  ;;  %v1799_v41 = vpop.f32.mrf.mxu0 }
 0x34f   :  { %v3249_v61 = vsel %vm1382_vm0, %v3037_v47, 0.0  ;;  %v1800_v26 = vadd.f32 %v6454_v8, %v1799_v41  ;;  %v2128_v16 = vpop.f32.mrf.mxu1 }
 0x350   :  { %v6803_v23 = vadd.f32 %v3249_v61, %v3248_v60  ;;  %2683 = vst.msk [vmem:[%s7117_s3 + $0x3c8] sm:$0xff] %vm1382_vm0, %v6799_v0 }
 0x351   :  { %v2129_v57 = vadd.f32 %v2128_v16, %v1800_v26 }
 0x353   :  { %v6810_v37 = vadd.f32 %v2457_v19, %v2129_v57 }
 0x355   :  { %2648 = vst.msk [vmem:[%s7117_s3 + $0x2b0] sm:$0xff] %vm1382_vm0, %v6810_v37  ;;  %v2464_v28 = vpop.f32.mrf.mxu2  ;;  %v2547_v17 = vpop.f32.mrf.mxu3 }
 0x356   :  { %v6818_v22 = vadd.f32 %v2547_v17, %v6150_v9  ;;  %v1801_v12 = vpop.f32.mrf.mxu0 }
 0x357   :  { %v1802_v15 = vadd.f32 %v6454_v8, %v1801_v12  ;;  %v2130_v33 = vpop.f32.mrf.mxu1 }
 0x358   :  { %2684 = vst.msk [vmem:[%s7117_s3 + $0x3d0] sm:$0xff] %vm1382_vm0, %v6818_v22 }
 0x359   :  { %v2131_v19 = vadd.f32 %v2130_v33, %v1802_v15 }
 0x35b   :  { %v2460_v7 = vadd.f32 %v2459_v13, %v2131_v19 }
 0x35d   :  { %2649 = vst.msk [vmem:[%s7117_s3 + $0x2b8] sm:$0xff] %vm1382_vm0, %v2460_v7  ;;  %v2467_v54 = vpop.f32.mrf.mxu2  ;;  %v2549_v9 = vpop.f32.mrf.mxu3 }
 0x35e   :  { %v6831_v48 = vadd.f32 %v2549_v9, %v6180_v11  ;;  %v1804_v51 = vpop.f32.mrf.mxu0 }
 0x35f   :  { %v1805_v53 = vadd.f32 %v6454_v8, %v1804_v51  ;;  %v2133_v50 = vpop.f32.mrf.mxu1 }
 0x360   :  { %2685 = vst.msk [vmem:[%s7117_s3 + $0x3d8] sm:$0xff] %vm1382_vm0, %v6831_v48 }
 0x361   :  { %v2134_v13 = vadd.f32 %v2133_v50, %v1805_v53 }
 0x363   :  { %v2463_v55 = vadd.f32 %v2462_v34, %v2134_v13 }
 0x365   :  { %2650 = vst.msk [vmem:[%s7117_s3 + $0x2c0] sm:$0xff] %vm1382_vm0, %v2463_v55  ;;  %v2469_v31 = vpop.f32.mrf.mxu2  ;;  %v2552_v11 = vpop.f32.mrf.mxu3 }
 0x366   :  { %v6844_v60 = vadd.f32 %v2552_v11, %v6198_v63  ;;  %v1806_v32 = vpop.f32.mrf.mxu0 }
 0x367   :  { %v1807_v1 = vadd.f32 %v6454_v8, %v1806_v32  ;;  %v2135_v25 = vpop.f32.mrf.mxu1 }
 0x368   :  { %2686 = vst.msk [vmem:[%s7117_s3 + $0x3e0] sm:$0xff] %vm1382_vm0, %v6844_v60 }
 0x369   :  { %v2136_v47 = vadd.f32 %v2135_v25, %v1807_v1  ;;  %v3038_v25 = vmul.f32 %v6810_v37, %v6810_v37 }
 0x36b   :  { %v2465_v34 = vadd.f32 %v2464_v28, %v2136_v47 }
 0x36d   :  { %2651 = vst.msk [vmem:[%s7117_s3 + $0x2c8] sm:$0xff] %vm1382_vm0, %v2465_v34  ;;  %v2472_v4 = vpop.f32.mrf.mxu2  ;;  %v2554_v63 = vpop.f32.mrf.mxu3 }
 0x36e   :  { %v6857_v41 = vadd.f32 %v2554_v63, %v6228_v5  ;;  %v1809_v61 = vpop.f32.mrf.mxu0 }
 0x36f   :  { %v1810_v26 = vadd.f32 %v6454_v8, %v1809_v61  ;;  %v2138_v16 = vpop.f32.mrf.mxu1  ;;  %v2861_v61 = vsel %vm1382_vm0, %v6810_v37, 0.0 }
 0x370   :  { %2687 = vst.msk [vmem:[%s7117_s3 + $0x3e8] sm:$0xff] %vm1382_vm0, %v6857_v41 }
 0x371   :  { %v2139_v57 = vadd.f32 %v2138_v16, %v1810_v26  ;;  %v3039_v26 = vmul.f32 %v2460_v7, %v2460_v7 }
 0x373   :  { %v2468_v28 = vadd.f32 %v2467_v54, %v2139_v57  ;;  %v2863_v57 = vsel %vm1382_vm0, %v2460_v7, 0.0 }
 0x375   :  { %2652 = vst.msk [vmem:[%s7117_s3 + $0x2d0] sm:$0xff] %vm1382_vm0, %v2468_v28  ;;  %v2474_v17 = vpop.f32.mrf.mxu2  ;;  %v2557_v5 = vpop.f32.mrf.mxu3 }
 0x376   :  { %v6870_v12 = vadd.f32 %v2557_v5, %v6246_v52  ;;  %v1811_v15 = vpop.f32.mrf.mxu0  ;;  %v3040_v5 = vmul.f32 %v2463_v55, %v2463_v55 }
 0x377   :  { %v1812_v33 = vadd.f32 %v6454_v8, %v1811_v15  ;;  %v2140_v19 = vpop.f32.mrf.mxu1 }
 0x378   :  { %2688 = vst.msk [vmem:[%s7117_s3 + $0x3f0] sm:$0xff] %vm1382_vm0, %v6870_v12 }
 0x379   :  { %v2141_v54 = vadd.f32 %v2140_v19, %v1812_v33  ;;  %v2862_v33 = vadd.f32 %v2861_v61, %v6796_v44  ;;  %v3253_v19 = vsel %vm1382_vm0, %v3039_v26, 0.0  ;;  %v2867_v44 = vsel %vm1382_vm0, %v2465_v34, 0.0 }
 0x37b   :  { %v2470_v9 = vadd.f32 %v2469_v31, %v2141_v54  ;;  %v2865_v54 = vsel %vm1382_vm0, %v2463_v55, 0.0 }
 0x37d   :  { %2653 = vst.msk [vmem:[%s7117_s3 + $0x2d8] sm:$0xff] %vm1382_vm0, %v2470_v9  ;;  %v2477_v51 = vpop.f32.mrf.mxu2  ;;  %v2559_v52 = vpop.f32.mrf.mxu3 }
 0x37e   :  { %v6883_v53 = vadd.f32 %v2559_v52, %v6276_v27  ;;  %v1814_v50 = vpop.f32.mrf.mxu0  ;;  %v3041_v52 = vmul.f32 %v2465_v34, %v2465_v34 }
 0x37f   :  { %v1815_v13 = vadd.f32 %v6454_v8, %v1814_v50  ;;  %v2143_v11 = vpop.f32.mrf.mxu1 }
 0x380   :  { %2689 = vst.msk [vmem:[%s7117_s3 + $0x3f8] sm:$0xff] %vm1382_vm0, %v6883_v53 }
 0x381   :  { %v2144_v31 = vadd.f32 %v2143_v11, %v1815_v13  ;;  %v2864_v13 = vadd.f32 %v2863_v57, %v2862_v33 }
 0x383   :  { %v2473_v32 = vadd.f32 %v2472_v4, %v2144_v31  ;;  %v3251_v4 = vsel %vm1382_vm0, %v3038_v25, 0.0  ;;  %v3042_v31 = vmul.f32 %v2468_v28, %v2468_v28 }
 0x384   :  { %v3252_v50 = vadd.f32 %v3251_v4, %v6803_v23  ;;  %v3257_v23 = vsel %vm1382_vm0, %v3041_v52, 0.0  ;;  %v2871_v4 = vsel %vm1382_vm0, %v2470_v9, 0.0 }
 0x385   :  { %2654 = vst.msk [vmem:[%s7117_s3 + $0x2e0] sm:$0xff] %vm1382_vm0, %v2473_v32  ;;  %v6895_v1 = vpop.f32.mrf.mxu2  ;;  %v3259_v34 = vsel %vm1382_vm0, %v3042_v31, 0.0  ;;  %v3044_v57 = vmul.f32 %v2473_v32, %v2473_v32 }
 0x386   :  { %v1816_v27 = vpop.f32.mrf.mxu0  ;;  %v3254_v25 = vadd.f32 %v3253_v19, %v3252_v50 }
 0x387   :  { %v1817_v47 = vadd.f32 %v6454_v8, %v1816_v27  ;;  %v2145_v63 = vpop.f32.mrf.mxu1 }
 0x389   :  { %v2146_v16 = vadd.f32 %v2145_v63, %v1817_v47  ;;  %v2866_v47 = vadd.f32 %v2865_v54, %v2864_v13  ;;  %v3043_v63 = vmul.f32 %v2470_v9, %v2470_v9 }
 0x38b   :  { %v2475_v15 = vadd.f32 %v2474_v17, %v2146_v16  ;;  %v3255_v17 = vsel %vm1382_vm0, %v3040_v5, 0.0  ;;  %v2868_v16 = vadd.f32 %v2867_v44, %v2866_v47  ;;  %v3261_v54 = vsel %vm1382_vm0, %v3043_v63, 0.0 }
 0x38c   :  { %v3256_v26 = vadd.f32 %v3255_v17, %v3254_v25 }
 0x38d   :  { %2655 = vst.msk [vmem:[%s7117_s3 + $0x2e8] sm:$0xff] %vm1382_vm0, %v2475_v15  ;;  %v2482_v37 = vpop.f32.mrf.mxu2  ;;  %v3045_v50 = vmul.f32 %v2475_v15, %v2475_v15  ;;  %v2875_v17 = vsel %vm1382_vm0, %v2475_v15, 0.0 }
 0x38e   :  { %v2483_v7 = vadd.f32 %v2482_v37, %v5528_v3  ;;  %v1819_v11 = vpop.f32.mrf.mxu0  ;;  %v2869_v3 = vsel %vm1382_vm0, %v2468_v28, 0.0  ;;  %v3258_v33 = vadd.f32 %v3257_v23, %v3256_v26  ;;  %v2873_v37 = vsel %vm1382_vm0, %v2473_v32, 0.0 }
 0x38f   :  { %v1820_v55 = vadd.f32 %v6454_v8, %v1819_v11  ;;  %v2148_v27 = vpop.f32.mrf.mxu1  ;;  %v2870_v19 = vadd.f32 %v2869_v3, %v2868_v16  ;;  %v3265_v25 = vsel %vm1382_vm0, %v3045_v50, 0.0 }
 0x390   :  { %2658 = vst.msk [vmem:[%s7117_s3 + $0x300] sm:$0xff] %vm1382_vm0, %v2483_v7  ;;  %v3260_v52 = vadd.f32 %v3259_v34, %v3258_v33  ;;  %v3048_v26 = vmul.f32 %v2483_v7, %v2483_v7 }
 0x391   :  { %v2149_v61 = vadd.f32 %v2148_v27, %v1820_v55  ;;  %v2872_v13 = vadd.f32 %v2871_v4, %v2870_v19  ;;  %v2881_v19 = vsel %vm1382_vm0, %v2483_v7, 0.0 }
 0x392   :  { %v3262_v32 = vadd.f32 %v3261_v54, %v3260_v52 }
 0x393   :  { %v2478_v5 = vadd.f32 %v2477_v51, %v2149_v61  ;;  %v3263_v51 = vsel %vm1382_vm0, %v3044_v57, 0.0  ;;  %v2874_v55 = vadd.f32 %v2873_v37, %v2872_v13 }
 0x394   :  { %v3264_v23 = vadd.f32 %v3263_v51, %v3262_v32 }
 0x395   :  { %2656 = vst.msk [vmem:[%s7117_s3 + $0x2f0] sm:$0xff] %vm1382_vm0, %v2478_v5  ;;  %v2484_v28 = vpop.f32.mrf.mxu2  ;;  %v3046_v44 = vmul.f32 %v2478_v5, %v2478_v5  ;;  %v2876_v3 = vadd.f32 %v2875_v17, %v2874_v55 }
 0x396   :  { %v2485_v11 = vadd.f32 %v2484_v28, %v5558_v43  ;;  %v1821_v9 = vpop.f32.mrf.mxu0  ;;  %v2877_v43 = vsel %vm1382_vm0, %v2478_v5, 0.0  ;;  %v3271_v28 = vsel %vm1382_vm0, %v3048_v26, 0.0  ;;  %v3054_v26 = vmul.f32 %v6351_v59, %v6351_v59 }
 0x397   :  { %v1822_v31 = vadd.f32 %v6454_v8, %v1821_v9  ;;  %v2150_v27 = vpop.f32.mrf.mxu1  ;;  %v3267_v15 = vsel %vm1382_vm0, %v3046_v44, 0.0  ;;  %v3266_v8 = vadd.f32 %v3265_v25, %v3264_v23  ;;  %v2878_v61 = vadd.f32 %v2877_v43, %v2876_v3 }
 0x398   :  { %2659 = vst.msk [vmem:[%s7117_s3 + $0x308] sm:$0xff] %vm1382_vm0, %v2485_v11  ;;  %v3049_v54 = vmul.f32 %v2485_v11, %v2485_v11  ;;  %v2883_v52 = vsel %vm1382_vm0, %v2485_v11, 0.0  ;;  %v3052_v25 = vmul.f32 %v6293_v18, %v6293_v18  ;;  %v2889_v23 = vsel %vm1382_vm0, %v6293_v18, 0.0 }
 0x399   :  { %v2151_v47 = vadd.f32 %v2150_v27, %v1822_v31  ;;  %v3268_v57 = vadd.f32 %v3267_v15, %v3266_v8  ;;  %v3053_v3 = vmul.f32 %v6329_v29, %v6329_v29  ;;  %v2893_v18 = vsel %vm1382_vm0, %v6351_v59, 0.0 }
 0x39a   :  { %v3279_v8 = vsel %vm1382_vm0, %v3052_v25, 0.0  ;;  %v2897_v59 = vsel %vm1382_vm0, %v6412_v45, 0.0 }
 0x39b   :  { %v2480_v63 = vadd.f32 %v6895_v1, %v2151_v47 }
 0x39d   :  { %2657 = vst.msk [vmem:[%s7117_s3 + $0x2f8] sm:$0xff] %vm1382_vm0, %v2480_v63  ;;  %v2879_v16 = vsel %vm1382_vm0, %v2480_v63, 0.0  ;;  %v3047_v34 = vmul.f32 %v2480_v63, %v2480_v63  ;;  %v2487_v4 = vpop.f32.mrf.mxu2 }
 0x39e   :  { %v2880_v5 = vadd.f32 %v2879_v16, %v2878_v61  ;;  %v2488_v33 = vadd.f32 %v2487_v4, %v5575_v21  ;;  %v3273_v21 = vsel %vm1382_vm0, %v3049_v54, 0.0  ;;  %v2891_v61 = vsel %vm1382_vm0, %v6329_v29, 0.0 }
 0x39f   :  { %v3269_v1 = vsel %vm1382_vm0, %v3047_v34, 0.0  ;;  %v3281_v4 = vsel %vm1382_vm0, %v3053_v3, 0.0  ;;  %v2895_v29 = vsel %vm1382_vm0, %v6387_v35, 0.0  ;;  %v3056_v54 = vmul.f32 %v6412_v45, %v6412_v45 }
 0x3a0   :  { %v3270_v37 = vadd.f32 %v3269_v1, %v3268_v57  ;;  %2660 = vst.msk [vmem:[%s7117_s3 + $0x310] sm:$0xff] %vm1382_vm0, %v2488_v33  ;;  %v2882_v50 = vadd.f32 %v2881_v19, %v2880_v5  ;;  %v3050_v13 = vmul.f32 %v2488_v33, %v2488_v33  ;;  %v2885_v7 = vsel %vm1382_vm0, %v2488_v33, 0.0 }
 0x3a1   :  { %v3055_v57 = vmul.f32 %v6387_v35, %v6387_v35  ;;  %v3283_v19 = vsel %vm1382_vm0, %v3054_v26, 0.0  ;;  %v2899_v35 = vsel %vm1382_vm0, %v6448_v20, 0.0  ;;  %v2901_v45 = vsel %vm1382_vm0, %v6476_v42, 0.0 }
 0x3a2   :  { %v2884_v9 = vadd.f32 %v2883_v52, %v2882_v50  ;;  %v3272_v51 = vadd.f32 %v3271_v28, %v3270_v37  ;;  %v3275_v31 = vsel %vm1382_vm0, %v3050_v13, 0.0  ;;  %v3057_v28 = vmul.f32 %v6448_v20, %v6448_v20 }
 0x3a3   :  { %v3285_v50 = vsel %vm1382_vm0, %v3055_v57, 0.0  ;;  %v2903_v20 = vsel %vm1382_vm0, %v6513_v14, 0.0  ;;  %v3063_v26 = vmul.f32 %v6621_v36, %v6621_v36 }
 0x3a4   :  { %v2886_v17 = vadd.f32 %v2885_v7, %v2884_v9  ;;  %v3274_v44 = vadd.f32 %v3273_v21, %v3272_v51  ;;  %v3287_v9 = vsel %vm1382_vm0, %v3056_v54, 0.0  ;;  %v3058_v51 = vmul.f32 %v6476_v42, %v6476_v42 }
 0x3a5   :  { %v2489_v32 = vpop.f32.mrf.mxu2  ;;  %v2905_v42 = vsel %vm1382_vm0, %v6536_v10, 0.0 }
 0x3a6   :  { %v3276_v55 = vadd.f32 %v3275_v31, %v3274_v44  ;;  %v2490_v27 = vadd.f32 %v2489_v32, %v5605_v6  ;;  %v3059_v44 = vmul.f32 %v6513_v14, %v6513_v14  ;;  %v2907_v14 = vsel %vm1382_vm0, %v6570_v38, 0.0 }
 0x3a8   :  { %2661 = vst.msk [vmem:[%s7117_s3 + $0x318] sm:$0xff] %vm1382_vm0, %v2490_v27  ;;  %v2887_v11 = vsel %vm1382_vm0, %v2490_v27, 0.0  ;;  %v3051_v43 = vmul.f32 %v2490_v27, %v2490_v27  ;;  %v3060_v27 = vmul.f32 %v6536_v10, %v6536_v10  ;;  %v2909_v10 = vsel %vm1382_vm0, %v6593_v39, 0.0 }
 0x3a9   :  { %v2888_v47 = vadd.f32 %v2887_v11, %v2886_v17  ;;  %v3289_v17 = vsel %vm1382_vm0, %v3057_v28, 0.0 }
 0x3aa   :  { %v3277_v6 = vsel %vm1382_vm0, %v3051_v43, 0.0  ;;  %v3293_v43 = vsel %vm1382_vm0, %v3059_v44, 0.0 }
 0x3ab   :  { %v2890_v15 = vadd.f32 %v2889_v23, %v2888_v47  ;;  %v3278_v63 = vadd.f32 %v3277_v6, %v3276_v55  ;;  %v3291_v55 = vsel %vm1382_vm0, %v3058_v51, 0.0  ;;  %v3061_v47 = vmul.f32 %v6570_v38, %v6570_v38 }
 0x3ac   :  { %v3295_v6 = vsel %vm1382_vm0, %v3060_v27, 0.0  ;;  %v2911_v38 = vsel %vm1382_vm0, %v6621_v36, 0.0  ;;  %v2915_v36 = vsel %vm1382_vm0, %v6670_v40, 0.0  ;;  %v3068_v51 = vmul.f32 %v6722_v62, %v6722_v62 }
 0x3ad   :  { %v2892_v16 = vadd.f32 %v2891_v61, %v2890_v15  ;;  %v3280_v34 = vadd.f32 %v3279_v8, %v3278_v63  ;;  %v3062_v15 = vmul.f32 %v6593_v39, %v6593_v39  ;;  %v3297_v61 = vsel %vm1382_vm0, %v3061_v47, 0.0 }
 0x3ae   :  { %v2913_v39 = vsel %vm1382_vm0, %v6642_v56, 0.0 }
 0x3af   :  { %v2894_v5 = vadd.f32 %v2893_v18, %v2892_v16  ;;  %v3282_v33 = vadd.f32 %v3281_v4, %v3280_v34  ;;  %v3299_v4 = vsel %vm1382_vm0, %v3062_v15, 0.0  ;;  %v3064_v18 = vmul.f32 %v6642_v56, %v6642_v56 }
 0x3b0   :  { %v2917_v56 = vsel %vm1382_vm0, %v6691_v24, 0.0  ;;  %v3073_v15 = vmul.f32 %v6799_v0, %v6799_v0 }
 0x3b1   :  { %v2896_v1 = vadd.f32 %v2895_v29, %v2894_v5  ;;  %v3284_v37 = vadd.f32 %v3283_v19, %v3282_v33  ;;  %v3301_v33 = vsel %vm1382_vm0, %v3063_v26, 0.0  ;;  %v3065_v19 = vmul.f32 %v6670_v40, %v6670_v40 }
 0x3b2   :  { %v2919_v40 = vsel %vm1382_vm0, %v6707_v58, 0.0 }
 0x3b3   :  { %v2898_v52 = vadd.f32 %v2897_v59, %v2896_v1  ;;  %v3286_v13 = vadd.f32 %v3285_v50, %v3284_v37  ;;  %v3303_v1 = vsel %vm1382_vm0, %v3064_v18, 0.0  ;;  %v3066_v37 = vmul.f32 %v6691_v24, %v6691_v24 }
 0x3b4   :  { %v3305_v28 = vsel %vm1382_vm0, %v3065_v19, 0.0  ;;  %v2921_v24 = vsel %vm1382_vm0, %v6722_v62, 0.0  ;;  %v2925_v62 = vsel %vm1382_vm0, %v6752_v30, 0.0 }
 0x3b5   :  { %v2900_v21 = vadd.f32 %v2899_v35, %v2898_v52  ;;  %v3288_v7 = vadd.f32 %v3287_v9, %v3286_v13  ;;  %v3067_v52 = vmul.f32 %v6707_v58, %v6707_v58  ;;  %v3307_v35 = vsel %vm1382_vm0, %v3066_v37, 0.0 }
 0x3b6   :  { %v2923_v58 = vsel %vm1382_vm0, %v6737_v2, 0.0  ;;  %v3078_v37 = vmul.f32 %v6870_v12, %v6870_v12 }
 0x3b7   :  { %v2902_v31 = vadd.f32 %v2901_v45, %v2900_v21  ;;  %v3290_v32 = vadd.f32 %v3289_v17, %v3288_v7  ;;  %v3309_v17 = vsel %vm1382_vm0, %v3067_v52, 0.0  ;;  %v3069_v45 = vmul.f32 %v6737_v2, %v6737_v2 }
 0x3b8   :  { %v2927_v2 = vsel %vm1382_vm0, %v6767_v49, 0.0 }
 0x3b9   :  { %v2904_v25 = vadd.f32 %v2903_v20, %v2902_v31  ;;  %v3292_v11 = vadd.f32 %v3291_v55, %v3290_v32  ;;  %v3311_v32 = vsel %vm1382_vm0, %v3068_v51, 0.0  ;;  %v3070_v55 = vmul.f32 %v6752_v30, %v6752_v30 }
 0x3ba   :  { %v2929_v30 = vsel %vm1382_vm0, %v6782_v46, 0.0 }
 0x3bb   :  { %v2906_v23 = vadd.f32 %v2905_v42, %v2904_v25  ;;  %v3294_v3 = vadd.f32 %v3293_v43, %v3292_v11  ;;  %v3313_v25 = vsel %vm1382_vm0, %v3069_v45, 0.0  ;;  %v3071_v11 = vmul.f32 %v6767_v49, %v6767_v49 }
 0x3bc   :  { %v3315_v47 = vsel %vm1382_vm0, %v3070_v55, 0.0  ;;  %v2931_v49 = vsel %vm1382_vm0, %v6799_v0, 0.0  ;;  %v2935_v0 = vsel %vm1382_vm0, %v6831_v48, 0.0 }
 0x3bd   :  { %v2908_v63 = vadd.f32 %v2907_v14, %v2906_v23  ;;  %v3296_v8 = vadd.f32 %v3295_v6, %v3294_v3  ;;  %v3072_v23 = vmul.f32 %v6782_v46, %v6782_v46  ;;  %v3317_v14 = vsel %vm1382_vm0, %v3071_v11, 0.0 }
 0x3be   :  { %v2933_v46 = vsel %vm1382_vm0, %v6818_v22, 0.0 }
 0x3bf   :  { %v2910_v16 = vadd.f32 %v2909_v10, %v2908_v63  ;;  %v3298_v34 = vadd.f32 %v3297_v61, %v3296_v8  ;;  %v3319_v61 = vsel %vm1382_vm0, %v3072_v23, 0.0  ;;  %v3074_v10 = vmul.f32 %v6818_v22, %v6818_v22 }
 0x3c0   :  { %v2937_v22 = vsel %vm1382_vm0, %v6844_v60, 0.0 }
 0x3c1   :  { %v2912_v57 = vadd.f32 %v2911_v38, %v2910_v16  ;;  %v3300_v5 = vadd.f32 %v3299_v4, %v3298_v34  ;;  %v3321_v34 = vsel %vm1382_vm0, %v3073_v15, 0.0  ;;  %v3075_v4 = vmul.f32 %v6831_v48, %v6831_v48 }
 0x3c2   :  { %v2939_v48 = vsel %vm1382_vm0, %v6857_v41, 0.0 }
 0x3c3   :  { %v2914_v29 = vadd.f32 %v2913_v39, %v2912_v57  ;;  %v3302_v54 = vadd.f32 %v3301_v33, %v3300_v5  ;;  %v3323_v57 = vsel %vm1382_vm0, %v3074_v10, 0.0  ;;  %v3076_v5 = vmul.f32 %v6844_v60, %v6844_v60 }
 0x3c4   :  { %v3325_v19 = vsel %vm1382_vm0, %v3075_v4, 0.0  ;;  %v2941_v60 = vsel %vm1382_vm0, %v6870_v12, 0.0 }
 0x3c5   :  { %v2916_v50 = vadd.f32 %v2915_v36, %v2914_v29  ;;  %v3304_v59 = vadd.f32 %v3303_v1, %v3302_v54  ;;  %v3077_v29 = vmul.f32 %v6857_v41, %v6857_v41  ;;  %v3327_v36 = vsel %vm1382_vm0, %v3076_v5, 0.0 }
 0x3c6   :  { %v2943_v41 = vsel %vm1382_vm0, %v6883_v53, 0.0 }
 0x3c7   :  { %v2918_v13 = vadd.f32 %v2917_v56, %v2916_v50  ;;  %v3306_v9 = vadd.f32 %v3305_v28, %v3304_v59  ;;  %v3329_v28 = vsel %vm1382_vm0, %v3077_v29, 0.0  ;;  %v3079_v56 = vmul.f32 %v6883_v53, %v6883_v53 }
 0x3c9   :  { %v2920_v21 = vadd.f32 %v2919_v40, %v2918_v13  ;;  %v3308_v7 = vadd.f32 %v3307_v35, %v3306_v9  ;;  %v3331_v9 = vsel %vm1382_vm0, %v3078_v37, 0.0  ;;  %v3333_v51 = vsel %vm1382_vm0, %v3079_v56, 0.0 }
 0x3cb   :  { %v2922_v44 = vadd.f32 %v2921_v24, %v2920_v21  ;;  %v3310_v31 = vadd.f32 %v3309_v17, %v3308_v7 }
 0x3cd   :  { %v2924_v20 = vadd.f32 %v2923_v58, %v2922_v44  ;;  %v3312_v27 = vadd.f32 %v3311_v32, %v3310_v31 }
 0x3cf   :  { %v2926_v43 = vadd.f32 %v2925_v62, %v2924_v20  ;;  %v3314_v42 = vadd.f32 %v3313_v25, %v3312_v27 }
 0x3d1   :  { %v2928_v3 = vadd.f32 %v2927_v2, %v2926_v43  ;;  %v3316_v6 = vadd.f32 %v3315_v47, %v3314_v42 }
 0x3d3   :  { %v2930_v63 = vadd.f32 %v2929_v30, %v2928_v3  ;;  %v3318_v8 = vadd.f32 %v3317_v14, %v3316_v6 }
 0x3d5   :  { %v2932_v26 = vadd.f32 %v2931_v49, %v2930_v63  ;;  %v3320_v16 = vadd.f32 %v3319_v61, %v3318_v8 }
 0x3d7   :  { %v2934_v38 = vadd.f32 %v2933_v46, %v2932_v26  ;;  %v3322_v18 = vadd.f32 %v3321_v34, %v3320_v16 }
 0x3d9   :  { %v2936_v33 = vadd.f32 %v2935_v0, %v2934_v38  ;;  %v3324_v39 = vadd.f32 %v3323_v57, %v3322_v18 }
 0x3db   :  { %v2938_v54 = vadd.f32 %v2937_v22, %v2936_v33  ;;  %v3326_v1 = vadd.f32 %v3325_v19, %v3324_v39 }
 0x3dd   :  { %v2940_v50 = vadd.f32 %v2939_v48, %v2938_v54  ;;  %v3328_v59 = vadd.f32 %v3327_v36, %v3326_v1 }
 0x3df   :  { %v2942_v52 = vadd.f32 %v2941_v60, %v2940_v50  ;;  %v3330_v13 = vadd.f32 %v3329_v28, %v3328_v59 }
 0x3e1   :  { %v2944_v35 = vadd.f32 %v2943_v41, %v2942_v52  ;;  %v3332_v40 = vadd.f32 %v3331_v9, %v3330_v13 }
 0x3e3   :  { %v2945_v21 = vrot.slane %v2944_v35, 4  ;;  %v3334_v7 = vadd.f32 %v3333_v51, %v3332_v40 }
 0x3e5   :  { %v2946_v17 = vadd.f32 %v2945_v21, %v2944_v35  ;;  %v3335_v24 = vrot.slane %v3334_v7, 4 }
 0x3e7   :  { %v2947_v45 = vrot.slane %v2946_v17, 2  ;;  %v3336_v12 = vadd.f32 %v3335_v24, %v3334_v7 }
 0x3e9   :  { %v2948_v44 = vadd.f32 %v2947_v45, %v2946_v17  ;;  %v3337_v31 = vrot.slane %v3336_v12, 2 }
 0x3eb   :  { %v2949_v32 = vrot.slane %v2948_v44, 1  ;;  %v3338_v58 = vadd.f32 %v3337_v31, %v3336_v12 }
 0x3ed   :  { %v2950_v55 = vadd.f32 %v2949_v32, %v2948_v44  ;;  %v3339_v20 = vrot.slane %v3338_v58, 1 }
 0x3ef   :  { %v2951_v27 = vmul.f32 0.125, %v2950_v55  ;;  %v3340_v25 = vadd.f32 %v3339_v20, %v3338_v58 }
 0x3f1   :  { %v3341_v62 = vmul.f32 0.125, %v3340_v25  ;;  %3342 = vst.msk [vmem:[%s7118_s4] sm:$0xff] %vm1382_vm0, %v2951_v27 }
 0x3f3   :  { %3343 = vst.msk [vmem:[%s7119_s5] sm:$0xff] %vm1382_vm0, %v3341_v62 }

</bundles_post_ra>
